<compile_context>
chip_gen: v6e
topology: v6e:2x2x1
jax: 0.10.0
libtpu: 0.0.40
codegen_flags: <defaults>
</compile_context>

<pallas_src>
import functools

import jax
import jax.numpy as jnp
from jax import lax
from jax.experimental import pallas as pl
from jax.experimental.pallas import tpu as pltpu


# ----------------------------------------------------------------------------
# helpers
# ----------------------------------------------------------------------------
def _round_up(n, m):
    return ((n + m - 1) // m) * m


def _pad_tb(x, t_pad, b_pad):
    T, B, _ = x.shape
    if T == t_pad and B == b_pad:
        return x
    return jnp.pad(x, ((0, t_pad - T), (0, b_pad - B), (0, 0)))


# ----------------------------------------------------------------------------
# Pallas kernels
# ----------------------------------------------------------------------------
def _dual_lstm_chunk_kernel(x_a_ref, wih_a_ref, whh_a_ref, b_a_ref,
                            x_b_ref, wih_b_ref, whh_b_ref, b_b_ref,
                            y_a_ref, y_b_ref,
                            gin_a, gin_b, h_a, c_a, h_b, c_b,
                            *, t_chunk, n_chunks, t_true, reverse_b):
    """Two independent LSTM chains, fused, time-chunked.

    Per grid step i:
      chain a processes global time chunk i (forward in time),
      chain b processes chunk i (forward) or chunk nc-1-i walked in reverse
      (reverse_b=True, word bi-LSTM backward direction).

    x_*_ref : (Tc*Bp, Din)  bf16 chunk of the flattened input sequence
    wih_*   : (Din, 4*Hp)   bf16, per-gate lane-padded, pre-transposed
    whh_*   : (Hp, 4*Hp)    bf16
    b_*     : (1, 4*Hp)     f32 combined bias (b_ih + b_hh)
    y_*_ref : (Tc, Bp, Hp)  bf16 output hidden states for this chunk
    gin_*   : (Tc*Bp, 4*Hp) bf16 scratch — hoisted input projection
    h_*/c_* : (Bp, Hp)      f32 persistent recurrent state (across grid steps)
    """
    i = pl.program_id(0)
    Bp, Hp = h_a.shape

    @pl.when(i == 0)
    def _():
        h_a[...] = jnp.zeros_like(h_a)
        c_a[...] = jnp.zeros_like(c_a)
        h_b[...] = jnp.zeros_like(h_b)
        c_b[...] = jnp.zeros_like(c_b)

    # hoisted per-chunk input->gates projection: one MXU matmul per chain
    gin_a[...] = (jnp.dot(x_a_ref[...], wih_a_ref[...],
                          preferred_element_type=jnp.float32)
                  + b_a_ref[...]).astype(gin_a.dtype)
    gin_b[...] = (jnp.dot(x_b_ref[...], wih_b_ref[...],
                          preferred_element_type=jnp.float32)
                  + b_b_ref[...]).astype(gin_b.dtype)

    base_a = i * t_chunk
    base_b = (n_chunks - 1 - i) * t_chunk if reverse_b else base_a
    need_mask = t_true < n_chunks * t_chunk    # static (Python) branch

    def cell(pre, c_prev):
        # PyTorch gate order i, f, g, o; every gate block is lane-aligned
        i_g = jax.nn.sigmoid(pre[:, 0 * Hp:1 * Hp])
        f_g = jax.nn.sigmoid(pre[:, 1 * Hp:2 * Hp])
        g_g = jnp.tanh(pre[:, 2 * Hp:3 * Hp])
        o_g = jax.nn.sigmoid(pre[:, 3 * Hp:4 * Hp])
        c_new = f_g * c_prev + i_g * g_g
        return o_g * jnp.tanh(c_new), c_new

    def step(t, carry):
        ta = t
        tb = (t_chunk - 1 - t) if reverse_b else t
        row_a = pl.multiple_of(ta * Bp, Bp)
        row_b = pl.multiple_of(tb * Bp, Bp)

        h_ap = h_a[...]
        c_ap = c_a[...]
        h_bp = h_b[...]
        c_bp = c_b[...]

        pre_a = (jnp.dot(h_ap.astype(jnp.bfloat16), whh_a_ref[...],
                         preferred_element_type=jnp.float32)
                 + gin_a[pl.ds(row_a, Bp)].astype(jnp.float32))
        pre_b = (jnp.dot(h_bp.astype(jnp.bfloat16), whh_b_ref[...],
                         preferred_element_type=jnp.float32)
                 + gin_b[pl.ds(row_b, Bp)].astype(jnp.float32))

        h_an, c_an = cell(pre_a, c_ap)
        h_bn, c_bn = cell(pre_b, c_bp)

        if need_mask:
            # freeze state at padded time steps (keeps exact reverse semantics)
            m_a = (base_a + ta < t_true).astype(jnp.float32)
            m_b = (base_b + tb < t_true).astype(jnp.float32)
            h_an = m_a * h_an + (1.0 - m_a) * h_ap
            c_an = m_a * c_an + (1.0 - m_a) * c_ap
            h_bn = m_b * h_bn + (1.0 - m_b) * h_bp
            c_bn = m_b * c_bn + (1.0 - m_b) * c_bp

        h_a[...] = h_an
        c_a[...] = c_an
        h_b[...] = h_bn
        c_b[...] = c_bn
        y_a_ref[ta] = h_an.astype(y_a_ref.dtype)
        y_b_ref[tb] = h_bn.astype(y_b_ref.dtype)
        return carry

    lax.fori_loop(0, t_chunk, step, 0)


def _linear2_kernel(x1_ref, x2_ref, w1_ref, w2_ref, b_ref, y_ref):
    """y = concat([x1, x2], -1) @ W^T + b without materializing the concat."""
    y_ref[...] = (jnp.dot(x1_ref[...], w1_ref[...],
                          preferred_element_type=jnp.float32)
                  + jnp.dot(x2_ref[...], w2_ref[...],
                            preferred_element_type=jnp.float32)
                  + b_ref[...])


# ----------------------------------------------------------------------------
# pallas_call wrappers
# ----------------------------------------------------------------------------
def _dual_lstm_call(x_a, x_b, p_a, p_b, *, reverse_b, t_true, t_chunk):
    """x_a/x_b: (T_pad, Bp, Din) bf16 with Bp%8==0 and T_pad%t_chunk==0.
    Returns (T_pad, Bp, Hp) bf16 per chain (chain b reversed in time when
    reverse_b).  Grid over time chunks; h/c persist in scratch across chunks."""
    T_pad, Bp, din_a = x_a.shape
    din_b = x_b.shape[2]
    Hp = p_a["hp"]
    assert T_pad % t_chunk == 0 and Bp % 8 == 0
    nc = T_pad // t_chunk

    x_a2 = x_a.reshape(T_pad * Bp, din_a)
    x_b2 = x_b.reshape(T_pad * Bp, din_b)

    def xa_map(i):
        return (i, 0)

    def ya_map(i):
        return (i, 0, 0)

    if reverse_b:
        def xb_map(i):
            return (nc - 1 - i, 0)

        def yb_map(i):
            return (nc - 1 - i, 0, 0)
    else:
        xb_map, yb_map = xa_map, ya_map

    kernel = functools.partial(_dual_lstm_chunk_kernel, t_chunk=t_chunk,
                               n_chunks=nc, t_true=t_true, reverse_b=reverse_b)

    # VMEM budget: double-buffered x/y blocks + resident weights + scratch, 2x margin.
    est = (2 * (t_chunk * Bp) * (din_a + din_b) * 2        # x blocks (bf16)
           + 2 * (t_chunk * Bp) * 2 * Hp * 2               # y blocks (bf16)
           + 2 * ((din_a + din_b) * 4 * Hp) * 2            # wih a+b (bf16)
           + 2 * (2 * Hp * 4 * Hp) * 2                     # whh a+b (bf16)
           + 2 * (t_chunk * Bp) * 4 * Hp * 2               # gin scratch (bf16)
           + 4 * Bp * Hp * 4 + 2 * 2 * 4 * Hp * 4)         # h/c state + biases
    vmem_limit = int(min(max(2 * est + (2 << 20), 8 << 20), 64 << 20))

    y_a, y_b = pl.pallas_call(
        kernel,
        out_shape=(jax.ShapeDtypeStruct((T_pad, Bp, Hp), jnp.bfloat16),
                   jax.ShapeDtypeStruct((T_pad, Bp, Hp), jnp.bfloat16)),
        grid=(nc,),
        in_specs=[
            pl.BlockSpec((t_chunk * Bp, din_a), xa_map),
            pl.BlockSpec(p_a["wih"].shape, lambda i: (0, 0)),
            pl.BlockSpec(p_a["whh"].shape, lambda i: (0, 0)),
            pl.BlockSpec(p_a["b"].shape, lambda i: (0, 0)),
            pl.BlockSpec((t_chunk * Bp, din_b), xb_map),
            pl.BlockSpec(p_b["wih"].shape, lambda i: (0, 0)),
            pl.BlockSpec(p_b["whh"].shape, lambda i: (0, 0)),
            pl.BlockSpec(p_b["b"].shape, lambda i: (0, 0)),
        ],
        out_specs=(pl.BlockSpec((t_chunk, Bp, Hp), ya_map),
                   pl.BlockSpec((t_chunk, Bp, Hp), yb_map)),
        scratch_shapes=[
            pltpu.VMEM((t_chunk * Bp, 4 * Hp), jnp.bfloat16),   # gin_a
            pltpu.VMEM((t_chunk * Bp, 4 * Hp), jnp.bfloat16),   # gin_b
            pltpu.VMEM((Bp, Hp), jnp.float32),                  # h_a
            pltpu.VMEM((Bp, Hp), jnp.float32),                  # c_a
            pltpu.VMEM((Bp, Hp), jnp.float32),                  # h_b
            pltpu.VMEM((Bp, Hp), jnp.float32),                  # c_b
        ],
        compiler_params=pltpu.CompilerParams(
            dimension_semantics=("arbitrary",),
            vmem_limit_bytes=vmem_limit),
    )(x_a2, p_a["wih"], p_a["whh"], p_a["b"],
      x_b2, p_b["wih"], p_b["whh"], p_b["b"])
    return y_a, y_b


def pallas_char_bilstm(x_fw, x_bw, fw_layers, bw_layers, t_chunk=32):
    """char_fw / char_bw stacks fused per layer (both run forward in time on
    their own inputs).  Returns padded (T_pad, Bp, Hp) bf16 outputs."""
    T, B, _ = x_fw.shape
    Bp = _round_up(max(B, 8), 8)
    tc = T if T <= t_chunk else t_chunk
    T_pad = _round_up(T, tc)
    x_fw = _pad_tb(x_fw.astype(jnp.bfloat16), T_pad, Bp)
    x_bw = _pad_tb(x_bw.astype(jnp.bfloat16), T_pad, Bp)
    for la, lb in zip(fw_layers, bw_layers):
        x_fw, x_bw = _dual_lstm_call(x_fw, x_bw, la, lb, reverse_b=False,
                                     t_true=T, t_chunk=tc)
    return x_fw, x_bw


def pallas_word_bilstm(x, fw_layers, bw_layers, t_chunk=32):
    """Bidirectional multi-layer LSTM (PyTorch bidirectional=True semantics).
    Both directions of a layer run in one fused, time-chunked kernel; the
    backward direction walks chunks (and steps inside a chunk) in reverse."""
    T, B, _ = x.shape
    Bp = _round_up(max(B, 8), 8)
    tc = T if T <= t_chunk else t_chunk
    T_pad = _round_up(T, tc)
    x = _pad_tb(x.astype(jnp.bfloat16), T_pad, Bp)
    yf = yb = None
    for li, (la, lb) in enumerate(zip(fw_layers, bw_layers)):
        yf, yb = _dual_lstm_call(x, x, la, lb, reverse_b=True,
                                 t_true=T, t_chunk=tc)
        if li + 1 < len(fw_layers):
            # TODO(synk): feed the two padded halves separately to the next
            # layer's gin matmul to avoid this concat copy (only w_layer > 1).
            x = jnp.concatenate([yf, yb], axis=2)
    return yf, yb


def pallas_linear2(x1, x2, lin, row_tile=512):
    """y = concat([x1, x2], -1) @ W^T + b, consuming the two lane-padded halves
    directly.  x1/x2: (N, Hp).  Returns (N, Dout) f32 with lane pad stripped."""
    N = x1.shape[0]
    hp1, hp2 = x1.shape[1], x2.shape[1]
    dout_p = lin["dout_p"]
    rt = row_tile if N >= row_tile else _round_up(N, 8)
    n_p = _round_up(N, rt)
    if n_p != N:
        x1 = jnp.pad(x1, ((0, n_p - N), (0, 0)))
        x2 = jnp.pad(x2, ((0, n_p - N), (0, 0)))

    y = pl.pallas_call(
        _linear2_kernel,
        out_shape=jax.ShapeDtypeStruct((n_p, dout_p), jnp.float32),
        grid=(n_p // rt,),
        in_specs=[pl.BlockSpec((rt, hp1), lambda i: (i, 0)),
                  pl.BlockSpec((rt, hp2), lambda i: (i, 0)),
                  pl.BlockSpec(lin["w1"].shape, lambda i: (0, 0)),
                  pl.BlockSpec(lin["w2"].shape, lambda i: (0, 0)),
                  pl.BlockSpec((1, dout_p), lambda i: (0, 0))],
        out_specs=pl.BlockSpec((rt, dout_p), lambda i: (i, 0)),
        compiler_params=pltpu.CompilerParams(
            dimension_semantics=("parallel",)),
    )(x1.astype(jnp.bfloat16), x2.astype(jnp.bfloat16),
      lin["w1"], lin["w2"], lin["b"])
    return y[:N, :lin["dout"]]


# ----------------------------------------------------------------------------
# Parameter construction (PyTorch shapes) + one-time preparation
# ----------------------------------------------------------------------------
def _uniform(key, shape, scale=0.1):
    return jax.random.uniform(key, shape, jnp.float32, -scale, scale)


def make_lstm_params(key, input_size, hidden_size, num_layers):
    layers = []
    for l in range(num_layers):
        din = input_size if l == 0 else hidden_size
        key, k1, k2, k3, k4 = jax.random.split(key, 5)
        layers.append((
            _uniform(k1, (4 * hidden_size, din)),          # w_ih
            _uniform(k2, (4 * hidden_size, hidden_size)),  # w_hh
            _uniform(k3, (4 * hidden_size,)),              # b_ih
            _uniform(k4, (4 * hidden_size,)),              # b_hh
        ))
    return layers


def make_bilstm_params(key, input_size, hidden_size, num_layers):
    fw, bw = [], []
    for l in range(num_layers):
        din = input_size if l == 0 else 2 * hidden_size
        key, k1, k2 = jax.random.split(key, 3)
        fw.extend(make_lstm_params(k1, din, hidden_size, 1))
        bw.extend(make_lstm_params(k2, din, hidden_size, 1))
    return fw, bw


def make_params(key, c_num, c_dim, c_hidden, c_layer,
                w_num, w_dim, w_hidden, w_layer, y_num):
    ks = jax.random.split(key, 10)
    word_fw, word_bw = make_bilstm_params(ks[4], 2 * w_dim, w_hidden // 2, w_layer)
    return {
        "char_embed": _uniform(ks[0], (c_num, c_dim)),
        "word_embed": _uniform(ks[1], (w_num, w_dim)),
        "char_fw": make_lstm_params(ks[2], c_dim, c_hidden, c_layer),
        "char_bw": make_lstm_params(ks[3], c_dim, c_hidden, c_layer),
        "word_fw": word_fw,
        "word_bw": word_bw,
        "char_seq_W": _uniform(ks[5], (w_dim, 2 * c_hidden)),   # nn.Linear(2*c_hidden, w_dim)
        "char_seq_b": _uniform(ks[6], (w_dim,)),
        "crf_W": _uniform(ks[7], (y_num * y_num, w_hidden)),    # CRF hidden2tag
        "crf_b": _uniform(ks[8], (y_num * y_num,)),
    }


def _prepare_lstm_layer(w_ih, w_hh, b_ih, b_hh, in_segments=None, din_pad=None,
                        lane=128):
    """PyTorch LSTM params -> bf16, pre-transposed, per-gate lane-padded weights.

    in_segments: list of (src_col_start, length, dst_row_start) mapping raw
    w_ih input columns onto rows of the prepared (din_pad, 4*Hp) weight — used
    when the runtime input carries lane padding (outputs of a previous layer)."""
    fourH, din = w_ih.shape
    H = fourH // 4
    Hp = _round_up(H, lane)
    if in_segments is None:
        in_segments = [(0, din, 0)]
        din_pad = din
    wih = jnp.zeros((din_pad, 4 * Hp), jnp.float32)
    whh = jnp.zeros((Hp, 4 * Hp), jnp.float32)
    b = jnp.zeros((1, 4 * Hp), jnp.float32)
    bias = (b_ih + b_hh).astype(jnp.float32)
    for k in range(4):
        for (s, L, d) in in_segments:
            wih = wih.at[d:d + L, k * Hp:k * Hp + H].set(
                jnp.transpose(w_ih[k * H:(k + 1) * H, s:s + L]).astype(jnp.float32))
        whh = whh.at[:H, k * Hp:k * Hp + H].set(
            jnp.transpose(w_hh[k * H:(k + 1) * H, :]).astype(jnp.float32))
        b = b.at[0, k * Hp:k * Hp + H].set(bias[k * H:(k + 1) * H])
    return {"wih": wih.astype(jnp.bfloat16), "whh": whh.astype(jnp.bfloat16),
            "b": b, "h": H, "hp": Hp}


def _prep_uni_stack(layers):
    """char stacks: layer 0 sees raw embeddings; layers >=1 see padded (Hp) y."""
    out = []
    for l, (w_ih, w_hh, b_ih, b_hh) in enumerate(layers):
        if l == 0:
            out.append(_prepare_lstm_layer(w_ih, w_hh, b_ih, b_hh))
        else:
            H = w_hh.shape[1]
            Hp = _round_up(H, 128)
            out.append(_prepare_lstm_layer(w_ih, w_hh, b_ih, b_hh,
                                           in_segments=[(0, H, 0)], din_pad=Hp))
    return out


def _prep_bi_stack(fw_layers, bw_layers):
    """word bi-LSTM: layers >=1 consume concat of the two Hp-padded halves."""
    fw_out, bw_out = [], []
    for l, (lf, lb) in enumerate(zip(fw_layers, bw_layers)):
        if l == 0:
            segs, dpad = None, None
        else:
            H = lf[1].shape[1]
            Hp = _round_up(H, 128)
            segs, dpad = [(0, H, 0), (H, H, Hp)], 2 * Hp
        fw_out.append(_prepare_lstm_layer(*lf, in_segments=segs, din_pad=dpad))
        bw_out.append(_prepare_lstm_layer(*lb, in_segments=segs, din_pad=dpad))
    return fw_out, bw_out


def _prepare_linear2(weight, bias, h_half, hp_half, lane=128):
    """nn.Linear consuming concat([a, b], -1) where a/b each hold h_half valid
    features padded to hp_half lanes.  Weight split into two row blocks."""
    dout, din = weight.shape
    assert din == 2 * h_half
    dout_p = _round_up(dout, lane)
    w1 = jnp.zeros((hp_half, dout_p), jnp.float32)
    w2 = jnp.zeros((hp_half, dout_p), jnp.float32)
    w1 = w1.at[:h_half, :dout].set(
        jnp.transpose(weight[:, :h_half]).astype(jnp.float32))
    w2 = w2.at[:h_half, :dout].set(
        jnp.transpose(weight[:, h_half:]).astype(jnp.float32))
    b = jnp.zeros((1, dout_p), jnp.float32).at[0, :dout].set(bias.astype(jnp.float32))
    return {"w1": w1.astype(jnp.bfloat16), "w2": w2.astype(jnp.bfloat16),
            "b": b, "dout": dout, "dout_p": dout_p}


def prepare_params(raw):
    """Pre-transpose / combine / lane-pad weights once (outside jit)."""
    H_c = raw["char_fw"][0][1].shape[1]          # c_hidden
    Hp_c = _round_up(H_c, 128)
    H_w = raw["word_fw"][0][1].shape[1]          # w_hidden // 2
    Hp_w = _round_up(H_w, 128)
    word_fw, word_bw = _prep_bi_stack(raw["word_fw"], raw["word_bw"])
    return {
        "char_embed": raw["char_embed"].astype(jnp.float32),
        "word_embed": raw["word_embed"].astype(jnp.float32),
        "char_fw": _prep_uni_stack(raw["char_fw"]),
        "char_bw": _prep_uni_stack(raw["char_bw"]),
        "word_fw": word_fw,
        "word_bw": word_bw,
        "char_seq": _prepare_linear2(raw["char_seq_W"], raw["char_seq_b"], H_c, Hp_c),
        "crf": _prepare_linear2(raw["crf_W"], raw["crf_b"], H_w, Hp_w),
    }


# ----------------------------------------------------------------------------
# Full forward pass (Vanilla_SeqLabel.forward)
# ----------------------------------------------------------------------------
def vanilla_seqlabel_forward(prep, y_num,
                             f_c, f_p, b_c, b_p, flm_w, blm_w, blm_ind, f_w,
                             char_chunk=32, word_chunk=32):
    # flm_w, blm_w, blm_ind are unused in the Vanilla (no-LM) model — same as PyTorch.
    del flm_w, blm_w, blm_ind
    word_seq_length, batch_size = f_w.shape
    c_len = f_c.shape[0]
    c_hp = prep["char_fw"][-1]["hp"]

    # char embeddings (dropout is identity at inference)
    f_c_e = jnp.take(prep["char_embed"], f_c, axis=0)   # (c_len, B, c_dim)
    b_c_e = jnp.take(prep["char_embed"], b_c, axis=0)

    # character-level LSTM stacks (fw + bw fused per layer, time-chunked)
    f_c_h, b_c_h = pallas_char_bilstm(f_c_e, b_c_e, prep["char_fw"],
                                      prep["char_bw"], t_chunk=char_chunk)

    # strip time/batch padding so the flattening matches PyTorch's (c_len*B);
    # lane padding (Hp) is kept — the char_seq weight rows are arranged for it.
    f_c_h = f_c_h[:c_len, :batch_size].reshape(c_len * batch_size, c_hp)
    b_c_h = b_c_h[:c_len, :batch_size].reshape(c_len * batch_size, c_hp)
    f_sel = jnp.take(f_c_h, f_p, axis=0)                 # (w_len*B, Hp_c)
    b_sel = jnp.take(b_c_h, b_p, axis=0)

    # char_seq: Linear(2*c_hidden -> w_dim), consumes the two padded halves
    c_o = pallas_linear2(f_sel, b_sel, prep["char_seq"])  # (w_len*B, w_dim) f32
    w_dim = prep["char_seq"]["dout"]
    c_o = c_o.reshape(word_seq_length, batch_size, w_dim)

    # word embedding and word-level bidirectional LSTM (fused fw/bw per layer)
    w_e = jnp.take(prep["word_embed"], f_w, axis=0)       # (w_len, B, w_dim)
    rnn_in = jnp.concatenate([c_o, w_e], axis=2)          # (w_len, B, 2*w_dim)
    yf, yb = pallas_word_bilstm(rnn_in, prep["word_fw"], prep["word_bw"],
                                t_chunk=word_chunk)        # (T_pad, Bp, Hp_w) each

    # CRF potentials: Linear(w_hidden -> y_num*y_num) on the two padded halves
    Tp, Bp, w_hp = yf.shape
    crf_out = pallas_linear2(yf.reshape(Tp * Bp, w_hp), yb.reshape(Tp * Bp, w_hp),
                             prep["crf"])                  # (Tp*Bp, y_num*y_num)
    crf_out = crf_out.reshape(Tp, Bp, y_num, y_num)[:word_seq_length, :batch_size]
    return crf_out


# ----------------------------------------------------------------------------
if __name__ == "__main__":
    # small config (2 char layers / 2 word layers to exercise padded-input layers)
    c_num, c_dim, c_hidden, c_layer = 40, 16, 16, 2
    w_num, w_dim, w_hidden, w_layer = 50, 16, 32, 2
    y_num = 5
    c_len, w_len, batch = 20, 10, 2

    key = jax.random.PRNGKey(0)
    pkey, dkey = jax.random.split(key)
    raw_params = make_params(pkey, c_num, c_dim, c_hidden, c_layer,
                             w_num, w_dim, w_hidden, w_layer, y_num)
    prep = prepare_params(raw_params)

    ks = jax.random.split(dkey, 8)
    f_c = jax.random.randint(ks[0], (c_len, batch), 0, c_num, jnp.int32)
    b_c = jax.random.randint(ks[1], (c_len, batch), 0, c_num, jnp.int32)
    f_p = jax.random.randint(ks[2], (w_len * batch,), 0, c_len * batch, jnp.int32)
    b_p = jax.random.randint(ks[3], (w_len * batch,), 0, c_len * batch, jnp.int32)
    flm_w = jax.random.randint(ks[4], (w_len, batch), 0, w_num, jnp.int32)    # unused
    blm_w = jax.random.randint(ks[5], (w_len, batch), 0, w_num, jnp.int32)    # unused
    blm_ind = jax.random.randint(ks[6], (w_len * batch,), 0, w_len * batch,
                                 jnp.int32)                                   # unused
    f_w = jax.random.randint(ks[7], (w_len, batch), 0, w_num, jnp.int32)

    # chunk sizes chosen so the demo exercises multi-chunk grids, ragged-T
    # masking and the reversed-chunk traversal of the word backward chain.
    fwd = jax.jit(functools.partial(vanilla_seqlabel_forward, prep, y_num,
                                    char_chunk=16, word_chunk=8))
    out = jax.block_until_ready(fwd(f_c, f_p, b_c, b_p, flm_w, blm_w, blm_ind, f_w))

    assert out.shape == (w_len, batch, y_num, y_num), out.shape
    assert out.dtype == jnp.float32
    assert bool(jnp.all(jnp.isfinite(out)))
    print("KERNEL_OK")
</pallas_src>

<mosaic_0001>
module attributes {stable_mosaic.version = 11 : i64} {
  func.func @_dual_lstm_chunk_kernel(%arg0: i32, %arg1: memref<128x128xbf16, #tpu.memory_space<vmem>>, %arg2: memref<128x512xbf16, #tpu.memory_space<vmem>>, %arg3: memref<128x512xbf16, #tpu.memory_space<vmem>>, %arg4: memref<1x512xf32, #tpu.memory_space<vmem>>, %arg5: memref<128x128xbf16, #tpu.memory_space<vmem>>, %arg6: memref<128x512xbf16, #tpu.memory_space<vmem>>, %arg7: memref<128x512xbf16, #tpu.memory_space<vmem>>, %arg8: memref<1x512xf32, #tpu.memory_space<vmem>>, %arg9: memref<16x8x128xbf16, #tpu.memory_space<vmem>>, %arg10: memref<16x8x128xbf16, #tpu.memory_space<vmem>>, %arg11: memref<128x512xbf16, #tpu.memory_space<vmem>>, %arg12: memref<128x512xbf16, #tpu.memory_space<vmem>>, %arg13: memref<8x128xf32, #tpu.memory_space<vmem>>, %arg14: memref<8x128xf32, #tpu.memory_space<vmem>>, %arg15: memref<8x128xf32, #tpu.memory_space<vmem>>, %arg16: memref<8x128xf32, #tpu.memory_space<vmem>>) attributes {dimension_semantics = [#tpu.dimension_semantics<arbitrary>], iteration_bounds = array<i64: 2>, scalar_prefetch = 0 : i64, scratch_operands = 6 : i64, tpu.core_type = #tpu.core_type<tc>, window_params = [{transform_indices = @transform_0, window_bounds = array<i64: 128, 128>}, {pipeline_mode = #tpu.pipeline_mode<synchronous>, transform_indices = @transform_1, window_bounds = array<i64: 128, 512>}, {pipeline_mode = #tpu.pipeline_mode<synchronous>, transform_indices = @transform_2, window_bounds = array<i64: 128, 512>}, {pipeline_mode = #tpu.pipeline_mode<synchronous>, transform_indices = @transform_3, window_bounds = array<i64: 1, 512>}, {transform_indices = @transform_4, window_bounds = array<i64: 128, 128>}, {pipeline_mode = #tpu.pipeline_mode<synchronous>, transform_indices = @transform_5, window_bounds = array<i64: 128, 512>}, {pipeline_mode = #tpu.pipeline_mode<synchronous>, transform_indices = @transform_6, window_bounds = array<i64: 128, 512>}, {pipeline_mode = #tpu.pipeline_mode<synchronous>, transform_indices = @transform_7, window_bounds = array<i64: 1, 512>}, {transform_indices = @transform_8, window_bounds = array<i64: 16, 8, 128>}, {transform_indices = @transform_9, window_bounds = array<i64: 16, 8, 128>}]} {
    %c0_i32 = arith.constant 0 : i32
    %0 = arith.cmpi eq, %arg0, %c0_i32 : i32
    %1 = arith.extui %0 : i1 to i32
    %c0_i32_0 = arith.constant 0 : i32
    %2 = arith.cmpi ne, %1, %c0_i32_0 : i32
    scf.if %2 {
      %cst_20 = arith.constant 0.000000e+00 : f32
      %21 = vector.broadcast %cst_20 : f32 to vector<8x128xf32>
      %c0_21 = arith.constant 0 : index
      %c0_22 = arith.constant 0 : index
      %22 = vector.load %arg13[%c0_21, %c0_22] : memref<8x128xf32, #tpu.memory_space<vmem>>, vector<8x128xf32>
      tpu.vector_store %arg13[%c0_21, %c0_22], %21 {strides = array<i32>} : memref<8x128xf32, #tpu.memory_space<vmem>>, vector<8x128xf32>,
      %cst_23 = arith.constant 0.000000e+00 : f32
      %23 = vector.broadcast %cst_23 : f32 to vector<8x128xf32>
      %c0_24 = arith.constant 0 : index
      %c0_25 = arith.constant 0 : index
      %24 = vector.load %arg14[%c0_24, %c0_25] : memref<8x128xf32, #tpu.memory_space<vmem>>, vector<8x128xf32>
      tpu.vector_store %arg14[%c0_24, %c0_25], %23 {strides = array<i32>} : memref<8x128xf32, #tpu.memory_space<vmem>>, vector<8x128xf32>,
      %cst_26 = arith.constant 0.000000e+00 : f32
      %25 = vector.broadcast %cst_26 : f32 to vector<8x128xf32>
      %c0_27 = arith.constant 0 : index
      %c0_28 = arith.constant 0 : index
      %26 = vector.load %arg15[%c0_27, %c0_28] : memref<8x128xf32, #tpu.memory_space<vmem>>, vector<8x128xf32>
      tpu.vector_store %arg15[%c0_27, %c0_28], %25 {strides = array<i32>} : memref<8x128xf32, #tpu.memory_space<vmem>>, vector<8x128xf32>,
      %cst_29 = arith.constant 0.000000e+00 : f32
      %27 = vector.broadcast %cst_29 : f32 to vector<8x128xf32>
      %c0_30 = arith.constant 0 : index
      %c0_31 = arith.constant 0 : index
      %28 = vector.load %arg16[%c0_30, %c0_31] : memref<8x128xf32, #tpu.memory_space<vmem>>, vector<8x128xf32>
      tpu.vector_store %arg16[%c0_30, %c0_31], %27 {strides = array<i32>} : memref<8x128xf32, #tpu.memory_space<vmem>>, vector<8x128xf32>,
    } else {
    }
    %c0 = arith.constant 0 : index
    %c0_1 = arith.constant 0 : index
    %3 = vector.load %arg1[%c0, %c0_1] : memref<128x128xbf16, #tpu.memory_space<vmem>>, vector<128x128xbf16>
    %c0_2 = arith.constant 0 : index
    %c0_3 = arith.constant 0 : index
    %4 = vector.load %arg2[%c0_2, %c0_3] : memref<128x512xbf16, #tpu.memory_space<vmem>>, vector<128x512xbf16>
    %cst = arith.constant dense<0.000000e+00> : vector<128x512xf32>
    %5 = tpu.matmul %3, %4, %cst {dimension_numbers = #tpu.dot_dimension_numbers<[1], [0], [0], [1], [0, 0, 1, 1], [], []>} : vector<128x128xbf16>, vector<128x512xbf16>, vector<128x512xf32> -> vector<128x512xf32>
    %c0_4 = arith.constant 0 : index
    %c0_5 = arith.constant 0 : index
    %6 = vector.load %arg4[%c0_4, %c0_5] : memref<1x512xf32, #tpu.memory_space<vmem>>, vector<1x512xf32>
    %7 = vector.broadcast %6 : vector<1x512xf32> to vector<128x512xf32>
    %8 = arith.addf %5, %7 : vector<128x512xf32>
    %9 = arith.truncf %8 : vector<128x512xf32> to vector<128x512xbf16>
    %c0_6 = arith.constant 0 : index
    %c0_7 = arith.constant 0 : index
    %10 = vector.load %arg11[%c0_6, %c0_7] : memref<128x512xbf16, #tpu.memory_space<vmem>>, vector<128x512xbf16>
    tpu.vector_store %arg11[%c0_6, %c0_7], %9 {strides = array<i32>} : memref<128x512xbf16, #tpu.memory_space<vmem>>, vector<128x512xbf16>,
    %c0_8 = arith.constant 0 : index
    %c0_9 = arith.constant 0 : index
    %11 = vector.load %arg5[%c0_8, %c0_9] : memref<128x128xbf16, #tpu.memory_space<vmem>>, vector<128x128xbf16>
    %c0_10 = arith.constant 0 : index
    %c0_11 = arith.constant 0 : index
    %12 = vector.load %arg6[%c0_10, %c0_11] : memref<128x512xbf16, #tpu.memory_space<vmem>>, vector<128x512xbf16>
    %cst_12 = arith.constant dense<0.000000e+00> : vector<128x512xf32>
    %13 = tpu.matmul %11, %12, %cst_12 {dimension_numbers = #tpu.dot_dimension_numbers<[1], [0], [0], [1], [0, 0, 1, 1], [], []>} : vector<128x128xbf16>, vector<128x512xbf16>, vector<128x512xf32> -> vector<128x512xf32>
    %c0_13 = arith.constant 0 : index
    %c0_14 = arith.constant 0 : index
    %14 = vector.load %arg8[%c0_13, %c0_14] : memref<1x512xf32, #tpu.memory_space<vmem>>, vector<1x512xf32>
    %15 = vector.broadcast %14 : vector<1x512xf32> to vector<128x512xf32>
    %16 = arith.addf %13, %15 : vector<128x512xf32>
    %17 = arith.truncf %16 : vector<128x512xf32> to vector<128x512xbf16>
    %c0_15 = arith.constant 0 : index
    %c0_16 = arith.constant 0 : index
    %18 = vector.load %arg12[%c0_15, %c0_16] : memref<128x512xbf16, #tpu.memory_space<vmem>>, vector<128x512xbf16>
    tpu.vector_store %arg12[%c0_15, %c0_16], %17 {strides = array<i32>} : memref<128x512xbf16, #tpu.memory_space<vmem>>, vector<128x512xbf16>,
    %c16_i32 = arith.constant 16 : i32
    %19 = arith.muli %arg0, %c16_i32 : i32
    %c0_i32_17 = arith.constant 0 : i32
    %c16_i32_18 = arith.constant 16 : i32
    %20 = arith.addi %c0_i32_17, %c16_i32_18 : i32
    %c1_i32 = arith.constant 1 : i32
    scf.for %arg17 = %c0_i32_17 to %20 step %c1_i32  : i32 {
      %c8_i32 = arith.constant 8 : i32
      %21 = arith.muli %arg17, %c8_i32 : i32
      %22 = tpu.assume_multiple %21, 8 : i32
      %c8_i32_20 = arith.constant 8 : i32
      %23 = arith.muli %arg17, %c8_i32_20 : i32
      %24 = tpu.assume_multiple %23, 8 : i32
      %c0_21 = arith.constant 0 : index
      %c0_22 = arith.constant 0 : index
      %25 = vector.load %arg13[%c0_21, %c0_22] : memref<8x128xf32, #tpu.memory_space<vmem>>, vector<8x128xf32>
      %c0_23 = arith.constant 0 : index
      %c0_24 = arith.constant 0 : index
      %26 = vector.load %arg14[%c0_23, %c0_24] : memref<8x128xf32, #tpu.memory_space<vmem>>, vector<8x128xf32>
      %c0_25 = arith.constant 0 : index
      %c0_26 = arith.constant 0 : index
      %27 = vector.load %arg15[%c0_25, %c0_26] : memref<8x128xf32, #tpu.memory_space<vmem>>, vector<8x128xf32>
      %c0_27 = arith.constant 0 : index
      %c0_28 = arith.constant 0 : index
      %28 = vector.load %arg16[%c0_27, %c0_28] : memref<8x128xf32, #tpu.memory_space<vmem>>, vector<8x128xf32>
      %29 = arith.truncf %25 : vector<8x128xf32> to vector<8x128xbf16>
      %c0_29 = arith.constant 0 : index
      %c0_30 = arith.constant 0 : index
      %30 = vector.load %arg3[%c0_29, %c0_30] : memref<128x512xbf16, #tpu.memory_space<vmem>>, vector<128x512xbf16>
      %cst_31 = arith.constant dense<0.000000e+00> : vector<8x512xf32>
      %31 = tpu.matmul %29, %30, %cst_31 {dimension_numbers = #tpu.dot_dimension_numbers<[1], [0], [0], [1], [0, 0, 1, 1], [], []>} : vector<8x128xbf16>, vector<128x512xbf16>, vector<8x512xf32> -> vector<8x512xf32>
      %32 = arith.index_cast %22 : i32 to index
      %c0_32 = arith.constant 0 : index
      %33 = vector.load %arg11[%32, %c0_32] : memref<128x512xbf16, #tpu.memory_space<vmem>>, vector<8x512xbf16>
      %34 = arith.extf %33 : vector<8x512xbf16> to vector<8x512xf32>
      %35 = arith.addf %31, %34 : vector<8x512xf32>
      %36 = arith.truncf %27 : vector<8x128xf32> to vector<8x128xbf16>
      %c0_33 = arith.constant 0 : index
      %c0_34 = arith.constant 0 : index
      %37 = vector.load %arg7[%c0_33, %c0_34] : memref<128x512xbf16, #tpu.memory_space<vmem>>, vector<128x512xbf16>
      %cst_35 = arith.constant dense<0.000000e+00> : vector<8x512xf32>
      %38 = tpu.matmul %36, %37, %cst_35 {dimension_numbers = #tpu.dot_dimension_numbers<[1], [0], [0], [1], [0, 0, 1, 1], [], []>} : vector<8x128xbf16>, vector<128x512xbf16>, vector<8x512xf32> -> vector<8x512xf32>
      %39 = arith.index_cast %24 : i32 to index
      %c0_36 = arith.constant 0 : index
      %40 = vector.load %arg12[%39, %c0_36] : memref<128x512xbf16, #tpu.memory_space<vmem>>, vector<8x512xbf16>
      %41 = arith.extf %40 : vector<8x512xbf16> to vector<8x512xf32>
      %42 = arith.addf %38, %41 : vector<8x512xf32>
      %43 = vector.extract_strided_slice %35 {offsets = [0, 0], sizes = [8, 128], strides = [1, 1]} : vector<8x512xf32> to vector<8x128xf32>
      %44 = arith.negf %43 : vector<8x128xf32>
      %45 = math.exp %44 : vector<8x128xf32>
      %cst_37 = arith.constant 1.000000e+00 : f32
      %46 = vector.broadcast %cst_37 : f32 to vector<8x128xf32>
      %47 = arith.addf %46, %45 : vector<8x128xf32>
      %48 = arith.divf %46, %47 : vector<8x128xf32>
      %49 = vector.extract_strided_slice %35 {offsets = [0, 128], sizes = [8, 128], strides = [1, 1]} : vector<8x512xf32> to vector<8x128xf32>
      %50 = arith.negf %49 : vector<8x128xf32>
      %51 = math.exp %50 : vector<8x128xf32>
      %cst_38 = arith.constant 1.000000e+00 : f32
      %52 = vector.broadcast %cst_38 : f32 to vector<8x128xf32>
      %53 = arith.addf %52, %51 : vector<8x128xf32>
      %54 = arith.divf %52, %53 : vector<8x128xf32>
      %55 = vector.extract_strided_slice %35 {offsets = [0, 256], sizes = [8, 128], strides = [1, 1]} : vector<8x512xf32> to vector<8x128xf32>
      %56 = math.tanh %55 : vector<8x128xf32>
      %57 = vector.extract_strided_slice %35 {offsets = [0, 384], sizes = [8, 128], strides = [1, 1]} : vector<8x512xf32> to vector<8x128xf32>
      %58 = arith.negf %57 : vector<8x128xf32>
      %59 = math.exp %58 : vector<8x128xf32>
      %cst_39 = arith.constant 1.000000e+00 : f32
      %60 = vector.broadcast %cst_39 : f32 to vector<8x128xf32>
      %61 = arith.addf %60, %59 : vector<8x128xf32>
      %62 = arith.divf %60, %61 : vector<8x128xf32>
      %63 = arith.mulf %54, %26 : vector<8x128xf32>
      %64 = arith.mulf %48, %56 : vector<8x128xf32>
      %65 = arith.addf %63, %64 : vector<8x128xf32>
      %66 = math.tanh %65 : vector<8x128xf32>
      %67 = arith.mulf %62, %66 : vector<8x128xf32>
      %68 = vector.extract_strided_slice %42 {offsets = [0, 0], sizes = [8, 128], strides = [1, 1]} : vector<8x512xf32> to vector<8x128xf32>
      %69 = arith.negf %68 : vector<8x128xf32>
      %70 = math.exp %69 : vector<8x128xf32>
      %cst_40 = arith.constant 1.000000e+00 : f32
      %71 = vector.broadcast %cst_40 : f32 to vector<8x128xf32>
      %72 = arith.addf %71, %70 : vector<8x128xf32>
      %73 = arith.divf %71, %72 : vector<8x128xf32>
      %74 = vector.extract_strided_slice %42 {offsets = [0, 128], sizes = [8, 128], strides = [1, 1]} : vector<8x512xf32> to vector<8x128xf32>
      %75 = arith.negf %74 : vector<8x128xf32>
      %76 = math.exp %75 : vector<8x128xf32>
      %cst_41 = arith.constant 1.000000e+00 : f32
      %77 = vector.broadcast %cst_41 : f32 to vector<8x128xf32>
      %78 = arith.addf %77, %76 : vector<8x128xf32>
      %79 = arith.divf %77, %78 : vector<8x128xf32>
      %80 = vector.extract_strided_slice %42 {offsets = [0, 256], sizes = [8, 128], strides = [1, 1]} : vector<8x512xf32> to vector<8x128xf32>
      %81 = math.tanh %80 : vector<8x128xf32>
      %82 = vector.extract_strided_slice %42 {offsets = [0, 384], sizes = [8, 128], strides = [1, 1]} : vector<8x512xf32> to vector<8x128xf32>
      %83 = arith.negf %82 : vector<8x128xf32>
      %84 = math.exp %83 : vector<8x128xf32>
      %cst_42 = arith.constant 1.000000e+00 : f32
      %85 = vector.broadcast %cst_42 : f32 to vector<8x128xf32>
      %86 = arith.addf %85, %84 : vector<8x128xf32>
      %87 = arith.divf %85, %86 : vector<8x128xf32>
      %88 = arith.mulf %79, %28 : vector<8x128xf32>
      %89 = arith.mulf %73, %81 : vector<8x128xf32>
      %90 = arith.addf %88, %89 : vector<8x128xf32>
      %91 = math.tanh %90 : vector<8x128xf32>
      %92 = arith.mulf %87, %91 : vector<8x128xf32>
      %93 = arith.addi %19, %arg17 : i32
      %c20_i32 = arith.constant 20 : i32
      %94 = arith.cmpi slt, %93, %c20_i32 : i32
      %95 = arith.extui %94 : i1 to i32
      %96 = arith.sitofp %95 : i32 to f32
      %97 = arith.addi %19, %arg17 : i32
      %c20_i32_43 = arith.constant 20 : i32
      %98 = arith.cmpi slt, %97, %c20_i32_43 : i32
      %99 = arith.extui %98 : i1 to i32
      %100 = arith.sitofp %99 : i32 to f32
      %101 = vector.broadcast %96 : f32 to vector<8x128xf32>
      %102 = arith.mulf %101, %67 : vector<8x128xf32>
      %cst_44 = arith.constant 1.000000e+00 : f32
      %103 = arith.subf %cst_44, %96 : f32
      %104 = vector.broadcast %103 : f32 to vector<8x128xf32>
      %105 = arith.mulf %104, %25 : vector<8x128xf32>
      %106 = arith.addf %102, %105 : vector<8x128xf32>
      %107 = vector.broadcast %96 : f32 to vector<8x128xf32>
      %108 = arith.mulf %107, %65 : vector<8x128xf32>
      %cst_45 = arith.constant 1.000000e+00 : f32
      %109 = arith.subf %cst_45, %96 : f32
      %110 = vector.broadcast %109 : f32 to vector<8x128xf32>
      %111 = arith.mulf %110, %26 : vector<8x128xf32>
      %112 = arith.addf %108, %111 : vector<8x128xf32>
      %113 = vector.broadcast %100 : f32 to vector<8x128xf32>
      %114 = arith.mulf %113, %92 : vector<8x128xf32>
      %cst_46 = arith.constant 1.000000e+00 : f32
      %115 = arith.subf %cst_46, %100 : f32
      %116 = vector.broadcast %115 : f32 to vector<8x128xf32>
      %117 = arith.mulf %116, %27 : vector<8x128xf32>
      %118 = arith.addf %114, %117 : vector<8x128xf32>
      %119 = vector.broadcast %100 : f32 to vector<8x128xf32>
      %120 = arith.mulf %119, %90 : vector<8x128xf32>
      %cst_47 = arith.constant 1.000000e+00 : f32
      %121 = arith.subf %cst_47, %100 : f32
      %122 = vector.broadcast %121 : f32 to vector<8x128xf32>
      %123 = arith.mulf %122, %28 : vector<8x128xf32>
      %124 = arith.addf %120, %123 : vector<8x128xf32>
      %c0_48 = arith.constant 0 : index
      %c0_49 = arith.constant 0 : index
      %125 = vector.load %arg13[%c0_48, %c0_49] : memref<8x128xf32, #tpu.memory_space<vmem>>, vector<8x128xf32>
      tpu.vector_store %arg13[%c0_48, %c0_49], %106 {strides = array<i32>} : memref<8x128xf32, #tpu.memory_space<vmem>>, vector<8x128xf32>,
      %c0_50 = arith.constant 0 : index
      %c0_51 = arith.constant 0 : index
      %126 = vector.load %arg14[%c0_50, %c0_51] : memref<8x128xf32, #tpu.memory_space<vmem>>, vector<8x128xf32>
      tpu.vector_store %arg14[%c0_50, %c0_51], %112 {strides = array<i32>} : memref<8x128xf32, #tpu.memory_space<vmem>>, vector<8x128xf32>,
      %c0_52 = arith.constant 0 : index
      %c0_53 = arith.constant 0 : index
      %127 = vector.load %arg15[%c0_52, %c0_53] : memref<8x128xf32, #tpu.memory_space<vmem>>, vector<8x128xf32>
      tpu.vector_store %arg15[%c0_52, %c0_53], %118 {strides = array<i32>} : memref<8x128xf32, #tpu.memory_space<vmem>>, vector<8x128xf32>,
      %c0_54 = arith.constant 0 : index
      %c0_55 = arith.constant 0 : index
      %128 = vector.load %arg16[%c0_54, %c0_55] : memref<8x128xf32, #tpu.memory_space<vmem>>, vector<8x128xf32>
      tpu.vector_store %arg16[%c0_54, %c0_55], %124 {strides = array<i32>} : memref<8x128xf32, #tpu.memory_space<vmem>>, vector<8x128xf32>,
      %129 = arith.truncf %106 : vector<8x128xf32> to vector<8x128xbf16>
      %130 = arith.index_cast %arg17 : i32 to index
      %c0_56 = arith.constant 0 : index
      %c0_57 = arith.constant 0 : index
      %131 = vector.load %arg9[%130, %c0_56, %c0_57] : memref<16x8x128xbf16, #tpu.memory_space<vmem>>, vector<1x8x128xbf16>
      %132 = vector.shape_cast %131 : vector<1x8x128xbf16> to vector<8x128xbf16>
      %133 = vector.shape_cast %129 : vector<8x128xbf16> to vector<1x8x128xbf16>
      tpu.vector_store %arg9[%130, %c0_56, %c0_57], %133 {strides = array<i32>} : memref<16x8x128xbf16, #tpu.memory_space<vmem>>, vector<1x8x128xbf16>,
      %134 = arith.truncf %118 : vector<8x128xf32> to vector<8x128xbf16>
      %135 = arith.index_cast %arg17 : i32 to index
      %c0_58 = arith.constant 0 : index
      %c0_59 = arith.constant 0 : index
      %136 = vector.load %arg10[%135, %c0_58, %c0_59] : memref<16x8x128xbf16, #tpu.memory_space<vmem>>, vector<1x8x128xbf16>
      %137 = vector.shape_cast %136 : vector<1x8x128xbf16> to vector<8x128xbf16>
      %138 = vector.shape_cast %134 : vector<8x128xbf16> to vector<1x8x128xbf16>
      tpu.vector_store %arg10[%135, %c0_58, %c0_59], %138 {strides = array<i32>} : memref<16x8x128xbf16, #tpu.memory_space<vmem>>, vector<1x8x128xbf16>,
    }
    %c16_i32_19 = arith.constant 16 : i32
    return
  }
  func.func @transform_0(%arg0: i32) -> (i32, i32) {
    %c0_i32 = arith.constant 0 : i32
    %c0_i32_0 = arith.constant 0 : i32
    return %arg0, %c0_i32 : i32, i32
  }
  func.func @transform_1(%arg0: i32) -> (i32, i32) {
    %c0_i32 = arith.constant 0 : i32
    %c0_i32_0 = arith.constant 0 : i32
    %c0_i32_1 = arith.constant 0 : i32
    return %c0_i32, %c0_i32_0 : i32, i32
  }
  func.func @transform_2(%arg0: i32) -> (i32, i32) {
    %c0_i32 = arith.constant 0 : i32
    %c0_i32_0 = arith.constant 0 : i32
    %c0_i32_1 = arith.constant 0 : i32
    return %c0_i32, %c0_i32_0 : i32, i32
  }
  func.func @transform_3(%arg0: i32) -> (i32, i32) {
    %c0_i32 = arith.constant 0 : i32
    %c0_i32_0 = arith.constant 0 : i32
    %c0_i32_1 = arith.constant 0 : i32
    return %c0_i32, %c0_i32_0 : i32, i32
  }
  func.func @transform_4(%arg0: i32) -> (i32, i32) {
    %c0_i32 = arith.constant 0 : i32
    %c0_i32_0 = arith.constant 0 : i32
    return %arg0, %c0_i32 : i32, i32
  }
  func.func @transform_5(%arg0: i32) -> (i32, i32) {
    %c0_i32 = arith.constant 0 : i32
    %c0_i32_0 = arith.constant 0 : i32
    %c0_i32_1 = arith.constant 0 : i32
    return %c0_i32, %c0_i32_0 : i32, i32
  }
  func.func @transform_6(%arg0: i32) -> (i32, i32) {
    %c0_i32 = arith.constant 0 : i32
    %c0_i32_0 = arith.constant 0 : i32
    %c0_i32_1 = arith.constant 0 : i32
    return %c0_i32, %c0_i32_0 : i32, i32
  }
  func.func @transform_7(%arg0: i32) -> (i32, i32) {
    %c0_i32 = arith.constant 0 : i32
    %c0_i32_0 = arith.constant 0 : i32
    %c0_i32_1 = arith.constant 0 : i32
    return %c0_i32, %c0_i32_0 : i32, i32
  }
  func.func @transform_8(%arg0: i32) -> (i32, i32, i32) {
    %c0_i32 = arith.constant 0 : i32
    %c0_i32_0 = arith.constant 0 : i32
    %c0_i32_1 = arith.constant 0 : i32
    return %arg0, %c0_i32, %c0_i32_0 : i32, i32, i32
  }
  func.func @transform_9(%arg0: i32) -> (i32, i32, i32) {
    %c0_i32 = arith.constant 0 : i32
    %c0_i32_0 = arith.constant 0 : i32
    %c0_i32_1 = arith.constant 0 : i32
    return %arg0, %c0_i32, %c0_i32_0 : i32, i32, i32
  }
}

module attributes {stable_mosaic.version = 11 : i64} {
  func.func @_dual_lstm_chunk_kernel(%arg0: i32, %arg1: memref<128x16xbf16, #tpu.memory_space<vmem>>, %arg2: memref<16x512xbf16, #tpu.memory_space<vmem>>, %arg3: memref<128x512xbf16, #tpu.memory_space<vmem>>, %arg4: memref<1x512xf32, #tpu.memory_space<vmem>>, %arg5: memref<128x16xbf16, #tpu.memory_space<vmem>>, %arg6: memref<16x512xbf16, #tpu.memory_space<vmem>>, %arg7: memref<128x512xbf16, #tpu.memory_space<vmem>>, %arg8: memref<1x512xf32, #tpu.memory_space<vmem>>, %arg9: memref<16x8x128xbf16, #tpu.memory_space<vmem>>, %arg10: memref<16x8x128xbf16, #tpu.memory_space<vmem>>, %arg11: memref<128x512xbf16, #tpu.memory_space<vmem>>, %arg12: memref<128x512xbf16, #tpu.memory_space<vmem>>, %arg13: memref<8x128xf32, #tpu.memory_space<vmem>>, %arg14: memref<8x128xf32, #tpu.memory_space<vmem>>, %arg15: memref<8x128xf32, #tpu.memory_space<vmem>>, %arg16: memref<8x128xf32, #tpu.memory_space<vmem>>) attributes {dimension_semantics = [#tpu.dimension_semantics<arbitrary>], iteration_bounds = array<i64: 2>, scalar_prefetch = 0 : i64, scratch_operands = 6 : i64, tpu.core_type = #tpu.core_type<tc>, window_params = [{transform_indices = @transform_0, window_bounds = array<i64: 128, 16>}, {pipeline_mode = #tpu.pipeline_mode<synchronous>, transform_indices = @transform_1, window_bounds = array<i64: 16, 512>}, {pipeline_mode = #tpu.pipeline_mode<synchronous>, transform_indices = @transform_2, window_bounds = array<i64: 128, 512>}, {pipeline_mode = #tpu.pipeline_mode<synchronous>, transform_indices = @transform_3, window_bounds = array<i64: 1, 512>}, {transform_indices = @transform_4, window_bounds = array<i64: 128, 16>}, {pipeline_mode = #tpu.pipeline_mode<synchronous>, transform_indices = @transform_5, window_bounds = array<i64: 16, 512>}, {pipeline_mode = #tpu.pipeline_mode<synchronous>, transform_indices = @transform_6, window_bounds = array<i64: 128, 512>}, {pipeline_mode = #tpu.pipeline_mode<synchronous>, transform_indices = @transform_7, window_bounds = array<i64: 1, 512>}, {transform_indices = @transform_8, window_bounds = array<i64: 16, 8, 128>}, {transform_indices = @transform_9, window_bounds = array<i64: 16, 8, 128>}]} {
    %c0_i32 = arith.constant 0 : i32
    %0 = arith.cmpi eq, %arg0, %c0_i32 : i32
    %1 = arith.extui %0 : i1 to i32
    %c0_i32_0 = arith.constant 0 : i32
    %2 = arith.cmpi ne, %1, %c0_i32_0 : i32
    scf.if %2 {
      %cst_20 = arith.constant 0.000000e+00 : f32
      %21 = vector.broadcast %cst_20 : f32 to vector<8x128xf32>
      %c0_21 = arith.constant 0 : index
      %c0_22 = arith.constant 0 : index
      %22 = vector.load %arg13[%c0_21, %c0_22] : memref<8x128xf32, #tpu.memory_space<vmem>>, vector<8x128xf32>
      tpu.vector_store %arg13[%c0_21, %c0_22], %21 {strides = array<i32>} : memref<8x128xf32, #tpu.memory_space<vmem>>, vector<8x128xf32>,
      %cst_23 = arith.constant 0.000000e+00 : f32
      %23 = vector.broadcast %cst_23 : f32 to vector<8x128xf32>
      %c0_24 = arith.constant 0 : index
      %c0_25 = arith.constant 0 : index
      %24 = vector.load %arg14[%c0_24, %c0_25] : memref<8x128xf32, #tpu.memory_space<vmem>>, vector<8x128xf32>
      tpu.vector_store %arg14[%c0_24, %c0_25], %23 {strides = array<i32>} : memref<8x128xf32, #tpu.memory_space<vmem>>, vector<8x128xf32>,
      %cst_26 = arith.constant 0.000000e+00 : f32
      %25 = vector.broadcast %cst_26 : f32 to vector<8x128xf32>
      %c0_27 = arith.constant 0 : index
      %c0_28 = arith.constant 0 : index
      %26 = vector.load %arg15[%c0_27, %c0_28] : memref<8x128xf32, #tpu.memory_space<vmem>>, vector<8x128xf32>
      tpu.vector_store %arg15[%c0_27, %c0_28], %25 {strides = array<i32>} : memref<8x128xf32, #tpu.memory_space<vmem>>, vector<8x128xf32>,
      %cst_29 = arith.constant 0.000000e+00 : f32
      %27 = vector.broadcast %cst_29 : f32 to vector<8x128xf32>
      %c0_30 = arith.constant 0 : index
      %c0_31 = arith.constant 0 : index
      %28 = vector.load %arg16[%c0_30, %c0_31] : memref<8x128xf32, #tpu.memory_space<vmem>>, vector<8x128xf32>
      tpu.vector_store %arg16[%c0_30, %c0_31], %27 {strides = array<i32>} : memref<8x128xf32, #tpu.memory_space<vmem>>, vector<8x128xf32>,
    } else {
    }
    %c0 = arith.constant 0 : index
    %c0_1 = arith.constant 0 : index
    %3 = vector.load %arg1[%c0, %c0_1] : memref<128x16xbf16, #tpu.memory_space<vmem>>, vector<128x16xbf16>
    %c0_2 = arith.constant 0 : index
    %c0_3 = arith.constant 0 : index
    %4 = vector.load %arg2[%c0_2, %c0_3] : memref<16x512xbf16, #tpu.memory_space<vmem>>, vector<16x512xbf16>
    %cst = arith.constant dense<0.000000e+00> : vector<128x512xf32>
    %5 = tpu.matmul %3, %4, %cst {dimension_numbers = #tpu.dot_dimension_numbers<[1], [0], [0], [1], [0, 0, 1, 1], [], []>} : vector<128x16xbf16>, vector<16x512xbf16>, vector<128x512xf32> -> vector<128x512xf32>
    %c0_4 = arith.constant 0 : index
    %c0_5 = arith.constant 0 : index
    %6 = vector.load %arg4[%c0_4, %c0_5] : memref<1x512xf32, #tpu.memory_space<vmem>>, vector<1x512xf32>
    %7 = vector.broadcast %6 : vector<1x512xf32> to vector<128x512xf32>
    %8 = arith.addf %5, %7 : vector<128x512xf32>
    %9 = arith.truncf %8 : vector<128x512xf32> to vector<128x512xbf16>
    %c0_6 = arith.constant 0 : index
    %c0_7 = arith.constant 0 : index
    %10 = vector.load %arg11[%c0_6, %c0_7] : memref<128x512xbf16, #tpu.memory_space<vmem>>, vector<128x512xbf16>
    tpu.vector_store %arg11[%c0_6, %c0_7], %9 {strides = array<i32>} : memref<128x512xbf16, #tpu.memory_space<vmem>>, vector<128x512xbf16>,
    %c0_8 = arith.constant 0 : index
    %c0_9 = arith.constant 0 : index
    %11 = vector.load %arg5[%c0_8, %c0_9] : memref<128x16xbf16, #tpu.memory_space<vmem>>, vector<128x16xbf16>
    %c0_10 = arith.constant 0 : index
    %c0_11 = arith.constant 0 : index
    %12 = vector.load %arg6[%c0_10, %c0_11] : memref<16x512xbf16, #tpu.memory_space<vmem>>, vector<16x512xbf16>
    %cst_12 = arith.constant dense<0.000000e+00> : vector<128x512xf32>
    %13 = tpu.matmul %11, %12, %cst_12 {dimension_numbers = #tpu.dot_dimension_numbers<[1], [0], [0], [1], [0, 0, 1, 1], [], []>} : vector<128x16xbf16>, vector<16x512xbf16>, vector<128x512xf32> -> vector<128x512xf32>
    %c0_13 = arith.constant 0 : index
    %c0_14 = arith.constant 0 : index
    %14 = vector.load %arg8[%c0_13, %c0_14] : memref<1x512xf32, #tpu.memory_space<vmem>>, vector<1x512xf32>
    %15 = vector.broadcast %14 : vector<1x512xf32> to vector<128x512xf32>
    %16 = arith.addf %13, %15 : vector<128x512xf32>
    %17 = arith.truncf %16 : vector<128x512xf32> to vector<128x512xbf16>
    %c0_15 = arith.constant 0 : index
    %c0_16 = arith.constant 0 : index
    %18 = vector.load %arg12[%c0_15, %c0_16] : memref<128x512xbf16, #tpu.memory_space<vmem>>, vector<128x512xbf16>
    tpu.vector_store %arg12[%c0_15, %c0_16], %17 {strides = array<i32>} : memref<128x512xbf16, #tpu.memory_space<vmem>>, vector<128x512xbf16>,
    %c16_i32 = arith.constant 16 : i32
    %19 = arith.muli %arg0, %c16_i32 : i32
    %c0_i32_17 = arith.constant 0 : i32
    %c16_i32_18 = arith.constant 16 : i32
    %20 = arith.addi %c0_i32_17, %c16_i32_18 : i32
    %c1_i32 = arith.constant 1 : i32
    scf.for %arg17 = %c0_i32_17 to %20 step %c1_i32  : i32 {
      %c8_i32 = arith.constant 8 : i32
      %21 = arith.muli %arg17, %c8_i32 : i32
      %22 = tpu.assume_multiple %21, 8 : i32
      %c8_i32_20 = arith.constant 8 : i32
      %23 = arith.muli %arg17, %c8_i32_20 : i32
      %24 = tpu.assume_multiple %23, 8 : i32
      %c0_21 = arith.constant 0 : index
      %c0_22 = arith.constant 0 : index
      %25 = vector.load %arg13[%c0_21, %c0_22] : memref<8x128xf32, #tpu.memory_space<vmem>>, vector<8x128xf32>
      %c0_23 = arith.constant 0 : index
      %c0_24 = arith.constant 0 : index
      %26 = vector.load %arg14[%c0_23, %c0_24] : memref<8x128xf32, #tpu.memory_space<vmem>>, vector<8x128xf32>
      %c0_25 = arith.constant 0 : index
      %c0_26 = arith.constant 0 : index
      %27 = vector.load %arg15[%c0_25, %c0_26] : memref<8x128xf32, #tpu.memory_space<vmem>>, vector<8x128xf32>
      %c0_27 = arith.constant 0 : index
      %c0_28 = arith.constant 0 : index
      %28 = vector.load %arg16[%c0_27, %c0_28] : memref<8x128xf32, #tpu.memory_space<vmem>>, vector<8x128xf32>
      %29 = arith.truncf %25 : vector<8x128xf32> to vector<8x128xbf16>
      %c0_29 = arith.constant 0 : index
      %c0_30 = arith.constant 0 : index
      %30 = vector.load %arg3[%c0_29, %c0_30] : memref<128x512xbf16, #tpu.memory_space<vmem>>, vector<128x512xbf16>
      %cst_31 = arith.constant dense<0.000000e+00> : vector<8x512xf32>
      %31 = tpu.matmul %29, %30, %cst_31 {dimension_numbers = #tpu.dot_dimension_numbers<[1], [0], [0], [1], [0, 0, 1, 1], [], []>} : vector<8x128xbf16>, vector<128x512xbf16>, vector<8x512xf32> -> vector<8x512xf32>
      %32 = arith.index_cast %22 : i32 to index
      %c0_32 = arith.constant 0 : index
      %33 = vector.load %arg11[%32, %c0_32] : memref<128x512xbf16, #tpu.memory_space<vmem>>, vector<8x512xbf16>
      %34 = arith.extf %33 : vector<8x512xbf16> to vector<8x512xf32>
      %35 = arith.addf %31, %34 : vector<8x512xf32>
      %36 = arith.truncf %27 : vector<8x128xf32> to vector<8x128xbf16>
      %c0_33 = arith.constant 0 : index
      %c0_34 = arith.constant 0 : index
      %37 = vector.load %arg7[%c0_33, %c0_34] : memref<128x512xbf16, #tpu.memory_space<vmem>>, vector<128x512xbf16>
      %cst_35 = arith.constant dense<0.000000e+00> : vector<8x512xf32>
      %38 = tpu.matmul %36, %37, %cst_35 {dimension_numbers = #tpu.dot_dimension_numbers<[1], [0], [0], [1], [0, 0, 1, 1], [], []>} : vector<8x128xbf16>, vector<128x512xbf16>, vector<8x512xf32> -> vector<8x512xf32>
      %39 = arith.index_cast %24 : i32 to index
      %c0_36 = arith.constant 0 : index
      %40 = vector.load %arg12[%39, %c0_36] : memref<128x512xbf16, #tpu.memory_space<vmem>>, vector<8x512xbf16>
      %41 = arith.extf %40 : vector<8x512xbf16> to vector<8x512xf32>
      %42 = arith.addf %38, %41 : vector<8x512xf32>
      %43 = vector.extract_strided_slice %35 {offsets = [0, 0], sizes = [8, 128], strides = [1, 1]} : vector<8x512xf32> to vector<8x128xf32>
      %44 = arith.negf %43 : vector<8x128xf32>
      %45 = math.exp %44 : vector<8x128xf32>
      %cst_37 = arith.constant 1.000000e+00 : f32
      %46 = vector.broadcast %cst_37 : f32 to vector<8x128xf32>
      %47 = arith.addf %46, %45 : vector<8x128xf32>
      %48 = arith.divf %46, %47 : vector<8x128xf32>
      %49 = vector.extract_strided_slice %35 {offsets = [0, 128], sizes = [8, 128], strides = [1, 1]} : vector<8x512xf32> to vector<8x128xf32>
      %50 = arith.negf %49 : vector<8x128xf32>
      %51 = math.exp %50 : vector<8x128xf32>
      %cst_38 = arith.constant 1.000000e+00 : f32
      %52 = vector.broadcast %cst_38 : f32 to vector<8x128xf32>
      %53 = arith.addf %52, %51 : vector<8x128xf32>
      %54 = arith.divf %52, %53 : vector<8x128xf32>
      %55 = vector.extract_strided_slice %35 {offsets = [0, 256], sizes = [8, 128], strides = [1, 1]} : vector<8x512xf32> to vector<8x128xf32>
      %56 = math.tanh %55 : vector<8x128xf32>
      %57 = vector.extract_strided_slice %35 {offsets = [0, 384], sizes = [8, 128], strides = [1, 1]} : vector<8x512xf32> to vector<8x128xf32>
      %58 = arith.negf %57 : vector<8x128xf32>
      %59 = math.exp %58 : vector<8x128xf32>
      %cst_39 = arith.constant 1.000000e+00 : f32
      %60 = vector.broadcast %cst_39 : f32 to vector<8x128xf32>
      %61 = arith.addf %60, %59 : vector<8x128xf32>
      %62 = arith.divf %60, %61 : vector<8x128xf32>
      %63 = arith.mulf %54, %26 : vector<8x128xf32>
      %64 = arith.mulf %48, %56 : vector<8x128xf32>
      %65 = arith.addf %63, %64 : vector<8x128xf32>
      %66 = math.tanh %65 : vector<8x128xf32>
      %67 = arith.mulf %62, %66 : vector<8x128xf32>
      %68 = vector.extract_strided_slice %42 {offsets = [0, 0], sizes = [8, 128], strides = [1, 1]} : vector<8x512xf32> to vector<8x128xf32>
      %69 = arith.negf %68 : vector<8x128xf32>
      %70 = math.exp %69 : vector<8x128xf32>
      %cst_40 = arith.constant 1.000000e+00 : f32
      %71 = vector.broadcast %cst_40 : f32 to vector<8x128xf32>
      %72 = arith.addf %71, %70 : vector<8x128xf32>
      %73 = arith.divf %71, %72 : vector<8x128xf32>
      %74 = vector.extract_strided_slice %42 {offsets = [0, 128], sizes = [8, 128], strides = [1, 1]} : vector<8x512xf32> to vector<8x128xf32>
      %75 = arith.negf %74 : vector<8x128xf32>
      %76 = math.exp %75 : vector<8x128xf32>
      %cst_41 = arith.constant 1.000000e+00 : f32
      %77 = vector.broadcast %cst_41 : f32 to vector<8x128xf32>
      %78 = arith.addf %77, %76 : vector<8x128xf32>
      %79 = arith.divf %77, %78 : vector<8x128xf32>
      %80 = vector.extract_strided_slice %42 {offsets = [0, 256], sizes = [8, 128], strides = [1, 1]} : vector<8x512xf32> to vector<8x128xf32>
      %81 = math.tanh %80 : vector<8x128xf32>
      %82 = vector.extract_strided_slice %42 {offsets = [0, 384], sizes = [8, 128], strides = [1, 1]} : vector<8x512xf32> to vector<8x128xf32>
      %83 = arith.negf %82 : vector<8x128xf32>
      %84 = math.exp %83 : vector<8x128xf32>
      %cst_42 = arith.constant 1.000000e+00 : f32
      %85 = vector.broadcast %cst_42 : f32 to vector<8x128xf32>
      %86 = arith.addf %85, %84 : vector<8x128xf32>
      %87 = arith.divf %85, %86 : vector<8x128xf32>
      %88 = arith.mulf %79, %28 : vector<8x128xf32>
      %89 = arith.mulf %73, %81 : vector<8x128xf32>
      %90 = arith.addf %88, %89 : vector<8x128xf32>
      %91 = math.tanh %90 : vector<8x128xf32>
      %92 = arith.mulf %87, %91 : vector<8x128xf32>
      %93 = arith.addi %19, %arg17 : i32
      %c20_i32 = arith.constant 20 : i32
      %94 = arith.cmpi slt, %93, %c20_i32 : i32
      %95 = arith.extui %94 : i1 to i32
      %96 = arith.sitofp %95 : i32 to f32
      %97 = arith.addi %19, %arg17 : i32
      %c20_i32_43 = arith.constant 20 : i32
      %98 = arith.cmpi slt, %97, %c20_i32_43 : i32
      %99 = arith.extui %98 : i1 to i32
      %100 = arith.sitofp %99 : i32 to f32
      %101 = vector.broadcast %96 : f32 to vector<8x128xf32>
      %102 = arith.mulf %101, %67 : vector<8x128xf32>
      %cst_44 = arith.constant 1.000000e+00 : f32
      %103 = arith.subf %cst_44, %96 : f32
      %104 = vector.broadcast %103 : f32 to vector<8x128xf32>
      %105 = arith.mulf %104, %25 : vector<8x128xf32>
      %106 = arith.addf %102, %105 : vector<8x128xf32>
      %107 = vector.broadcast %96 : f32 to vector<8x128xf32>
      %108 = arith.mulf %107, %65 : vector<8x128xf32>
      %cst_45 = arith.constant 1.000000e+00 : f32
      %109 = arith.subf %cst_45, %96 : f32
      %110 = vector.broadcast %109 : f32 to vector<8x128xf32>
      %111 = arith.mulf %110, %26 : vector<8x128xf32>
      %112 = arith.addf %108, %111 : vector<8x128xf32>
      %113 = vector.broadcast %100 : f32 to vector<8x128xf32>
      %114 = arith.mulf %113, %92 : vector<8x128xf32>
      %cst_46 = arith.constant 1.000000e+00 : f32
      %115 = arith.subf %cst_46, %100 : f32
      %116 = vector.broadcast %115 : f32 to vector<8x128xf32>
      %117 = arith.mulf %116, %27 : vector<8x128xf32>
      %118 = arith.addf %114, %117 : vector<8x128xf32>
      %119 = vector.broadcast %100 : f32 to vector<8x128xf32>
      %120 = arith.mulf %119, %90 : vector<8x128xf32>
      %cst_47 = arith.constant 1.000000e+00 : f32
      %121 = arith.subf %cst_47, %100 : f32
      %122 = vector.broadcast %121 : f32 to vector<8x128xf32>
      %123 = arith.mulf %122, %28 : vector<8x128xf32>
      %124 = arith.addf %120, %123 : vector<8x128xf32>
      %c0_48 = arith.constant 0 : index
      %c0_49 = arith.constant 0 : index
      %125 = vector.load %arg13[%c0_48, %c0_49] : memref<8x128xf32, #tpu.memory_space<vmem>>, vector<8x128xf32>
      tpu.vector_store %arg13[%c0_48, %c0_49], %106 {strides = array<i32>} : memref<8x128xf32, #tpu.memory_space<vmem>>, vector<8x128xf32>,
      %c0_50 = arith.constant 0 : index
      %c0_51 = arith.constant 0 : index
      %126 = vector.load %arg14[%c0_50, %c0_51] : memref<8x128xf32, #tpu.memory_space<vmem>>, vector<8x128xf32>
      tpu.vector_store %arg14[%c0_50, %c0_51], %112 {strides = array<i32>} : memref<8x128xf32, #tpu.memory_space<vmem>>, vector<8x128xf32>,
      %c0_52 = arith.constant 0 : index
      %c0_53 = arith.constant 0 : index
      %127 = vector.load %arg15[%c0_52, %c0_53] : memref<8x128xf32, #tpu.memory_space<vmem>>, vector<8x128xf32>
      tpu.vector_store %arg15[%c0_52, %c0_53], %118 {strides = array<i32>} : memref<8x128xf32, #tpu.memory_space<vmem>>, vector<8x128xf32>,
      %c0_54 = arith.constant 0 : index
      %c0_55 = arith.constant 0 : index
      %128 = vector.load %arg16[%c0_54, %c0_55] : memref<8x128xf32, #tpu.memory_space<vmem>>, vector<8x128xf32>
      tpu.vector_store %arg16[%c0_54, %c0_55], %124 {strides = array<i32>} : memref<8x128xf32, #tpu.memory_space<vmem>>, vector<8x128xf32>,
      %129 = arith.truncf %106 : vector<8x128xf32> to vector<8x128xbf16>
      %130 = arith.index_cast %arg17 : i32 to index
      %c0_56 = arith.constant 0 : index
      %c0_57 = arith.constant 0 : index
      %131 = vector.load %arg9[%130, %c0_56, %c0_57] : memref<16x8x128xbf16, #tpu.memory_space<vmem>>, vector<1x8x128xbf16>
      %132 = vector.shape_cast %131 : vector<1x8x128xbf16> to vector<8x128xbf16>
      %133 = vector.shape_cast %129 : vector<8x128xbf16> to vector<1x8x128xbf16>
      tpu.vector_store %arg9[%130, %c0_56, %c0_57], %133 {strides = array<i32>} : memref<16x8x128xbf16, #tpu.memory_space<vmem>>, vector<1x8x128xbf16>,
      %134 = arith.truncf %118 : vector<8x128xf32> to vector<8x128xbf16>
      %135 = arith.index_cast %arg17 : i32 to index
      %c0_58 = arith.constant 0 : index
      %c0_59 = arith.constant 0 : index
      %136 = vector.load %arg10[%135, %c0_58, %c0_59] : memref<16x8x128xbf16, #tpu.memory_space<vmem>>, vector<1x8x128xbf16>
      %137 = vector.shape_cast %136 : vector<1x8x128xbf16> to vector<8x128xbf16>
      %138 = vector.shape_cast %134 : vector<8x128xbf16> to vector<1x8x128xbf16>
      tpu.vector_store %arg10[%135, %c0_58, %c0_59], %138 {strides = array<i32>} : memref<16x8x128xbf16, #tpu.memory_space<vmem>>, vector<1x8x128xbf16>,
    }
    %c16_i32_19 = arith.constant 16 : i32
    return
  }
  func.func @transform_0(%arg0: i32) -> (i32, i32) {
    %c0_i32 = arith.constant 0 : i32
    %c0_i32_0 = arith.constant 0 : i32
    return %arg0, %c0_i32 : i32, i32
  }
  func.func @transform_1(%arg0: i32) -> (i32, i32) {
    %c0_i32 = arith.constant 0 : i32
    %c0_i32_0 = arith.constant 0 : i32
    %c0_i32_1 = arith.constant 0 : i32
    return %c0_i32, %c0_i32_0 : i32, i32
  }
  func.func @transform_2(%arg0: i32) -> (i32, i32) {
    %c0_i32 = arith.constant 0 : i32
    %c0_i32_0 = arith.constant 0 : i32
    %c0_i32_1 = arith.constant 0 : i32
    return %c0_i32, %c0_i32_0 : i32, i32
  }
  func.func @transform_3(%arg0: i32) -> (i32, i32) {
    %c0_i32 = arith.constant 0 : i32
    %c0_i32_0 = arith.constant 0 : i32
    %c0_i32_1 = arith.constant 0 : i32
    return %c0_i32, %c0_i32_0 : i32, i32
  }
  func.func @transform_4(%arg0: i32) -> (i32, i32) {
    %c0_i32 = arith.constant 0 : i32
    %c0_i32_0 = arith.constant 0 : i32
    return %arg0, %c0_i32 : i32, i32
  }
  func.func @transform_5(%arg0: i32) -> (i32, i32) {
    %c0_i32 = arith.constant 0 : i32
    %c0_i32_0 = arith.constant 0 : i32
    %c0_i32_1 = arith.constant 0 : i32
    return %c0_i32, %c0_i32_0 : i32, i32
  }
  func.func @transform_6(%arg0: i32) -> (i32, i32) {
    %c0_i32 = arith.constant 0 : i32
    %c0_i32_0 = arith.constant 0 : i32
    %c0_i32_1 = arith.constant 0 : i32
    return %c0_i32, %c0_i32_0 : i32, i32
  }
  func.func @transform_7(%arg0: i32) -> (i32, i32) {
    %c0_i32 = arith.constant 0 : i32
    %c0_i32_0 = arith.constant 0 : i32
    %c0_i32_1 = arith.constant 0 : i32
    return %c0_i32, %c0_i32_0 : i32, i32
  }
  func.func @transform_8(%arg0: i32) -> (i32, i32, i32) {
    %c0_i32 = arith.constant 0 : i32
    %c0_i32_0 = arith.constant 0 : i32
    %c0_i32_1 = arith.constant 0 : i32
    return %arg0, %c0_i32, %c0_i32_0 : i32, i32, i32
  }
  func.func @transform_9(%arg0: i32) -> (i32, i32, i32) {
    %c0_i32 = arith.constant 0 : i32
    %c0_i32_0 = arith.constant 0 : i32
    %c0_i32_1 = arith.constant 0 : i32
    return %arg0, %c0_i32, %c0_i32_0 : i32, i32, i32
  }
}

module attributes {stable_mosaic.version = 11 : i64} {
  func.func @_linear2_kernel(%arg0: i32, %arg1: memref<24x128xbf16, #tpu.memory_space<vmem>>, %arg2: memref<24x128xbf16, #tpu.memory_space<vmem>>, %arg3: memref<128x128xbf16, #tpu.memory_space<vmem>>, %arg4: memref<128x128xbf16, #tpu.memory_space<vmem>>, %arg5: memref<1x128xf32, #tpu.memory_space<vmem>>, %arg6: memref<24x128xf32, #tpu.memory_space<vmem>>) attributes {dimension_semantics = [#tpu.dimension_semantics<parallel>], iteration_bounds = array<i64: 1>, scalar_prefetch = 0 : i64, scratch_operands = 0 : i64, tpu.core_type = #tpu.core_type<tc>, window_params = [{transform_indices = @transform_0, window_bounds = array<i64: 24, 128>}, {transform_indices = @transform_1, window_bounds = array<i64: 24, 128>}, {pipeline_mode = #tpu.pipeline_mode<synchronous>, transform_indices = @transform_2, window_bounds = array<i64: 128, 128>}, {pipeline_mode = #tpu.pipeline_mode<synchronous>, transform_indices = @transform_3, window_bounds = array<i64: 128, 128>}, {pipeline_mode = #tpu.pipeline_mode<synchronous>, transform_indices = @transform_4, window_bounds = array<i64: 1, 128>}, {transform_indices = @transform_5, window_bounds = array<i64: 24, 128>}]} {
    %c0 = arith.constant 0 : index
    %c0_0 = arith.constant 0 : index
    %0 = vector.load %arg1[%c0, %c0_0] : memref<24x128xbf16, #tpu.memory_space<vmem>>, vector<24x128xbf16>
    %c0_1 = arith.constant 0 : index
    %c0_2 = arith.constant 0 : index
    %1 = vector.load %arg3[%c0_1, %c0_2] : memref<128x128xbf16, #tpu.memory_space<vmem>>, vector<128x128xbf16>
    %cst = arith.constant dense<0.000000e+00> : vector<24x128xf32>
    %2 = tpu.matmul %0, %1, %cst {dimension_numbers = #tpu.dot_dimension_numbers<[1], [0], [0], [1], [0, 0, 1, 1], [], []>} : vector<24x128xbf16>, vector<128x128xbf16>, vector<24x128xf32> -> vector<24x128xf32>
    %c0_3 = arith.constant 0 : index
    %c0_4 = arith.constant 0 : index
    %3 = vector.load %arg2[%c0_3, %c0_4] : memref<24x128xbf16, #tpu.memory_space<vmem>>, vector<24x128xbf16>
    %c0_5 = arith.constant 0 : index
    %c0_6 = arith.constant 0 : index
    %4 = vector.load %arg4[%c0_5, %c0_6] : memref<128x128xbf16, #tpu.memory_space<vmem>>, vector<128x128xbf16>
    %cst_7 = arith.constant dense<0.000000e+00> : vector<24x128xf32>
    %5 = tpu.matmul %3, %4, %cst_7 {dimension_numbers = #tpu.dot_dimension_numbers<[1], [0], [0], [1], [0, 0, 1, 1], [], []>} : vector<24x128xbf16>, vector<128x128xbf16>, vector<24x128xf32> -> vector<24x128xf32>
    %6 = arith.addf %2, %5 : vector<24x128xf32>
    %c0_8 = arith.constant 0 : index
    %c0_9 = arith.constant 0 : index
    %7 = vector.load %arg5[%c0_8, %c0_9] : memref<1x128xf32, #tpu.memory_space<vmem>>, vector<1x128xf32>
    %8 = vector.broadcast %7 : vector<1x128xf32> to vector<24x128xf32>
    %9 = arith.addf %6, %8 : vector<24x128xf32>
    %c0_10 = arith.constant 0 : index
    %c0_11 = arith.constant 0 : index
    %10 = vector.load %arg6[%c0_10, %c0_11] : memref<24x128xf32, #tpu.memory_space<vmem>>, vector<24x128xf32>
    tpu.vector_store %arg6[%c0_10, %c0_11], %9 {strides = array<i32>} : memref<24x128xf32, #tpu.memory_space<vmem>>, vector<24x128xf32>,
    return
  }
  func.func @transform_0(%arg0: i32) -> (i32, i32) {
    %c0_i32 = arith.constant 0 : i32
    %c0_i32_0 = arith.constant 0 : i32
    return %arg0, %c0_i32 : i32, i32
  }
  func.func @transform_1(%arg0: i32) -> (i32, i32) {
    %c0_i32 = arith.constant 0 : i32
    %c0_i32_0 = arith.constant 0 : i32
    return %arg0, %c0_i32 : i32, i32
  }
  func.func @transform_2(%arg0: i32) -> (i32, i32) {
    %c0_i32 = arith.constant 0 : i32
    %c0_i32_0 = arith.constant 0 : i32
    %c0_i32_1 = arith.constant 0 : i32
    return %c0_i32, %c0_i32_0 : i32, i32
  }
  func.func @transform_3(%arg0: i32) -> (i32, i32) {
    %c0_i32 = arith.constant 0 : i32
    %c0_i32_0 = arith.constant 0 : i32
    %c0_i32_1 = arith.constant 0 : i32
    return %c0_i32, %c0_i32_0 : i32, i32
  }
  func.func @transform_4(%arg0: i32) -> (i32, i32) {
    %c0_i32 = arith.constant 0 : i32
    %c0_i32_0 = arith.constant 0 : i32
    %c0_i32_1 = arith.constant 0 : i32
    return %c0_i32, %c0_i32_0 : i32, i32
  }
  func.func @transform_5(%arg0: i32) -> (i32, i32) {
    %c0_i32 = arith.constant 0 : i32
    %c0_i32_0 = arith.constant 0 : i32
    return %arg0, %c0_i32 : i32, i32
  }
}

module attributes {stable_mosaic.version = 11 : i64} {
  func.func @_dual_lstm_chunk_kernel(%arg0: i32, %arg1: memref<64x32xbf16, #tpu.memory_space<vmem>>, %arg2: memref<32x512xbf16, #tpu.memory_space<vmem>>, %arg3: memref<128x512xbf16, #tpu.memory_space<vmem>>, %arg4: memref<1x512xf32, #tpu.memory_space<vmem>>, %arg5: memref<64x32xbf16, #tpu.memory_space<vmem>>, %arg6: memref<32x512xbf16, #tpu.memory_space<vmem>>, %arg7: memref<128x512xbf16, #tpu.memory_space<vmem>>, %arg8: memref<1x512xf32, #tpu.memory_space<vmem>>, %arg9: memref<8x8x128xbf16, #tpu.memory_space<vmem>>, %arg10: memref<8x8x128xbf16, #tpu.memory_space<vmem>>, %arg11: memref<64x512xbf16, #tpu.memory_space<vmem>>, %arg12: memref<64x512xbf16, #tpu.memory_space<vmem>>, %arg13: memref<8x128xf32, #tpu.memory_space<vmem>>, %arg14: memref<8x128xf32, #tpu.memory_space<vmem>>, %arg15: memref<8x128xf32, #tpu.memory_space<vmem>>, %arg16: memref<8x128xf32, #tpu.memory_space<vmem>>) attributes {dimension_semantics = [#tpu.dimension_semantics<arbitrary>], iteration_bounds = array<i64: 2>, scalar_prefetch = 0 : i64, scratch_operands = 6 : i64, tpu.core_type = #tpu.core_type<tc>, window_params = [{transform_indices = @transform_0, window_bounds = array<i64: 64, 32>}, {pipeline_mode = #tpu.pipeline_mode<synchronous>, transform_indices = @transform_1, window_bounds = array<i64: 32, 512>}, {pipeline_mode = #tpu.pipeline_mode<synchronous>, transform_indices = @transform_2, window_bounds = array<i64: 128, 512>}, {pipeline_mode = #tpu.pipeline_mode<synchronous>, transform_indices = @transform_3, window_bounds = array<i64: 1, 512>}, {transform_indices = @transform_4, window_bounds = array<i64: 64, 32>}, {pipeline_mode = #tpu.pipeline_mode<synchronous>, transform_indices = @transform_5, window_bounds = array<i64: 32, 512>}, {pipeline_mode = #tpu.pipeline_mode<synchronous>, transform_indices = @transform_6, window_bounds = array<i64: 128, 512>}, {pipeline_mode = #tpu.pipeline_mode<synchronous>, transform_indices = @transform_7, window_bounds = array<i64: 1, 512>}, {transform_indices = @transform_8, window_bounds = array<i64: 8, 8, 128>}, {transform_indices = @transform_9, window_bounds = array<i64: 8, 8, 128>}]} {
    %c0_i32 = arith.constant 0 : i32
    %0 = arith.cmpi eq, %arg0, %c0_i32 : i32
    %1 = arith.extui %0 : i1 to i32
    %c0_i32_0 = arith.constant 0 : i32
    %2 = arith.cmpi ne, %1, %c0_i32_0 : i32
    scf.if %2 {
      %cst_22 = arith.constant 0.000000e+00 : f32
      %23 = vector.broadcast %cst_22 : f32 to vector<8x128xf32>
      %c0_23 = arith.constant 0 : index
      %c0_24 = arith.constant 0 : index
      %24 = vector.load %arg13[%c0_23, %c0_24] : memref<8x128xf32, #tpu.memory_space<vmem>>, vector<8x128xf32>
      tpu.vector_store %arg13[%c0_23, %c0_24], %23 {strides = array<i32>} : memref<8x128xf32, #tpu.memory_space<vmem>>, vector<8x128xf32>,
      %cst_25 = arith.constant 0.000000e+00 : f32
      %25 = vector.broadcast %cst_25 : f32 to vector<8x128xf32>
      %c0_26 = arith.constant 0 : index
      %c0_27 = arith.constant 0 : index
      %26 = vector.load %arg14[%c0_26, %c0_27] : memref<8x128xf32, #tpu.memory_space<vmem>>, vector<8x128xf32>
      tpu.vector_store %arg14[%c0_26, %c0_27], %25 {strides = array<i32>} : memref<8x128xf32, #tpu.memory_space<vmem>>, vector<8x128xf32>,
      %cst_28 = arith.constant 0.000000e+00 : f32
      %27 = vector.broadcast %cst_28 : f32 to vector<8x128xf32>
      %c0_29 = arith.constant 0 : index
      %c0_30 = arith.constant 0 : index
      %28 = vector.load %arg15[%c0_29, %c0_30] : memref<8x128xf32, #tpu.memory_space<vmem>>, vector<8x128xf32>
      tpu.vector_store %arg15[%c0_29, %c0_30], %27 {strides = array<i32>} : memref<8x128xf32, #tpu.memory_space<vmem>>, vector<8x128xf32>,
      %cst_31 = arith.constant 0.000000e+00 : f32
      %29 = vector.broadcast %cst_31 : f32 to vector<8x128xf32>
      %c0_32 = arith.constant 0 : index
      %c0_33 = arith.constant 0 : index
      %30 = vector.load %arg16[%c0_32, %c0_33] : memref<8x128xf32, #tpu.memory_space<vmem>>, vector<8x128xf32>
      tpu.vector_store %arg16[%c0_32, %c0_33], %29 {strides = array<i32>} : memref<8x128xf32, #tpu.memory_space<vmem>>, vector<8x128xf32>,
    } else {
    }
    %c0 = arith.constant 0 : index
    %c0_1 = arith.constant 0 : index
    %3 = vector.load %arg1[%c0, %c0_1] : memref<64x32xbf16, #tpu.memory_space<vmem>>, vector<64x32xbf16>
    %c0_2 = arith.constant 0 : index
    %c0_3 = arith.constant 0 : index
    %4 = vector.load %arg2[%c0_2, %c0_3] : memref<32x512xbf16, #tpu.memory_space<vmem>>, vector<32x512xbf16>
    %cst = arith.constant dense<0.000000e+00> : vector<64x512xf32>
    %5 = tpu.matmul %3, %4, %cst {dimension_numbers = #tpu.dot_dimension_numbers<[1], [0], [0], [1], [0, 0, 1, 1], [], []>} : vector<64x32xbf16>, vector<32x512xbf16>, vector<64x512xf32> -> vector<64x512xf32>
    %c0_4 = arith.constant 0 : index
    %c0_5 = arith.constant 0 : index
    %6 = vector.load %arg4[%c0_4, %c0_5] : memref<1x512xf32, #tpu.memory_space<vmem>>, vector<1x512xf32>
    %7 = vector.broadcast %6 : vector<1x512xf32> to vector<64x512xf32>
    %8 = arith.addf %5, %7 : vector<64x512xf32>
    %9 = arith.truncf %8 : vector<64x512xf32> to vector<64x512xbf16>
    %c0_6 = arith.constant 0 : index
    %c0_7 = arith.constant 0 : index
    %10 = vector.load %arg11[%c0_6, %c0_7] : memref<64x512xbf16, #tpu.memory_space<vmem>>, vector<64x512xbf16>
    tpu.vector_store %arg11[%c0_6, %c0_7], %9 {strides = array<i32>} : memref<64x512xbf16, #tpu.memory_space<vmem>>, vector<64x512xbf16>,
    %c0_8 = arith.constant 0 : index
    %c0_9 = arith.constant 0 : index
    %11 = vector.load %arg5[%c0_8, %c0_9] : memref<64x32xbf16, #tpu.memory_space<vmem>>, vector<64x32xbf16>
    %c0_10 = arith.constant 0 : index
    %c0_11 = arith.constant 0 : index
    %12 = vector.load %arg6[%c0_10, %c0_11] : memref<32x512xbf16, #tpu.memory_space<vmem>>, vector<32x512xbf16>
    %cst_12 = arith.constant dense<0.000000e+00> : vector<64x512xf32>
    %13 = tpu.matmul %11, %12, %cst_12 {dimension_numbers = #tpu.dot_dimension_numbers<[1], [0], [0], [1], [0, 0, 1, 1], [], []>} : vector<64x32xbf16>, vector<32x512xbf16>, vector<64x512xf32> -> vector<64x512xf32>
    %c0_13 = arith.constant 0 : index
    %c0_14 = arith.constant 0 : index
    %14 = vector.load %arg8[%c0_13, %c0_14] : memref<1x512xf32, #tpu.memory_space<vmem>>, vector<1x512xf32>
    %15 = vector.broadcast %14 : vector<1x512xf32> to vector<64x512xf32>
    %16 = arith.addf %13, %15 : vector<64x512xf32>
    %17 = arith.truncf %16 : vector<64x512xf32> to vector<64x512xbf16>
    %c0_15 = arith.constant 0 : index
    %c0_16 = arith.constant 0 : index
    %18 = vector.load %arg12[%c0_15, %c0_16] : memref<64x512xbf16, #tpu.memory_space<vmem>>, vector<64x512xbf16>
    tpu.vector_store %arg12[%c0_15, %c0_16], %17 {strides = array<i32>} : memref<64x512xbf16, #tpu.memory_space<vmem>>, vector<64x512xbf16>,
    %c8_i32 = arith.constant 8 : i32
    %19 = arith.muli %arg0, %c8_i32 : i32
    %c1_i32 = arith.constant 1 : i32
    %20 = arith.subi %c1_i32, %arg0 : i32
    %c8_i32_17 = arith.constant 8 : i32
    %21 = arith.muli %20, %c8_i32_17 : i32
    %c0_i32_18 = arith.constant 0 : i32
    %c8_i32_19 = arith.constant 8 : i32
    %22 = arith.addi %c0_i32_18, %c8_i32_19 : i32
    %c1_i32_20 = arith.constant 1 : i32
    scf.for %arg17 = %c0_i32_18 to %22 step %c1_i32_20  : i32 {
      %c7_i32 = arith.constant 7 : i32
      %23 = arith.subi %c7_i32, %arg17 : i32
      %c8_i32_22 = arith.constant 8 : i32
      %24 = arith.muli %arg17, %c8_i32_22 : i32
      %25 = tpu.assume_multiple %24, 8 : i32
      %c8_i32_23 = arith.constant 8 : i32
      %26 = arith.muli %23, %c8_i32_23 : i32
      %27 = tpu.assume_multiple %26, 8 : i32
      %c0_24 = arith.constant 0 : index
      %c0_25 = arith.constant 0 : index
      %28 = vector.load %arg13[%c0_24, %c0_25] : memref<8x128xf32, #tpu.memory_space<vmem>>, vector<8x128xf32>
      %c0_26 = arith.constant 0 : index
      %c0_27 = arith.constant 0 : index
      %29 = vector.load %arg14[%c0_26, %c0_27] : memref<8x128xf32, #tpu.memory_space<vmem>>, vector<8x128xf32>
      %c0_28 = arith.constant 0 : index
      %c0_29 = arith.constant 0 : index
      %30 = vector.load %arg15[%c0_28, %c0_29] : memref<8x128xf32, #tpu.memory_space<vmem>>, vector<8x128xf32>
      %c0_30 = arith.constant 0 : index
      %c0_31 = arith.constant 0 : index
      %31 = vector.load %arg16[%c0_30, %c0_31] : memref<8x128xf32, #tpu.memory_space<vmem>>, vector<8x128xf32>
      %32 = arith.truncf %28 : vector<8x128xf32> to vector<8x128xbf16>
      %c0_32 = arith.constant 0 : index
      %c0_33 = arith.constant 0 : index
      %33 = vector.load %arg3[%c0_32, %c0_33] : memref<128x512xbf16, #tpu.memory_space<vmem>>, vector<128x512xbf16>
      %cst_34 = arith.constant dense<0.000000e+00> : vector<8x512xf32>
      %34 = tpu.matmul %32, %33, %cst_34 {dimension_numbers = #tpu.dot_dimension_numbers<[1], [0], [0], [1], [0, 0, 1, 1], [], []>} : vector<8x128xbf16>, vector<128x512xbf16>, vector<8x512xf32> -> vector<8x512xf32>
      %35 = arith.index_cast %25 : i32 to index
      %c0_35 = arith.constant 0 : index
      %36 = vector.load %arg11[%35, %c0_35] : memref<64x512xbf16, #tpu.memory_space<vmem>>, vector<8x512xbf16>
      %37 = arith.extf %36 : vector<8x512xbf16> to vector<8x512xf32>
      %38 = arith.addf %34, %37 : vector<8x512xf32>
      %39 = arith.truncf %30 : vector<8x128xf32> to vector<8x128xbf16>
      %c0_36 = arith.constant 0 : index
      %c0_37 = arith.constant 0 : index
      %40 = vector.load %arg7[%c0_36, %c0_37] : memref<128x512xbf16, #tpu.memory_space<vmem>>, vector<128x512xbf16>
      %cst_38 = arith.constant dense<0.000000e+00> : vector<8x512xf32>
      %41 = tpu.matmul %39, %40, %cst_38 {dimension_numbers = #tpu.dot_dimension_numbers<[1], [0], [0], [1], [0, 0, 1, 1], [], []>} : vector<8x128xbf16>, vector<128x512xbf16>, vector<8x512xf32> -> vector<8x512xf32>
      %42 = arith.index_cast %27 : i32 to index
      %c0_39 = arith.constant 0 : index
      %43 = vector.load %arg12[%42, %c0_39] : memref<64x512xbf16, #tpu.memory_space<vmem>>, vector<8x512xbf16>
      %44 = arith.extf %43 : vector<8x512xbf16> to vector<8x512xf32>
      %45 = arith.addf %41, %44 : vector<8x512xf32>
      %46 = vector.extract_strided_slice %38 {offsets = [0, 0], sizes = [8, 128], strides = [1, 1]} : vector<8x512xf32> to vector<8x128xf32>
      %47 = arith.negf %46 : vector<8x128xf32>
      %48 = math.exp %47 : vector<8x128xf32>
      %cst_40 = arith.constant 1.000000e+00 : f32
      %49 = vector.broadcast %cst_40 : f32 to vector<8x128xf32>
      %50 = arith.addf %49, %48 : vector<8x128xf32>
      %51 = arith.divf %49, %50 : vector<8x128xf32>
      %52 = vector.extract_strided_slice %38 {offsets = [0, 128], sizes = [8, 128], strides = [1, 1]} : vector<8x512xf32> to vector<8x128xf32>
      %53 = arith.negf %52 : vector<8x128xf32>
      %54 = math.exp %53 : vector<8x128xf32>
      %cst_41 = arith.constant 1.000000e+00 : f32
      %55 = vector.broadcast %cst_41 : f32 to vector<8x128xf32>
      %56 = arith.addf %55, %54 : vector<8x128xf32>
      %57 = arith.divf %55, %56 : vector<8x128xf32>
      %58 = vector.extract_strided_slice %38 {offsets = [0, 256], sizes = [8, 128], strides = [1, 1]} : vector<8x512xf32> to vector<8x128xf32>
      %59 = math.tanh %58 : vector<8x128xf32>
      %60 = vector.extract_strided_slice %38 {offsets = [0, 384], sizes = [8, 128], strides = [1, 1]} : vector<8x512xf32> to vector<8x128xf32>
      %61 = arith.negf %60 : vector<8x128xf32>
      %62 = math.exp %61 : vector<8x128xf32>
      %cst_42 = arith.constant 1.000000e+00 : f32
      %63 = vector.broadcast %cst_42 : f32 to vector<8x128xf32>
      %64 = arith.addf %63, %62 : vector<8x128xf32>
      %65 = arith.divf %63, %64 : vector<8x128xf32>
      %66 = arith.mulf %57, %29 : vector<8x128xf32>
      %67 = arith.mulf %51, %59 : vector<8x128xf32>
      %68 = arith.addf %66, %67 : vector<8x128xf32>
      %69 = math.tanh %68 : vector<8x128xf32>
      %70 = arith.mulf %65, %69 : vector<8x128xf32>
      %71 = vector.extract_strided_slice %45 {offsets = [0, 0], sizes = [8, 128], strides = [1, 1]} : vector<8x512xf32> to vector<8x128xf32>
      %72 = arith.negf %71 : vector<8x128xf32>
      %73 = math.exp %72 : vector<8x128xf32>
      %cst_43 = arith.constant 1.000000e+00 : f32
      %74 = vector.broadcast %cst_43 : f32 to vector<8x128xf32>
      %75 = arith.addf %74, %73 : vector<8x128xf32>
      %76 = arith.divf %74, %75 : vector<8x128xf32>
      %77 = vector.extract_strided_slice %45 {offsets = [0, 128], sizes = [8, 128], strides = [1, 1]} : vector<8x512xf32> to vector<8x128xf32>
      %78 = arith.negf %77 : vector<8x128xf32>
      %79 = math.exp %78 : vector<8x128xf32>
      %cst_44 = arith.constant 1.000000e+00 : f32
      %80 = vector.broadcast %cst_44 : f32 to vector<8x128xf32>
      %81 = arith.addf %80, %79 : vector<8x128xf32>
      %82 = arith.divf %80, %81 : vector<8x128xf32>
      %83 = vector.extract_strided_slice %45 {offsets = [0, 256], sizes = [8, 128], strides = [1, 1]} : vector<8x512xf32> to vector<8x128xf32>
      %84 = math.tanh %83 : vector<8x128xf32>
      %85 = vector.extract_strided_slice %45 {offsets = [0, 384], sizes = [8, 128], strides = [1, 1]} : vector<8x512xf32> to vector<8x128xf32>
      %86 = arith.negf %85 : vector<8x128xf32>
      %87 = math.exp %86 : vector<8x128xf32>
      %cst_45 = arith.constant 1.000000e+00 : f32
      %88 = vector.broadcast %cst_45 : f32 to vector<8x128xf32>
      %89 = arith.addf %88, %87 : vector<8x128xf32>
      %90 = arith.divf %88, %89 : vector<8x128xf32>
      %91 = arith.mulf %82, %31 : vector<8x128xf32>
      %92 = arith.mulf %76, %84 : vector<8x128xf32>
      %93 = arith.addf %91, %92 : vector<8x128xf32>
      %94 = math.tanh %93 : vector<8x128xf32>
      %95 = arith.mulf %90, %94 : vector<8x128xf32>
      %96 = arith.addi %19, %arg17 : i32
      %c10_i32 = arith.constant 10 : i32
      %97 = arith.cmpi slt, %96, %c10_i32 : i32
      %98 = arith.extui %97 : i1 to i32
      %99 = arith.sitofp %98 : i32 to f32
      %100 = arith.addi %21, %23 : i32
      %c10_i32_46 = arith.constant 10 : i32
      %101 = arith.cmpi slt, %100, %c10_i32_46 : i32
      %102 = arith.extui %101 : i1 to i32
      %103 = arith.sitofp %102 : i32 to f32
      %104 = vector.broadcast %99 : f32 to vector<8x128xf32>
      %105 = arith.mulf %104, %70 : vector<8x128xf32>
      %cst_47 = arith.constant 1.000000e+00 : f32
      %106 = arith.subf %cst_47, %99 : f32
      %107 = vector.broadcast %106 : f32 to vector<8x128xf32>
      %108 = arith.mulf %107, %28 : vector<8x128xf32>
      %109 = arith.addf %105, %108 : vector<8x128xf32>
      %110 = vector.broadcast %99 : f32 to vector<8x128xf32>
      %111 = arith.mulf %110, %68 : vector<8x128xf32>
      %cst_48 = arith.constant 1.000000e+00 : f32
      %112 = arith.subf %cst_48, %99 : f32
      %113 = vector.broadcast %112 : f32 to vector<8x128xf32>
      %114 = arith.mulf %113, %29 : vector<8x128xf32>
      %115 = arith.addf %111, %114 : vector<8x128xf32>
      %116 = vector.broadcast %103 : f32 to vector<8x128xf32>
      %117 = arith.mulf %116, %95 : vector<8x128xf32>
      %cst_49 = arith.constant 1.000000e+00 : f32
      %118 = arith.subf %cst_49, %103 : f32
      %119 = vector.broadcast %118 : f32 to vector<8x128xf32>
      %120 = arith.mulf %119, %30 : vector<8x128xf32>
      %121 = arith.addf %117, %120 : vector<8x128xf32>
      %122 = vector.broadcast %103 : f32 to vector<8x128xf32>
      %123 = arith.mulf %122, %93 : vector<8x128xf32>
      %cst_50 = arith.constant 1.000000e+00 : f32
      %124 = arith.subf %cst_50, %103 : f32
      %125 = vector.broadcast %124 : f32 to vector<8x128xf32>
      %126 = arith.mulf %125, %31 : vector<8x128xf32>
      %127 = arith.addf %123, %126 : vector<8x128xf32>
      %c0_51 = arith.constant 0 : index
      %c0_52 = arith.constant 0 : index
      %128 = vector.load %arg13[%c0_51, %c0_52] : memref<8x128xf32, #tpu.memory_space<vmem>>, vector<8x128xf32>
      tpu.vector_store %arg13[%c0_51, %c0_52], %109 {strides = array<i32>} : memref<8x128xf32, #tpu.memory_space<vmem>>, vector<8x128xf32>,
      %c0_53 = arith.constant 0 : index
      %c0_54 = arith.constant 0 : index
      %129 = vector.load %arg14[%c0_53, %c0_54] : memref<8x128xf32, #tpu.memory_space<vmem>>, vector<8x128xf32>
      tpu.vector_store %arg14[%c0_53, %c0_54], %115 {strides = array<i32>} : memref<8x128xf32, #tpu.memory_space<vmem>>, vector<8x128xf32>,
      %c0_55 = arith.constant 0 : index
      %c0_56 = arith.constant 0 : index
      %130 = vector.load %arg15[%c0_55, %c0_56] : memref<8x128xf32, #tpu.memory_space<vmem>>, vector<8x128xf32>
      tpu.vector_store %arg15[%c0_55, %c0_56], %121 {strides = array<i32>} : memref<8x128xf32, #tpu.memory_space<vmem>>, vector<8x128xf32>,
      %c0_57 = arith.constant 0 : index
      %c0_58 = arith.constant 0 : index
      %131 = vector.load %arg16[%c0_57, %c0_58] : memref<8x128xf32, #tpu.memory_space<vmem>>, vector<8x128xf32>
      tpu.vector_store %arg16[%c0_57, %c0_58], %127 {strides = array<i32>} : memref<8x128xf32, #tpu.memory_space<vmem>>, vector<8x128xf32>,
      %132 = arith.truncf %109 : vector<8x128xf32> to vector<8x128xbf16>
      %133 = arith.index_cast %arg17 : i32 to index
      %c0_59 = arith.constant 0 : index
      %c0_60 = arith.constant 0 : index
      %134 = vector.load %arg9[%133, %c0_59, %c0_60] : memref<8x8x128xbf16, #tpu.memory_space<vmem>>, vector<1x8x128xbf16>
      %135 = vector.shape_cast %134 : vector<1x8x128xbf16> to vector<8x128xbf16>
      %136 = vector.shape_cast %132 : vector<8x128xbf16> to vector<1x8x128xbf16>
      tpu.vector_store %arg9[%133, %c0_59, %c0_60], %136 {strides = array<i32>} : memref<8x8x128xbf16, #tpu.memory_space<vmem>>, vector<1x8x128xbf16>,
      %137 = arith.truncf %121 : vector<8x128xf32> to vector<8x128xbf16>
      %138 = arith.index_cast %23 : i32 to index
      %c0_61 = arith.constant 0 : index
      %c0_62 = arith.constant 0 : index
      %139 = vector.load %arg10[%138, %c0_61, %c0_62] : memref<8x8x128xbf16, #tpu.memory_space<vmem>>, vector<1x8x128xbf16>
      %140 = vector.shape_cast %139 : vector<1x8x128xbf16> to vector<8x128xbf16>
      %141 = vector.shape_cast %137 : vector<8x128xbf16> to vector<1x8x128xbf16>
      tpu.vector_store %arg10[%138, %c0_61, %c0_62], %141 {strides = array<i32>} : memref<8x8x128xbf16, #tpu.memory_space<vmem>>, vector<1x8x128xbf16>,
    }
    %c8_i32_21 = arith.constant 8 : i32
    return
  }
  func.func @transform_0(%arg0: i32) -> (i32, i32) {
    %c0_i32 = arith.constant 0 : i32
    %c0_i32_0 = arith.constant 0 : i32
    return %arg0, %c0_i32 : i32, i32
  }
  func.func @transform_1(%arg0: i32) -> (i32, i32) {
    %c0_i32 = arith.constant 0 : i32
    %c0_i32_0 = arith.constant 0 : i32
    %c0_i32_1 = arith.constant 0 : i32
    return %c0_i32, %c0_i32_0 : i32, i32
  }
  func.func @transform_2(%arg0: i32) -> (i32, i32) {
    %c0_i32 = arith.constant 0 : i32
    %c0_i32_0 = arith.constant 0 : i32
    %c0_i32_1 = arith.constant 0 : i32
    return %c0_i32, %c0_i32_0 : i32, i32
  }
  func.func @transform_3(%arg0: i32) -> (i32, i32) {
    %c0_i32 = arith.constant 0 : i32
    %c0_i32_0 = arith.constant 0 : i32
    %c0_i32_1 = arith.constant 0 : i32
    return %c0_i32, %c0_i32_0 : i32, i32
  }
  func.func @transform_4(%arg0: i32) -> (i32, i32) {
    %c1_i32 = arith.constant 1 : i32
    %0 = arith.subi %c1_i32, %arg0 : i32
    %c0_i32 = arith.constant 0 : i32
    %c0_i32_0 = arith.constant 0 : i32
    return %0, %c0_i32 : i32, i32
  }
  func.func @transform_5(%arg0: i32) -> (i32, i32) {
    %c0_i32 = arith.constant 0 : i32
    %c0_i32_0 = arith.constant 0 : i32
    %c0_i32_1 = arith.constant 0 : i32
    return %c0_i32, %c0_i32_0 : i32, i32
  }
  func.func @transform_6(%arg0: i32) -> (i32, i32) {
    %c0_i32 = arith.constant 0 : i32
    %c0_i32_0 = arith.constant 0 : i32
    %c0_i32_1 = arith.constant 0 : i32
    return %c0_i32, %c0_i32_0 : i32, i32
  }
  func.func @transform_7(%arg0: i32) -> (i32, i32) {
    %c0_i32 = arith.constant 0 : i32
    %c0_i32_0 = arith.constant 0 : i32
    %c0_i32_1 = arith.constant 0 : i32
    return %c0_i32, %c0_i32_0 : i32, i32
  }
  func.func @transform_8(%arg0: i32) -> (i32, i32, i32) {
    %c0_i32 = arith.constant 0 : i32
    %c0_i32_0 = arith.constant 0 : i32
    %c0_i32_1 = arith.constant 0 : i32
    return %arg0, %c0_i32, %c0_i32_0 : i32, i32, i32
  }
  func.func @transform_9(%arg0: i32) -> (i32, i32, i32) {
    %c1_i32 = arith.constant 1 : i32
    %0 = arith.subi %c1_i32, %arg0 : i32
    %c0_i32 = arith.constant 0 : i32
    %c0_i32_0 = arith.constant 0 : i32
    %c0_i32_1 = arith.constant 0 : i32
    return %0, %c0_i32, %c0_i32_0 : i32, i32, i32
  }
}

module attributes {stable_mosaic.version = 11 : i64} {
  func.func @_dual_lstm_chunk_kernel(%arg0: i32, %arg1: memref<64x256xbf16, #tpu.memory_space<vmem>>, %arg2: memref<256x512xbf16, #tpu.memory_space<vmem>>, %arg3: memref<128x512xbf16, #tpu.memory_space<vmem>>, %arg4: memref<1x512xf32, #tpu.memory_space<vmem>>, %arg5: memref<64x256xbf16, #tpu.memory_space<vmem>>, %arg6: memref<256x512xbf16, #tpu.memory_space<vmem>>, %arg7: memref<128x512xbf16, #tpu.memory_space<vmem>>, %arg8: memref<1x512xf32, #tpu.memory_space<vmem>>, %arg9: memref<8x8x128xbf16, #tpu.memory_space<vmem>>, %arg10: memref<8x8x128xbf16, #tpu.memory_space<vmem>>, %arg11: memref<64x512xbf16, #tpu.memory_space<vmem>>, %arg12: memref<64x512xbf16, #tpu.memory_space<vmem>>, %arg13: memref<8x128xf32, #tpu.memory_space<vmem>>, %arg14: memref<8x128xf32, #tpu.memory_space<vmem>>, %arg15: memref<8x128xf32, #tpu.memory_space<vmem>>, %arg16: memref<8x128xf32, #tpu.memory_space<vmem>>) attributes {dimension_semantics = [#tpu.dimension_semantics<arbitrary>], iteration_bounds = array<i64: 2>, scalar_prefetch = 0 : i64, scratch_operands = 6 : i64, tpu.core_type = #tpu.core_type<tc>, window_params = [{transform_indices = @transform_0, window_bounds = array<i64: 64, 256>}, {pipeline_mode = #tpu.pipeline_mode<synchronous>, transform_indices = @transform_1, window_bounds = array<i64: 256, 512>}, {pipeline_mode = #tpu.pipeline_mode<synchronous>, transform_indices = @transform_2, window_bounds = array<i64: 128, 512>}, {pipeline_mode = #tpu.pipeline_mode<synchronous>, transform_indices = @transform_3, window_bounds = array<i64: 1, 512>}, {transform_indices = @transform_4, window_bounds = array<i64: 64, 256>}, {pipeline_mode = #tpu.pipeline_mode<synchronous>, transform_indices = @transform_5, window_bounds = array<i64: 256, 512>}, {pipeline_mode = #tpu.pipeline_mode<synchronous>, transform_indices = @transform_6, window_bounds = array<i64: 128, 512>}, {pipeline_mode = #tpu.pipeline_mode<synchronous>, transform_indices = @transform_7, window_bounds = array<i64: 1, 512>}, {transform_indices = @transform_8, window_bounds = array<i64: 8, 8, 128>}, {transform_indices = @transform_9, window_bounds = array<i64: 8, 8, 128>}]} {
    %c0_i32 = arith.constant 0 : i32
    %0 = arith.cmpi eq, %arg0, %c0_i32 : i32
    %1 = arith.extui %0 : i1 to i32
    %c0_i32_0 = arith.constant 0 : i32
    %2 = arith.cmpi ne, %1, %c0_i32_0 : i32
    scf.if %2 {
      %cst_22 = arith.constant 0.000000e+00 : f32
      %23 = vector.broadcast %cst_22 : f32 to vector<8x128xf32>
      %c0_23 = arith.constant 0 : index
      %c0_24 = arith.constant 0 : index
      %24 = vector.load %arg13[%c0_23, %c0_24] : memref<8x128xf32, #tpu.memory_space<vmem>>, vector<8x128xf32>
      tpu.vector_store %arg13[%c0_23, %c0_24], %23 {strides = array<i32>} : memref<8x128xf32, #tpu.memory_space<vmem>>, vector<8x128xf32>,
      %cst_25 = arith.constant 0.000000e+00 : f32
      %25 = vector.broadcast %cst_25 : f32 to vector<8x128xf32>
      %c0_26 = arith.constant 0 : index
      %c0_27 = arith.constant 0 : index
      %26 = vector.load %arg14[%c0_26, %c0_27] : memref<8x128xf32, #tpu.memory_space<vmem>>, vector<8x128xf32>
      tpu.vector_store %arg14[%c0_26, %c0_27], %25 {strides = array<i32>} : memref<8x128xf32, #tpu.memory_space<vmem>>, vector<8x128xf32>,
      %cst_28 = arith.constant 0.000000e+00 : f32
      %27 = vector.broadcast %cst_28 : f32 to vector<8x128xf32>
      %c0_29 = arith.constant 0 : index
      %c0_30 = arith.constant 0 : index
      %28 = vector.load %arg15[%c0_29, %c0_30] : memref<8x128xf32, #tpu.memory_space<vmem>>, vector<8x128xf32>
      tpu.vector_store %arg15[%c0_29, %c0_30], %27 {strides = array<i32>} : memref<8x128xf32, #tpu.memory_space<vmem>>, vector<8x128xf32>,
      %cst_31 = arith.constant 0.000000e+00 : f32
      %29 = vector.broadcast %cst_31 : f32 to vector<8x128xf32>
      %c0_32 = arith.constant 0 : index
      %c0_33 = arith.constant 0 : index
      %30 = vector.load %arg16[%c0_32, %c0_33] : memref<8x128xf32, #tpu.memory_space<vmem>>, vector<8x128xf32>
      tpu.vector_store %arg16[%c0_32, %c0_33], %29 {strides = array<i32>} : memref<8x128xf32, #tpu.memory_space<vmem>>, vector<8x128xf32>,
    } else {
    }
    %c0 = arith.constant 0 : index
    %c0_1 = arith.constant 0 : index
    %3 = vector.load %arg1[%c0, %c0_1] : memref<64x256xbf16, #tpu.memory_space<vmem>>, vector<64x256xbf16>
    %c0_2 = arith.constant 0 : index
    %c0_3 = arith.constant 0 : index
    %4 = vector.load %arg2[%c0_2, %c0_3] : memref<256x512xbf16, #tpu.memory_space<vmem>>, vector<256x512xbf16>
    %cst = arith.constant dense<0.000000e+00> : vector<64x512xf32>
    %5 = tpu.matmul %3, %4, %cst {dimension_numbers = #tpu.dot_dimension_numbers<[1], [0], [0], [1], [0, 0, 1, 1], [], []>} : vector<64x256xbf16>, vector<256x512xbf16>, vector<64x512xf32> -> vector<64x512xf32>
    %c0_4 = arith.constant 0 : index
    %c0_5 = arith.constant 0 : index
    %6 = vector.load %arg4[%c0_4, %c0_5] : memref<1x512xf32, #tpu.memory_space<vmem>>, vector<1x512xf32>
    %7 = vector.broadcast %6 : vector<1x512xf32> to vector<64x512xf32>
    %8 = arith.addf %5, %7 : vector<64x512xf32>
    %9 = arith.truncf %8 : vector<64x512xf32> to vector<64x512xbf16>
    %c0_6 = arith.constant 0 : index
    %c0_7 = arith.constant 0 : index
    %10 = vector.load %arg11[%c0_6, %c0_7] : memref<64x512xbf16, #tpu.memory_space<vmem>>, vector<64x512xbf16>
    tpu.vector_store %arg11[%c0_6, %c0_7], %9 {strides = array<i32>} : memref<64x512xbf16, #tpu.memory_space<vmem>>, vector<64x512xbf16>,
    %c0_8 = arith.constant 0 : index
    %c0_9 = arith.constant 0 : index
    %11 = vector.load %arg5[%c0_8, %c0_9] : memref<64x256xbf16, #tpu.memory_space<vmem>>, vector<64x256xbf16>
    %c0_10 = arith.constant 0 : index
    %c0_11 = arith.constant 0 : index
    %12 = vector.load %arg6[%c0_10, %c0_11] : memref<256x512xbf16, #tpu.memory_space<vmem>>, vector<256x512xbf16>
    %cst_12 = arith.constant dense<0.000000e+00> : vector<64x512xf32>
    %13 = tpu.matmul %11, %12, %cst_12 {dimension_numbers = #tpu.dot_dimension_numbers<[1], [0], [0], [1], [0, 0, 1, 1], [], []>} : vector<64x256xbf16>, vector<256x512xbf16>, vector<64x512xf32> -> vector<64x512xf32>
    %c0_13 = arith.constant 0 : index
    %c0_14 = arith.constant 0 : index
    %14 = vector.load %arg8[%c0_13, %c0_14] : memref<1x512xf32, #tpu.memory_space<vmem>>, vector<1x512xf32>
    %15 = vector.broadcast %14 : vector<1x512xf32> to vector<64x512xf32>
    %16 = arith.addf %13, %15 : vector<64x512xf32>
    %17 = arith.truncf %16 : vector<64x512xf32> to vector<64x512xbf16>
    %c0_15 = arith.constant 0 : index
    %c0_16 = arith.constant 0 : index
    %18 = vector.load %arg12[%c0_15, %c0_16] : memref<64x512xbf16, #tpu.memory_space<vmem>>, vector<64x512xbf16>
    tpu.vector_store %arg12[%c0_15, %c0_16], %17 {strides = array<i32>} : memref<64x512xbf16, #tpu.memory_space<vmem>>, vector<64x512xbf16>,
    %c8_i32 = arith.constant 8 : i32
    %19 = arith.muli %arg0, %c8_i32 : i32
    %c1_i32 = arith.constant 1 : i32
    %20 = arith.subi %c1_i32, %arg0 : i32
    %c8_i32_17 = arith.constant 8 : i32
    %21 = arith.muli %20, %c8_i32_17 : i32
    %c0_i32_18 = arith.constant 0 : i32
    %c8_i32_19 = arith.constant 8 : i32
    %22 = arith.addi %c0_i32_18, %c8_i32_19 : i32
    %c1_i32_20 = arith.constant 1 : i32
    scf.for %arg17 = %c0_i32_18 to %22 step %c1_i32_20  : i32 {
      %c7_i32 = arith.constant 7 : i32
      %23 = arith.subi %c7_i32, %arg17 : i32
      %c8_i32_22 = arith.constant 8 : i32
      %24 = arith.muli %arg17, %c8_i32_22 : i32
      %25 = tpu.assume_multiple %24, 8 : i32
      %c8_i32_23 = arith.constant 8 : i32
      %26 = arith.muli %23, %c8_i32_23 : i32
      %27 = tpu.assume_multiple %26, 8 : i32
      %c0_24 = arith.constant 0 : index
      %c0_25 = arith.constant 0 : index
      %28 = vector.load %arg13[%c0_24, %c0_25] : memref<8x128xf32, #tpu.memory_space<vmem>>, vector<8x128xf32>
      %c0_26 = arith.constant 0 : index
      %c0_27 = arith.constant 0 : index
      %29 = vector.load %arg14[%c0_26, %c0_27] : memref<8x128xf32, #tpu.memory_space<vmem>>, vector<8x128xf32>
      %c0_28 = arith.constant 0 : index
      %c0_29 = arith.constant 0 : index
      %30 = vector.load %arg15[%c0_28, %c0_29] : memref<8x128xf32, #tpu.memory_space<vmem>>, vector<8x128xf32>
      %c0_30 = arith.constant 0 : index
      %c0_31 = arith.constant 0 : index
      %31 = vector.load %arg16[%c0_30, %c0_31] : memref<8x128xf32, #tpu.memory_space<vmem>>, vector<8x128xf32>
      %32 = arith.truncf %28 : vector<8x128xf32> to vector<8x128xbf16>
      %c0_32 = arith.constant 0 : index
      %c0_33 = arith.constant 0 : index
      %33 = vector.load %arg3[%c0_32, %c0_33] : memref<128x512xbf16, #tpu.memory_space<vmem>>, vector<128x512xbf16>
      %cst_34 = arith.constant dense<0.000000e+00> : vector<8x512xf32>
      %34 = tpu.matmul %32, %33, %cst_34 {dimension_numbers = #tpu.dot_dimension_numbers<[1], [0], [0], [1], [0, 0, 1, 1], [], []>} : vector<8x128xbf16>, vector<128x512xbf16>, vector<8x512xf32> -> vector<8x512xf32>
      %35 = arith.index_cast %25 : i32 to index
      %c0_35 = arith.constant 0 : index
      %36 = vector.load %arg11[%35, %c0_35] : memref<64x512xbf16, #tpu.memory_space<vmem>>, vector<8x512xbf16>
      %37 = arith.extf %36 : vector<8x512xbf16> to vector<8x512xf32>
      %38 = arith.addf %34, %37 : vector<8x512xf32>
      %39 = arith.truncf %30 : vector<8x128xf32> to vector<8x128xbf16>
      %c0_36 = arith.constant 0 : index
      %c0_37 = arith.constant 0 : index
      %40 = vector.load %arg7[%c0_36, %c0_37] : memref<128x512xbf16, #tpu.memory_space<vmem>>, vector<128x512xbf16>
      %cst_38 = arith.constant dense<0.000000e+00> : vector<8x512xf32>
      %41 = tpu.matmul %39, %40, %cst_38 {dimension_numbers = #tpu.dot_dimension_numbers<[1], [0], [0], [1], [0, 0, 1, 1], [], []>} : vector<8x128xbf16>, vector<128x512xbf16>, vector<8x512xf32> -> vector<8x512xf32>
      %42 = arith.index_cast %27 : i32 to index
      %c0_39 = arith.constant 0 : index
      %43 = vector.load %arg12[%42, %c0_39] : memref<64x512xbf16, #tpu.memory_space<vmem>>, vector<8x512xbf16>
      %44 = arith.extf %43 : vector<8x512xbf16> to vector<8x512xf32>
      %45 = arith.addf %41, %44 : vector<8x512xf32>
      %46 = vector.extract_strided_slice %38 {offsets = [0, 0], sizes = [8, 128], strides = [1, 1]} : vector<8x512xf32> to vector<8x128xf32>
      %47 = arith.negf %46 : vector<8x128xf32>
      %48 = math.exp %47 : vector<8x128xf32>
      %cst_40 = arith.constant 1.000000e+00 : f32
      %49 = vector.broadcast %cst_40 : f32 to vector<8x128xf32>
      %50 = arith.addf %49, %48 : vector<8x128xf32>
      %51 = arith.divf %49, %50 : vector<8x128xf32>
      %52 = vector.extract_strided_slice %38 {offsets = [0, 128], sizes = [8, 128], strides = [1, 1]} : vector<8x512xf32> to vector<8x128xf32>
      %53 = arith.negf %52 : vector<8x128xf32>
      %54 = math.exp %53 : vector<8x128xf32>
      %cst_41 = arith.constant 1.000000e+00 : f32
      %55 = vector.broadcast %cst_41 : f32 to vector<8x128xf32>
      %56 = arith.addf %55, %54 : vector<8x128xf32>
      %57 = arith.divf %55, %56 : vector<8x128xf32>
      %58 = vector.extract_strided_slice %38 {offsets = [0, 256], sizes = [8, 128], strides = [1, 1]} : vector<8x512xf32> to vector<8x128xf32>
      %59 = math.tanh %58 : vector<8x128xf32>
      %60 = vector.extract_strided_slice %38 {offsets = [0, 384], sizes = [8, 128], strides = [1, 1]} : vector<8x512xf32> to vector<8x128xf32>
      %61 = arith.negf %60 : vector<8x128xf32>
      %62 = math.exp %61 : vector<8x128xf32>
      %cst_42 = arith.constant 1.000000e+00 : f32
      %63 = vector.broadcast %cst_42 : f32 to vector<8x128xf32>
      %64 = arith.addf %63, %62 : vector<8x128xf32>
      %65 = arith.divf %63, %64 : vector<8x128xf32>
      %66 = arith.mulf %57, %29 : vector<8x128xf32>
      %67 = arith.mulf %51, %59 : vector<8x128xf32>
      %68 = arith.addf %66, %67 : vector<8x128xf32>
      %69 = math.tanh %68 : vector<8x128xf32>
      %70 = arith.mulf %65, %69 : vector<8x128xf32>
      %71 = vector.extract_strided_slice %45 {offsets = [0, 0], sizes = [8, 128], strides = [1, 1]} : vector<8x512xf32> to vector<8x128xf32>
      %72 = arith.negf %71 : vector<8x128xf32>
      %73 = math.exp %72 : vector<8x128xf32>
      %cst_43 = arith.constant 1.000000e+00 : f32
      %74 = vector.broadcast %cst_43 : f32 to vector<8x128xf32>
      %75 = arith.addf %74, %73 : vector<8x128xf32>
      %76 = arith.divf %74, %75 : vector<8x128xf32>
      %77 = vector.extract_strided_slice %45 {offsets = [0, 128], sizes = [8, 128], strides = [1, 1]} : vector<8x512xf32> to vector<8x128xf32>
      %78 = arith.negf %77 : vector<8x128xf32>
      %79 = math.exp %78 : vector<8x128xf32>
      %cst_44 = arith.constant 1.000000e+00 : f32
      %80 = vector.broadcast %cst_44 : f32 to vector<8x128xf32>
      %81 = arith.addf %80, %79 : vector<8x128xf32>
      %82 = arith.divf %80, %81 : vector<8x128xf32>
      %83 = vector.extract_strided_slice %45 {offsets = [0, 256], sizes = [8, 128], strides = [1, 1]} : vector<8x512xf32> to vector<8x128xf32>
      %84 = math.tanh %83 : vector<8x128xf32>
      %85 = vector.extract_strided_slice %45 {offsets = [0, 384], sizes = [8, 128], strides = [1, 1]} : vector<8x512xf32> to vector<8x128xf32>
      %86 = arith.negf %85 : vector<8x128xf32>
      %87 = math.exp %86 : vector<8x128xf32>
      %cst_45 = arith.constant 1.000000e+00 : f32
      %88 = vector.broadcast %cst_45 : f32 to vector<8x128xf32>
      %89 = arith.addf %88, %87 : vector<8x128xf32>
      %90 = arith.divf %88, %89 : vector<8x128xf32>
      %91 = arith.mulf %82, %31 : vector<8x128xf32>
      %92 = arith.mulf %76, %84 : vector<8x128xf32>
      %93 = arith.addf %91, %92 : vector<8x128xf32>
      %94 = math.tanh %93 : vector<8x128xf32>
      %95 = arith.mulf %90, %94 : vector<8x128xf32>
      %96 = arith.addi %19, %arg17 : i32
      %c10_i32 = arith.constant 10 : i32
      %97 = arith.cmpi slt, %96, %c10_i32 : i32
      %98 = arith.extui %97 : i1 to i32
      %99 = arith.sitofp %98 : i32 to f32
      %100 = arith.addi %21, %23 : i32
      %c10_i32_46 = arith.constant 10 : i32
      %101 = arith.cmpi slt, %100, %c10_i32_46 : i32
      %102 = arith.extui %101 : i1 to i32
      %103 = arith.sitofp %102 : i32 to f32
      %104 = vector.broadcast %99 : f32 to vector<8x128xf32>
      %105 = arith.mulf %104, %70 : vector<8x128xf32>
      %cst_47 = arith.constant 1.000000e+00 : f32
      %106 = arith.subf %cst_47, %99 : f32
      %107 = vector.broadcast %106 : f32 to vector<8x128xf32>
      %108 = arith.mulf %107, %28 : vector<8x128xf32>
      %109 = arith.addf %105, %108 : vector<8x128xf32>
      %110 = vector.broadcast %99 : f32 to vector<8x128xf32>
      %111 = arith.mulf %110, %68 : vector<8x128xf32>
      %cst_48 = arith.constant 1.000000e+00 : f32
      %112 = arith.subf %cst_48, %99 : f32
      %113 = vector.broadcast %112 : f32 to vector<8x128xf32>
      %114 = arith.mulf %113, %29 : vector<8x128xf32>
      %115 = arith.addf %111, %114 : vector<8x128xf32>
      %116 = vector.broadcast %103 : f32 to vector<8x128xf32>
      %117 = arith.mulf %116, %95 : vector<8x128xf32>
      %cst_49 = arith.constant 1.000000e+00 : f32
      %118 = arith.subf %cst_49, %103 : f32
      %119 = vector.broadcast %118 : f32 to vector<8x128xf32>
      %120 = arith.mulf %119, %30 : vector<8x128xf32>
      %121 = arith.addf %117, %120 : vector<8x128xf32>
      %122 = vector.broadcast %103 : f32 to vector<8x128xf32>
      %123 = arith.mulf %122, %93 : vector<8x128xf32>
      %cst_50 = arith.constant 1.000000e+00 : f32
      %124 = arith.subf %cst_50, %103 : f32
      %125 = vector.broadcast %124 : f32 to vector<8x128xf32>
      %126 = arith.mulf %125, %31 : vector<8x128xf32>
      %127 = arith.addf %123, %126 : vector<8x128xf32>
      %c0_51 = arith.constant 0 : index
      %c0_52 = arith.constant 0 : index
      %128 = vector.load %arg13[%c0_51, %c0_52] : memref<8x128xf32, #tpu.memory_space<vmem>>, vector<8x128xf32>
      tpu.vector_store %arg13[%c0_51, %c0_52], %109 {strides = array<i32>} : memref<8x128xf32, #tpu.memory_space<vmem>>, vector<8x128xf32>,
      %c0_53 = arith.constant 0 : index
      %c0_54 = arith.constant 0 : index
      %129 = vector.load %arg14[%c0_53, %c0_54] : memref<8x128xf32, #tpu.memory_space<vmem>>, vector<8x128xf32>
      tpu.vector_store %arg14[%c0_53, %c0_54], %115 {strides = array<i32>} : memref<8x128xf32, #tpu.memory_space<vmem>>, vector<8x128xf32>,
      %c0_55 = arith.constant 0 : index
      %c0_56 = arith.constant 0 : index
      %130 = vector.load %arg15[%c0_55, %c0_56] : memref<8x128xf32, #tpu.memory_space<vmem>>, vector<8x128xf32>
      tpu.vector_store %arg15[%c0_55, %c0_56], %121 {strides = array<i32>} : memref<8x128xf32, #tpu.memory_space<vmem>>, vector<8x128xf32>,
      %c0_57 = arith.constant 0 : index
      %c0_58 = arith.constant 0 : index
      %131 = vector.load %arg16[%c0_57, %c0_58] : memref<8x128xf32, #tpu.memory_space<vmem>>, vector<8x128xf32>
      tpu.vector_store %arg16[%c0_57, %c0_58], %127 {strides = array<i32>} : memref<8x128xf32, #tpu.memory_space<vmem>>, vector<8x128xf32>,
      %132 = arith.truncf %109 : vector<8x128xf32> to vector<8x128xbf16>
      %133 = arith.index_cast %arg17 : i32 to index
      %c0_59 = arith.constant 0 : index
      %c0_60 = arith.constant 0 : index
      %134 = vector.load %arg9[%133, %c0_59, %c0_60] : memref<8x8x128xbf16, #tpu.memory_space<vmem>>, vector<1x8x128xbf16>
      %135 = vector.shape_cast %134 : vector<1x8x128xbf16> to vector<8x128xbf16>
      %136 = vector.shape_cast %132 : vector<8x128xbf16> to vector<1x8x128xbf16>
      tpu.vector_store %arg9[%133, %c0_59, %c0_60], %136 {strides = array<i32>} : memref<8x8x128xbf16, #tpu.memory_space<vmem>>, vector<1x8x128xbf16>,
      %137 = arith.truncf %121 : vector<8x128xf32> to vector<8x128xbf16>
      %138 = arith.index_cast %23 : i32 to index
      %c0_61 = arith.constant 0 : index
      %c0_62 = arith.constant 0 : index
      %139 = vector.load %arg10[%138, %c0_61, %c0_62] : memref<8x8x128xbf16, #tpu.memory_space<vmem>>, vector<1x8x128xbf16>
      %140 = vector.shape_cast %139 : vector<1x8x128xbf16> to vector<8x128xbf16>
      %141 = vector.shape_cast %137 : vector<8x128xbf16> to vector<1x8x128xbf16>
      tpu.vector_store %arg10[%138, %c0_61, %c0_62], %141 {strides = array<i32>} : memref<8x8x128xbf16, #tpu.memory_space<vmem>>, vector<1x8x128xbf16>,
    }
    %c8_i32_21 = arith.constant 8 : i32
    return
  }
  func.func @transform_0(%arg0: i32) -> (i32, i32) {
    %c0_i32 = arith.constant 0 : i32
    %c0_i32_0 = arith.constant 0 : i32
    return %arg0, %c0_i32 : i32, i32
  }
  func.func @transform_1(%arg0: i32) -> (i32, i32) {
    %c0_i32 = arith.constant 0 : i32
    %c0_i32_0 = arith.constant 0 : i32
    %c0_i32_1 = arith.constant 0 : i32
    return %c0_i32, %c0_i32_0 : i32, i32
  }
  func.func @transform_2(%arg0: i32) -> (i32, i32) {
    %c0_i32 = arith.constant 0 : i32
    %c0_i32_0 = arith.constant 0 : i32
    %c0_i32_1 = arith.constant 0 : i32
    return %c0_i32, %c0_i32_0 : i32, i32
  }
  func.func @transform_3(%arg0: i32) -> (i32, i32) {
    %c0_i32 = arith.constant 0 : i32
    %c0_i32_0 = arith.constant 0 : i32
    %c0_i32_1 = arith.constant 0 : i32
    return %c0_i32, %c0_i32_0 : i32, i32
  }
  func.func @transform_4(%arg0: i32) -> (i32, i32) {
    %c1_i32 = arith.constant 1 : i32
    %0 = arith.subi %c1_i32, %arg0 : i32
    %c0_i32 = arith.constant 0 : i32
    %c0_i32_0 = arith.constant 0 : i32
    return %0, %c0_i32 : i32, i32
  }
  func.func @transform_5(%arg0: i32) -> (i32, i32) {
    %c0_i32 = arith.constant 0 : i32
    %c0_i32_0 = arith.constant 0 : i32
    %c0_i32_1 = arith.constant 0 : i32
    return %c0_i32, %c0_i32_0 : i32, i32
  }
  func.func @transform_6(%arg0: i32) -> (i32, i32) {
    %c0_i32 = arith.constant 0 : i32
    %c0_i32_0 = arith.constant 0 : i32
    %c0_i32_1 = arith.constant 0 : i32
    return %c0_i32, %c0_i32_0 : i32, i32
  }
  func.func @transform_7(%arg0: i32) -> (i32, i32) {
    %c0_i32 = arith.constant 0 : i32
    %c0_i32_0 = arith.constant 0 : i32
    %c0_i32_1 = arith.constant 0 : i32
    return %c0_i32, %c0_i32_0 : i32, i32
  }
  func.func @transform_8(%arg0: i32) -> (i32, i32, i32) {
    %c0_i32 = arith.constant 0 : i32
    %c0_i32_0 = arith.constant 0 : i32
    %c0_i32_1 = arith.constant 0 : i32
    return %arg0, %c0_i32, %c0_i32_0 : i32, i32, i32
  }
  func.func @transform_9(%arg0: i32) -> (i32, i32, i32) {
    %c1_i32 = arith.constant 1 : i32
    %0 = arith.subi %c1_i32, %arg0 : i32
    %c0_i32 = arith.constant 0 : i32
    %c0_i32_0 = arith.constant 0 : i32
    %c0_i32_1 = arith.constant 0 : i32
    return %0, %c0_i32, %c0_i32_0 : i32, i32, i32
  }
}

module attributes {stable_mosaic.version = 11 : i64} {
  func.func @_linear2_kernel(%arg0: i32, %arg1: memref<128x128xbf16, #tpu.memory_space<vmem>>, %arg2: memref<128x128xbf16, #tpu.memory_space<vmem>>, %arg3: memref<128x128xbf16, #tpu.memory_space<vmem>>, %arg4: memref<128x128xbf16, #tpu.memory_space<vmem>>, %arg5: memref<1x128xf32, #tpu.memory_space<vmem>>, %arg6: memref<128x128xf32, #tpu.memory_space<vmem>>) attributes {dimension_semantics = [#tpu.dimension_semantics<parallel>], iteration_bounds = array<i64: 1>, scalar_prefetch = 0 : i64, scratch_operands = 0 : i64, tpu.core_type = #tpu.core_type<tc>, window_params = [{transform_indices = @transform_0, window_bounds = array<i64: 128, 128>}, {transform_indices = @transform_1, window_bounds = array<i64: 128, 128>}, {pipeline_mode = #tpu.pipeline_mode<synchronous>, transform_indices = @transform_2, window_bounds = array<i64: 128, 128>}, {pipeline_mode = #tpu.pipeline_mode<synchronous>, transform_indices = @transform_3, window_bounds = array<i64: 128, 128>}, {pipeline_mode = #tpu.pipeline_mode<synchronous>, transform_indices = @transform_4, window_bounds = array<i64: 1, 128>}, {transform_indices = @transform_5, window_bounds = array<i64: 128, 128>}]} {
    %c0 = arith.constant 0 : index
    %c0_0 = arith.constant 0 : index
    %0 = vector.load %arg1[%c0, %c0_0] : memref<128x128xbf16, #tpu.memory_space<vmem>>, vector<128x128xbf16>
    %c0_1 = arith.constant 0 : index
    %c0_2 = arith.constant 0 : index
    %1 = vector.load %arg3[%c0_1, %c0_2] : memref<128x128xbf16, #tpu.memory_space<vmem>>, vector<128x128xbf16>
    %cst = arith.constant dense<0.000000e+00> : vector<128x128xf32>
    %2 = tpu.matmul %0, %1, %cst {dimension_numbers = #tpu.dot_dimension_numbers<[1], [0], [0], [1], [0, 0, 1, 1], [], []>} : vector<128x128xbf16>, vector<128x128xbf16>, vector<128x128xf32> -> vector<128x128xf32>
    %c0_3 = arith.constant 0 : index
    %c0_4 = arith.constant 0 : index
    %3 = vector.load %arg2[%c0_3, %c0_4] : memref<128x128xbf16, #tpu.memory_space<vmem>>, vector<128x128xbf16>
    %c0_5 = arith.constant 0 : index
    %c0_6 = arith.constant 0 : index
    %4 = vector.load %arg4[%c0_5, %c0_6] : memref<128x128xbf16, #tpu.memory_space<vmem>>, vector<128x128xbf16>
    %cst_7 = arith.constant dense<0.000000e+00> : vector<128x128xf32>
    %5 = tpu.matmul %3, %4, %cst_7 {dimension_numbers = #tpu.dot_dimension_numbers<[1], [0], [0], [1], [0, 0, 1, 1], [], []>} : vector<128x128xbf16>, vector<128x128xbf16>, vector<128x128xf32> -> vector<128x128xf32>
    %6 = arith.addf %2, %5 : vector<128x128xf32>
    %c0_8 = arith.constant 0 : index
    %c0_9 = arith.constant 0 : index
    %7 = vector.load %arg5[%c0_8, %c0_9] : memref<1x128xf32, #tpu.memory_space<vmem>>, vector<1x128xf32>
    %8 = vector.broadcast %7 : vector<1x128xf32> to vector<128x128xf32>
    %9 = arith.addf %6, %8 : vector<128x128xf32>
    %c0_10 = arith.constant 0 : index
    %c0_11 = arith.constant 0 : index
    %10 = vector.load %arg6[%c0_10, %c0_11] : memref<128x128xf32, #tpu.memory_space<vmem>>, vector<128x128xf32>
    tpu.vector_store %arg6[%c0_10, %c0_11], %9 {strides = array<i32>} : memref<128x128xf32, #tpu.memory_space<vmem>>, vector<128x128xf32>,
    return
  }
  func.func @transform_0(%arg0: i32) -> (i32, i32) {
    %c0_i32 = arith.constant 0 : i32
    %c0_i32_0 = arith.constant 0 : i32
    return %arg0, %c0_i32 : i32, i32
  }
  func.func @transform_1(%arg0: i32) -> (i32, i32) {
    %c0_i32 = arith.constant 0 : i32
    %c0_i32_0 = arith.constant 0 : i32
    return %arg0, %c0_i32 : i32, i32
  }
  func.func @transform_2(%arg0: i32) -> (i32, i32) {
    %c0_i32 = arith.constant 0 : i32
    %c0_i32_0 = arith.constant 0 : i32
    %c0_i32_1 = arith.constant 0 : i32
    return %c0_i32, %c0_i32_0 : i32, i32
  }
  func.func @transform_3(%arg0: i32) -> (i32, i32) {
    %c0_i32 = arith.constant 0 : i32
    %c0_i32_0 = arith.constant 0 : i32
    %c0_i32_1 = arith.constant 0 : i32
    return %c0_i32, %c0_i32_0 : i32, i32
  }
  func.func @transform_4(%arg0: i32) -> (i32, i32) {
    %c0_i32 = arith.constant 0 : i32
    %c0_i32_0 = arith.constant 0 : i32
    %c0_i32_1 = arith.constant 0 : i32
    return %c0_i32, %c0_i32_0 : i32, i32
  }
  func.func @transform_5(%arg0: i32) -> (i32, i32) {
    %c0_i32 = arith.constant 0 : i32
    %c0_i32_0 = arith.constant 0 : i32
    return %arg0, %c0_i32 : i32, i32
  }
}

</mosaic_0001>

<bundles_post_ra>
// kernel: vanilla_seqlabel_forward.8
= control target key start
LH: loop header
LB: loop body
LE: loop exit
PB: predicated region body
PF: predicated region fallthrough
CT: control target
= control target key end

     0   :  { %s491_s3 = inlined_call_operand.vmem [shape: bf16[128,128], index: 3, kind: input, shape index: {}]   ;;  %s492_s2 = inlined_call_operand.vmem [shape: bf16[128,128], index: 2, kind: input, shape index: {}]   ;;  %s493_s1 = inlined_call_operand.vmem [shape: bf16[24,128], index: 1, kind: input, shape index: {}]   ;;  %s494_s0 = inlined_call_operand.vmem [shape: bf16[24,128], index: 0, kind: input, shape index: {}]   ;;  %s495_s4 = inlined_call_operand.vmem [shape: f32[1,128], index: 4, kind: input, shape index: {}]   ;;  %s496_s5 = inlined_call_operand.vmem [shape: f32[24,128], index: 5, kind: output, shape index: {}]  }
   0x1   :  { %v369_v0 = vld [vmem:[%s491_s3 + $0x38] sm:$0xff]   ;;  %v371_v2 = vld [vmem:[%s491_s3 + $0x30] sm:$0xff]   ;;  %v373_v4 = vld [vmem:[%s491_s3 + $0x28] sm:$0xff]  }
   0x2   :  { %v370_v1 = vld [vmem:[%s492_s2 + $0x38] sm:$0xff]   ;;  %329 = vmatprep.subr.bf16.mxu0 %v369_v0  ;;  %v372_v3 = vld [vmem:[%s492_s2 + $0x30] sm:$0xff]   ;;  %v374_v5 = vld [vmem:[%s492_s2 + $0x28] sm:$0xff]  }
   0x3   :  { %349 = vmatprep.subr.bf16.mxu1 %v370_v1  ;;  %330 = vmatpush3.bf16.msra.mxu0 %v369_v0  ;;  %v375_v6 = vld [vmem:[%s491_s3 + $0x20] sm:$0xff]   ;;  %v377_v8 = vld [vmem:[%s491_s3 + $0x18] sm:$0xff]   ;;  %v379_v10 = vld [vmem:[%s491_s3 + $0x10] sm:$0xff]  }
   0x4   :  { %350 = vmatpush3.bf16.msra.mxu1 %v370_v1  ;;  %331 = vmatprep.subr.bf16.mxu0 %v371_v2  ;;  %v376_v7 = vld [vmem:[%s492_s2 + $0x20] sm:$0xff]   ;;  %v378_v9 = vld [vmem:[%s492_s2 + $0x18] sm:$0xff]   ;;  %v380_v11 = vld [vmem:[%s492_s2 + $0x10] sm:$0xff]  }
   0x5   :  { %351 = vmatprep.subr.bf16.mxu1 %v372_v3  ;;  %v385_v12 = vld [vmem:[%s493_s1] sm:$0xff]   ;;  %v381_v14 = vld [vmem:[%s491_s3 + $0x8] sm:$0xff]  }
   0x6   :  { %v386_v13 = vld [vmem:[%s494_s0] sm:$0xff]   ;;  %345 = vmatprep.mubr.bf16.mxu0 %v385_v12  ;;  %v382_v15 = vld [vmem:[%s492_s2 + $0x8] sm:$0xff]  }
   0x7   :  { %332 = vmatpush3.bf16.msra.mxu0 %v371_v2  ;;  %365 = vmatprep.mubr.bf16.mxu1 %v386_v13  ;;  %v383_v16 = vld [vmem:[%s491_s3] sm:$0xff]   ;;  %v387_v18 = vld [vmem:[%s493_s1 + $0x8] ss:$0 sps:$4 sm:$0xff]  }
   0x8   :  { %352 = vmatpush3.bf16.msra.mxu1 %v372_v3  ;;  %333 = vmatprep.subr.bf16.mxu0 %v373_v4  ;;  %v384_v17 = vld [vmem:[%s492_s2] sm:$0xff]   ;;  %v388_v19 = vld [vmem:[%s494_s0 + $0x8] ss:$0 sps:$4 sm:$0xff]  }
   0x9   :  { %353 = vmatprep.subr.bf16.mxu1 %v374_v5  ;;  %v308_v22 = vld [vmem:[%s495_s4] ss:$0 sm:$0xff] }
   0xb   :  { %334 = vmatpush3.bf16.msra.mxu0 %v373_v4 }
   0xc   :  { %354 = vmatpush3.bf16.msra.mxu1 %v374_v5  ;;  %335 = vmatprep.subr.bf16.mxu0 %v375_v6 }
   0xd   :  { %355 = vmatprep.subr.bf16.mxu1 %v376_v7 }
   0xf   :  { %336 = vmatpush3.bf16.msra.mxu0 %v375_v6 }
  0x10   :  { %356 = vmatpush3.bf16.msra.mxu1 %v376_v7  ;;  %337 = vmatprep.subr.bf16.mxu0 %v377_v8 }
  0x11   :  { %357 = vmatprep.subr.bf16.mxu1 %v378_v9 }
  0x13   :  { %338 = vmatpush3.bf16.msra.mxu0 %v377_v8 }
  0x14   :  { %358 = vmatpush3.bf16.msra.mxu1 %v378_v9  ;;  %339 = vmatprep.subr.bf16.mxu0 %v379_v10 }
  0x15   :  { %359 = vmatprep.subr.bf16.mxu1 %v380_v11 }
  0x17   :  { %340 = vmatpush3.bf16.msra.mxu0 %v379_v10 }
  0x18   :  { %360 = vmatpush3.bf16.msra.mxu1 %v380_v11  ;;  %341 = vmatprep.subr.bf16.mxu0 %v381_v14 }
  0x19   :  { %361 = vmatprep.subr.bf16.mxu1 %v382_v15 }
  0x1b   :  { %342 = vmatpush3.bf16.msra.mxu0 %v381_v14 }
  0x1c   :  { %362 = vmatpush3.bf16.msra.mxu1 %v382_v15  ;;  %343 = vmatprep.subr.bf16.mxu0 %v383_v16 }
  0x1d   :  { %363 = vmatprep.subr.bf16.mxu1 %v384_v17 }
  0x1f   :  { %344 = vmatpush3.bf16.msra.mxu0 %v383_v16 }
  0x20   :  { %364 = vmatpush3.bf16.msra.mxu1 %v384_v17 }
  0x22   :  { %346 = vmatmul.mubr.bf16.vlgmr.msra.gmra.mxu0 %v387_v18 }
  0x23   :  { %366 = vmatmul.mubr.bf16.vlgmr.msra.gmra.mxu1 %v388_v19 }
  0xe2   :  { %v347_v20 = vpop.f32.mrf.mxu0 }
  0xe3   :  { %v367_v21 = vpop.f32.mrf.mxu1 }
  0xe4   :  { %v266_v23 = vadd.f32 %v367_v21, %v347_v20  ;;  %v151_v24 = vpop.f32.mrf.mxu0 }
  0xe5   :  { %v257_v25 = vpop.f32.mrf.mxu1 }
  0xe6   :  { %v280_v26 = vadd.f32 %v308_v22, %v266_v23  ;;  %v258_v27 = vadd.f32 %v257_v25, %v151_v24  ;;  %v348_v28 = vpop.f32.mrf.mxu0 }
  0xe7   :  { %v368_v29 = vpop.f32.mrf.mxu1 }
  0xe8   :  { %283 = vst [vmem:[%s496_s5 + $0x10] sm:$0xff] %v280_v26  ;;  %v278_v30 = vadd.f32 %v308_v22, %v258_v27  ;;  %v154_v31 = vpop.f32.mrf.mxu0 }
  0xe9   :  { %v260_v32 = vpop.f32.mrf.mxu1 }
  0xea   :  { %281 = vst [vmem:[%s496_s5] sm:$0xff] %v278_v30  ;;  %v261_v33 = vadd.f32 %v260_v32, %v154_v31 }
  0xec   :  { %v279_v34 = vadd.f32 %v308_v22, %v261_v33 }
  0xee   :  { %282 = vst [vmem:[%s496_s5 + $0x8] sm:$0xff] %v279_v34 }

// kernel: vanilla_seqlabel_forward.6
= control target key start
LH: loop header
LB: loop body
LE: loop exit
PB: predicated region body
PF: predicated region fallthrough
CT: control target
= control target key end

     0   :  { %s2832_s30 = smov 0   ;;  %s3380_s0 = inlined_call_operand.vmem [shape: bf16[256,16], index: 0, kind: input, shape index: {}]   ;;  %s3381_s1 = inlined_call_operand.vmem [shape: bf16[16,512], index: 1, kind: input, shape index: {}]   ;;  %s3382_s2 = inlined_call_operand.vmem [shape: bf16[128,512], index: 2, kind: input, shape index: {}]   ;;  %s3383_s3 = inlined_call_operand.vmem [shape: f32[1,512], index: 3, kind: input, shape index: {}]   ;;  %s3384_s4 = inlined_call_operand.vmem [shape: bf16[256,16], index: 4, kind: input, shape index: {}]   ;;  %s3385_s5 = inlined_call_operand.vmem [shape: bf16[16,512], index: 5, kind: input, shape index: {}]   ;;  %s3386_s6 = inlined_call_operand.vmem [shape: bf16[128,512], index: 6, kind: input, shape index: {}]   ;;  %s3387_s7 = inlined_call_operand.vmem [shape: f32[1,512], index: 7, kind: input, shape index: {}]   ;;  %s3388_s8 = inlined_call_operand.vmem [shape: bf16[32,8,128], index: 8, kind: output, shape index: {0}]   ;;  %s3389_s9 = inlined_call_operand.vmem [shape: bf16[32,8,128], index: 9, kind: output, shape index: {1}]  }
   0x1 LB: > { %s2309_s10 = sadd.s32 4294967295, %s2773_s30   ;;  %p2313_p0 = scmp.ge.s32.totalorder %s2773_s30, 1  ;;  %s2773_s30 = sphi %s2832_s30, %s20_s30  }
   0x2   : > { %p302_p1 = scmp.lt.s32.totalorder %s2773_s30, 3 }
   0x4   : > { %p303_p2 = pnand %p2313_p0, %p302_p1 }
   0x5   : > { %s2840_s11 = sshll.u32 (!%p303_p2), %s2309_s10, 4  ;;  %p2322_p4 = scmp.ne.s32.totalorder (!%p303_p2), %s2309_s10, 0 }
   0x6   : > { %306 = sbr.rel (%p303_p2) target bundleno = 672 (0x2a0), region = 52  ;;  %p349_p3 = scmp.lt.s32.totalorder (!%p303_p2), %s2840_s11, 31 }
   0xb   : > { %s350_s12 = scalar_select %p349_p3, %s2840_s11, 31 }
   0xc   : > { %376 = sbr.rel (%p2322_p4) target bundleno = 20 (0x14), region = 56 }
   0xd   : > { %s2844_s13 = sshll.u32 %s350_s12, 2 }
   0xe   : > { %s2850_s16 = scalar_lea.vmem %s3380_s0, %s2844_s13  ;;  %s2856_s19 = scalar_lea.vmem %s3384_s4, %s2844_s13 }
   0xf   : > { %s364_s22 = scalar_lea.vmem %s3388_s8, %s2844_s13  ;;  %s370_s25 = scalar_lea.vmem %s3389_s9, %s2844_s13 }
  0x11   : > { %v2779_v0 = vmov 0.0  }
  0x12   : > { %377 = vst [vmem:[#allocation4] sm:$0xff] %v2779_v0  ;;  %378 = vst [vmem:[#allocation5] sm:$0xff] %v2779_v0 }
  0x13   : > { %379 = vst [vmem:[#allocation6] sm:$0xff] %v2779_v0  ;;  %380 = vst [vmem:[#allocation7] sm:$0xff] %v2779_v0 }
  0x14 PF: > { %v2607_v1 = vld [vmem:[%s3381_s1 + $0x4] ss:$16 sps:$4 sm:$0xff]   ;;  %v2609_v2 = vld [vmem:[%s3381_s1 + $0xc] ss:$16 sps:$4 sm:$0xff]   ;;  %v2780_v3 = vmov 0   ;;  %vm483_vm0 = vcmask 130048   ;;  %v403_v26 = vlaneseq }
  0x15   : > { %540 = vmatprep.mubr.bf16.mxu0 %v2780_v3  ;;  %653 = vmatprep.mubr.bf16.mxu1 %v2780_v3  ;;  %v2611_v4 = vld [vmem:[%s3381_s1] ss:$16 sps:$4 sm:$0xff]   ;;  %v2612_v5 = vld [vmem:[%s3381_s1 + $0x8] ss:$16 sps:$4 sm:$0xff]   ;;  %v2616_v8 = vld [vmem:[%s3385_s5 + $0x4] ss:$16 sps:$4 sm:$0xff]  }
  0x16   : > { %522 = vmatprep.subr.bf16.mxu0 %v2607_v1  ;;  %635 = vmatprep.subr.bf16.mxu1 %v2609_v2  ;;  %v2613_v6 = vld [vmem:[%s2850_s16] sm:$0xff]   ;;  %v2617_v9 = vld [vmem:[%s3385_s5 + $0x8] ss:$16 sps:$4 sm:$0xff]   ;;  %v2619_v10 = vld [vmem:[%s3385_s5 + $0xc] ss:$16 sps:$4 sm:$0xff]   ;;  %v2970_v27 = vshrl.u32 %v403_v26, 7 }
  0x17   : > { %523 = vmatpush1.bf16.msra.mxu0 %v2611_v4  ;;  %636 = vmatpush1.bf16.msra.mxu1 %v2612_v5  ;;  %v2614_v7 = vld [vmem:[%s3385_s5] ss:$16 sps:$4 sm:$0xff]   ;;  %v2620_v11 = vld [vmem:[%s2850_s16 + $0x8] sm:$0xff]   ;;  %v2622_v13 = vld [vmem:[%s2850_s16 + $0x18] sm:$0xff]   ;;  %s3142_s10 = smov 0  }
  0x18   : > { %1098 = vmatprep.subr.bf16.mxu0 %v2616_v8  ;;  %1211 = vmatprep.subr.bf16.mxu1 %v2619_v10  ;;  %v2621_v12 = vld [vmem:[%s2850_s16 + $0x10] sm:$0xff]   ;;  %v2623_v14 = vld [vmem:[%s2850_s16 + $0x20] sm:$0xff]   ;;  %v2624_v15 = vld [vmem:[%s2850_s16 + $0x28] sm:$0xff]   ;;  %v405_v28 = vsub.s32 0, %v2970_v27  ;;  %v413_v29 = vsub.s32 2, %v2970_v27  ;;  %v409_v30 = vsub.s32 1, %v2970_v27 }
  0x19   : > { %v2625_v16 = vld [vmem:[%s2850_s16 + $0x30] sm:$0xff]   ;;  %v2626_v17 = vld [vmem:[%s2850_s16 + $0x38] sm:$0xff]   ;;  %v2627_v18 = vld [vmem:[%s2856_s19] sm:$0xff]   ;;  %v417_v31 = vsub.s32 3, %v2970_v27 }
  0x1a   : > { %2335 = vmatmul.mubr.msk.bf16.vlgmr.msra.gmra.mxu0 %vm483_vm0, %v2613_v6  ;;  %2343 = vmatmul.mubr.msk.bf16.vlgmr.msra.gmra.mxu1 %vm483_vm0, %v2613_v6  ;;  %v2628_v19 = vld [vmem:[%s2856_s19 + $0x8] sm:$0xff]   ;;  %v2629_v20 = vld [vmem:[%s2856_s19 + $0x10] sm:$0xff]   ;;  %v2630_v21 = vld [vmem:[%s2856_s19 + $0x18] sm:$0xff]  }
  0x1b   : > { %1099 = vmatpush1.bf16.msra.mxu0 %v2614_v7  ;;  %1212 = vmatpush1.bf16.msra.mxu1 %v2617_v9  ;;  %v2631_v22 = vld [vmem:[%s2856_s19 + $0x20] sm:$0xff]   ;;  %v2632_v23 = vld [vmem:[%s2856_s19 + $0x28] sm:$0xff]   ;;  %v2633_v24 = vld [vmem:[%s2856_s19 + $0x30] sm:$0xff]  }
  0x1c   : > { %550 = vmatprep.mubr.bf16.mxu0 %v2780_v3  ;;  %663 = vmatprep.mubr.bf16.mxu1 %v2780_v3  ;;  %v2634_v25 = vld [vmem:[%s2856_s19 + $0x38] sm:$0xff]   ;;  %v401_v32 = vld [vmem:[%s3383_s3] sm:$0xf] }
  0x1d   : > { %v2981_v33 = vrot.slane %v401_v32, %v405_v28  ;;  %v2985_v34 = vrot.slane %v401_v32, %v413_v29  ;;  %v2989_v35 = vrot.slane %v401_v32, %v409_v30  ;;  %v2993_v36 = vrot.slane %v401_v32, %v417_v31 }
  0x22   : > { %2336 = vmatmul.mubr.msk.bf16.gmra.mxu0 %vm483_vm0, %v2620_v11  ;;  %2344 = vmatmul.mubr.msk.bf16.gmra.mxu1 %vm483_vm0, %v2620_v11 }
  0x23   : > { %560 = vmatprep.mubr.bf16.mxu0 %v2780_v3  ;;  %673 = vmatprep.mubr.bf16.mxu1 %v2780_v3 }
  0x2a   : > { %2337 = vmatmul.mubr.msk.bf16.gmra.mxu0 %vm483_vm0, %v2621_v12  ;;  %2345 = vmatmul.mubr.msk.bf16.gmra.mxu1 %vm483_vm0, %v2621_v12 }
  0x2b   : > { %570 = vmatprep.mubr.bf16.mxu0 %v2780_v3  ;;  %683 = vmatprep.mubr.bf16.mxu1 %v2780_v3 }
  0x32   : > { %2338 = vmatmul.mubr.msk.bf16.gmra.mxu0 %vm483_vm0, %v2622_v13  ;;  %2346 = vmatmul.mubr.msk.bf16.gmra.mxu1 %vm483_vm0, %v2622_v13 }
  0x33   : > { %580 = vmatprep.mubr.bf16.mxu0 %v2780_v3  ;;  %693 = vmatprep.mubr.bf16.mxu1 %v2780_v3 }
  0x3a   : > { %2339 = vmatmul.mubr.msk.bf16.gmra.mxu0 %vm483_vm0, %v2623_v14  ;;  %2347 = vmatmul.mubr.msk.bf16.gmra.mxu1 %vm483_vm0, %v2623_v14 }
  0x3b   : > { %590 = vmatprep.mubr.bf16.mxu0 %v2780_v3  ;;  %703 = vmatprep.mubr.bf16.mxu1 %v2780_v3 }
  0x42   : > { %2340 = vmatmul.mubr.msk.bf16.gmra.mxu0 %vm483_vm0, %v2624_v15  ;;  %2348 = vmatmul.mubr.msk.bf16.gmra.mxu1 %vm483_vm0, %v2624_v15 }
  0x43   : > { %600 = vmatprep.mubr.bf16.mxu0 %v2780_v3  ;;  %713 = vmatprep.mubr.bf16.mxu1 %v2780_v3 }
  0x4a   : > { %2341 = vmatmul.mubr.msk.bf16.gmra.mxu0 %vm483_vm0, %v2625_v16  ;;  %2349 = vmatmul.mubr.msk.bf16.gmra.mxu1 %vm483_vm0, %v2625_v16 }
  0x4b   : > { %610 = vmatprep.mubr.bf16.mxu0 %v2780_v3  ;;  %723 = vmatprep.mubr.bf16.mxu1 %v2780_v3 }
  0x52   : > { %2342 = vmatmul.mubr.msk.bf16.gmra.mxu0 %vm483_vm0, %v2626_v17  ;;  %2350 = vmatmul.mubr.msk.bf16.gmra.mxu1 %vm483_vm0, %v2626_v17 }
  0x53   : > { %1116 = vmatprep.mubr.bf16.mxu0 %v2780_v3  ;;  %1229 = vmatprep.mubr.bf16.mxu1 %v2780_v3 }
  0x5a   : > { %2395 = vmatmul.mubr.msk.bf16.vlgmr.msra.gmra.mxu0 %vm483_vm0, %v2627_v18  ;;  %2403 = vmatmul.mubr.msk.bf16.vlgmr.msra.gmra.mxu1 %vm483_vm0, %v2627_v18 }
  0x5b   : > { %1126 = vmatprep.mubr.bf16.mxu0 %v2780_v3  ;;  %1239 = vmatprep.mubr.bf16.mxu1 %v2780_v3 }
  0x62   : > { %2396 = vmatmul.mubr.msk.bf16.gmra.mxu0 %vm483_vm0, %v2628_v19  ;;  %2404 = vmatmul.mubr.msk.bf16.gmra.mxu1 %vm483_vm0, %v2628_v19 }
  0x63   : > { %1136 = vmatprep.mubr.bf16.mxu0 %v2780_v3  ;;  %1249 = vmatprep.mubr.bf16.mxu1 %v2780_v3 }
  0x6a   : > { %2397 = vmatmul.mubr.msk.bf16.gmra.mxu0 %vm483_vm0, %v2629_v20  ;;  %2405 = vmatmul.mubr.msk.bf16.gmra.mxu1 %vm483_vm0, %v2629_v20 }
  0x6b   : > { %1146 = vmatprep.mubr.bf16.mxu0 %v2780_v3  ;;  %1259 = vmatprep.mubr.bf16.mxu1 %v2780_v3 }
  0x72   : > { %2398 = vmatmul.mubr.msk.bf16.gmra.mxu0 %vm483_vm0, %v2630_v21  ;;  %2406 = vmatmul.mubr.msk.bf16.gmra.mxu1 %vm483_vm0, %v2630_v21 }
  0x73   : > { %1156 = vmatprep.mubr.bf16.mxu0 %v2780_v3  ;;  %1269 = vmatprep.mubr.bf16.mxu1 %v2780_v3 }
  0x7a   : > { %2399 = vmatmul.mubr.msk.bf16.gmra.mxu0 %vm483_vm0, %v2631_v22  ;;  %2407 = vmatmul.mubr.msk.bf16.gmra.mxu1 %vm483_vm0, %v2631_v22 }
  0x7b   : > { %1166 = vmatprep.mubr.bf16.mxu0 %v2780_v3  ;;  %1279 = vmatprep.mubr.bf16.mxu1 %v2780_v3 }
  0x82   : > { %2400 = vmatmul.mubr.msk.bf16.gmra.mxu0 %vm483_vm0, %v2632_v23  ;;  %2408 = vmatmul.mubr.msk.bf16.gmra.mxu1 %vm483_vm0, %v2632_v23 }
  0x83   : > { %1176 = vmatprep.mubr.bf16.mxu0 %v2780_v3  ;;  %1289 = vmatprep.mubr.bf16.mxu1 %v2780_v3 }
  0x8a   : > { %2401 = vmatmul.mubr.msk.bf16.gmra.mxu0 %vm483_vm0, %v2633_v24  ;;  %2409 = vmatmul.mubr.msk.bf16.gmra.mxu1 %vm483_vm0, %v2633_v24 }
  0x8b   : > { %1186 = vmatprep.mubr.bf16.mxu0 %v2780_v3  ;;  %1299 = vmatprep.mubr.bf16.mxu1 %v2780_v3 }
  0x92   : > { %2402 = vmatmul.mubr.msk.bf16.gmra.mxu0 %vm483_vm0, %v2634_v25  ;;  %2410 = vmatmul.mubr.msk.bf16.gmra.mxu1 %vm483_vm0, %v2634_v25 }
  0xda   : > { %v542_v37 = vpop.f32.mrf.mxu0  ;;  %v655_v38 = vpop.f32.mrf.mxu1 }
  0xdb   : > { %v543_v41 = vadd.f32 %v542_v37, %v2981_v33  ;;  %v656_v42 = vadd.f32 %v655_v38, %v2985_v34 }
  0xdc   : > { %v544_v39 = vpop.f32.mrf.mxu0  ;;  %v657_v40 = vpop.f32.mrf.mxu1 }
  0xdd   : > { %v545_v43 = vadd.f32 %v544_v39, %v2989_v35  ;;  %v658_v44 = vadd.f32 %v657_v40, %v2993_v36 }
  0xde   : > { %v546_v45 = vpop.f32.mrf.mxu0  ;;  %v659_v46 = vpop.f32.mrf.mxu1 }
  0xdf   : > { %v2522_v47 = vpack.c.bf16 %v545_v43, %v543_v41  ;;  %v2523_v48 = vpack.c.bf16 %v658_v44, %v656_v42  ;;  %v547_v51 = vadd.f32 %v546_v45, %v2981_v33  ;;  %v660_v52 = vadd.f32 %v659_v46, %v2985_v34 }
  0xe0   : > { %v548_v49 = vpop.f32.mrf.mxu0  ;;  %v661_v50 = vpop.f32.mrf.mxu1 }
  0xe1   : > { %926 = vst [vmem:[#allocation2] sm:$0xff] %v2522_v47  ;;  %927 = vst [vmem:[#allocation2 + $0x8] sm:$0xff] %v2523_v48  ;;  %v549_v53 = vadd.f32 %v548_v49, %v2989_v35  ;;  %v662_v54 = vadd.f32 %v661_v50, %v2993_v36 }
  0xe2   : > { %v552_v55 = vpop.f32.mrf.mxu0  ;;  %v665_v56 = vpop.f32.mrf.mxu1 }
  0xe3   : > { %v2524_v57 = vpack.c.bf16 %v549_v53, %v547_v51  ;;  %v2525_v58 = vpack.c.bf16 %v662_v54, %v660_v52  ;;  %v553_v61 = vadd.f32 %v552_v55, %v2981_v33  ;;  %v666_v62 = vadd.f32 %v665_v56, %v2985_v34 }
  0xe4   : > { %v554_v59 = vpop.f32.mrf.mxu0  ;;  %v667_v60 = vpop.f32.mrf.mxu1 }
  0xe5   : > { %928 = vst [vmem:[#allocation2 + $0x10] sm:$0xff] %v2524_v57  ;;  %929 = vst [vmem:[#allocation2 + $0x18] sm:$0xff] %v2525_v58  ;;  %v555_v63 = vadd.f32 %v554_v59, %v2989_v35  ;;  %v668_v0 = vadd.f32 %v667_v60, %v2993_v36 }
  0xe6   : > { %v556_v1 = vpop.f32.mrf.mxu0  ;;  %v669_v2 = vpop.f32.mrf.mxu1 }
  0xe7   : > { %v2526_v3 = vpack.c.bf16 %v555_v63, %v553_v61  ;;  %v2527_v4 = vpack.c.bf16 %v668_v0, %v666_v62  ;;  %v557_v7 = vadd.f32 %v556_v1, %v2981_v33  ;;  %v670_v8 = vadd.f32 %v669_v2, %v2985_v34 }
  0xe8   : > { %v558_v5 = vpop.f32.mrf.mxu0  ;;  %v671_v6 = vpop.f32.mrf.mxu1 }
  0xe9   : > { %930 = vst [vmem:[#allocation2 + $0x20] sm:$0xff] %v2526_v3  ;;  %931 = vst [vmem:[#allocation2 + $0x28] sm:$0xff] %v2527_v4  ;;  %v559_v9 = vadd.f32 %v558_v5, %v2989_v35  ;;  %v672_v10 = vadd.f32 %v671_v6, %v2993_v36 }
  0xea   : > { %v562_v11 = vpop.f32.mrf.mxu0  ;;  %v675_v12 = vpop.f32.mrf.mxu1 }
  0xeb   : > { %v2528_v13 = vpack.c.bf16 %v559_v9, %v557_v7  ;;  %v2529_v14 = vpack.c.bf16 %v672_v10, %v670_v8  ;;  %v563_v17 = vadd.f32 %v562_v11, %v2981_v33  ;;  %v676_v18 = vadd.f32 %v675_v12, %v2985_v34 }
  0xec   : > { %v564_v15 = vpop.f32.mrf.mxu0  ;;  %v677_v16 = vpop.f32.mrf.mxu1 }
  0xed   : > { %932 = vst [vmem:[#allocation2 + $0x30] sm:$0xff] %v2528_v13  ;;  %933 = vst [vmem:[#allocation2 + $0x38] sm:$0xff] %v2529_v14  ;;  %v565_v19 = vadd.f32 %v564_v15, %v2989_v35  ;;  %v678_v20 = vadd.f32 %v677_v16, %v2993_v36 }
  0xee   : > { %v566_v21 = vpop.f32.mrf.mxu0  ;;  %v679_v22 = vpop.f32.mrf.mxu1 }
  0xef   : > { %v2530_v23 = vpack.c.bf16 %v565_v19, %v563_v17  ;;  %v2531_v24 = vpack.c.bf16 %v678_v20, %v676_v18  ;;  %v567_v32 = vadd.f32 %v566_v21, %v2981_v33  ;;  %v680_v37 = vadd.f32 %v679_v22, %v2985_v34 }
  0xf0   : > { %v568_v25 = vpop.f32.mrf.mxu0  ;;  %v681_v26 = vpop.f32.mrf.mxu1 }
  0xf1   : > { %934 = vst [vmem:[#allocation2 + $0x40] sm:$0xff] %v2530_v23  ;;  %935 = vst [vmem:[#allocation2 + $0x48] sm:$0xff] %v2531_v24  ;;  %v569_v38 = vadd.f32 %v568_v25, %v2989_v35  ;;  %v682_v39 = vadd.f32 %v681_v26, %v2993_v36 }
  0xf2   : > { %v572_v40 = vpop.f32.mrf.mxu0  ;;  %v685_v41 = vpop.f32.mrf.mxu1 }
  0xf3   : > { %v2532_v42 = vpack.c.bf16 %v569_v38, %v567_v32  ;;  %v2533_v43 = vpack.c.bf16 %v682_v39, %v680_v37  ;;  %v573_v46 = vadd.f32 %v572_v40, %v2981_v33  ;;  %v686_v47 = vadd.f32 %v685_v41, %v2985_v34 }
  0xf4   : > { %v574_v44 = vpop.f32.mrf.mxu0  ;;  %v687_v45 = vpop.f32.mrf.mxu1 }
  0xf5   : > { %936 = vst [vmem:[#allocation2 + $0x50] sm:$0xff] %v2532_v42  ;;  %937 = vst [vmem:[#allocation2 + $0x58] sm:$0xff] %v2533_v43  ;;  %v575_v48 = vadd.f32 %v574_v44, %v2989_v35  ;;  %v688_v49 = vadd.f32 %v687_v45, %v2993_v36 }
  0xf6   : > { %v576_v50 = vpop.f32.mrf.mxu0  ;;  %v689_v51 = vpop.f32.mrf.mxu1 }
  0xf7   : > { %v2534_v52 = vpack.c.bf16 %v575_v48, %v573_v46  ;;  %v2535_v53 = vpack.c.bf16 %v688_v49, %v686_v47  ;;  %v577_v56 = vadd.f32 %v576_v50, %v2981_v33  ;;  %v690_v57 = vadd.f32 %v689_v51, %v2985_v34 }
  0xf8   : > { %v578_v54 = vpop.f32.mrf.mxu0  ;;  %v691_v55 = vpop.f32.mrf.mxu1 }
  0xf9   : > { %938 = vst [vmem:[#allocation2 + $0x60] sm:$0xff] %v2534_v52  ;;  %939 = vst [vmem:[#allocation2 + $0x68] sm:$0xff] %v2535_v53  ;;  %v579_v58 = vadd.f32 %v578_v54, %v2989_v35  ;;  %v692_v59 = vadd.f32 %v691_v55, %v2993_v36 }
  0xfa   : > { %v582_v60 = vpop.f32.mrf.mxu0  ;;  %v695_v61 = vpop.f32.mrf.mxu1 }
  0xfb   : > { %v2536_v62 = vpack.c.bf16 %v579_v58, %v577_v56  ;;  %v2537_v63 = vpack.c.bf16 %v692_v59, %v690_v57  ;;  %v583_v2 = vadd.f32 %v582_v60, %v2981_v33  ;;  %v696_v3 = vadd.f32 %v695_v61, %v2985_v34 }
  0xfc   : > { %v584_v0 = vpop.f32.mrf.mxu0  ;;  %v697_v1 = vpop.f32.mrf.mxu1 }
  0xfd   : > { %940 = vst [vmem:[#allocation2 + $0x70] sm:$0xff] %v2536_v62  ;;  %941 = vst [vmem:[#allocation2 + $0x78] sm:$0xff] %v2537_v63  ;;  %v585_v4 = vadd.f32 %v584_v0, %v2989_v35  ;;  %v698_v5 = vadd.f32 %v697_v1, %v2993_v36 }
  0xfe   : > { %v586_v6 = vpop.f32.mrf.mxu0  ;;  %v699_v7 = vpop.f32.mrf.mxu1 }
  0xff   : > { %v2538_v8 = vpack.c.bf16 %v585_v4, %v583_v2  ;;  %v2539_v9 = vpack.c.bf16 %v698_v5, %v696_v3  ;;  %v587_v12 = vadd.f32 %v586_v6, %v2981_v33  ;;  %v700_v13 = vadd.f32 %v699_v7, %v2985_v34 }
 0x100   : > { %v588_v10 = vpop.f32.mrf.mxu0  ;;  %v701_v11 = vpop.f32.mrf.mxu1 }
 0x101   : > { %942 = vst [vmem:[#allocation2 + $0x80] sm:$0xff] %v2538_v8  ;;  %943 = vst [vmem:[#allocation2 + $0x88] sm:$0xff] %v2539_v9  ;;  %v589_v14 = vadd.f32 %v588_v10, %v2989_v35  ;;  %v702_v15 = vadd.f32 %v701_v11, %v2993_v36  ;;  %v978_v11 = vld [vmem:[%s3387_s7] sm:$0xf] }
 0x102   : > { %v592_v16 = vpop.f32.mrf.mxu0  ;;  %v705_v17 = vpop.f32.mrf.mxu1 }
 0x103   : > { %v2540_v18 = vpack.c.bf16 %v589_v14, %v587_v12  ;;  %v2541_v19 = vpack.c.bf16 %v702_v15, %v700_v13  ;;  %v593_v22 = vadd.f32 %v592_v16, %v2981_v33  ;;  %v706_v23 = vadd.f32 %v705_v17, %v2985_v34 }
 0x104   : > { %v594_v20 = vpop.f32.mrf.mxu0  ;;  %v707_v21 = vpop.f32.mrf.mxu1 }
 0x105   : > { %944 = vst [vmem:[#allocation2 + $0x90] sm:$0xff] %v2540_v18  ;;  %945 = vst [vmem:[#allocation2 + $0x98] sm:$0xff] %v2541_v19  ;;  %v595_v24 = vadd.f32 %v594_v20, %v2989_v35  ;;  %v708_v25 = vadd.f32 %v707_v21, %v2993_v36  ;;  %v3060_v18 = vrot.slane %v978_v11, %v405_v28 }
 0x106   : > { %v596_v26 = vpop.f32.mrf.mxu0  ;;  %v709_v32 = vpop.f32.mrf.mxu1  ;;  %v3064_v19 = vrot.slane %v978_v11, %v413_v29  ;;  %v3068_v20 = vrot.slane %v978_v11, %v409_v30  ;;  %v3072_v21 = vrot.slane %v978_v11, %v417_v31 }
 0x107   : > { %v2542_v37 = vpack.c.bf16 %v595_v24, %v593_v22  ;;  %v2543_v38 = vpack.c.bf16 %v708_v25, %v706_v23  ;;  %v597_v41 = vadd.f32 %v596_v26, %v2981_v33  ;;  %v710_v42 = vadd.f32 %v709_v32, %v2985_v34 }
 0x108   : > { %v598_v39 = vpop.f32.mrf.mxu0  ;;  %v711_v40 = vpop.f32.mrf.mxu1 }
 0x109   : > { %946 = vst [vmem:[#allocation2 + $0xa0] sm:$0xff] %v2542_v37  ;;  %947 = vst [vmem:[#allocation2 + $0xa8] sm:$0xff] %v2543_v38  ;;  %v599_v43 = vadd.f32 %v598_v39, %v2989_v35  ;;  %v712_v44 = vadd.f32 %v711_v40, %v2993_v36 }
 0x10a   : > { %v602_v45 = vpop.f32.mrf.mxu0  ;;  %v715_v46 = vpop.f32.mrf.mxu1 }
 0x10b   : > { %v2544_v47 = vpack.c.bf16 %v599_v43, %v597_v41  ;;  %v2545_v48 = vpack.c.bf16 %v712_v44, %v710_v42  ;;  %v603_v51 = vadd.f32 %v602_v45, %v2981_v33  ;;  %v716_v52 = vadd.f32 %v715_v46, %v2985_v34 }
 0x10c   : > { %v604_v49 = vpop.f32.mrf.mxu0  ;;  %v717_v50 = vpop.f32.mrf.mxu1 }
 0x10d   : > { %948 = vst [vmem:[#allocation2 + $0xb0] sm:$0xff] %v2544_v47  ;;  %949 = vst [vmem:[#allocation2 + $0xb8] sm:$0xff] %v2545_v48  ;;  %v605_v53 = vadd.f32 %v604_v49, %v2989_v35  ;;  %v718_v54 = vadd.f32 %v717_v50, %v2993_v36 }
 0x10e   : > { %v606_v55 = vpop.f32.mrf.mxu0  ;;  %v719_v56 = vpop.f32.mrf.mxu1 }
 0x10f   : > { %v2546_v57 = vpack.c.bf16 %v605_v53, %v603_v51  ;;  %v2547_v58 = vpack.c.bf16 %v718_v54, %v716_v52  ;;  %v607_v61 = vadd.f32 %v606_v55, %v2981_v33  ;;  %v720_v62 = vadd.f32 %v719_v56, %v2985_v34 }
 0x110   : > { %v608_v59 = vpop.f32.mrf.mxu0  ;;  %v721_v60 = vpop.f32.mrf.mxu1 }
 0x111   : > { %950 = vst [vmem:[#allocation2 + $0xc0] sm:$0xff] %v2546_v57  ;;  %951 = vst [vmem:[#allocation2 + $0xc8] sm:$0xff] %v2547_v58  ;;  %v609_v63 = vadd.f32 %v608_v59, %v2989_v35  ;;  %v722_v0 = vadd.f32 %v721_v60, %v2993_v36 }
 0x112   : > { %v612_v1 = vpop.f32.mrf.mxu0  ;;  %v725_v2 = vpop.f32.mrf.mxu1 }
 0x113   : > { %v2548_v3 = vpack.c.bf16 %v609_v63, %v607_v61  ;;  %v2549_v4 = vpack.c.bf16 %v722_v0, %v720_v62  ;;  %v613_v7 = vadd.f32 %v612_v1, %v2981_v33  ;;  %v726_v8 = vadd.f32 %v725_v2, %v2985_v34 }
 0x114   : > { %v614_v5 = vpop.f32.mrf.mxu0  ;;  %v727_v6 = vpop.f32.mrf.mxu1 }
 0x115   : > { %952 = vst [vmem:[#allocation2 + $0xd0] sm:$0xff] %v2548_v3  ;;  %953 = vst [vmem:[#allocation2 + $0xd8] sm:$0xff] %v2549_v4  ;;  %v615_v9 = vadd.f32 %v614_v5, %v2989_v35  ;;  %v728_v10 = vadd.f32 %v727_v6, %v2993_v36 }
 0x116   : > { %v616_v12 = vpop.f32.mrf.mxu0  ;;  %v729_v13 = vpop.f32.mrf.mxu1 }
 0x117   : > { %v2550_v14 = vpack.c.bf16 %v615_v9, %v613_v7  ;;  %v2551_v15 = vpack.c.bf16 %v728_v10, %v726_v8  ;;  %v617_v22 = vadd.f32 %v616_v12, %v2981_v33  ;;  %v730_v23 = vadd.f32 %v729_v13, %v2985_v34 }
 0x118   : > { %v618_v16 = vpop.f32.mrf.mxu0  ;;  %v731_v17 = vpop.f32.mrf.mxu1 }
 0x119   : > { %954 = vst [vmem:[#allocation2 + $0xe0] sm:$0xff] %v2550_v14  ;;  %955 = vst [vmem:[#allocation2 + $0xe8] sm:$0xff] %v2551_v15  ;;  %v619_v28 = vadd.f32 %v618_v16, %v2989_v35  ;;  %v732_v24 = vadd.f32 %v731_v17, %v2993_v36 }
 0x11a   : > { %v1118_v29 = vpop.f32.mrf.mxu0  ;;  %v1231_v25 = vpop.f32.mrf.mxu1 }
 0x11b   : > { %v2552_v26 = vpack.c.bf16 %v619_v28, %v617_v22  ;;  %v2553_v32 = vpack.c.bf16 %v732_v24, %v730_v23  ;;  %v1119_v27 = vadd.f32 %v1118_v29, %v3060_v18  ;;  %v1232_v31 = vadd.f32 %v1231_v25, %v3064_v19 }
 0x11c   : > { %v1120_v30 = vpop.f32.mrf.mxu0  ;;  %v1233_v37 = vpop.f32.mrf.mxu1 }
 0x11d   : > { %956 = vst [vmem:[#allocation2 + $0xf0] sm:$0xff] %v2552_v26  ;;  %957 = vst [vmem:[#allocation2 + $0xf8] sm:$0xff] %v2553_v32  ;;  %v1121_v33 = vadd.f32 %v1120_v30, %v3068_v20  ;;  %v1234_v34 = vadd.f32 %v1233_v37, %v3072_v21 }
 0x11e   : > { %v1122_v38 = vpop.f32.mrf.mxu0  ;;  %v1235_v35 = vpop.f32.mrf.mxu1 }
 0x11f   : > { %v2554_v39 = vpack.c.bf16 %v1121_v33, %v1119_v27  ;;  %v2555_v36 = vpack.c.bf16 %v1234_v34, %v1232_v31  ;;  %v1123_v42 = vadd.f32 %v1122_v38, %v3060_v18  ;;  %v1236_v43 = vadd.f32 %v1235_v35, %v3064_v19 }
 0x120   : > { %v1124_v40 = vpop.f32.mrf.mxu0  ;;  %v1237_v41 = vpop.f32.mrf.mxu1 }
 0x121   : > { %1502 = vst [vmem:[#allocation3] sm:$0xff] %v2554_v39  ;;  %1503 = vst [vmem:[#allocation3 + $0x8] sm:$0xff] %v2555_v36  ;;  %v1125_v44 = vadd.f32 %v1124_v40, %v3068_v20  ;;  %v1238_v45 = vadd.f32 %v1237_v41, %v3072_v21 }
 0x122   : > { %v1128_v46 = vpop.f32.mrf.mxu0  ;;  %v1241_v47 = vpop.f32.mrf.mxu1 }
 0x123   : > { %v2556_v48 = vpack.c.bf16 %v1125_v44, %v1123_v42  ;;  %v2557_v49 = vpack.c.bf16 %v1238_v45, %v1236_v43  ;;  %v1129_v52 = vadd.f32 %v1128_v46, %v3060_v18  ;;  %v1242_v53 = vadd.f32 %v1241_v47, %v3064_v19 }
 0x124   : > { %v1130_v50 = vpop.f32.mrf.mxu0  ;;  %v1243_v51 = vpop.f32.mrf.mxu1 }
 0x125   : > { %1504 = vst [vmem:[#allocation3 + $0x10] sm:$0xff] %v2556_v48  ;;  %1505 = vst [vmem:[#allocation3 + $0x18] sm:$0xff] %v2557_v49  ;;  %v1131_v54 = vadd.f32 %v1130_v50, %v3068_v20  ;;  %v1244_v55 = vadd.f32 %v1243_v51, %v3072_v21 }
 0x126   : > { %v1132_v56 = vpop.f32.mrf.mxu0  ;;  %v1245_v57 = vpop.f32.mrf.mxu1 }
 0x127   : > { %v2558_v58 = vpack.c.bf16 %v1131_v54, %v1129_v52  ;;  %v2559_v59 = vpack.c.bf16 %v1244_v55, %v1242_v53  ;;  %v1133_v62 = vadd.f32 %v1132_v56, %v3060_v18  ;;  %v1246_v63 = vadd.f32 %v1245_v57, %v3064_v19 }
 0x128   : > { %v1134_v60 = vpop.f32.mrf.mxu0  ;;  %v1247_v61 = vpop.f32.mrf.mxu1 }
 0x129   : > { %1506 = vst [vmem:[#allocation3 + $0x20] sm:$0xff] %v2558_v58  ;;  %1507 = vst [vmem:[#allocation3 + $0x28] sm:$0xff] %v2559_v59  ;;  %v1135_v0 = vadd.f32 %v1134_v60, %v3068_v20  ;;  %v1248_v1 = vadd.f32 %v1247_v61, %v3072_v21 }
 0x12a   : > { %v1138_v2 = vpop.f32.mrf.mxu0  ;;  %v1251_v3 = vpop.f32.mrf.mxu1 }
 0x12b   : > { %v2560_v4 = vpack.c.bf16 %v1135_v0, %v1133_v62  ;;  %v2561_v5 = vpack.c.bf16 %v1248_v1, %v1246_v63  ;;  %v1139_v8 = vadd.f32 %v1138_v2, %v3060_v18  ;;  %v1252_v9 = vadd.f32 %v1251_v3, %v3064_v19 }
 0x12c   : > { %v1140_v6 = vpop.f32.mrf.mxu0  ;;  %v1253_v7 = vpop.f32.mrf.mxu1 }
 0x12d   : > { %1508 = vst [vmem:[#allocation3 + $0x30] sm:$0xff] %v2560_v4  ;;  %1509 = vst [vmem:[#allocation3 + $0x38] sm:$0xff] %v2561_v5  ;;  %v1141_v10 = vadd.f32 %v1140_v6, %v3068_v20  ;;  %v1254_v11 = vadd.f32 %v1253_v7, %v3072_v21 }
 0x12e   : > { %v1142_v12 = vpop.f32.mrf.mxu0  ;;  %v1255_v13 = vpop.f32.mrf.mxu1 }
 0x12f   : > { %v2562_v14 = vpack.c.bf16 %v1141_v10, %v1139_v8  ;;  %v2563_v15 = vpack.c.bf16 %v1254_v11, %v1252_v9  ;;  %v1143_v22 = vadd.f32 %v1142_v12, %v3060_v18  ;;  %v1256_v23 = vadd.f32 %v1255_v13, %v3064_v19 }
 0x130   : > { %v1144_v16 = vpop.f32.mrf.mxu0  ;;  %v1257_v17 = vpop.f32.mrf.mxu1 }
 0x131   : > { %1510 = vst [vmem:[#allocation3 + $0x40] sm:$0xff] %v2562_v14  ;;  %1511 = vst [vmem:[#allocation3 + $0x48] sm:$0xff] %v2563_v15  ;;  %v1145_v28 = vadd.f32 %v1144_v16, %v3068_v20  ;;  %v1258_v24 = vadd.f32 %v1257_v17, %v3072_v21 }
 0x132   : > { %v1148_v29 = vpop.f32.mrf.mxu0  ;;  %v1261_v25 = vpop.f32.mrf.mxu1 }
 0x133   : > { %v2564_v26 = vpack.c.bf16 %v1145_v28, %v1143_v22  ;;  %v2565_v32 = vpack.c.bf16 %v1258_v24, %v1256_v23  ;;  %v1149_v27 = vadd.f32 %v1148_v29, %v3060_v18  ;;  %v1262_v31 = vadd.f32 %v1261_v25, %v3064_v19 }
 0x134   : > { %v1150_v30 = vpop.f32.mrf.mxu0  ;;  %v1263_v37 = vpop.f32.mrf.mxu1 }
 0x135   : > { %1512 = vst [vmem:[#allocation3 + $0x50] sm:$0xff] %v2564_v26  ;;  %1513 = vst [vmem:[#allocation3 + $0x58] sm:$0xff] %v2565_v32  ;;  %v1151_v33 = vadd.f32 %v1150_v30, %v3068_v20  ;;  %v1264_v34 = vadd.f32 %v1263_v37, %v3072_v21 }
 0x136   : > { %v1152_v38 = vpop.f32.mrf.mxu0  ;;  %v1265_v35 = vpop.f32.mrf.mxu1 }
 0x137   : > { %v2566_v39 = vpack.c.bf16 %v1151_v33, %v1149_v27  ;;  %v2567_v36 = vpack.c.bf16 %v1264_v34, %v1262_v31  ;;  %v1153_v42 = vadd.f32 %v1152_v38, %v3060_v18  ;;  %v1266_v43 = vadd.f32 %v1265_v35, %v3064_v19 }
 0x138   : > { %v1154_v40 = vpop.f32.mrf.mxu0  ;;  %v1267_v41 = vpop.f32.mrf.mxu1 }
 0x139   : > { %1514 = vst [vmem:[#allocation3 + $0x60] sm:$0xff] %v2566_v39  ;;  %1515 = vst [vmem:[#allocation3 + $0x68] sm:$0xff] %v2567_v36  ;;  %v1155_v44 = vadd.f32 %v1154_v40, %v3068_v20  ;;  %v1268_v45 = vadd.f32 %v1267_v41, %v3072_v21 }
 0x13a   : > { %v1158_v46 = vpop.f32.mrf.mxu0  ;;  %v1271_v47 = vpop.f32.mrf.mxu1 }
 0x13b   : > { %v2568_v48 = vpack.c.bf16 %v1155_v44, %v1153_v42  ;;  %v2569_v49 = vpack.c.bf16 %v1268_v45, %v1266_v43  ;;  %v1159_v52 = vadd.f32 %v1158_v46, %v3060_v18  ;;  %v1272_v53 = vadd.f32 %v1271_v47, %v3064_v19 }
 0x13c   : > { %v1160_v50 = vpop.f32.mrf.mxu0  ;;  %v1273_v51 = vpop.f32.mrf.mxu1 }
 0x13d   : > { %1516 = vst [vmem:[#allocation3 + $0x70] sm:$0xff] %v2568_v48  ;;  %1517 = vst [vmem:[#allocation3 + $0x78] sm:$0xff] %v2569_v49  ;;  %v1161_v54 = vadd.f32 %v1160_v50, %v3068_v20  ;;  %v1274_v55 = vadd.f32 %v1273_v51, %v3072_v21 }
 0x13e   : > { %v1162_v56 = vpop.f32.mrf.mxu0  ;;  %v1275_v57 = vpop.f32.mrf.mxu1 }
 0x13f   : > { %v2570_v58 = vpack.c.bf16 %v1161_v54, %v1159_v52  ;;  %v2571_v59 = vpack.c.bf16 %v1274_v55, %v1272_v53  ;;  %v1163_v62 = vadd.f32 %v1162_v56, %v3060_v18  ;;  %v1276_v63 = vadd.f32 %v1275_v57, %v3064_v19 }
 0x140   : > { %v1164_v60 = vpop.f32.mrf.mxu0  ;;  %v1277_v61 = vpop.f32.mrf.mxu1 }
 0x141   : > { %1518 = vst [vmem:[#allocation3 + $0x80] sm:$0xff] %v2570_v58  ;;  %1519 = vst [vmem:[#allocation3 + $0x88] sm:$0xff] %v2571_v59  ;;  %v1165_v0 = vadd.f32 %v1164_v60, %v3068_v20  ;;  %v1278_v1 = vadd.f32 %v1277_v61, %v3072_v21 }
 0x142   : > { %v1168_v2 = vpop.f32.mrf.mxu0  ;;  %v1281_v3 = vpop.f32.mrf.mxu1 }
 0x143   : > { %v2572_v4 = vpack.c.bf16 %v1165_v0, %v1163_v62  ;;  %v2573_v5 = vpack.c.bf16 %v1278_v1, %v1276_v63  ;;  %v1169_v8 = vadd.f32 %v1168_v2, %v3060_v18  ;;  %v1282_v9 = vadd.f32 %v1281_v3, %v3064_v19 }
 0x144   : > { %v1170_v6 = vpop.f32.mrf.mxu0  ;;  %v1283_v7 = vpop.f32.mrf.mxu1 }
 0x145   : > { %1520 = vst [vmem:[#allocation3 + $0x90] sm:$0xff] %v2572_v4  ;;  %1521 = vst [vmem:[#allocation3 + $0x98] sm:$0xff] %v2573_v5  ;;  %v1171_v10 = vadd.f32 %v1170_v6, %v3068_v20  ;;  %v1284_v11 = vadd.f32 %v1283_v7, %v3072_v21 }
 0x146   : > { %v1172_v12 = vpop.f32.mrf.mxu0  ;;  %v1285_v13 = vpop.f32.mrf.mxu1 }
 0x147   : > { %v2574_v14 = vpack.c.bf16 %v1171_v10, %v1169_v8  ;;  %v2575_v15 = vpack.c.bf16 %v1284_v11, %v1282_v9  ;;  %v1173_v22 = vadd.f32 %v1172_v12, %v3060_v18  ;;  %v1286_v23 = vadd.f32 %v1285_v13, %v3064_v19 }
 0x148   : > { %v1174_v16 = vpop.f32.mrf.mxu0  ;;  %v1287_v17 = vpop.f32.mrf.mxu1 }
 0x149   : > { %1522 = vst [vmem:[#allocation3 + $0xa0] sm:$0xff] %v2574_v14  ;;  %1523 = vst [vmem:[#allocation3 + $0xa8] sm:$0xff] %v2575_v15  ;;  %v1175_v28 = vadd.f32 %v1174_v16, %v3068_v20  ;;  %v1288_v24 = vadd.f32 %v1287_v17, %v3072_v21 }
 0x14a   : > { %v1178_v29 = vpop.f32.mrf.mxu0  ;;  %v1291_v25 = vpop.f32.mrf.mxu1 }
 0x14b   : > { %v2576_v26 = vpack.c.bf16 %v1175_v28, %v1173_v22  ;;  %v2577_v32 = vpack.c.bf16 %v1288_v24, %v1286_v23  ;;  %v1179_v27 = vadd.f32 %v1178_v29, %v3060_v18  ;;  %v1292_v31 = vadd.f32 %v1291_v25, %v3064_v19 }
 0x14c   : > { %v1180_v30 = vpop.f32.mrf.mxu0  ;;  %v1293_v37 = vpop.f32.mrf.mxu1 }
 0x14d   : > { %1524 = vst [vmem:[#allocation3 + $0xb0] sm:$0xff] %v2576_v26  ;;  %1525 = vst [vmem:[#allocation3 + $0xb8] sm:$0xff] %v2577_v32  ;;  %v1181_v33 = vadd.f32 %v1180_v30, %v3068_v20  ;;  %v1294_v34 = vadd.f32 %v1293_v37, %v3072_v21 }
 0x14e   : > { %v1182_v38 = vpop.f32.mrf.mxu0  ;;  %v1295_v35 = vpop.f32.mrf.mxu1 }
 0x14f   : > { %v2578_v39 = vpack.c.bf16 %v1181_v33, %v1179_v27  ;;  %v2579_v36 = vpack.c.bf16 %v1294_v34, %v1292_v31  ;;  %v1183_v42 = vadd.f32 %v1182_v38, %v3060_v18  ;;  %v1296_v43 = vadd.f32 %v1295_v35, %v3064_v19 }
 0x150   : > { %v1184_v40 = vpop.f32.mrf.mxu0  ;;  %v1297_v41 = vpop.f32.mrf.mxu1 }
 0x151   : > { %1526 = vst [vmem:[#allocation3 + $0xc0] sm:$0xff] %v2578_v39  ;;  %1527 = vst [vmem:[#allocation3 + $0xc8] sm:$0xff] %v2579_v36  ;;  %v1185_v44 = vadd.f32 %v1184_v40, %v3068_v20  ;;  %v1298_v45 = vadd.f32 %v1297_v41, %v3072_v21 }
 0x152   : > { %v1188_v46 = vpop.f32.mrf.mxu0  ;;  %v1301_v47 = vpop.f32.mrf.mxu1 }
 0x153   : > { %v2580_v48 = vpack.c.bf16 %v1185_v44, %v1183_v42  ;;  %v2581_v49 = vpack.c.bf16 %v1298_v45, %v1296_v43  ;;  %v1189_v52 = vadd.f32 %v1188_v46, %v3060_v18  ;;  %v1302_v53 = vadd.f32 %v1301_v47, %v3064_v19 }
 0x154   : > { %v1190_v50 = vpop.f32.mrf.mxu0  ;;  %v1303_v51 = vpop.f32.mrf.mxu1 }
 0x155   : > { %1528 = vst [vmem:[#allocation3 + $0xd0] sm:$0xff] %v2580_v48  ;;  %1529 = vst [vmem:[#allocation3 + $0xd8] sm:$0xff] %v2581_v49  ;;  %v1191_v54 = vadd.f32 %v1190_v50, %v3068_v20  ;;  %v1304_v55 = vadd.f32 %v1303_v51, %v3072_v21 }
 0x156   : > { %v1192_v56 = vpop.f32.mrf.mxu0  ;;  %v1305_v57 = vpop.f32.mrf.mxu1 }
 0x157   : > { %v2582_v58 = vpack.c.bf16 %v1191_v54, %v1189_v52  ;;  %v2583_v59 = vpack.c.bf16 %v1304_v55, %v1302_v53  ;;  %v1193_v62 = vadd.f32 %v1192_v56, %v3060_v18  ;;  %v1306_v63 = vadd.f32 %v1305_v57, %v3064_v19 }
 0x158   : > { %v1194_v60 = vpop.f32.mrf.mxu0  ;;  %v1307_v61 = vpop.f32.mrf.mxu1 }
 0x159   : > { %1530 = vst [vmem:[#allocation3 + $0xe0] sm:$0xff] %v2582_v58  ;;  %1531 = vst [vmem:[#allocation3 + $0xe8] sm:$0xff] %v2583_v59  ;;  %v1195_v0 = vadd.f32 %v1194_v60, %v3068_v20  ;;  %v1308_v1 = vadd.f32 %v1307_v61, %v3072_v21 }
 0x15b   : > { %v2584_v2 = vpack.c.bf16 %v1195_v0, %v1193_v62  ;;  %v2585_v3 = vpack.c.bf16 %v1308_v1, %v1306_v63 }
 0x15d   : > { %1532 = vst [vmem:[#allocation3 + $0xf0] sm:$0xff] %v2584_v2  ;;  %1533 = vst [vmem:[#allocation3 + $0xf8] sm:$0xff] %v2585_v3 }
 0x15e LB: >> { %v2635_v18 = vld [vmem:[%s3382_s2 + $0xe4] ss:$16 sps:$4 sm:$0xff]   ;;  %v2637_v19 = vld [vmem:[%s3382_s2 + $0xe0] ss:$16 sps:$4 sm:$0xff]   ;;  %v2781_v20 = vmov 0   ;;  %s2444_s24 = sshll.u32 %s2777_s10, 3  ;;  %s2163_s28 = sadd.s32 %s2777_s10, %s2840_s11  ;;  %s2777_s10 = sphi %s3142_s10, %s1540_s10  }
 0x15f   : >> { %1782 = vmatprep.mubr.bf16.mxu0 %v2781_v20  ;;  %1823 = vmatprep.mubr.bf16.mxu1 %v2781_v20  ;;  %v2638_v21 = vld [vmem:[%s3382_s2 + $0xc4] ss:$16 sps:$4 sm:$0xff]   ;;  %v2640_v4 = vld [vmem:[%s3382_s2 + $0xc0] ss:$16 sps:$4 sm:$0xff]   ;;  %v2646_v6 = vld [vmem:[%s3382_s2 + $0xec] ss:$16 sps:$4 sm:$0xff]  }
 0x160   : >> { %1750 = vmatprep.subr.bf16.mxu0 %v2635_v18  ;;  %v2641_v5 = vld [vmem:[%s3382_s2 + $0xa4] ss:$16 sps:$4 sm:$0xff]   ;;  %v2649_v7 = vld [vmem:[%s3382_s2 + $0xe8] ss:$16 sps:$4 sm:$0xff]   ;;  %v2643_v8 = vld [vmem:[%s3382_s2 + $0xa0] ss:$16 sps:$4 sm:$0xff]   ;;  %1791 = vmatprep.subr.bf16.mxu1 %v2646_v6 }
 0x161   : >> { %1751 = vmatpush1.bf16.msra.mxu0 %v2637_v19  ;;  %v2644_v9 = vld [vmem:[%s3382_s2 + $0x84] ss:$16 sps:$4 sm:$0xff]   ;;  %1792 = vmatpush1.bf16.msra.mxu1 %v2649_v7  ;;  %v2652_v10 = vld [vmem:[%s3382_s2 + $0xcc] ss:$16 sps:$4 sm:$0xff]   ;;  %v2655_v11 = vld [vmem:[%s3382_s2 + $0xc8] ss:$16 sps:$4 sm:$0xff]  }
 0x162   : >> { %1752 = vmatprep.subr.bf16.mxu0 %v2638_v21  ;;  %1793 = vmatprep.subr.bf16.mxu1 %v2652_v10  ;;  %v2648_v12 = vld [vmem:[%s3382_s2 + $0x80] ss:$16 sps:$4 sm:$0xff]   ;;  %v2650_v13 = vld [vmem:[%s3382_s2 + $0x64] ss:$16 sps:$4 sm:$0xff]   ;;  %v2658_v14 = vld [vmem:[%s3382_s2 + $0xac] ss:$16 sps:$4 sm:$0xff]  }
 0x163   : >> { %v2661_v15 = vld [vmem:[%s3382_s2 + $0xa8] ss:$16 sps:$4 sm:$0xff]   ;;  %v2664_v16 = vld [vmem:[%s3382_s2 + $0x8c] ss:$16 sps:$4 sm:$0xff]   ;;  %v2654_v17 = vld [vmem:[%s3382_s2 + $0x60] ss:$16 sps:$4 sm:$0xff]  }
 0x164   : >> { %v2656_v22 = vld [vmem:[%s3382_s2 + $0x44] ss:$16 sps:$4 sm:$0xff]   ;;  %v2667_v23 = vld [vmem:[%s3382_s2 + $0x88] ss:$16 sps:$4 sm:$0xff]   ;;  %v2670_v28 = vld [vmem:[%s3382_s2 + $0x6c] ss:$16 sps:$4 sm:$0xff]  }
 0x165   : >> { %1753 = vmatpush1.bf16.msra.mxu0 %v2640_v4  ;;  %1794 = vmatpush1.bf16.msra.mxu1 %v2655_v11  ;;  %v2660_v24 = vld [vmem:[%s3382_s2 + $0x40] ss:$16 sps:$4 sm:$0xff]   ;;  %v2662_v29 = vld [vmem:[%s3382_s2 + $0x24] ss:$16 sps:$4 sm:$0xff]   ;;  %v2673_v25 = vld [vmem:[%s3382_s2 + $0x68] ss:$16 sps:$4 sm:$0xff]  }
 0x166   : >> { %1754 = vmatprep.subr.bf16.mxu0 %v2641_v5  ;;  %1795 = vmatprep.subr.bf16.mxu1 %v2658_v14  ;;  %v2674_v26 = vld [vmem:[%s3382_s2 + $0x4c] ss:$16 sps:$4 sm:$0xff]   ;;  %v2666_v32 = vld [vmem:[%s3382_s2 + $0x20] ss:$16 sps:$4 sm:$0xff]   ;;  %v2668_v30 = vld [vmem:[%s3382_s2 + $0x4] ss:$16 sps:$4 sm:$0xff]  }
 0x167   : >> { %v2679_v37 = vld [vmem:[%s3382_s2 + $0x48] ss:$16 sps:$4 sm:$0xff]   ;;  %v2680_v27 = vld [vmem:[%s3382_s2 + $0x2c] ss:$16 sps:$4 sm:$0xff]   ;;  %v2672_v31 = vld [vmem:[%s3382_s2] ss:$16 sps:$4 sm:$0xff]  }
 0x168   : >> { %v3236_v33 = vld [vmem:[#allocation4] sm:$0xff]  ;;  %v2685_v38 = vld [vmem:[%s3382_s2 + $0x28] ss:$16 sps:$4 sm:$0xff]   ;;  %v2686_v35 = vld [vmem:[%s3382_s2 + $0xc] ss:$16 sps:$4 sm:$0xff]   ;;  %s3352_s26 = sshra.s32 %s2444_s24, 3 }
 0x169   : >> { %1755 = vmatpush1.bf16.msra.mxu0 %v2643_v8  ;;  %1796 = vmatpush1.bf16.msra.mxu1 %v2661_v15  ;;  %v2678_v34 = vld [vmem:[%s3386_s6 + $0xe4] ss:$16 sps:$4 sm:$0xff]   ;;  %v1546_v39 = vpack.c.bf16 %v3236_v33, %v3236_v33  ;;  %v2676_v36 = vld [vmem:[%s3386_s6 + $0xe0] ss:$16 sps:$4 sm:$0xff]   ;;  %v2691_v41 = vld [vmem:[%s3382_s2 + $0x8] ss:$16 sps:$4 sm:$0xff]  }
 0x16a   : >> { %1756 = vmatprep.subr.bf16.mxu0 %v2644_v9  ;;  %1797 = vmatprep.subr.bf16.mxu1 %v2664_v16  ;;  %v2684_v40 = vld [vmem:[%s3386_s6 + $0xc4] ss:$16 sps:$4 sm:$0xff]   ;;  %v2697_v42 = vld [vmem:[%s3386_s6 + $0xec] ss:$16 sps:$4 sm:$0xff]   ;;  %v2682_v43 = vld [vmem:[%s3386_s6 + $0xc0] ss:$16 sps:$4 sm:$0xff]  }
 0x16b   : >> { %v2690_v44 = vld [vmem:[%s3386_s6 + $0xa4] ss:$16 sps:$4 sm:$0xff]   ;;  %v2695_v45 = vld [vmem:[%s3386_s6 + $0xe8] ss:$16 sps:$4 sm:$0xff]   ;;  %v2703_v46 = vld [vmem:[%s3386_s6 + $0xcc] ss:$16 sps:$4 sm:$0xff]  }
 0x16c   : >> { %v2688_v47 = vld [vmem:[%s3386_s6 + $0xa0] ss:$16 sps:$4 sm:$0xff]   ;;  %v2694_v48 = vld [vmem:[%s3386_s6 + $0x84] ss:$16 sps:$4 sm:$0xff]   ;;  %v2701_v49 = vld [vmem:[%s3386_s6 + $0xc8] ss:$16 sps:$4 sm:$0xff]  }
 0x16d   : >> { %1757 = vmatpush1.bf16.msra.mxu0 %v2648_v12  ;;  %1798 = vmatpush1.bf16.msra.mxu1 %v2667_v23  ;;  %v2709_v50 = vld [vmem:[%s3386_s6 + $0xac] ss:$16 sps:$4 sm:$0xff]   ;;  %v2692_v51 = vld [vmem:[%s3386_s6 + $0x80] ss:$16 sps:$4 sm:$0xff]   ;;  %v2700_v52 = vld [vmem:[%s3386_s6 + $0x64] ss:$16 sps:$4 sm:$0xff]  }
 0x16e   : >> { %1758 = vmatprep.subr.bf16.mxu0 %v2650_v13  ;;  %1799 = vmatprep.subr.bf16.mxu1 %v2670_v28  ;;  %v2707_v53 = vld [vmem:[%s3386_s6 + $0xa8] ss:$16 sps:$4 sm:$0xff]   ;;  %v2715_v54 = vld [vmem:[%s3386_s6 + $0x8c] ss:$16 sps:$4 sm:$0xff]   ;;  %v2698_v55 = vld [vmem:[%s3386_s6 + $0x60] ss:$16 sps:$4 sm:$0xff]  }
 0x16f   : >> { %v2706_v56 = vld [vmem:[%s3386_s6 + $0x44] ss:$16 sps:$4 sm:$0xff]   ;;  %v2713_v57 = vld [vmem:[%s3386_s6 + $0x88] ss:$16 sps:$4 sm:$0xff]   ;;  %v2721_v58 = vld [vmem:[%s3386_s6 + $0x6c] ss:$16 sps:$4 sm:$0xff]  }
 0x170   : >> { %v2704_v59 = vld [vmem:[%s3386_s6 + $0x40] ss:$16 sps:$4 sm:$0xff]   ;;  %v2712_v60 = vld [vmem:[%s3386_s6 + $0x24] ss:$16 sps:$4 sm:$0xff]   ;;  %v2719_v61 = vld [vmem:[%s3386_s6 + $0x68] ss:$16 sps:$4 sm:$0xff]  }
 0x171   : >> { %1759 = vmatpush1.bf16.msra.mxu0 %v2654_v17  ;;  %1800 = vmatpush1.bf16.msra.mxu1 %v2673_v25  ;;  %v2724_v62 = vld [vmem:[%s3386_s6 + $0x4c] ss:$16 sps:$4 sm:$0xff]   ;;  %v2710_v63 = vld [vmem:[%s3386_s6 + $0x20] ss:$16 sps:$4 sm:$0xff]   ;;  %v2718_v0 = vld [vmem:[%s3386_s6 + $0x4] ss:$16 sps:$4 sm:$0xff]  }
 0x172   : >> { %1760 = vmatprep.subr.bf16.mxu0 %v2656_v22  ;;  %1801 = vmatprep.subr.bf16.mxu1 %v2674_v26  ;;  %v2722_v1 = vld [vmem:[%s3386_s6 + $0x48] ss:$16 sps:$4 sm:$0xff]   ;;  %v2727_v2 = vld [vmem:[%s3386_s6 + $0x2c] ss:$16 sps:$4 sm:$0xff]   ;;  %v2716_v3 = vld [vmem:[%s3386_s6] ss:$16 sps:$4 sm:$0xff]  }
 0x173   : >> { %v3338_v18 = vld [vmem:[#allocation6] sm:$0xff]  ;;  %v2725_v19 = vld [vmem:[%s3386_s6 + $0x28] ss:$16 sps:$4 sm:$0xff]   ;;  %s2586_s27 = sshll.u32 %s3352_s26, 4  ;;  %p2164_p5 = scmp.lt.s32.totalorder %s2163_s28, 20 }
 0x174   : >> { %v1832_v21 = vpack.c.bf16 %v3338_v18, %v3338_v18  ;;  %v2728_v4 = vld [vmem:[%s3386_s6 + $0x8] ss:$16 sps:$4 sm:$0xff]   ;;  %s1583_s16 = scalar_lea.vmem [#allocation2], %s2586_s27  ;;  %s1866_s29 = scalar_lea.vmem [#allocation3], %s2586_s27 }
 0x175   : >> { %1761 = vmatpush1.bf16.msra.mxu0 %v2660_v24  ;;  %1802 = vmatpush1.bf16.msra.mxu1 %v2679_v37  ;;  %v1584_v5 = vld [vmem:[%s1583_s16] sm:$0xff]  ;;  %v1585_v13 = vld [vmem:[%s1583_s16 + $0x8] sm:$0xff]  ;;  %s2165_s19 = scalar_select %p2164_p5, 1, 0 }
 0x176   : >> { %1762 = vmatprep.subr.bf16.mxu0 %v2662_v29  ;;  %1803 = vmatprep.subr.bf16.mxu1 %v2680_v27  ;;  %v1586_v6 = vunpack.c.l.bf16 %v1584_v5  ;;  %v1587_v7 = vunpack.c.h.bf16 %v1584_v5  ;;  %v1589_v22 = vunpack.c.h.bf16 %v1585_v13  ;;  %v1588_v29 = vunpack.c.l.bf16 %v1585_v13  ;;  %s2518_s15 = sshll.u32 %s2777_s10, 2  ;;  %s1540_s10 = sadd.s32 1, %s2777_s10  }
 0x177   : >> { %s2166_s12 = scvt.s32.f32 %s2165_s19  ;;  %s2188_s20 = scalar_lea.vmem %s364_s22, %s2518_s15 }
 0x178   : >> { %s2192_s24 = scalar_lea.vmem %s370_s25, %s2518_s15  ;;  %p1537_p6 = scmp.ge.s32.totalorder %s1540_s10, 16  }
 0x179   : >> { %1763 = vmatpush1.bf16.msra.mxu0 %v2666_v32  ;;  %1804 = vmatpush1.bf16.msra.mxu1 %v2685_v38  ;;  %s2169_s14 = ssub.f32 1.0, %s2166_s12 }
 0x17a   : >> { %1764 = vmatprep.subr.bf16.mxu0 %v2668_v30  ;;  %1805 = vmatprep.subr.bf16.mxu1 %v2686_v35 }
 0x17d   : >> { %1765 = vmatpush1.bf16.msra.mxu0 %v2672_v31  ;;  %1806 = vmatpush1.bf16.msra.mxu1 %v2691_v41 }
 0x17e   : >> { %2033 = vmatprep.subr.bf16.mxu0 %v2678_v34  ;;  %2074 = vmatprep.subr.bf16.mxu1 %v2697_v42  ;;  %v1867_v34 = vld [vmem:[%s1866_s29] sm:$0xff] }
 0x17f   : >> { %v1869_v38 = vunpack.c.l.bf16 %v1867_v34 }
 0x180   : >> { %1783 = vmatmul.mubr.bf16.vlgmr.msra.gmra.mxu0 %v1546_v39  ;;  %1824 = vmatmul.mubr.bf16.vlgmr.msra.gmra.mxu1 %v1546_v39  ;;  %v1870_v39 = vunpack.c.h.bf16 %v1867_v34 }
 0x181   : >> { %2034 = vmatpush1.bf16.msra.mxu0 %v2676_v36  ;;  %2065 = vmatprep.mubr.bf16.mxu0 %v2781_v20 }
 0x182   : >> { %2035 = vmatprep.subr.bf16.mxu0 %v2684_v40  ;;  %2075 = vmatpush1.bf16.msra.mxu1 %v2695_v45 }
 0x183   : >> { %2076 = vmatprep.subr.bf16.mxu1 %v2703_v46  ;;  %2106 = vmatprep.mubr.bf16.mxu1 %v2781_v20  ;;  %v2730_v20 = vld [vmem:[%s3386_s6 + $0xc] ss:$16 sps:$4 sm:$0xff]  }
 0x185   : >> { %2036 = vmatpush1.bf16.msra.mxu0 %v2682_v43  ;;  %v1543_v43 = vld [vmem:[#allocation5] sm:$0xff] }
 0x186   : >> { %2037 = vmatprep.subr.bf16.mxu0 %v2690_v44  ;;  %2077 = vmatpush1.bf16.msra.mxu1 %v2701_v49 }
 0x187   : >> { %2078 = vmatprep.subr.bf16.mxu1 %v2709_v50  ;;  %v2170_v50 = vstv %s2169_s14 }
 0x189   : >> { %2038 = vmatpush1.bf16.msra.mxu0 %v2688_v47 }
 0x18a   : >> { %2039 = vmatprep.subr.bf16.mxu0 %v2694_v48  ;;  %2079 = vmatpush1.bf16.msra.mxu1 %v2707_v53 }
 0x18b   : >> { %2080 = vmatprep.subr.bf16.mxu1 %v2715_v54  ;;  %v1868_v54 = vld [vmem:[%s1866_s29 + $0x8] sm:$0xff] }
 0x18d   : >> { %2040 = vmatpush1.bf16.msra.mxu0 %v2692_v51 }
 0x18e   : >> { %2041 = vmatprep.subr.bf16.mxu0 %v2700_v52  ;;  %2081 = vmatpush1.bf16.msra.mxu1 %v2713_v57 }
 0x18f   : >> { %2082 = vmatprep.subr.bf16.mxu1 %v2721_v58  ;;  %v2174_v58 = vmul.f32 %v2170_v50, %v1543_v43 }
 0x191   : >> { %2042 = vmatpush1.bf16.msra.mxu0 %v2698_v55 }
 0x192   : >> { %2043 = vmatprep.subr.bf16.mxu0 %v2706_v56  ;;  %2083 = vmatpush1.bf16.msra.mxu1 %v2719_v61  ;;  %v2167_v56 = vstv %s2166_s12  ;;  %v1872_v61 = vunpack.c.h.bf16 %v1868_v54 }
 0x193   : >> { %2084 = vmatprep.subr.bf16.mxu1 %v2724_v62 }
 0x195   : >> { %2044 = vmatpush1.bf16.msra.mxu0 %v2704_v59 }
 0x196   : >> { %2045 = vmatprep.subr.bf16.mxu0 %v2712_v60  ;;  %2085 = vmatpush1.bf16.msra.mxu1 %v2722_v1  ;;  %v1871_v1 = vunpack.c.l.bf16 %v1868_v54 }
 0x197   : >> { %2086 = vmatprep.subr.bf16.mxu1 %v2727_v2 }
 0x199   : >> { %2046 = vmatpush1.bf16.msra.mxu0 %v2710_v63 }
 0x19a   : >> { %2047 = vmatprep.subr.bf16.mxu0 %v2718_v0  ;;  %2087 = vmatpush1.bf16.msra.mxu1 %v2725_v19 }
 0x19b   : >> { %2088 = vmatprep.subr.bf16.mxu1 %v2730_v20 }
 0x19d   : >> { %2048 = vmatpush1.bf16.msra.mxu0 %v2716_v3 }
 0x19e   : >> { %2089 = vmatpush1.bf16.msra.mxu1 %v2728_v4 }
 0x1a0   : >> { %2066 = vmatmul.mubr.bf16.vlgmr.msra.gmra.mxu0 %v1832_v21 }
 0x1a1   : >> { %2107 = vmatmul.mubr.bf16.vlgmr.msra.gmra.mxu1 %v1832_v21 }
 0x240   : >> { %v1784_v8 = vpop.f32.mrf.mxu0  ;;  %v1825_v16 = vpop.f32.mrf.mxu1 }
 0x241   : >> { %v1785_v9 = vadd.f32 %v1784_v8, %v1586_v6  ;;  %v1826_v32 = vadd.f32 %v1825_v16, %v1588_v29 }
 0x242   : >> { %v1786_v10 = vpop.f32.mrf.mxu0  ;;  %v1827_v23 = vpop.f32.mrf.mxu1 }
 0x243   : >> { %v2512_v11 = vmul.f32 -1.442695, %v1785_v9  ;;  %v1787_v12 = vadd.f32 %v1786_v10, %v1587_v7  ;;  %v1828_v24 = vadd.f32 %v1827_v23, %v1589_v22  ;;  %v2171_v9 = vmul.f32 %v2170_v50, %v3236_v33 }
 0x244   : >> { %v1788_v14 = vpop.f32.mrf.mxu0  ;;  %v1829_v28 = vpop.f32.mrf.mxu1 }
 0x245   : >> { %2731 = vpow2.f32 %v2512_v11  ;;  %v2513_v15 = vmul.f32 -1.442695, %v1787_v12  ;;  %v2514_v26 = vmul.f32 -1.442695, %v1828_v24 }
 0x246   : >> { %v1789_v17 = vpop.f32.mrf.mxu0  ;;  %v1830_v25 = vpop.f32.mrf.mxu1 }
 0x247   : >> { %2733 = vpow2.f32 %v2513_v15  ;;  %v1545_v17 = vld [vmem:[#allocation7] sm:$0xff] }
 0x248   : >> { %2735 = vpow2.f32 %v2514_v26  ;;  %v2180_v24 = vmul.f32 %v2170_v50, %v1545_v17 }
 0x249   : >> { %2737 = vtanh.f32 %v1826_v32 }
 0x252   : >> { %v2732_v30 = vpop.eup %2731 }
 0x253   : >> { %v2118_v37 = vadd.f32 1.0, %v2732_v30 }
 0x254   : >> { %v2734_v27 = vpop.eup %2733 }
 0x255   : >> { %2739 = vrcp.f32 %v2118_v37  ;;  %v2124_v31 = vadd.f32 1.0, %v2734_v27  ;;  %v2736_v35 = vpop.eup %2735  ;;  %v2177_v37 = vmul.f32 %v2170_v50, %v3338_v18 }
 0x256   : >> { %v2738_v36 = vpop.eup %2737  ;;  %v2131_v44 = vadd.f32 1.0, %v2736_v35 }
 0x257   : >> { %2741 = vrcp.f32 %v2124_v31 }
 0x260   : >> { %v2067_v40 = vpop.f32.mrf.mxu0 }
 0x261   : >> { %v2068_v41 = vadd.f32 %v2067_v40, %v1869_v38  ;;  %v2108_v55 = vpop.f32.mrf.mxu1 }
 0x262   : >> { %v2740_v42 = vpop.eup %2739  ;;  %v2069_v45 = vpop.f32.mrf.mxu0  ;;  %v2109_v19 = vadd.f32 %v2108_v55, %v1871_v1 }
 0x263   : >> { %v2135_v46 = vmul.f32 %v2740_v42, %v2738_v36  ;;  %v2515_v47 = vmul.f32 -1.442695, %v2068_v41  ;;  %v2070_v48 = vadd.f32 %v2069_v45, %v1870_v39  ;;  %v2110_v60 = vpop.f32.mrf.mxu1 }
 0x264   : >> { %v2742_v49 = vpop.eup %2741  ;;  %v2071_v51 = vpop.f32.mrf.mxu0  ;;  %v2111_v3 = vadd.f32 %v2110_v60, %v1872_v61 }
 0x265   : >> { %v2134_v52 = vmul.f32 %v2742_v49, %v1543_v43  ;;  %2743 = vpow2.f32 %v2515_v47  ;;  %v2516_v53 = vmul.f32 -1.442695, %v2070_v48  ;;  %v2112_v63 = vpop.f32.mrf.mxu1 }
 0x266   : >> { %2745 = vrcp.f32 %v2131_v44  ;;  %v2072_v57 = vpop.f32.mrf.mxu0  ;;  %v2517_v20 = vmul.f32 -1.442695, %v2111_v3 }
 0x267   : >> { %v2136_v59 = vadd.f32 %v2135_v46, %v2134_v52  ;;  %2747 = vpow2.f32 %v2516_v53  ;;  %v2113_v2 = vpop.f32.mrf.mxu1 }
 0x269   : >> { %2749 = vtanh.f32 %v2136_v59  ;;  %v2173_v62 = vmul.f32 %v2167_v56, %v2136_v59 }
 0x26a   : >> { %2751 = vtanh.f32 %v2109_v19 }
 0x26b   : >> { %v2175_v0 = vadd.f32 %v2174_v58, %v2173_v62  ;;  %2753 = vpow2.f32 %v2517_v20 }
 0x26d   : >> { %2183 = vst [vmem:[#allocation5] sm:$0xff] %v2175_v0 }
 0x272   : >> { %v2744_v21 = vpop.eup %2743 }
 0x273   : >> { %v2746_v4 = vpop.eup %2745  ;;  %v2142_v5 = vadd.f32 1.0, %v2744_v21 }
 0x274   : >> { %v2748_v6 = vpop.eup %2747 }
 0x275   : >> { %2755 = vrcp.f32 %v2142_v5  ;;  %v2148_v7 = vadd.f32 1.0, %v2748_v6 }
 0x276   : >> { %v2750_v8 = vpop.eup %2749 }
 0x277   : >> { %v2138_v10 = vmul.f32 %v2750_v8, %v2746_v4  ;;  %2757 = vrcp.f32 %v2148_v7  ;;  %v2752_v14 = vpop.eup %2751 }
 0x278   : >> { %v2754_v15 = vpop.eup %2753 }
 0x279   : >> { %v2168_v11 = vmul.f32 %v2167_v56, %v2138_v10  ;;  %v2155_v23 = vadd.f32 1.0, %v2754_v15 }
 0x27b   : >> { %v2172_v12 = vadd.f32 %v2171_v9, %v2168_v11  ;;  %2759 = vrcp.f32 %v2155_v23 }
 0x27d   : >> { %2182 = vst [vmem:[#allocation4] sm:$0xff] %v2172_v12  ;;  %v2186_v13 = vpack.c.bf16 %v2172_v12, %v2172_v12 }
 0x27f   : >> { %2189 = vst [vmem:[%s2188_s20] sm:$0xf] %v2186_v13 }
 0x282   : >> { %v2756_v16 = vpop.eup %2755 }
 0x283   : >> { %v2159_v28 = vmul.f32 %v2756_v16, %v2752_v14 }
 0x284   : >> { %v2758_v22 = vpop.eup %2757 }
 0x285   : >> { %v2158_v33 = vmul.f32 %v2758_v22, %v1545_v17 }
 0x287   : >> { %v2160_v29 = vadd.f32 %v2159_v28, %v2158_v33 }
 0x288   : >> { %v2760_v32 = vpop.eup %2759 }
 0x289   : >> { %2761 = vtanh.f32 %v2160_v29  ;;  %v2179_v25 = vmul.f32 %v2167_v56, %v2160_v29 }
 0x28b   : >> { %v2181_v26 = vadd.f32 %v2180_v24, %v2179_v25 }
 0x28d   : >> { %2185 = vst [vmem:[#allocation7] sm:$0xff] %v2181_v26 }
 0x296   : >> { %v2762_v30 = vpop.eup %2761 }
 0x297   : >> { %v2162_v27 = vmul.f32 %v2762_v30, %v2760_v32 }
 0x299   : >> { %v2176_v31 = vmul.f32 %v2167_v56, %v2162_v27 }
 0x29b   : >> { %v2178_v34 = vadd.f32 %v2177_v37, %v2176_v31  ;;  %1539 = sbr.rel (!%p1537_p6) target bundleno = 350 (0x15e), region = 112 }
 0x29d   : >> { %2184 = vst [vmem:[#allocation6] sm:$0xff] %v2178_v34  ;;  %v2190_v38 = vpack.c.bf16 %v2178_v34, %v2178_v34 }
 0x29f   : >> { %2193 = vst [vmem:[%s2192_s24] sm:$0xf] %v2190_v38 }
 0x2a0 PF: > { %s20_s30 = sadd.s32 1, %s2773_s30  }
 0x2a1   : > { %p17_p7 = scmp.ge.s32.totalorder %s20_s30, 4  }
 0x2a3   :  { %19 = sbr.rel (!%p17_p7) target bundleno = 1 (0x1), region = 123 }

// kernel: vanilla_seqlabel_forward.7
= control target key start
LH: loop header
LB: loop body
LE: loop exit
PB: predicated region body
PF: predicated region fallthrough
CT: control target
= control target key end

     0   :  { %s3243_s30 = smov 0   ;;  %s3927_s0 = inlined_call_operand.vmem [shape: bf16[256,128], index: 0, kind: input, shape index: {}]   ;;  %s3928_s1 = inlined_call_operand.vmem [shape: bf16[128,512], index: 1, kind: input, shape index: {}]   ;;  %s3929_s2 = inlined_call_operand.vmem [shape: bf16[128,512], index: 2, kind: input, shape index: {}]   ;;  %s3930_s3 = inlined_call_operand.vmem [shape: f32[1,512], index: 3, kind: input, shape index: {}]   ;;  %s3931_s4 = inlined_call_operand.vmem [shape: bf16[256,128], index: 4, kind: input, shape index: {}]   ;;  %s3932_s5 = inlined_call_operand.vmem [shape: bf16[128,512], index: 5, kind: input, shape index: {}]   ;;  %s3933_s6 = inlined_call_operand.vmem [shape: bf16[128,512], index: 6, kind: input, shape index: {}]   ;;  %s3934_s7 = inlined_call_operand.vmem [shape: f32[1,512], index: 7, kind: input, shape index: {}]   ;;  %s3935_s8 = inlined_call_operand.vmem [shape: bf16[32,8,128], index: 8, kind: output, shape index: {0}]   ;;  %s3936_s9 = inlined_call_operand.vmem [shape: bf16[32,8,128], index: 9, kind: output, shape index: {1}]  }
   0x1 LB: > { %s2612_s10 = sadd.s32 4294967295, %s3184_s30   ;;  %p2616_p0 = scmp.ge.s32.totalorder %s3184_s30, 1  ;;  %s3184_s30 = sphi %s3243_s30, %s20_s30  }
   0x2   : > { %p302_p1 = scmp.lt.s32.totalorder %s3184_s30, 3 }
   0x4   : > { %p303_p2 = pnand %p2616_p0, %p302_p1 }
   0x5   : > { %s3251_s11 = sshll.u32 (!%p303_p2), %s2612_s10, 4  ;;  %p2625_p4 = scmp.ne.s32.totalorder (!%p303_p2), %s2612_s10, 0 }
   0x6   : > { %306 = sbr.rel (%p303_p2) target bundleno = 700 (0x2bc), region = 52  ;;  %p349_p3 = scmp.lt.s32.totalorder (!%p303_p2), %s3251_s11, 31 }
   0xb   : > { %s350_s12 = scalar_select %p349_p3, %s3251_s11, 31 }
   0xc   : > { %376 = sbr.rel (%p2625_p4) target bundleno = 20 (0x14), region = 56 }
   0xd   : > { %s3255_s13 = sshll.u32 %s350_s12, 2 }
   0xe   : > { %s3261_s16 = scalar_lea.vmem %s3927_s0, %s3255_s13  ;;  %s3267_s19 = scalar_lea.vmem %s3931_s4, %s3255_s13 }
   0xf   : > { %s364_s22 = scalar_lea.vmem %s3935_s8, %s3255_s13  ;;  %s370_s25 = scalar_lea.vmem %s3936_s9, %s3255_s13 }
  0x11   : > { %v3190_v0 = vmov 0.0  }
  0x12   : > { %377 = vst [vmem:[#allocation4] sm:$0xff] %v3190_v0  ;;  %378 = vst [vmem:[#allocation5] sm:$0xff] %v3190_v0 }
  0x13   : > { %379 = vst [vmem:[#allocation6] sm:$0xff] %v3190_v0  ;;  %380 = vst [vmem:[#allocation7] sm:$0xff] %v3190_v0 }
  0x14 PF: > { %v2934_v1 = vld [vmem:[%s3928_s1 + $0xe4] ss:$16 sps:$4 sm:$0xff]   ;;  %v2936_v2 = vld [vmem:[%s3928_s1 + $0xec] ss:$16 sps:$4 sm:$0xff]   ;;  %v3191_v3 = vmov 0   ;;  %s3689_s10 = smov 0  }
  0x15   : > { %691 = vmatprep.mubr.bf16.mxu0 %v3191_v3  ;;  %804 = vmatprep.mubr.bf16.mxu1 %v3191_v3  ;;  %v2938_v4 = vld [vmem:[%s3928_s1 + $0xe0] ss:$16 sps:$4 sm:$0xff]   ;;  %v2939_v5 = vld [vmem:[%s3928_s1 + $0xe8] ss:$16 sps:$4 sm:$0xff]   ;;  %v2940_v6 = vld [vmem:[%s3928_s1 + $0xc4] ss:$16 sps:$4 sm:$0xff]  }
  0x16   : > { %659 = vmatprep.subr.bf16.mxu0 %v2934_v1  ;;  %772 = vmatprep.subr.bf16.mxu1 %v2936_v2  ;;  %v2942_v7 = vld [vmem:[%s3928_s1 + $0xcc] ss:$16 sps:$4 sm:$0xff]   ;;  %v2944_v8 = vld [vmem:[%s3928_s1 + $0xc0] ss:$16 sps:$4 sm:$0xff]   ;;  %v2945_v9 = vld [vmem:[%s3928_s1 + $0xc8] ss:$16 sps:$4 sm:$0xff]  }
  0x17   : > { %660 = vmatpush1.bf16.msra.mxu0 %v2938_v4  ;;  %773 = vmatpush1.bf16.msra.mxu1 %v2939_v5  ;;  %v2946_v10 = vld [vmem:[%s3928_s1 + $0xa4] ss:$16 sps:$4 sm:$0xff]   ;;  %v2948_v11 = vld [vmem:[%s3928_s1 + $0xac] ss:$16 sps:$4 sm:$0xff]   ;;  %v2950_v12 = vld [vmem:[%s3928_s1 + $0xa0] ss:$16 sps:$4 sm:$0xff]  }
  0x18   : > { %661 = vmatprep.subr.bf16.mxu0 %v2940_v6  ;;  %774 = vmatprep.subr.bf16.mxu1 %v2942_v7  ;;  %v2951_v13 = vld [vmem:[%s3928_s1 + $0xa8] ss:$16 sps:$4 sm:$0xff]   ;;  %v2952_v14 = vld [vmem:[%s3928_s1 + $0x84] ss:$16 sps:$4 sm:$0xff]   ;;  %v2954_v15 = vld [vmem:[%s3928_s1 + $0x8c] ss:$16 sps:$4 sm:$0xff]  }
  0x19   : > { %v2956_v16 = vld [vmem:[%s3928_s1 + $0x80] ss:$16 sps:$4 sm:$0xff]   ;;  %v2957_v17 = vld [vmem:[%s3928_s1 + $0x88] ss:$16 sps:$4 sm:$0xff]   ;;  %v2958_v18 = vld [vmem:[%s3928_s1 + $0x64] ss:$16 sps:$4 sm:$0xff]  }
  0x1a   : > { %v2960_v19 = vld [vmem:[%s3928_s1 + $0x6c] ss:$16 sps:$4 sm:$0xff]   ;;  %v2962_v20 = vld [vmem:[%s3928_s1 + $0x60] ss:$16 sps:$4 sm:$0xff]   ;;  %v2963_v21 = vld [vmem:[%s3928_s1 + $0x68] ss:$16 sps:$4 sm:$0xff]  }
  0x1b   : > { %662 = vmatpush1.bf16.msra.mxu0 %v2944_v8  ;;  %775 = vmatpush1.bf16.msra.mxu1 %v2945_v9  ;;  %v2964_v22 = vld [vmem:[%s3928_s1 + $0x44] ss:$16 sps:$4 sm:$0xff]   ;;  %v2966_v23 = vld [vmem:[%s3928_s1 + $0x4c] ss:$16 sps:$4 sm:$0xff]   ;;  %v2968_v24 = vld [vmem:[%s3928_s1 + $0x40] ss:$16 sps:$4 sm:$0xff]  }
  0x1c   : > { %663 = vmatprep.subr.bf16.mxu0 %v2946_v10  ;;  %776 = vmatprep.subr.bf16.mxu1 %v2948_v11  ;;  %v2969_v25 = vld [vmem:[%s3928_s1 + $0x48] ss:$16 sps:$4 sm:$0xff]   ;;  %v2970_v26 = vld [vmem:[%s3928_s1 + $0x24] ss:$16 sps:$4 sm:$0xff]   ;;  %v2972_v27 = vld [vmem:[%s3928_s1 + $0x2c] ss:$16 sps:$4 sm:$0xff]  }
  0x1d   : > { %v2974_v28 = vld [vmem:[%s3928_s1 + $0x20] ss:$16 sps:$4 sm:$0xff]   ;;  %v2975_v29 = vld [vmem:[%s3928_s1 + $0x28] ss:$16 sps:$4 sm:$0xff]   ;;  %v2976_v30 = vld [vmem:[%s3928_s1 + $0x4] ss:$16 sps:$4 sm:$0xff]  }
  0x1e   : > { %v2978_v31 = vld [vmem:[%s3928_s1 + $0xc] ss:$16 sps:$4 sm:$0xff]   ;;  %v2980_v32 = vld [vmem:[%s3928_s1] ss:$16 sps:$4 sm:$0xff]   ;;  %v2981_v33 = vld [vmem:[%s3928_s1 + $0x8] ss:$16 sps:$4 sm:$0xff]  }
  0x1f   : > { %664 = vmatpush1.bf16.msra.mxu0 %v2950_v12  ;;  %777 = vmatpush1.bf16.msra.mxu1 %v2951_v13  ;;  %v2985_v34 = vld [vmem:[%s3932_s5 + $0xe4] ss:$16 sps:$4 sm:$0xff]   ;;  %v2988_v35 = vld [vmem:[%s3932_s5 + $0xec] ss:$16 sps:$4 sm:$0xff]   ;;  %v2983_v37 = vld [vmem:[%s3932_s5 + $0xe0] ss:$16 sps:$4 sm:$0xff]  }
  0x20   : > { %665 = vmatprep.subr.bf16.mxu0 %v2952_v14  ;;  %778 = vmatprep.subr.bf16.mxu1 %v2954_v15  ;;  %v2982_v36 = vld [vmem:[%s3261_s16] sm:$0xff]   ;;  %v2986_v38 = vld [vmem:[%s3932_s5 + $0xe8] ss:$16 sps:$4 sm:$0xff]   ;;  %v2995_v40 = vld [vmem:[%s3932_s5 + $0xcc] ss:$16 sps:$4 sm:$0xff]  }
  0x21   : > { %v2992_v39 = vld [vmem:[%s3932_s5 + $0xc4] ss:$16 sps:$4 sm:$0xff]   ;;  %v2990_v41 = vld [vmem:[%s3932_s5 + $0xc0] ss:$16 sps:$4 sm:$0xff]   ;;  %v2993_v42 = vld [vmem:[%s3932_s5 + $0xc8] ss:$16 sps:$4 sm:$0xff]  }
  0x22   : > { %v2999_v43 = vld [vmem:[%s3932_s5 + $0xa4] ss:$16 sps:$4 sm:$0xff]   ;;  %v3002_v44 = vld [vmem:[%s3932_s5 + $0xac] ss:$16 sps:$4 sm:$0xff]   ;;  %v2997_v46 = vld [vmem:[%s3932_s5 + $0xa0] ss:$16 sps:$4 sm:$0xff]  }
  0x23   : > { %666 = vmatpush1.bf16.msra.mxu0 %v2956_v16  ;;  %779 = vmatpush1.bf16.msra.mxu1 %v2957_v17  ;;  %v2989_v45 = vld [vmem:[%s3261_s16 + $0x8] sm:$0xff]   ;;  %v3006_v48 = vld [vmem:[%s3932_s5 + $0x84] ss:$16 sps:$4 sm:$0xff]   ;;  %v3004_v50 = vld [vmem:[%s3932_s5 + $0x80] ss:$16 sps:$4 sm:$0xff]  }
  0x24   : > { %667 = vmatprep.subr.bf16.mxu0 %v2958_v18  ;;  %780 = vmatprep.subr.bf16.mxu1 %v2960_v19  ;;  %v3000_v47 = vld [vmem:[%s3932_s5 + $0xa8] ss:$16 sps:$4 sm:$0xff]   ;;  %v3009_v49 = vld [vmem:[%s3932_s5 + $0x8c] ss:$16 sps:$4 sm:$0xff]   ;;  %v3013_v52 = vld [vmem:[%s3932_s5 + $0x64] ss:$16 sps:$4 sm:$0xff]   ;;  %v431_v19 = vlaneseq }
  0x25   : > { %v3007_v51 = vld [vmem:[%s3932_s5 + $0x88] ss:$16 sps:$4 sm:$0xff]   ;;  %v3016_v53 = vld [vmem:[%s3932_s5 + $0x6c] ss:$16 sps:$4 sm:$0xff]   ;;  %v2996_v54 = vld [vmem:[%s3261_s16 + $0x10] sm:$0xff]  }
  0x26   : > { %v3011_v55 = vld [vmem:[%s3932_s5 + $0x60] ss:$16 sps:$4 sm:$0xff]   ;;  %v3014_v56 = vld [vmem:[%s3932_s5 + $0x68] ss:$16 sps:$4 sm:$0xff]   ;;  %v3020_v57 = vld [vmem:[%s3932_s5 + $0x44] ss:$16 sps:$4 sm:$0xff]  }
  0x27   : > { %668 = vmatpush1.bf16.msra.mxu0 %v2962_v20  ;;  %781 = vmatpush1.bf16.msra.mxu1 %v2963_v21  ;;  %v3023_v58 = vld [vmem:[%s3932_s5 + $0x4c] ss:$16 sps:$4 sm:$0xff]   ;;  %v3018_v59 = vld [vmem:[%s3932_s5 + $0x40] ss:$16 sps:$4 sm:$0xff]   ;;  %v3021_v60 = vld [vmem:[%s3932_s5 + $0x48] ss:$16 sps:$4 sm:$0xff]  }
  0x28   : > { %669 = vmatprep.subr.bf16.mxu0 %v2964_v22  ;;  %782 = vmatprep.subr.bf16.mxu1 %v2966_v23  ;;  %v3027_v61 = vld [vmem:[%s3932_s5 + $0x24] ss:$16 sps:$4 sm:$0xff]   ;;  %v3030_v62 = vld [vmem:[%s3932_s5 + $0x2c] ss:$16 sps:$4 sm:$0xff]   ;;  %v3025_v0 = vld [vmem:[%s3932_s5 + $0x20] ss:$16 sps:$4 sm:$0xff]  }
  0x29   : > { %v3003_v63 = vld [vmem:[%s3261_s16 + $0x18] sm:$0xff]   ;;  %v3034_v2 = vld [vmem:[%s3932_s5 + $0x4] ss:$16 sps:$4 sm:$0xff]   ;;  %v3032_v5 = vld [vmem:[%s3932_s5] ss:$16 sps:$4 sm:$0xff]   ;;  %v3517_v20 = vshrl.u32 %v431_v19, 7 }
  0x2a   : > { %v3028_v1 = vld [vmem:[%s3932_s5 + $0x28] ss:$16 sps:$4 sm:$0xff]   ;;  %v3037_v4 = vld [vmem:[%s3932_s5 + $0xc] ss:$16 sps:$4 sm:$0xff]   ;;  %v3010_v7 = vld [vmem:[%s3261_s16 + $0x20] sm:$0xff]  }
  0x2b   : > { %670 = vmatpush1.bf16.msra.mxu0 %v2968_v24  ;;  %783 = vmatpush1.bf16.msra.mxu1 %v2969_v25  ;;  %v3035_v6 = vld [vmem:[%s3932_s5 + $0x8] ss:$16 sps:$4 sm:$0xff]   ;;  %v3024_v9 = vld [vmem:[%s3261_s16 + $0x30] sm:$0xff]   ;;  %v3038_v11 = vld [vmem:[%s3267_s19] sm:$0xff]   ;;  %v433_v21 = vsub.s32 0, %v3517_v20  ;;  %v441_v22 = vsub.s32 2, %v3517_v20 }
  0x2c   : > { %671 = vmatprep.subr.bf16.mxu0 %v2970_v26  ;;  %784 = vmatprep.subr.bf16.mxu1 %v2972_v27  ;;  %v3017_v8 = vld [vmem:[%s3261_s16 + $0x28] sm:$0xff]   ;;  %v3031_v10 = vld [vmem:[%s3261_s16 + $0x38] sm:$0xff]   ;;  %v3040_v13 = vld [vmem:[%s3267_s19 + $0x10] sm:$0xff]   ;;  %v437_v23 = vsub.s32 1, %v3517_v20  ;;  %v445_v24 = vsub.s32 3, %v3517_v20 }
  0x2d   : > { %v3039_v12 = vld [vmem:[%s3267_s19 + $0x8] sm:$0xff]   ;;  %v3041_v14 = vld [vmem:[%s3267_s19 + $0x18] sm:$0xff]   ;;  %v3042_v15 = vld [vmem:[%s3267_s19 + $0x20] sm:$0xff]  }
  0x2e   : > { %v3043_v16 = vld [vmem:[%s3267_s19 + $0x28] sm:$0xff]   ;;  %v3044_v17 = vld [vmem:[%s3267_s19 + $0x30] sm:$0xff]   ;;  %v3045_v18 = vld [vmem:[%s3267_s19 + $0x38] sm:$0xff]  }
  0x2f   : > { %672 = vmatpush1.bf16.msra.mxu0 %v2974_v28  ;;  %785 = vmatpush1.bf16.msra.mxu1 %v2975_v29  ;;  %v429_v25 = vld [vmem:[%s3930_s3] sm:$0xf] }
  0x30   : > { %673 = vmatprep.subr.bf16.mxu0 %v2976_v30  ;;  %786 = vmatprep.subr.bf16.mxu1 %v2978_v31  ;;  %v3532_v26 = vrot.slane %v429_v25, %v441_v22  ;;  %v3536_v27 = vrot.slane %v429_v25, %v437_v23  ;;  %v3540_v28 = vrot.slane %v429_v25, %v445_v24 }
  0x33   : > { %674 = vmatpush1.bf16.msra.mxu0 %v2980_v32  ;;  %787 = vmatpush1.bf16.msra.mxu1 %v2981_v33 }
  0x34   : > { %1387 = vmatprep.subr.bf16.mxu0 %v2985_v34  ;;  %1500 = vmatprep.subr.bf16.mxu1 %v2988_v35 }
  0x36   : > { %692 = vmatmul.mubr.bf16.vlgmr.msra.gmra.mxu0 %v2982_v36  ;;  %805 = vmatmul.mubr.bf16.vlgmr.msra.gmra.mxu1 %v2982_v36 }
  0x37   : > { %1388 = vmatpush1.bf16.msra.mxu0 %v2983_v37  ;;  %1501 = vmatpush1.bf16.msra.mxu1 %v2986_v38 }
  0x38   : > { %701 = vmatprep.mubr.bf16.mxu0 %v3191_v3  ;;  %814 = vmatprep.mubr.bf16.mxu1 %v3191_v3 }
  0x39   : > { %1389 = vmatprep.subr.bf16.mxu0 %v2992_v39  ;;  %1502 = vmatprep.subr.bf16.mxu1 %v2995_v40 }
  0x3b   : > { %1390 = vmatpush1.bf16.msra.mxu0 %v2990_v41  ;;  %1503 = vmatpush1.bf16.msra.mxu1 %v2993_v42 }
  0x3c   : > { %1391 = vmatprep.subr.bf16.mxu0 %v2999_v43  ;;  %1504 = vmatprep.subr.bf16.mxu1 %v3002_v44 }
  0x3e   : > { %702 = vmatmul.mubr.bf16.gmra.mxu0 %v2989_v45  ;;  %815 = vmatmul.mubr.bf16.gmra.mxu1 %v2989_v45 }
  0x3f   : > { %711 = vmatprep.mubr.bf16.mxu0 %v3191_v3  ;;  %824 = vmatprep.mubr.bf16.mxu1 %v3191_v3 }
  0x40   : > { %1392 = vmatpush1.bf16.msra.mxu0 %v2997_v46  ;;  %1505 = vmatpush1.bf16.msra.mxu1 %v3000_v47 }
  0x41   : > { %1393 = vmatprep.subr.bf16.mxu0 %v3006_v48  ;;  %1506 = vmatprep.subr.bf16.mxu1 %v3009_v49 }
  0x44   : > { %1394 = vmatpush1.bf16.msra.mxu0 %v3004_v50  ;;  %1507 = vmatpush1.bf16.msra.mxu1 %v3007_v51 }
  0x45   : > { %1395 = vmatprep.subr.bf16.mxu0 %v3013_v52  ;;  %1508 = vmatprep.subr.bf16.mxu1 %v3016_v53 }
  0x46   : > { %712 = vmatmul.mubr.bf16.gmra.mxu0 %v2996_v54  ;;  %825 = vmatmul.mubr.bf16.gmra.mxu1 %v2996_v54 }
  0x47   : > { %721 = vmatprep.mubr.bf16.mxu0 %v3191_v3  ;;  %834 = vmatprep.mubr.bf16.mxu1 %v3191_v3 }
  0x48   : > { %1396 = vmatpush1.bf16.msra.mxu0 %v3011_v55  ;;  %1509 = vmatpush1.bf16.msra.mxu1 %v3014_v56 }
  0x49   : > { %1397 = vmatprep.subr.bf16.mxu0 %v3020_v57  ;;  %1510 = vmatprep.subr.bf16.mxu1 %v3023_v58 }
  0x4c   : > { %1398 = vmatpush1.bf16.msra.mxu0 %v3018_v59  ;;  %1511 = vmatpush1.bf16.msra.mxu1 %v3021_v60 }
  0x4d   : > { %1399 = vmatprep.subr.bf16.mxu0 %v3027_v61  ;;  %1512 = vmatprep.subr.bf16.mxu1 %v3030_v62 }
  0x4e   : > { %722 = vmatmul.mubr.bf16.gmra.mxu0 %v3003_v63  ;;  %835 = vmatmul.mubr.bf16.gmra.mxu1 %v3003_v63 }
  0x4f   : > { %731 = vmatprep.mubr.bf16.mxu0 %v3191_v3  ;;  %844 = vmatprep.mubr.bf16.mxu1 %v3191_v3 }
  0x50   : > { %1400 = vmatpush1.bf16.msra.mxu0 %v3025_v0  ;;  %1513 = vmatpush1.bf16.msra.mxu1 %v3028_v1 }
  0x51   : > { %1401 = vmatprep.subr.bf16.mxu0 %v3034_v2  ;;  %1514 = vmatprep.subr.bf16.mxu1 %v3037_v4 }
  0x54   : > { %1402 = vmatpush1.bf16.msra.mxu0 %v3032_v5  ;;  %1515 = vmatpush1.bf16.msra.mxu1 %v3035_v6 }
  0x56   : > { %732 = vmatmul.mubr.bf16.gmra.mxu0 %v3010_v7  ;;  %845 = vmatmul.mubr.bf16.gmra.mxu1 %v3010_v7 }
  0x57   : > { %741 = vmatprep.mubr.bf16.mxu0 %v3191_v3  ;;  %854 = vmatprep.mubr.bf16.mxu1 %v3191_v3 }
  0x5e   : > { %742 = vmatmul.mubr.bf16.gmra.mxu0 %v3017_v8  ;;  %855 = vmatmul.mubr.bf16.gmra.mxu1 %v3017_v8 }
  0x5f   : > { %751 = vmatprep.mubr.bf16.mxu0 %v3191_v3  ;;  %864 = vmatprep.mubr.bf16.mxu1 %v3191_v3 }
  0x66   : > { %752 = vmatmul.mubr.bf16.gmra.mxu0 %v3024_v9  ;;  %865 = vmatmul.mubr.bf16.gmra.mxu1 %v3024_v9 }
  0x67   : > { %761 = vmatprep.mubr.bf16.mxu0 %v3191_v3  ;;  %874 = vmatprep.mubr.bf16.mxu1 %v3191_v3 }
  0x6e   : > { %762 = vmatmul.mubr.bf16.gmra.mxu0 %v3031_v10  ;;  %875 = vmatmul.mubr.bf16.gmra.mxu1 %v3031_v10 }
  0x6f   : > { %1419 = vmatprep.mubr.bf16.mxu0 %v3191_v3  ;;  %1532 = vmatprep.mubr.bf16.mxu1 %v3191_v3 }
  0x76   : > { %1420 = vmatmul.mubr.bf16.vlgmr.msra.gmra.mxu0 %v3038_v11  ;;  %1533 = vmatmul.mubr.bf16.vlgmr.msra.gmra.mxu1 %v3038_v11 }
  0x77   : > { %1429 = vmatprep.mubr.bf16.mxu0 %v3191_v3  ;;  %1542 = vmatprep.mubr.bf16.mxu1 %v3191_v3 }
  0x7e   : > { %1430 = vmatmul.mubr.bf16.gmra.mxu0 %v3039_v12  ;;  %1543 = vmatmul.mubr.bf16.gmra.mxu1 %v3039_v12 }
  0x7f   : > { %1439 = vmatprep.mubr.bf16.mxu0 %v3191_v3  ;;  %1552 = vmatprep.mubr.bf16.mxu1 %v3191_v3 }
  0x86   : > { %1440 = vmatmul.mubr.bf16.gmra.mxu0 %v3040_v13  ;;  %1553 = vmatmul.mubr.bf16.gmra.mxu1 %v3040_v13 }
  0x87   : > { %1449 = vmatprep.mubr.bf16.mxu0 %v3191_v3  ;;  %1562 = vmatprep.mubr.bf16.mxu1 %v3191_v3 }
  0x8e   : > { %1450 = vmatmul.mubr.bf16.gmra.mxu0 %v3041_v14  ;;  %1563 = vmatmul.mubr.bf16.gmra.mxu1 %v3041_v14 }
  0x8f   : > { %1459 = vmatprep.mubr.bf16.mxu0 %v3191_v3  ;;  %1572 = vmatprep.mubr.bf16.mxu1 %v3191_v3 }
  0x96   : > { %1460 = vmatmul.mubr.bf16.gmra.mxu0 %v3042_v15  ;;  %1573 = vmatmul.mubr.bf16.gmra.mxu1 %v3042_v15 }
  0x97   : > { %1469 = vmatprep.mubr.bf16.mxu0 %v3191_v3  ;;  %1582 = vmatprep.mubr.bf16.mxu1 %v3191_v3 }
  0x9e   : > { %1470 = vmatmul.mubr.bf16.gmra.mxu0 %v3043_v16  ;;  %1583 = vmatmul.mubr.bf16.gmra.mxu1 %v3043_v16 }
  0x9f   : > { %1479 = vmatprep.mubr.bf16.mxu0 %v3191_v3  ;;  %1592 = vmatprep.mubr.bf16.mxu1 %v3191_v3 }
  0xa6   : > { %1480 = vmatmul.mubr.bf16.gmra.mxu0 %v3044_v17  ;;  %1593 = vmatmul.mubr.bf16.gmra.mxu1 %v3044_v17 }
  0xa7   : > { %1489 = vmatprep.mubr.bf16.mxu0 %v3191_v3  ;;  %1602 = vmatprep.mubr.bf16.mxu1 %v3191_v3  ;;  %v3528_v3 = vrot.slane %v429_v25, %v433_v21 }
  0xae   : > { %1490 = vmatmul.mubr.bf16.gmra.mxu0 %v3045_v18  ;;  %1603 = vmatmul.mubr.bf16.gmra.mxu1 %v3045_v18 }
  0xf6   : > { %v693_v29 = vpop.f32.mrf.mxu0  ;;  %v806_v30 = vpop.f32.mrf.mxu1 }
  0xf7   : > { %v694_v33 = vadd.f32 %v693_v29, %v3528_v3  ;;  %v807_v34 = vadd.f32 %v806_v30, %v3532_v26 }
  0xf8   : > { %v695_v31 = vpop.f32.mrf.mxu0  ;;  %v808_v32 = vpop.f32.mrf.mxu1 }
  0xf9   : > { %v696_v35 = vadd.f32 %v695_v31, %v3536_v27  ;;  %v809_v36 = vadd.f32 %v808_v32, %v3540_v28 }
  0xfa   : > { %v697_v37 = vpop.f32.mrf.mxu0  ;;  %v810_v38 = vpop.f32.mrf.mxu1 }
  0xfb   : > { %v2849_v39 = vpack.c.bf16 %v696_v35, %v694_v33  ;;  %v2850_v40 = vpack.c.bf16 %v809_v36, %v807_v34  ;;  %v698_v43 = vadd.f32 %v697_v37, %v3528_v3  ;;  %v811_v44 = vadd.f32 %v810_v38, %v3532_v26 }
  0xfc   : > { %v699_v41 = vpop.f32.mrf.mxu0  ;;  %v812_v42 = vpop.f32.mrf.mxu1 }
  0xfd   : > { %1077 = vst [vmem:[#allocation2] sm:$0xff] %v2849_v39  ;;  %1078 = vst [vmem:[#allocation2 + $0x8] sm:$0xff] %v2850_v40  ;;  %v700_v45 = vadd.f32 %v699_v41, %v3536_v27  ;;  %v813_v46 = vadd.f32 %v812_v42, %v3540_v28 }
  0xfe   : > { %v703_v47 = vpop.f32.mrf.mxu0  ;;  %v816_v48 = vpop.f32.mrf.mxu1 }
  0xff   : > { %v2851_v49 = vpack.c.bf16 %v700_v45, %v698_v43  ;;  %v2852_v50 = vpack.c.bf16 %v813_v46, %v811_v44  ;;  %v704_v53 = vadd.f32 %v703_v47, %v3528_v3  ;;  %v817_v54 = vadd.f32 %v816_v48, %v3532_v26 }
 0x100   : > { %v705_v51 = vpop.f32.mrf.mxu0  ;;  %v818_v52 = vpop.f32.mrf.mxu1 }
 0x101   : > { %1079 = vst [vmem:[#allocation2 + $0x10] sm:$0xff] %v2851_v49  ;;  %1080 = vst [vmem:[#allocation2 + $0x18] sm:$0xff] %v2852_v50  ;;  %v706_v55 = vadd.f32 %v705_v51, %v3536_v27  ;;  %v819_v56 = vadd.f32 %v818_v52, %v3540_v28 }
 0x102   : > { %v707_v57 = vpop.f32.mrf.mxu0  ;;  %v820_v58 = vpop.f32.mrf.mxu1 }
 0x103   : > { %v2853_v59 = vpack.c.bf16 %v706_v55, %v704_v53  ;;  %v2854_v60 = vpack.c.bf16 %v819_v56, %v817_v54  ;;  %v708_v63 = vadd.f32 %v707_v57, %v3528_v3  ;;  %v821_v0 = vadd.f32 %v820_v58, %v3532_v26 }
 0x104   : > { %v709_v61 = vpop.f32.mrf.mxu0  ;;  %v822_v62 = vpop.f32.mrf.mxu1 }
 0x105   : > { %1081 = vst [vmem:[#allocation2 + $0x20] sm:$0xff] %v2853_v59  ;;  %1082 = vst [vmem:[#allocation2 + $0x28] sm:$0xff] %v2854_v60  ;;  %v710_v1 = vadd.f32 %v709_v61, %v3536_v27  ;;  %v823_v2 = vadd.f32 %v822_v62, %v3540_v28 }
 0x106   : > { %v713_v4 = vpop.f32.mrf.mxu0  ;;  %v826_v5 = vpop.f32.mrf.mxu1 }
 0x107   : > { %v2855_v6 = vpack.c.bf16 %v710_v1, %v708_v63  ;;  %v2856_v7 = vpack.c.bf16 %v823_v2, %v821_v0  ;;  %v714_v10 = vadd.f32 %v713_v4, %v3528_v3  ;;  %v827_v11 = vadd.f32 %v826_v5, %v3532_v26 }
 0x108   : > { %v715_v8 = vpop.f32.mrf.mxu0  ;;  %v828_v9 = vpop.f32.mrf.mxu1 }
 0x109   : > { %1083 = vst [vmem:[#allocation2 + $0x30] sm:$0xff] %v2855_v6  ;;  %1084 = vst [vmem:[#allocation2 + $0x38] sm:$0xff] %v2856_v7  ;;  %v716_v12 = vadd.f32 %v715_v8, %v3536_v27  ;;  %v829_v13 = vadd.f32 %v828_v9, %v3540_v28 }
 0x10a   : > { %v717_v14 = vpop.f32.mrf.mxu0  ;;  %v830_v15 = vpop.f32.mrf.mxu1 }
 0x10b   : > { %v2857_v16 = vpack.c.bf16 %v716_v12, %v714_v10  ;;  %v2858_v17 = vpack.c.bf16 %v829_v13, %v827_v11  ;;  %v718_v25 = vadd.f32 %v717_v14, %v3528_v3  ;;  %v831_v29 = vadd.f32 %v830_v15, %v3532_v26 }
 0x10c   : > { %v719_v18 = vpop.f32.mrf.mxu0  ;;  %v832_v19 = vpop.f32.mrf.mxu1 }
 0x10d   : > { %1085 = vst [vmem:[#allocation2 + $0x40] sm:$0xff] %v2857_v16  ;;  %1086 = vst [vmem:[#allocation2 + $0x48] sm:$0xff] %v2858_v17  ;;  %v720_v30 = vadd.f32 %v719_v18, %v3536_v27  ;;  %v833_v31 = vadd.f32 %v832_v19, %v3540_v28 }
 0x10e   : > { %v723_v32 = vpop.f32.mrf.mxu0  ;;  %v836_v33 = vpop.f32.mrf.mxu1 }
 0x10f   : > { %v2859_v34 = vpack.c.bf16 %v720_v30, %v718_v25  ;;  %v2860_v35 = vpack.c.bf16 %v833_v31, %v831_v29  ;;  %v724_v38 = vadd.f32 %v723_v32, %v3528_v3  ;;  %v837_v39 = vadd.f32 %v836_v33, %v3532_v26 }
 0x110   : > { %v725_v36 = vpop.f32.mrf.mxu0  ;;  %v838_v37 = vpop.f32.mrf.mxu1 }
 0x111   : > { %1087 = vst [vmem:[#allocation2 + $0x50] sm:$0xff] %v2859_v34  ;;  %1088 = vst [vmem:[#allocation2 + $0x58] sm:$0xff] %v2860_v35  ;;  %v726_v40 = vadd.f32 %v725_v36, %v3536_v27  ;;  %v839_v41 = vadd.f32 %v838_v37, %v3540_v28 }
 0x112   : > { %v727_v42 = vpop.f32.mrf.mxu0  ;;  %v840_v43 = vpop.f32.mrf.mxu1 }
 0x113   : > { %v2861_v44 = vpack.c.bf16 %v726_v40, %v724_v38  ;;  %v2862_v45 = vpack.c.bf16 %v839_v41, %v837_v39  ;;  %v728_v48 = vadd.f32 %v727_v42, %v3528_v3  ;;  %v841_v49 = vadd.f32 %v840_v43, %v3532_v26 }
 0x114   : > { %v729_v46 = vpop.f32.mrf.mxu0  ;;  %v842_v47 = vpop.f32.mrf.mxu1 }
 0x115   : > { %1089 = vst [vmem:[#allocation2 + $0x60] sm:$0xff] %v2861_v44  ;;  %1090 = vst [vmem:[#allocation2 + $0x68] sm:$0xff] %v2862_v45  ;;  %v730_v50 = vadd.f32 %v729_v46, %v3536_v27  ;;  %v843_v51 = vadd.f32 %v842_v47, %v3540_v28 }
 0x116   : > { %v733_v52 = vpop.f32.mrf.mxu0  ;;  %v846_v53 = vpop.f32.mrf.mxu1 }
 0x117   : > { %v2863_v54 = vpack.c.bf16 %v730_v50, %v728_v48  ;;  %v2864_v55 = vpack.c.bf16 %v843_v51, %v841_v49  ;;  %v734_v58 = vadd.f32 %v733_v52, %v3528_v3  ;;  %v847_v59 = vadd.f32 %v846_v53, %v3532_v26 }
 0x118   : > { %v735_v56 = vpop.f32.mrf.mxu0  ;;  %v848_v57 = vpop.f32.mrf.mxu1 }
 0x119   : > { %1091 = vst [vmem:[#allocation2 + $0x70] sm:$0xff] %v2863_v54  ;;  %1092 = vst [vmem:[#allocation2 + $0x78] sm:$0xff] %v2864_v55  ;;  %v736_v60 = vadd.f32 %v735_v56, %v3536_v27  ;;  %v849_v61 = vadd.f32 %v848_v57, %v3540_v28 }
 0x11a   : > { %v737_v62 = vpop.f32.mrf.mxu0  ;;  %v850_v63 = vpop.f32.mrf.mxu1 }
 0x11b   : > { %v2865_v0 = vpack.c.bf16 %v736_v60, %v734_v58  ;;  %v2866_v1 = vpack.c.bf16 %v849_v61, %v847_v59  ;;  %v738_v5 = vadd.f32 %v737_v62, %v3528_v3  ;;  %v851_v6 = vadd.f32 %v850_v63, %v3532_v26 }
 0x11c   : > { %v739_v2 = vpop.f32.mrf.mxu0  ;;  %v852_v4 = vpop.f32.mrf.mxu1 }
 0x11d   : > { %1093 = vst [vmem:[#allocation2 + $0x80] sm:$0xff] %v2865_v0  ;;  %1094 = vst [vmem:[#allocation2 + $0x88] sm:$0xff] %v2866_v1  ;;  %v740_v7 = vadd.f32 %v739_v2, %v3536_v27  ;;  %v853_v8 = vadd.f32 %v852_v4, %v3540_v28  ;;  %v1157_v4 = vld [vmem:[%s3934_s7] sm:$0xf] }
 0x11e   : > { %v743_v9 = vpop.f32.mrf.mxu0  ;;  %v856_v10 = vpop.f32.mrf.mxu1 }
 0x11f   : > { %v2867_v11 = vpack.c.bf16 %v740_v7, %v738_v5  ;;  %v2868_v12 = vpack.c.bf16 %v853_v8, %v851_v6  ;;  %v744_v15 = vadd.f32 %v743_v9, %v3528_v3  ;;  %v857_v16 = vadd.f32 %v856_v10, %v3532_v26 }
 0x120   : > { %v745_v13 = vpop.f32.mrf.mxu0  ;;  %v858_v14 = vpop.f32.mrf.mxu1 }
 0x121   : > { %1095 = vst [vmem:[#allocation2 + $0x90] sm:$0xff] %v2867_v11  ;;  %1096 = vst [vmem:[#allocation2 + $0x98] sm:$0xff] %v2868_v12  ;;  %v746_v17 = vadd.f32 %v745_v13, %v3536_v27  ;;  %v859_v18 = vadd.f32 %v858_v14, %v3540_v28  ;;  %v3607_v11 = vrot.slane %v1157_v4, %v433_v21 }
 0x122   : > { %v747_v19 = vpop.f32.mrf.mxu0  ;;  %v860_v25 = vpop.f32.mrf.mxu1  ;;  %v3611_v12 = vrot.slane %v1157_v4, %v441_v22  ;;  %v3615_v13 = vrot.slane %v1157_v4, %v437_v23  ;;  %v3619_v14 = vrot.slane %v1157_v4, %v445_v24 }
 0x123   : > { %v2869_v29 = vpack.c.bf16 %v746_v17, %v744_v15  ;;  %v2870_v30 = vpack.c.bf16 %v859_v18, %v857_v16  ;;  %v748_v33 = vadd.f32 %v747_v19, %v3528_v3  ;;  %v861_v34 = vadd.f32 %v860_v25, %v3532_v26 }
 0x124   : > { %v749_v31 = vpop.f32.mrf.mxu0  ;;  %v862_v32 = vpop.f32.mrf.mxu1 }
 0x125   : > { %1097 = vst [vmem:[#allocation2 + $0xa0] sm:$0xff] %v2869_v29  ;;  %1098 = vst [vmem:[#allocation2 + $0xa8] sm:$0xff] %v2870_v30  ;;  %v750_v35 = vadd.f32 %v749_v31, %v3536_v27  ;;  %v863_v36 = vadd.f32 %v862_v32, %v3540_v28 }
 0x126   : > { %v753_v37 = vpop.f32.mrf.mxu0  ;;  %v866_v38 = vpop.f32.mrf.mxu1 }
 0x127   : > { %v2871_v39 = vpack.c.bf16 %v750_v35, %v748_v33  ;;  %v2872_v40 = vpack.c.bf16 %v863_v36, %v861_v34  ;;  %v754_v43 = vadd.f32 %v753_v37, %v3528_v3  ;;  %v867_v44 = vadd.f32 %v866_v38, %v3532_v26 }
 0x128   : > { %v755_v41 = vpop.f32.mrf.mxu0  ;;  %v868_v42 = vpop.f32.mrf.mxu1 }
 0x129   : > { %1099 = vst [vmem:[#allocation2 + $0xb0] sm:$0xff] %v2871_v39  ;;  %1100 = vst [vmem:[#allocation2 + $0xb8] sm:$0xff] %v2872_v40  ;;  %v756_v45 = vadd.f32 %v755_v41, %v3536_v27  ;;  %v869_v46 = vadd.f32 %v868_v42, %v3540_v28 }
 0x12a   : > { %v757_v47 = vpop.f32.mrf.mxu0  ;;  %v870_v48 = vpop.f32.mrf.mxu1 }
 0x12b   : > { %v2873_v49 = vpack.c.bf16 %v756_v45, %v754_v43  ;;  %v2874_v50 = vpack.c.bf16 %v869_v46, %v867_v44  ;;  %v758_v53 = vadd.f32 %v757_v47, %v3528_v3  ;;  %v871_v54 = vadd.f32 %v870_v48, %v3532_v26 }
 0x12c   : > { %v759_v51 = vpop.f32.mrf.mxu0  ;;  %v872_v52 = vpop.f32.mrf.mxu1 }
 0x12d   : > { %1101 = vst [vmem:[#allocation2 + $0xc0] sm:$0xff] %v2873_v49  ;;  %1102 = vst [vmem:[#allocation2 + $0xc8] sm:$0xff] %v2874_v50  ;;  %v760_v55 = vadd.f32 %v759_v51, %v3536_v27  ;;  %v873_v56 = vadd.f32 %v872_v52, %v3540_v28 }
 0x12e   : > { %v763_v57 = vpop.f32.mrf.mxu0  ;;  %v876_v58 = vpop.f32.mrf.mxu1 }
 0x12f   : > { %v2875_v59 = vpack.c.bf16 %v760_v55, %v758_v53  ;;  %v2876_v60 = vpack.c.bf16 %v873_v56, %v871_v54  ;;  %v764_v63 = vadd.f32 %v763_v57, %v3528_v3  ;;  %v877_v0 = vadd.f32 %v876_v58, %v3532_v26 }
 0x130   : > { %v765_v61 = vpop.f32.mrf.mxu0  ;;  %v878_v62 = vpop.f32.mrf.mxu1 }
 0x131   : > { %1103 = vst [vmem:[#allocation2 + $0xd0] sm:$0xff] %v2875_v59  ;;  %1104 = vst [vmem:[#allocation2 + $0xd8] sm:$0xff] %v2876_v60  ;;  %v766_v1 = vadd.f32 %v765_v61, %v3536_v27  ;;  %v879_v2 = vadd.f32 %v878_v62, %v3540_v28 }
 0x132   : > { %v767_v5 = vpop.f32.mrf.mxu0  ;;  %v880_v6 = vpop.f32.mrf.mxu1 }
 0x133   : > { %v2877_v7 = vpack.c.bf16 %v766_v1, %v764_v63  ;;  %v2878_v8 = vpack.c.bf16 %v879_v2, %v877_v0  ;;  %v768_v15 = vadd.f32 %v767_v5, %v3528_v3  ;;  %v881_v16 = vadd.f32 %v880_v6, %v3532_v26 }
 0x134   : > { %v769_v9 = vpop.f32.mrf.mxu0  ;;  %v882_v10 = vpop.f32.mrf.mxu1 }
 0x135   : > { %1105 = vst [vmem:[#allocation2 + $0xe0] sm:$0xff] %v2877_v7  ;;  %1106 = vst [vmem:[#allocation2 + $0xe8] sm:$0xff] %v2878_v8  ;;  %v770_v21 = vadd.f32 %v769_v9, %v3536_v27  ;;  %v883_v17 = vadd.f32 %v882_v10, %v3540_v28 }
 0x136   : > { %v1421_v22 = vpop.f32.mrf.mxu0  ;;  %v1534_v18 = vpop.f32.mrf.mxu1 }
 0x137   : > { %v2879_v19 = vpack.c.bf16 %v770_v21, %v768_v15  ;;  %v2880_v25 = vpack.c.bf16 %v883_v17, %v881_v16  ;;  %v1422_v20 = vadd.f32 %v1421_v22, %v3607_v11  ;;  %v1535_v24 = vadd.f32 %v1534_v18, %v3611_v12 }
 0x138   : > { %v1423_v23 = vpop.f32.mrf.mxu0  ;;  %v1536_v29 = vpop.f32.mrf.mxu1 }
 0x139   : > { %1107 = vst [vmem:[#allocation2 + $0xf0] sm:$0xff] %v2879_v19  ;;  %1108 = vst [vmem:[#allocation2 + $0xf8] sm:$0xff] %v2880_v25  ;;  %v1424_v3 = vadd.f32 %v1423_v23, %v3615_v13  ;;  %v1537_v26 = vadd.f32 %v1536_v29, %v3619_v14 }
 0x13a   : > { %v1425_v30 = vpop.f32.mrf.mxu0  ;;  %v1538_v27 = vpop.f32.mrf.mxu1 }
 0x13b   : > { %v2881_v31 = vpack.c.bf16 %v1424_v3, %v1422_v20  ;;  %v2882_v28 = vpack.c.bf16 %v1537_v26, %v1535_v24  ;;  %v1426_v34 = vadd.f32 %v1425_v30, %v3607_v11  ;;  %v1539_v35 = vadd.f32 %v1538_v27, %v3611_v12 }
 0x13c   : > { %v1427_v32 = vpop.f32.mrf.mxu0  ;;  %v1540_v33 = vpop.f32.mrf.mxu1 }
 0x13d   : > { %1805 = vst [vmem:[#allocation3] sm:$0xff] %v2881_v31  ;;  %1806 = vst [vmem:[#allocation3 + $0x8] sm:$0xff] %v2882_v28  ;;  %v1428_v36 = vadd.f32 %v1427_v32, %v3615_v13  ;;  %v1541_v37 = vadd.f32 %v1540_v33, %v3619_v14 }
 0x13e   : > { %v1431_v38 = vpop.f32.mrf.mxu0  ;;  %v1544_v39 = vpop.f32.mrf.mxu1 }
 0x13f   : > { %v2883_v40 = vpack.c.bf16 %v1428_v36, %v1426_v34  ;;  %v2884_v41 = vpack.c.bf16 %v1541_v37, %v1539_v35  ;;  %v1432_v44 = vadd.f32 %v1431_v38, %v3607_v11  ;;  %v1545_v45 = vadd.f32 %v1544_v39, %v3611_v12 }
 0x140   : > { %v1433_v42 = vpop.f32.mrf.mxu0  ;;  %v1546_v43 = vpop.f32.mrf.mxu1 }
 0x141   : > { %1807 = vst [vmem:[#allocation3 + $0x10] sm:$0xff] %v2883_v40  ;;  %1808 = vst [vmem:[#allocation3 + $0x18] sm:$0xff] %v2884_v41  ;;  %v1434_v46 = vadd.f32 %v1433_v42, %v3615_v13  ;;  %v1547_v47 = vadd.f32 %v1546_v43, %v3619_v14 }
 0x142   : > { %v1435_v48 = vpop.f32.mrf.mxu0  ;;  %v1548_v49 = vpop.f32.mrf.mxu1 }
 0x143   : > { %v2885_v50 = vpack.c.bf16 %v1434_v46, %v1432_v44  ;;  %v2886_v51 = vpack.c.bf16 %v1547_v47, %v1545_v45  ;;  %v1436_v54 = vadd.f32 %v1435_v48, %v3607_v11  ;;  %v1549_v55 = vadd.f32 %v1548_v49, %v3611_v12 }
 0x144   : > { %v1437_v52 = vpop.f32.mrf.mxu0  ;;  %v1550_v53 = vpop.f32.mrf.mxu1 }
 0x145   : > { %1809 = vst [vmem:[#allocation3 + $0x20] sm:$0xff] %v2885_v50  ;;  %1810 = vst [vmem:[#allocation3 + $0x28] sm:$0xff] %v2886_v51  ;;  %v1438_v56 = vadd.f32 %v1437_v52, %v3615_v13  ;;  %v1551_v57 = vadd.f32 %v1550_v53, %v3619_v14 }
 0x146   : > { %v1441_v58 = vpop.f32.mrf.mxu0  ;;  %v1554_v59 = vpop.f32.mrf.mxu1 }
 0x147   : > { %v2887_v60 = vpack.c.bf16 %v1438_v56, %v1436_v54  ;;  %v2888_v61 = vpack.c.bf16 %v1551_v57, %v1549_v55  ;;  %v1442_v0 = vadd.f32 %v1441_v58, %v3607_v11  ;;  %v1555_v1 = vadd.f32 %v1554_v59, %v3611_v12 }
 0x148   : > { %v1443_v62 = vpop.f32.mrf.mxu0  ;;  %v1556_v63 = vpop.f32.mrf.mxu1 }
 0x149   : > { %1811 = vst [vmem:[#allocation3 + $0x30] sm:$0xff] %v2887_v60  ;;  %1812 = vst [vmem:[#allocation3 + $0x38] sm:$0xff] %v2888_v61  ;;  %v1444_v2 = vadd.f32 %v1443_v62, %v3615_v13  ;;  %v1557_v4 = vadd.f32 %v1556_v63, %v3619_v14 }
 0x14a   : > { %v1445_v5 = vpop.f32.mrf.mxu0  ;;  %v1558_v6 = vpop.f32.mrf.mxu1 }
 0x14b   : > { %v2889_v7 = vpack.c.bf16 %v1444_v2, %v1442_v0  ;;  %v2890_v8 = vpack.c.bf16 %v1557_v4, %v1555_v1  ;;  %v1446_v15 = vadd.f32 %v1445_v5, %v3607_v11  ;;  %v1559_v16 = vadd.f32 %v1558_v6, %v3611_v12 }
 0x14c   : > { %v1447_v9 = vpop.f32.mrf.mxu0  ;;  %v1560_v10 = vpop.f32.mrf.mxu1 }
 0x14d   : > { %1813 = vst [vmem:[#allocation3 + $0x40] sm:$0xff] %v2889_v7  ;;  %1814 = vst [vmem:[#allocation3 + $0x48] sm:$0xff] %v2890_v8  ;;  %v1448_v21 = vadd.f32 %v1447_v9, %v3615_v13  ;;  %v1561_v17 = vadd.f32 %v1560_v10, %v3619_v14 }
 0x14e   : > { %v1451_v22 = vpop.f32.mrf.mxu0  ;;  %v1564_v18 = vpop.f32.mrf.mxu1 }
 0x14f   : > { %v2891_v19 = vpack.c.bf16 %v1448_v21, %v1446_v15  ;;  %v2892_v25 = vpack.c.bf16 %v1561_v17, %v1559_v16  ;;  %v1452_v20 = vadd.f32 %v1451_v22, %v3607_v11  ;;  %v1565_v24 = vadd.f32 %v1564_v18, %v3611_v12 }
 0x150   : > { %v1453_v23 = vpop.f32.mrf.mxu0  ;;  %v1566_v29 = vpop.f32.mrf.mxu1 }
 0x151   : > { %1815 = vst [vmem:[#allocation3 + $0x50] sm:$0xff] %v2891_v19  ;;  %1816 = vst [vmem:[#allocation3 + $0x58] sm:$0xff] %v2892_v25  ;;  %v1454_v3 = vadd.f32 %v1453_v23, %v3615_v13  ;;  %v1567_v26 = vadd.f32 %v1566_v29, %v3619_v14 }
 0x152   : > { %v1455_v30 = vpop.f32.mrf.mxu0  ;;  %v1568_v27 = vpop.f32.mrf.mxu1 }
 0x153   : > { %v2893_v31 = vpack.c.bf16 %v1454_v3, %v1452_v20  ;;  %v2894_v28 = vpack.c.bf16 %v1567_v26, %v1565_v24  ;;  %v1456_v34 = vadd.f32 %v1455_v30, %v3607_v11  ;;  %v1569_v35 = vadd.f32 %v1568_v27, %v3611_v12 }
 0x154   : > { %v1457_v32 = vpop.f32.mrf.mxu0  ;;  %v1570_v33 = vpop.f32.mrf.mxu1 }
 0x155   : > { %1817 = vst [vmem:[#allocation3 + $0x60] sm:$0xff] %v2893_v31  ;;  %1818 = vst [vmem:[#allocation3 + $0x68] sm:$0xff] %v2894_v28  ;;  %v1458_v36 = vadd.f32 %v1457_v32, %v3615_v13  ;;  %v1571_v37 = vadd.f32 %v1570_v33, %v3619_v14 }
 0x156   : > { %v1461_v38 = vpop.f32.mrf.mxu0  ;;  %v1574_v39 = vpop.f32.mrf.mxu1 }
 0x157   : > { %v2895_v40 = vpack.c.bf16 %v1458_v36, %v1456_v34  ;;  %v2896_v41 = vpack.c.bf16 %v1571_v37, %v1569_v35  ;;  %v1462_v44 = vadd.f32 %v1461_v38, %v3607_v11  ;;  %v1575_v45 = vadd.f32 %v1574_v39, %v3611_v12 }
 0x158   : > { %v1463_v42 = vpop.f32.mrf.mxu0  ;;  %v1576_v43 = vpop.f32.mrf.mxu1 }
 0x159   : > { %1819 = vst [vmem:[#allocation3 + $0x70] sm:$0xff] %v2895_v40  ;;  %1820 = vst [vmem:[#allocation3 + $0x78] sm:$0xff] %v2896_v41  ;;  %v1464_v46 = vadd.f32 %v1463_v42, %v3615_v13  ;;  %v1577_v47 = vadd.f32 %v1576_v43, %v3619_v14 }
 0x15a   : > { %v1465_v48 = vpop.f32.mrf.mxu0  ;;  %v1578_v49 = vpop.f32.mrf.mxu1 }
 0x15b   : > { %v2897_v50 = vpack.c.bf16 %v1464_v46, %v1462_v44  ;;  %v2898_v51 = vpack.c.bf16 %v1577_v47, %v1575_v45  ;;  %v1466_v54 = vadd.f32 %v1465_v48, %v3607_v11  ;;  %v1579_v55 = vadd.f32 %v1578_v49, %v3611_v12 }
 0x15c   : > { %v1467_v52 = vpop.f32.mrf.mxu0  ;;  %v1580_v53 = vpop.f32.mrf.mxu1 }
 0x15d   : > { %1821 = vst [vmem:[#allocation3 + $0x80] sm:$0xff] %v2897_v50  ;;  %1822 = vst [vmem:[#allocation3 + $0x88] sm:$0xff] %v2898_v51  ;;  %v1468_v56 = vadd.f32 %v1467_v52, %v3615_v13  ;;  %v1581_v57 = vadd.f32 %v1580_v53, %v3619_v14 }
 0x15e   : > { %v1471_v58 = vpop.f32.mrf.mxu0  ;;  %v1584_v59 = vpop.f32.mrf.mxu1 }
 0x15f   : > { %v2899_v60 = vpack.c.bf16 %v1468_v56, %v1466_v54  ;;  %v2900_v61 = vpack.c.bf16 %v1581_v57, %v1579_v55  ;;  %v1472_v0 = vadd.f32 %v1471_v58, %v3607_v11  ;;  %v1585_v1 = vadd.f32 %v1584_v59, %v3611_v12 }
 0x160   : > { %v1473_v62 = vpop.f32.mrf.mxu0  ;;  %v1586_v63 = vpop.f32.mrf.mxu1 }
 0x161   : > { %1823 = vst [vmem:[#allocation3 + $0x90] sm:$0xff] %v2899_v60  ;;  %1824 = vst [vmem:[#allocation3 + $0x98] sm:$0xff] %v2900_v61  ;;  %v1474_v2 = vadd.f32 %v1473_v62, %v3615_v13  ;;  %v1587_v4 = vadd.f32 %v1586_v63, %v3619_v14 }
 0x162   : > { %v1475_v5 = vpop.f32.mrf.mxu0  ;;  %v1588_v6 = vpop.f32.mrf.mxu1 }
 0x163   : > { %v2901_v7 = vpack.c.bf16 %v1474_v2, %v1472_v0  ;;  %v2902_v8 = vpack.c.bf16 %v1587_v4, %v1585_v1  ;;  %v1476_v15 = vadd.f32 %v1475_v5, %v3607_v11  ;;  %v1589_v16 = vadd.f32 %v1588_v6, %v3611_v12 }
 0x164   : > { %v1477_v9 = vpop.f32.mrf.mxu0  ;;  %v1590_v10 = vpop.f32.mrf.mxu1 }
 0x165   : > { %1825 = vst [vmem:[#allocation3 + $0xa0] sm:$0xff] %v2901_v7  ;;  %1826 = vst [vmem:[#allocation3 + $0xa8] sm:$0xff] %v2902_v8  ;;  %v1478_v21 = vadd.f32 %v1477_v9, %v3615_v13  ;;  %v1591_v17 = vadd.f32 %v1590_v10, %v3619_v14 }
 0x166   : > { %v1481_v22 = vpop.f32.mrf.mxu0  ;;  %v1594_v18 = vpop.f32.mrf.mxu1 }
 0x167   : > { %v2903_v19 = vpack.c.bf16 %v1478_v21, %v1476_v15  ;;  %v2904_v25 = vpack.c.bf16 %v1591_v17, %v1589_v16  ;;  %v1482_v20 = vadd.f32 %v1481_v22, %v3607_v11  ;;  %v1595_v24 = vadd.f32 %v1594_v18, %v3611_v12 }
 0x168   : > { %v1483_v23 = vpop.f32.mrf.mxu0  ;;  %v1596_v29 = vpop.f32.mrf.mxu1 }
 0x169   : > { %1827 = vst [vmem:[#allocation3 + $0xb0] sm:$0xff] %v2903_v19  ;;  %1828 = vst [vmem:[#allocation3 + $0xb8] sm:$0xff] %v2904_v25  ;;  %v1484_v3 = vadd.f32 %v1483_v23, %v3615_v13  ;;  %v1597_v26 = vadd.f32 %v1596_v29, %v3619_v14 }
 0x16a   : > { %v1485_v30 = vpop.f32.mrf.mxu0  ;;  %v1598_v27 = vpop.f32.mrf.mxu1 }
 0x16b   : > { %v2905_v31 = vpack.c.bf16 %v1484_v3, %v1482_v20  ;;  %v2906_v28 = vpack.c.bf16 %v1597_v26, %v1595_v24  ;;  %v1486_v34 = vadd.f32 %v1485_v30, %v3607_v11  ;;  %v1599_v35 = vadd.f32 %v1598_v27, %v3611_v12 }
 0x16c   : > { %v1487_v32 = vpop.f32.mrf.mxu0  ;;  %v1600_v33 = vpop.f32.mrf.mxu1 }
 0x16d   : > { %1829 = vst [vmem:[#allocation3 + $0xc0] sm:$0xff] %v2905_v31  ;;  %1830 = vst [vmem:[#allocation3 + $0xc8] sm:$0xff] %v2906_v28  ;;  %v1488_v36 = vadd.f32 %v1487_v32, %v3615_v13  ;;  %v1601_v37 = vadd.f32 %v1600_v33, %v3619_v14 }
 0x16e   : > { %v1491_v38 = vpop.f32.mrf.mxu0  ;;  %v1604_v39 = vpop.f32.mrf.mxu1 }
 0x16f   : > { %v2907_v40 = vpack.c.bf16 %v1488_v36, %v1486_v34  ;;  %v2908_v41 = vpack.c.bf16 %v1601_v37, %v1599_v35  ;;  %v1492_v44 = vadd.f32 %v1491_v38, %v3607_v11  ;;  %v1605_v45 = vadd.f32 %v1604_v39, %v3611_v12 }
 0x170   : > { %v1493_v42 = vpop.f32.mrf.mxu0  ;;  %v1606_v43 = vpop.f32.mrf.mxu1 }
 0x171   : > { %1831 = vst [vmem:[#allocation3 + $0xd0] sm:$0xff] %v2907_v40  ;;  %1832 = vst [vmem:[#allocation3 + $0xd8] sm:$0xff] %v2908_v41  ;;  %v1494_v46 = vadd.f32 %v1493_v42, %v3615_v13  ;;  %v1607_v47 = vadd.f32 %v1606_v43, %v3619_v14 }
 0x172   : > { %v1495_v48 = vpop.f32.mrf.mxu0  ;;  %v1608_v49 = vpop.f32.mrf.mxu1 }
 0x173   : > { %v2909_v50 = vpack.c.bf16 %v1494_v46, %v1492_v44  ;;  %v2910_v51 = vpack.c.bf16 %v1607_v47, %v1605_v45  ;;  %v1496_v54 = vadd.f32 %v1495_v48, %v3607_v11  ;;  %v1609_v55 = vadd.f32 %v1608_v49, %v3611_v12 }
 0x174   : > { %v1497_v52 = vpop.f32.mrf.mxu0  ;;  %v1610_v53 = vpop.f32.mrf.mxu1 }
 0x175   : > { %1833 = vst [vmem:[#allocation3 + $0xe0] sm:$0xff] %v2909_v50  ;;  %1834 = vst [vmem:[#allocation3 + $0xe8] sm:$0xff] %v2910_v51  ;;  %v1498_v56 = vadd.f32 %v1497_v52, %v3615_v13  ;;  %v1611_v57 = vadd.f32 %v1610_v53, %v3619_v14 }
 0x177   : > { %v2911_v58 = vpack.c.bf16 %v1498_v56, %v1496_v54  ;;  %v2912_v59 = vpack.c.bf16 %v1611_v57, %v1609_v55 }
 0x179   : > { %1835 = vst [vmem:[#allocation3 + $0xf0] sm:$0xff] %v2911_v58  ;;  %1836 = vst [vmem:[#allocation3 + $0xf8] sm:$0xff] %v2912_v59 }
 0x17a LB: >> { %v3046_v11 = vld [vmem:[%s3929_s2 + $0xe4] ss:$16 sps:$4 sm:$0xff]   ;;  %v3048_v12 = vld [vmem:[%s3929_s2 + $0xe0] ss:$16 sps:$4 sm:$0xff]   ;;  %v3192_v13 = vmov 0   ;;  %s2771_s24 = sshll.u32 %s3188_s10, 3  ;;  %s2466_s28 = sadd.s32 %s3188_s10, %s3251_s11  ;;  %s3188_s10 = sphi %s3689_s10, %s1843_s10  }
 0x17b   : >> { %2085 = vmatprep.mubr.bf16.mxu0 %v3192_v13  ;;  %2126 = vmatprep.mubr.bf16.mxu1 %v3192_v13  ;;  %v3049_v14 = vld [vmem:[%s3929_s2 + $0xc4] ss:$16 sps:$4 sm:$0xff]   ;;  %v3051_v60 = vld [vmem:[%s3929_s2 + $0xc0] ss:$16 sps:$4 sm:$0xff]   ;;  %v3057_v62 = vld [vmem:[%s3929_s2 + $0xec] ss:$16 sps:$4 sm:$0xff]  }
 0x17c   : >> { %2053 = vmatprep.subr.bf16.mxu0 %v3046_v11  ;;  %v3052_v61 = vld [vmem:[%s3929_s2 + $0xa4] ss:$16 sps:$4 sm:$0xff]   ;;  %v3060_v63 = vld [vmem:[%s3929_s2 + $0xe8] ss:$16 sps:$4 sm:$0xff]   ;;  %v3054_v0 = vld [vmem:[%s3929_s2 + $0xa0] ss:$16 sps:$4 sm:$0xff]   ;;  %2094 = vmatprep.subr.bf16.mxu1 %v3057_v62 }
 0x17d   : >> { %2054 = vmatpush1.bf16.msra.mxu0 %v3048_v12  ;;  %v3055_v1 = vld [vmem:[%s3929_s2 + $0x84] ss:$16 sps:$4 sm:$0xff]   ;;  %2095 = vmatpush1.bf16.msra.mxu1 %v3060_v63  ;;  %v3063_v2 = vld [vmem:[%s3929_s2 + $0xcc] ss:$16 sps:$4 sm:$0xff]   ;;  %v3066_v4 = vld [vmem:[%s3929_s2 + $0xc8] ss:$16 sps:$4 sm:$0xff]  }
 0x17e   : >> { %2055 = vmatprep.subr.bf16.mxu0 %v3049_v14  ;;  %2096 = vmatprep.subr.bf16.mxu1 %v3063_v2  ;;  %v3059_v5 = vld [vmem:[%s3929_s2 + $0x80] ss:$16 sps:$4 sm:$0xff]   ;;  %v3061_v6 = vld [vmem:[%s3929_s2 + $0x64] ss:$16 sps:$4 sm:$0xff]   ;;  %v3069_v7 = vld [vmem:[%s3929_s2 + $0xac] ss:$16 sps:$4 sm:$0xff]  }
 0x17f   : >> { %v3072_v8 = vld [vmem:[%s3929_s2 + $0xa8] ss:$16 sps:$4 sm:$0xff]   ;;  %v3075_v9 = vld [vmem:[%s3929_s2 + $0x8c] ss:$16 sps:$4 sm:$0xff]   ;;  %v3065_v10 = vld [vmem:[%s3929_s2 + $0x60] ss:$16 sps:$4 sm:$0xff]  }
 0x180   : >> { %v3067_v15 = vld [vmem:[%s3929_s2 + $0x44] ss:$16 sps:$4 sm:$0xff]   ;;  %v3078_v16 = vld [vmem:[%s3929_s2 + $0x88] ss:$16 sps:$4 sm:$0xff]   ;;  %v3081_v21 = vld [vmem:[%s3929_s2 + $0x6c] ss:$16 sps:$4 sm:$0xff]  }
 0x181   : >> { %2056 = vmatpush1.bf16.msra.mxu0 %v3051_v60  ;;  %2097 = vmatpush1.bf16.msra.mxu1 %v3066_v4  ;;  %v3071_v17 = vld [vmem:[%s3929_s2 + $0x40] ss:$16 sps:$4 sm:$0xff]   ;;  %v3073_v22 = vld [vmem:[%s3929_s2 + $0x24] ss:$16 sps:$4 sm:$0xff]   ;;  %v3084_v18 = vld [vmem:[%s3929_s2 + $0x68] ss:$16 sps:$4 sm:$0xff]  }
 0x182   : >> { %2057 = vmatprep.subr.bf16.mxu0 %v3052_v61  ;;  %2098 = vmatprep.subr.bf16.mxu1 %v3069_v7  ;;  %v3085_v19 = vld [vmem:[%s3929_s2 + $0x4c] ss:$16 sps:$4 sm:$0xff]   ;;  %v3077_v25 = vld [vmem:[%s3929_s2 + $0x20] ss:$16 sps:$4 sm:$0xff]   ;;  %v3079_v23 = vld [vmem:[%s3929_s2 + $0x4] ss:$16 sps:$4 sm:$0xff]  }
 0x183   : >> { %v3090_v29 = vld [vmem:[%s3929_s2 + $0x48] ss:$16 sps:$4 sm:$0xff]   ;;  %v3091_v20 = vld [vmem:[%s3929_s2 + $0x2c] ss:$16 sps:$4 sm:$0xff]   ;;  %v3083_v24 = vld [vmem:[%s3929_s2] ss:$16 sps:$4 sm:$0xff]  }
 0x184   : >> { %v3783_v3 = vld [vmem:[#allocation4] sm:$0xff]  ;;  %v3096_v30 = vld [vmem:[%s3929_s2 + $0x28] ss:$16 sps:$4 sm:$0xff]   ;;  %v3097_v27 = vld [vmem:[%s3929_s2 + $0xc] ss:$16 sps:$4 sm:$0xff]   ;;  %s3899_s26 = sshra.s32 %s2771_s24, 3 }
 0x185   : >> { %2058 = vmatpush1.bf16.msra.mxu0 %v3054_v0  ;;  %2099 = vmatpush1.bf16.msra.mxu1 %v3072_v8  ;;  %v3089_v26 = vld [vmem:[%s3933_s6 + $0xe4] ss:$16 sps:$4 sm:$0xff]   ;;  %v1849_v31 = vpack.c.bf16 %v3783_v3, %v3783_v3  ;;  %v3087_v28 = vld [vmem:[%s3933_s6 + $0xe0] ss:$16 sps:$4 sm:$0xff]   ;;  %v3102_v33 = vld [vmem:[%s3929_s2 + $0x8] ss:$16 sps:$4 sm:$0xff]  }
 0x186   : >> { %2059 = vmatprep.subr.bf16.mxu0 %v3055_v1  ;;  %2100 = vmatprep.subr.bf16.mxu1 %v3075_v9  ;;  %v3095_v32 = vld [vmem:[%s3933_s6 + $0xc4] ss:$16 sps:$4 sm:$0xff]   ;;  %v3108_v34 = vld [vmem:[%s3933_s6 + $0xec] ss:$16 sps:$4 sm:$0xff]   ;;  %v3093_v35 = vld [vmem:[%s3933_s6 + $0xc0] ss:$16 sps:$4 sm:$0xff]  }
 0x187   : >> { %v3101_v36 = vld [vmem:[%s3933_s6 + $0xa4] ss:$16 sps:$4 sm:$0xff]   ;;  %v3106_v37 = vld [vmem:[%s3933_s6 + $0xe8] ss:$16 sps:$4 sm:$0xff]   ;;  %v3114_v38 = vld [vmem:[%s3933_s6 + $0xcc] ss:$16 sps:$4 sm:$0xff]  }
 0x188   : >> { %v3099_v39 = vld [vmem:[%s3933_s6 + $0xa0] ss:$16 sps:$4 sm:$0xff]   ;;  %v3105_v40 = vld [vmem:[%s3933_s6 + $0x84] ss:$16 sps:$4 sm:$0xff]   ;;  %v3112_v41 = vld [vmem:[%s3933_s6 + $0xc8] ss:$16 sps:$4 sm:$0xff]  }
 0x189   : >> { %2060 = vmatpush1.bf16.msra.mxu0 %v3059_v5  ;;  %2101 = vmatpush1.bf16.msra.mxu1 %v3078_v16  ;;  %v3120_v42 = vld [vmem:[%s3933_s6 + $0xac] ss:$16 sps:$4 sm:$0xff]   ;;  %v3103_v43 = vld [vmem:[%s3933_s6 + $0x80] ss:$16 sps:$4 sm:$0xff]   ;;  %v3111_v44 = vld [vmem:[%s3933_s6 + $0x64] ss:$16 sps:$4 sm:$0xff]  }
 0x18a   : >> { %2061 = vmatprep.subr.bf16.mxu0 %v3061_v6  ;;  %2102 = vmatprep.subr.bf16.mxu1 %v3081_v21  ;;  %v3118_v45 = vld [vmem:[%s3933_s6 + $0xa8] ss:$16 sps:$4 sm:$0xff]   ;;  %v3126_v46 = vld [vmem:[%s3933_s6 + $0x8c] ss:$16 sps:$4 sm:$0xff]   ;;  %v3109_v47 = vld [vmem:[%s3933_s6 + $0x60] ss:$16 sps:$4 sm:$0xff]  }
 0x18b   : >> { %v3117_v48 = vld [vmem:[%s3933_s6 + $0x44] ss:$16 sps:$4 sm:$0xff]   ;;  %v3124_v49 = vld [vmem:[%s3933_s6 + $0x88] ss:$16 sps:$4 sm:$0xff]   ;;  %v3132_v50 = vld [vmem:[%s3933_s6 + $0x6c] ss:$16 sps:$4 sm:$0xff]  }
 0x18c   : >> { %v3115_v51 = vld [vmem:[%s3933_s6 + $0x40] ss:$16 sps:$4 sm:$0xff]   ;;  %v3123_v52 = vld [vmem:[%s3933_s6 + $0x24] ss:$16 sps:$4 sm:$0xff]   ;;  %v3130_v53 = vld [vmem:[%s3933_s6 + $0x68] ss:$16 sps:$4 sm:$0xff]  }
 0x18d   : >> { %2062 = vmatpush1.bf16.msra.mxu0 %v3065_v10  ;;  %2103 = vmatpush1.bf16.msra.mxu1 %v3084_v18  ;;  %v3135_v54 = vld [vmem:[%s3933_s6 + $0x4c] ss:$16 sps:$4 sm:$0xff]   ;;  %v3121_v55 = vld [vmem:[%s3933_s6 + $0x20] ss:$16 sps:$4 sm:$0xff]   ;;  %v3129_v56 = vld [vmem:[%s3933_s6 + $0x4] ss:$16 sps:$4 sm:$0xff]  }
 0x18e   : >> { %2063 = vmatprep.subr.bf16.mxu0 %v3067_v15  ;;  %2104 = vmatprep.subr.bf16.mxu1 %v3085_v19  ;;  %v3133_v57 = vld [vmem:[%s3933_s6 + $0x48] ss:$16 sps:$4 sm:$0xff]   ;;  %v3138_v58 = vld [vmem:[%s3933_s6 + $0x2c] ss:$16 sps:$4 sm:$0xff]   ;;  %v3127_v59 = vld [vmem:[%s3933_s6] ss:$16 sps:$4 sm:$0xff]  }
 0x18f   : >> { %v3885_v11 = vld [vmem:[#allocation6] sm:$0xff]  ;;  %v3136_v12 = vld [vmem:[%s3933_s6 + $0x28] ss:$16 sps:$4 sm:$0xff]   ;;  %s2913_s27 = sshll.u32 %s3899_s26, 4  ;;  %p2467_p5 = scmp.lt.s32.totalorder %s2466_s28, 20 }
 0x190   : >> { %v2135_v14 = vpack.c.bf16 %v3885_v11, %v3885_v11  ;;  %v3139_v60 = vld [vmem:[%s3933_s6 + $0x8] ss:$16 sps:$4 sm:$0xff]   ;;  %s1886_s16 = scalar_lea.vmem [#allocation2], %s2913_s27  ;;  %s2169_s29 = scalar_lea.vmem [#allocation3], %s2913_s27 }
 0x191   : >> { %2064 = vmatpush1.bf16.msra.mxu0 %v3071_v17  ;;  %2105 = vmatpush1.bf16.msra.mxu1 %v3090_v29  ;;  %v1887_v61 = vld [vmem:[%s1886_s16] sm:$0xff]  ;;  %v1888_v6 = vld [vmem:[%s1886_s16 + $0x8] sm:$0xff]  ;;  %s2468_s19 = scalar_select %p2467_p5, 1, 0 }
 0x192   : >> { %2065 = vmatprep.subr.bf16.mxu0 %v3073_v22  ;;  %2106 = vmatprep.subr.bf16.mxu1 %v3091_v20  ;;  %v1889_v62 = vunpack.c.l.bf16 %v1887_v61  ;;  %v1890_v63 = vunpack.c.h.bf16 %v1887_v61  ;;  %v1892_v15 = vunpack.c.h.bf16 %v1888_v6  ;;  %v1891_v22 = vunpack.c.l.bf16 %v1888_v6  ;;  %s2845_s15 = sshll.u32 %s3188_s10, 2  ;;  %s1843_s10 = sadd.s32 1, %s3188_s10  }
 0x193   : >> { %s2469_s12 = scvt.s32.f32 %s2468_s19  ;;  %s2491_s20 = scalar_lea.vmem %s364_s22, %s2845_s15 }
 0x194   : >> { %s2495_s24 = scalar_lea.vmem %s370_s25, %s2845_s15  ;;  %p1840_p6 = scmp.ge.s32.totalorder %s1843_s10, 16  }
 0x195   : >> { %2066 = vmatpush1.bf16.msra.mxu0 %v3077_v25  ;;  %2107 = vmatpush1.bf16.msra.mxu1 %v3096_v30  ;;  %s2472_s14 = ssub.f32 1.0, %s2469_s12 }
 0x196   : >> { %2067 = vmatprep.subr.bf16.mxu0 %v3079_v23  ;;  %2108 = vmatprep.subr.bf16.mxu1 %v3097_v27 }
 0x199   : >> { %2068 = vmatpush1.bf16.msra.mxu0 %v3083_v24  ;;  %2109 = vmatpush1.bf16.msra.mxu1 %v3102_v33 }
 0x19a   : >> { %2336 = vmatprep.subr.bf16.mxu0 %v3089_v26  ;;  %2377 = vmatprep.subr.bf16.mxu1 %v3108_v34  ;;  %v2170_v26 = vld [vmem:[%s2169_s29] sm:$0xff] }
 0x19b   : >> { %v2172_v30 = vunpack.c.l.bf16 %v2170_v26 }
 0x19c   : >> { %2086 = vmatmul.mubr.bf16.vlgmr.msra.gmra.mxu0 %v1849_v31  ;;  %2127 = vmatmul.mubr.bf16.vlgmr.msra.gmra.mxu1 %v1849_v31  ;;  %v2173_v31 = vunpack.c.h.bf16 %v2170_v26 }
 0x19d   : >> { %2337 = vmatpush1.bf16.msra.mxu0 %v3087_v28  ;;  %2368 = vmatprep.mubr.bf16.mxu0 %v3192_v13 }
 0x19e   : >> { %2338 = vmatprep.subr.bf16.mxu0 %v3095_v32  ;;  %2378 = vmatpush1.bf16.msra.mxu1 %v3106_v37 }
 0x19f   : >> { %2379 = vmatprep.subr.bf16.mxu1 %v3114_v38  ;;  %2409 = vmatprep.mubr.bf16.mxu1 %v3192_v13  ;;  %v3141_v13 = vld [vmem:[%s3933_s6 + $0xc] ss:$16 sps:$4 sm:$0xff]  }
 0x1a1   : >> { %2339 = vmatpush1.bf16.msra.mxu0 %v3093_v35  ;;  %v1846_v35 = vld [vmem:[#allocation5] sm:$0xff] }
 0x1a2   : >> { %2340 = vmatprep.subr.bf16.mxu0 %v3101_v36  ;;  %2380 = vmatpush1.bf16.msra.mxu1 %v3112_v41 }
 0x1a3   : >> { %2381 = vmatprep.subr.bf16.mxu1 %v3120_v42  ;;  %v2473_v42 = vstv %s2472_s14 }
 0x1a5   : >> { %2341 = vmatpush1.bf16.msra.mxu0 %v3099_v39 }
 0x1a6   : >> { %2342 = vmatprep.subr.bf16.mxu0 %v3105_v40  ;;  %2382 = vmatpush1.bf16.msra.mxu1 %v3118_v45 }
 0x1a7   : >> { %2383 = vmatprep.subr.bf16.mxu1 %v3126_v46  ;;  %v2171_v46 = vld [vmem:[%s2169_s29 + $0x8] sm:$0xff] }
 0x1a9   : >> { %2343 = vmatpush1.bf16.msra.mxu0 %v3103_v43 }
 0x1aa   : >> { %2344 = vmatprep.subr.bf16.mxu0 %v3111_v44  ;;  %2384 = vmatpush1.bf16.msra.mxu1 %v3124_v49 }
 0x1ab   : >> { %2385 = vmatprep.subr.bf16.mxu1 %v3132_v50  ;;  %v2477_v50 = vmul.f32 %v2473_v42, %v1846_v35 }
 0x1ad   : >> { %2345 = vmatpush1.bf16.msra.mxu0 %v3109_v47 }
 0x1ae   : >> { %2346 = vmatprep.subr.bf16.mxu0 %v3117_v48  ;;  %2386 = vmatpush1.bf16.msra.mxu1 %v3130_v53  ;;  %v2470_v48 = vstv %s2469_s12  ;;  %v2175_v53 = vunpack.c.h.bf16 %v2171_v46 }
 0x1af   : >> { %2387 = vmatprep.subr.bf16.mxu1 %v3135_v54 }
 0x1b1   : >> { %2347 = vmatpush1.bf16.msra.mxu0 %v3115_v51 }
 0x1b2   : >> { %2348 = vmatprep.subr.bf16.mxu0 %v3123_v52  ;;  %2388 = vmatpush1.bf16.msra.mxu1 %v3133_v57  ;;  %v2174_v57 = vunpack.c.l.bf16 %v2171_v46 }
 0x1b3   : >> { %2389 = vmatprep.subr.bf16.mxu1 %v3138_v58 }
 0x1b5   : >> { %2349 = vmatpush1.bf16.msra.mxu0 %v3121_v55 }
 0x1b6   : >> { %2350 = vmatprep.subr.bf16.mxu0 %v3129_v56  ;;  %2390 = vmatpush1.bf16.msra.mxu1 %v3136_v12 }
 0x1b7   : >> { %2391 = vmatprep.subr.bf16.mxu1 %v3141_v13 }
 0x1b9   : >> { %2351 = vmatpush1.bf16.msra.mxu0 %v3127_v59 }
 0x1ba   : >> { %2392 = vmatpush1.bf16.msra.mxu1 %v3139_v60 }
 0x1bc   : >> { %2369 = vmatmul.mubr.bf16.vlgmr.msra.gmra.mxu0 %v2135_v14 }
 0x1bd   : >> { %2410 = vmatmul.mubr.bf16.vlgmr.msra.gmra.mxu1 %v2135_v14 }
 0x25c   : >> { %v2087_v0 = vpop.f32.mrf.mxu0  ;;  %v2128_v9 = vpop.f32.mrf.mxu1 }
 0x25d   : >> { %v2088_v1 = vadd.f32 %v2087_v0, %v1889_v62  ;;  %v2129_v25 = vadd.f32 %v2128_v9, %v1891_v22 }
 0x25e   : >> { %v2089_v2 = vpop.f32.mrf.mxu0  ;;  %v2130_v16 = vpop.f32.mrf.mxu1 }
 0x25f   : >> { %v2839_v4 = vmul.f32 -1.442695, %v2088_v1  ;;  %v2090_v5 = vadd.f32 %v2089_v2, %v1890_v63  ;;  %v2131_v17 = vadd.f32 %v2130_v16, %v1892_v15  ;;  %v2474_v1 = vmul.f32 %v2473_v42, %v3783_v3 }
 0x260   : >> { %v2091_v7 = vpop.f32.mrf.mxu0  ;;  %v2132_v21 = vpop.f32.mrf.mxu1 }
 0x261   : >> { %3142 = vpow2.f32 %v2839_v4  ;;  %v2840_v8 = vmul.f32 -1.442695, %v2090_v5  ;;  %v2841_v19 = vmul.f32 -1.442695, %v2131_v17 }
 0x262   : >> { %v2092_v10 = vpop.f32.mrf.mxu0  ;;  %v2133_v18 = vpop.f32.mrf.mxu1 }
 0x263   : >> { %3144 = vpow2.f32 %v2840_v8  ;;  %v1848_v10 = vld [vmem:[#allocation7] sm:$0xff] }
 0x264   : >> { %3146 = vpow2.f32 %v2841_v19  ;;  %v2483_v17 = vmul.f32 %v2473_v42, %v1848_v10 }
 0x265   : >> { %3148 = vtanh.f32 %v2129_v25 }
 0x26e   : >> { %v3143_v23 = vpop.eup %3142 }
 0x26f   : >> { %v2421_v29 = vadd.f32 1.0, %v3143_v23 }
 0x270   : >> { %v3145_v20 = vpop.eup %3144 }
 0x271   : >> { %3150 = vrcp.f32 %v2421_v29  ;;  %v2427_v24 = vadd.f32 1.0, %v3145_v20  ;;  %v3147_v27 = vpop.eup %3146  ;;  %v2480_v29 = vmul.f32 %v2473_v42, %v3885_v11 }
 0x272   : >> { %v3149_v28 = vpop.eup %3148  ;;  %v2434_v36 = vadd.f32 1.0, %v3147_v27 }
 0x273   : >> { %3152 = vrcp.f32 %v2427_v24 }
 0x27c   : >> { %v2370_v32 = vpop.f32.mrf.mxu0 }
 0x27d   : >> { %v2371_v33 = vadd.f32 %v2370_v32, %v2172_v30  ;;  %v2411_v47 = vpop.f32.mrf.mxu1 }
 0x27e   : >> { %v3151_v34 = vpop.eup %3150  ;;  %v2372_v37 = vpop.f32.mrf.mxu0  ;;  %v2412_v12 = vadd.f32 %v2411_v47, %v2174_v57 }
 0x27f   : >> { %v2438_v38 = vmul.f32 %v3151_v34, %v3149_v28  ;;  %v2842_v39 = vmul.f32 -1.442695, %v2371_v33  ;;  %v2373_v40 = vadd.f32 %v2372_v37, %v2173_v31  ;;  %v2413_v52 = vpop.f32.mrf.mxu1 }
 0x280   : >> { %v3153_v41 = vpop.eup %3152  ;;  %v2374_v43 = vpop.f32.mrf.mxu0  ;;  %v2414_v59 = vadd.f32 %v2413_v52, %v2175_v53 }
 0x281   : >> { %v2437_v44 = vmul.f32 %v3153_v41, %v1846_v35  ;;  %3154 = vpow2.f32 %v2842_v39  ;;  %v2843_v45 = vmul.f32 -1.442695, %v2373_v40  ;;  %v2415_v55 = vpop.f32.mrf.mxu1 }
 0x282   : >> { %3156 = vrcp.f32 %v2434_v36  ;;  %v2375_v49 = vpop.f32.mrf.mxu0  ;;  %v2844_v13 = vmul.f32 -1.442695, %v2414_v59 }
 0x283   : >> { %v2439_v51 = vadd.f32 %v2438_v38, %v2437_v44  ;;  %3158 = vpow2.f32 %v2843_v45  ;;  %v2416_v58 = vpop.f32.mrf.mxu1 }
 0x285   : >> { %3160 = vtanh.f32 %v2439_v51  ;;  %v2476_v54 = vmul.f32 %v2470_v48, %v2439_v51 }
 0x286   : >> { %3162 = vtanh.f32 %v2412_v12 }
 0x287   : >> { %v2478_v56 = vadd.f32 %v2477_v50, %v2476_v54  ;;  %3164 = vpow2.f32 %v2844_v13 }
 0x289   : >> { %2486 = vst [vmem:[#allocation5] sm:$0xff] %v2478_v56 }
 0x28e   : >> { %v3155_v14 = vpop.eup %3154 }
 0x28f   : >> { %v3157_v60 = vpop.eup %3156  ;;  %v2445_v61 = vadd.f32 1.0, %v3155_v14 }
 0x290   : >> { %v3159_v62 = vpop.eup %3158 }
 0x291   : >> { %3166 = vrcp.f32 %v2445_v61  ;;  %v2451_v63 = vadd.f32 1.0, %v3159_v62 }
 0x292   : >> { %v3161_v0 = vpop.eup %3160 }
 0x293   : >> { %v2441_v2 = vmul.f32 %v3161_v0, %v3157_v60  ;;  %3168 = vrcp.f32 %v2451_v63  ;;  %v3163_v7 = vpop.eup %3162 }
 0x294   : >> { %v3165_v8 = vpop.eup %3164 }
 0x295   : >> { %v2471_v4 = vmul.f32 %v2470_v48, %v2441_v2  ;;  %v2458_v16 = vadd.f32 1.0, %v3165_v8 }
 0x297   : >> { %v2475_v5 = vadd.f32 %v2474_v1, %v2471_v4  ;;  %3170 = vrcp.f32 %v2458_v16 }
 0x299   : >> { %2485 = vst [vmem:[#allocation4] sm:$0xff] %v2475_v5  ;;  %v2489_v6 = vpack.c.bf16 %v2475_v5, %v2475_v5 }
 0x29b   : >> { %2492 = vst [vmem:[%s2491_s20] sm:$0xf] %v2489_v6 }
 0x29e   : >> { %v3167_v9 = vpop.eup %3166 }
 0x29f   : >> { %v2462_v21 = vmul.f32 %v3167_v9, %v3163_v7 }
 0x2a0   : >> { %v3169_v15 = vpop.eup %3168 }
 0x2a1   : >> { %v2461_v3 = vmul.f32 %v3169_v15, %v1848_v10 }
 0x2a3   : >> { %v2463_v22 = vadd.f32 %v2462_v21, %v2461_v3 }
 0x2a4   : >> { %v3171_v25 = vpop.eup %3170 }
 0x2a5   : >> { %3172 = vtanh.f32 %v2463_v22  ;;  %v2482_v18 = vmul.f32 %v2470_v48, %v2463_v22 }
 0x2a7   : >> { %v2484_v19 = vadd.f32 %v2483_v17, %v2482_v18 }
 0x2a9   : >> { %2488 = vst [vmem:[#allocation7] sm:$0xff] %v2484_v19 }
 0x2b2   : >> { %v3173_v23 = vpop.eup %3172 }
 0x2b3   : >> { %v2465_v20 = vmul.f32 %v3173_v23, %v3171_v25 }
 0x2b5   : >> { %v2479_v24 = vmul.f32 %v2470_v48, %v2465_v20 }
 0x2b7   : >> { %v2481_v26 = vadd.f32 %v2480_v29, %v2479_v24  ;;  %1842 = sbr.rel (!%p1840_p6) target bundleno = 378 (0x17a), region = 112 }
 0x2b9   : >> { %2487 = vst [vmem:[#allocation6] sm:$0xff] %v2481_v26  ;;  %v2493_v30 = vpack.c.bf16 %v2481_v26, %v2481_v26 }
 0x2bb   : >> { %2496 = vst [vmem:[%s2495_s24] sm:$0xf] %v2493_v30 }
 0x2bc PF: > { %s20_s30 = sadd.s32 1, %s3184_s30  }
 0x2bd   : > { %p17_p7 = scmp.ge.s32.totalorder %s20_s30, 4  }
 0x2bf   :  { %19 = sbr.rel (!%p17_p7) target bundleno = 1 (0x1), region = 123 }

// kernel: vanilla_seqlabel_forward.9
= control target key start
LH: loop header
LB: loop body
LE: loop exit
PB: predicated region body
PF: predicated region fallthrough
CT: control target
= control target key end

     0   :  { %s2372_s30 = smov 0   ;;  %s2838_s0 = inlined_call_operand.vmem [shape: bf16[128,32], index: 0, kind: input, shape index: {}, may-alias: {0,4}]   ;;  %s2839_s1 = inlined_call_operand.vmem [shape: bf16[32,512], index: 1, kind: input, shape index: {}]   ;;  %s2840_s2 = inlined_call_operand.vmem [shape: bf16[128,512], index: 2, kind: input, shape index: {}]   ;;  %s2841_s3 = inlined_call_operand.vmem [shape: f32[1,512], index: 3, kind: input, shape index: {}]   ;;  %s2842_s4 = inlined_call_operand.vmem [shape: bf16[128,32], index: 4, kind: input, shape index: {}, may-alias: {0,4}]   ;;  %s2843_s5 = inlined_call_operand.vmem [shape: bf16[32,512], index: 5, kind: input, shape index: {}]   ;;  %s2844_s6 = inlined_call_operand.vmem [shape: bf16[128,512], index: 6, kind: input, shape index: {}]   ;;  %s2845_s7 = inlined_call_operand.vmem [shape: f32[1,512], index: 7, kind: input, shape index: {}]   ;;  %s2846_s8 = inlined_call_operand.vmem [shape: bf16[16,8,128], index: 8, kind: output, shape index: {0}]   ;;  %s2847_s9 = inlined_call_operand.vmem [shape: bf16[16,8,128], index: 9, kind: output, shape index: {1}]  }
   0x1 LB: > { %s1922_s10 = sadd.s32 4294967295, %s2313_s30   ;;  %p1926_p0 = scmp.ge.s32.totalorder %s2313_s30, 1  ;;  %s2313_s30 = sphi %s2372_s30, %s20_s30  }
   0x2   : > { %p308_p1 = scmp.lt.s32.totalorder %s2313_s30, 3 }
   0x4   : > { %p309_p2 = pnand %p1926_p0, %p308_p1 }
   0x5   : > { %s2380_s11 = sshll.u32 (!%p309_p2), %s1922_s10, 3  ;;  %s362_s12 = ssub.s32 (!%p309_p2), 1, %s1922_s10 }
   0x6   : > { %312 = sbr.rel (%p309_p2) target bundleno = 613 (0x265), region = 52  ;;  %p357_p3 = scmp.lt.s32.totalorder (!%p309_p2), %s2380_s11, 15 }
   0x7   : > { %s2383_s13 = sshll.u32 (!%p309_p2), %s362_s12, 3  ;;  %p1935_p5 = scmp.ne.s32.totalorder (!%p309_p2), %s1922_s10, 0 }
   0x8   : > { %p364_p4 = scmp.lt.s32.totalorder (!%p309_p2), %s2383_s13, 15 }
   0xb   : > { %s358_s14 = scalar_select %p357_p3, %s2380_s11, 15 }
   0xc   : > { %s365_s15 = scalar_select %p364_p4, %s2383_s13, 15 }
   0xd   : > { %s1928_s16 = sshll.u32 %s358_s14, 2  ;;  %388 = sbr.rel (%p1935_p5) target bundleno = 21 (0x15), region = 56 }
   0xe   : > { %s2391_s19 = scalar_lea.vmem %s2838_s0, %s1928_s16  ;;  %s1930_s20 = sshll.u32 %s365_s15, 2 }
   0xf   : > { %s2396_s23 = scalar_lea.vmem %s2842_s4, %s1930_s20  ;;  %s2401_s26 = scalar_lea.vmem %s2846_s8, %s1928_s16 }
  0x10   : > { %s2406_s29 = scalar_lea.vmem %s2847_s9, %s1930_s20 }
  0x12   : > { %v2319_v0 = vmov 0.0  }
  0x13   : > { %389 = vst [vmem:[#allocation4] sm:$0xff] %v2319_v0  ;;  %390 = vst [vmem:[#allocation5] sm:$0xff] %v2319_v0 }
  0x14   : > { %391 = vst [vmem:[#allocation6] sm:$0xff] %v2319_v0  ;;  %392 = vst [vmem:[#allocation7] sm:$0xff] %v2319_v0 }
  0x15 PF: > { %v2143_v1 = vld [vmem:[%s2839_s1 + $0x24] ss:$16 sps:$4 sm:$0xff]   ;;  %v2145_v2 = vld [vmem:[%s2839_s1 + $0x2c] ss:$16 sps:$4 sm:$0xff]   ;;  %v2320_v3 = vmov 0   ;;  %vm491_vm0 = vcmask 261120   ;;  %v411_v26 = vlaneseq }
  0x16   : > { %536 = vmatprep.mubr.bf16.mxu0 %v2320_v3  ;;  %609 = vmatprep.mubr.bf16.mxu1 %v2320_v3  ;;  %v2147_v4 = vld [vmem:[%s2839_s1 + $0x20] ss:$16 sps:$4 sm:$0xff]   ;;  %v2148_v5 = vld [vmem:[%s2839_s1 + $0x28] ss:$16 sps:$4 sm:$0xff]   ;;  %v2149_v6 = vld [vmem:[%s2839_s1 + $0x4] ss:$16 sps:$4 sm:$0xff]  }
  0x17   : > { %516 = vmatprep.subr.bf16.mxu0 %v2143_v1  ;;  %589 = vmatprep.subr.bf16.mxu1 %v2145_v2  ;;  %v2151_v7 = vld [vmem:[%s2839_s1 + $0xc] ss:$16 sps:$4 sm:$0xff]   ;;  %v2153_v8 = vld [vmem:[%s2839_s1] ss:$16 sps:$4 sm:$0xff]   ;;  %v2154_v9 = vld [vmem:[%s2839_s1 + $0x8] ss:$16 sps:$4 sm:$0xff]  }
  0x18   : > { %517 = vmatpush1.bf16.msra.mxu0 %v2147_v4  ;;  %590 = vmatpush1.bf16.msra.mxu1 %v2148_v5  ;;  %v2155_v10 = vld [vmem:[%s2391_s19] sm:$0xff]   ;;  %v2159_v13 = vld [vmem:[%s2843_s5 + $0x28] ss:$16 sps:$4 sm:$0xff]   ;;  %v2161_v14 = vld [vmem:[%s2843_s5 + $0x2c] ss:$16 sps:$4 sm:$0xff]   ;;  %v2496_v27 = vshrl.u32 %v411_v26, 7 }
  0x19   : > { %518 = vmatprep.subr.bf16.mxu0 %v2149_v6  ;;  %591 = vmatprep.subr.bf16.mxu1 %v2151_v7  ;;  %v2156_v11 = vld [vmem:[%s2843_s5 + $0x20] ss:$16 sps:$4 sm:$0xff]   ;;  %v2158_v12 = vld [vmem:[%s2843_s5 + $0x24] ss:$16 sps:$4 sm:$0xff]   ;;  %v2167_v17 = vld [vmem:[%s2843_s5 + $0x8] ss:$16 sps:$4 sm:$0xff]  }
  0x1a   : > { %v2164_v15 = vld [vmem:[%s2843_s5] ss:$16 sps:$4 sm:$0xff]   ;;  %v2166_v16 = vld [vmem:[%s2843_s5 + $0x4] ss:$16 sps:$4 sm:$0xff]   ;;  %v2169_v18 = vld [vmem:[%s2843_s5 + $0xc] ss:$16 sps:$4 sm:$0xff]  }
  0x1b   : > { %v2162_v19 = vld [vmem:[%s2391_s19 + $0x8] sm:$0xff]   ;;  %v2163_v20 = vld [vmem:[%s2391_s19 + $0x10] sm:$0xff]   ;;  %v2170_v21 = vld [vmem:[%s2391_s19 + $0x18] sm:$0xff]   ;;  %v413_v28 = vsub.s32 0, %v2496_v27  ;;  %v421_v29 = vsub.s32 2, %v2496_v27  ;;  %v417_v30 = vsub.s32 1, %v2496_v27 }
  0x1c   : > { %519 = vmatpush1.bf16.msra.mxu0 %v2153_v8  ;;  %592 = vmatpush1.bf16.msra.mxu1 %v2154_v9  ;;  %v2171_v22 = vld [vmem:[%s2396_s23] sm:$0xff]   ;;  %v2172_v23 = vld [vmem:[%s2396_s23 + $0x8] sm:$0xff]   ;;  %v2173_v24 = vld [vmem:[%s2396_s23 + $0x10] sm:$0xff]   ;;  %v425_v31 = vsub.s32 3, %v2496_v27  ;;  %s2604_s18 = smov 0  }
  0x1d   : > { %884 = vmatprep.subr.bf16.mxu0 %v2158_v12  ;;  %957 = vmatprep.subr.bf16.mxu1 %v2161_v14  ;;  %v2174_v25 = vld [vmem:[%s2396_s23 + $0x18] sm:$0xff]   ;;  %v409_v32 = vld [vmem:[%s2841_s3] sm:$0xf] }
  0x1e   : > { %v2507_v33 = vrot.slane %v409_v32, %v413_v28  ;;  %v2511_v34 = vrot.slane %v409_v32, %v421_v29  ;;  %v2515_v35 = vrot.slane %v409_v32, %v417_v30  ;;  %v2519_v36 = vrot.slane %v409_v32, %v425_v31 }
  0x1f   : > { %1948 = vmatmul.mubr.msk.bf16.vlgmr.msra.gmra.mxu0 %vm491_vm0, %v2155_v10  ;;  %1952 = vmatmul.mubr.msk.bf16.vlgmr.msra.gmra.mxu1 %vm491_vm0, %v2155_v10 }
  0x20   : > { %885 = vmatpush1.bf16.msra.mxu0 %v2156_v11  ;;  %958 = vmatpush1.bf16.msra.mxu1 %v2159_v13 }
  0x21   : > { %546 = vmatprep.mubr.bf16.mxu0 %v2320_v3  ;;  %619 = vmatprep.mubr.bf16.mxu1 %v2320_v3 }
  0x22   : > { %886 = vmatprep.subr.bf16.mxu0 %v2166_v16  ;;  %959 = vmatprep.subr.bf16.mxu1 %v2169_v18 }
  0x24   : > { %887 = vmatpush1.bf16.msra.mxu0 %v2164_v15  ;;  %960 = vmatpush1.bf16.msra.mxu1 %v2167_v17 }
  0x27   : > { %1949 = vmatmul.mubr.msk.bf16.gmra.mxu0 %vm491_vm0, %v2162_v19  ;;  %1953 = vmatmul.mubr.msk.bf16.gmra.mxu1 %vm491_vm0, %v2162_v19 }
  0x28   : > { %556 = vmatprep.mubr.bf16.mxu0 %v2320_v3  ;;  %629 = vmatprep.mubr.bf16.mxu1 %v2320_v3 }
  0x2f   : > { %1950 = vmatmul.mubr.msk.bf16.gmra.mxu0 %vm491_vm0, %v2163_v20  ;;  %1954 = vmatmul.mubr.msk.bf16.gmra.mxu1 %vm491_vm0, %v2163_v20 }
  0x30   : > { %566 = vmatprep.mubr.bf16.mxu0 %v2320_v3  ;;  %639 = vmatprep.mubr.bf16.mxu1 %v2320_v3 }
  0x37   : > { %1951 = vmatmul.mubr.msk.bf16.gmra.mxu0 %vm491_vm0, %v2170_v21  ;;  %1955 = vmatmul.mubr.msk.bf16.gmra.mxu1 %vm491_vm0, %v2170_v21 }
  0x38   : > { %904 = vmatprep.mubr.bf16.mxu0 %v2320_v3  ;;  %977 = vmatprep.mubr.bf16.mxu1 %v2320_v3 }
  0x3f   : > { %1984 = vmatmul.mubr.msk.bf16.vlgmr.msra.gmra.mxu0 %vm491_vm0, %v2171_v22  ;;  %1988 = vmatmul.mubr.msk.bf16.vlgmr.msra.gmra.mxu1 %vm491_vm0, %v2171_v22 }
  0x40   : > { %914 = vmatprep.mubr.bf16.mxu0 %v2320_v3  ;;  %987 = vmatprep.mubr.bf16.mxu1 %v2320_v3 }
  0x47   : > { %1985 = vmatmul.mubr.msk.bf16.gmra.mxu0 %vm491_vm0, %v2172_v23  ;;  %1989 = vmatmul.mubr.msk.bf16.gmra.mxu1 %vm491_vm0, %v2172_v23 }
  0x48   : > { %924 = vmatprep.mubr.bf16.mxu0 %v2320_v3  ;;  %997 = vmatprep.mubr.bf16.mxu1 %v2320_v3 }
  0x4f   : > { %1986 = vmatmul.mubr.msk.bf16.gmra.mxu0 %vm491_vm0, %v2173_v24  ;;  %1990 = vmatmul.mubr.msk.bf16.gmra.mxu1 %vm491_vm0, %v2173_v24 }
  0x50   : > { %934 = vmatprep.mubr.bf16.mxu0 %v2320_v3  ;;  %1007 = vmatprep.mubr.bf16.mxu1 %v2320_v3 }
  0x57   : > { %1987 = vmatmul.mubr.msk.bf16.gmra.mxu0 %vm491_vm0, %v2174_v25  ;;  %1991 = vmatmul.mubr.msk.bf16.gmra.mxu1 %vm491_vm0, %v2174_v25 }
  0xdf   : > { %v538_v37 = vpop.f32.mrf.mxu0  ;;  %v611_v38 = vpop.f32.mrf.mxu1 }
  0xe0   : > { %v539_v41 = vadd.f32 %v538_v37, %v2507_v33  ;;  %v612_v42 = vadd.f32 %v611_v38, %v2511_v34 }
  0xe1   : > { %v540_v39 = vpop.f32.mrf.mxu0  ;;  %v613_v40 = vpop.f32.mrf.mxu1 }
  0xe2   : > { %v541_v43 = vadd.f32 %v540_v39, %v2515_v35  ;;  %v614_v44 = vadd.f32 %v613_v40, %v2519_v36 }
  0xe3   : > { %v542_v45 = vpop.f32.mrf.mxu0  ;;  %v615_v46 = vpop.f32.mrf.mxu1 }
  0xe4   : > { %v2090_v47 = vpack.c.bf16 %v541_v43, %v539_v41  ;;  %v2091_v48 = vpack.c.bf16 %v614_v44, %v612_v42  ;;  %v543_v51 = vadd.f32 %v542_v45, %v2507_v33  ;;  %v616_v52 = vadd.f32 %v615_v46, %v2511_v34 }
  0xe5   : > { %v544_v49 = vpop.f32.mrf.mxu0  ;;  %v617_v50 = vpop.f32.mrf.mxu1 }
  0xe6   : > { %746 = vst [vmem:[#allocation2] sm:$0xff] %v2090_v47  ;;  %747 = vst [vmem:[#allocation2 + $0x8] sm:$0xff] %v2091_v48  ;;  %v545_v53 = vadd.f32 %v544_v49, %v2515_v35  ;;  %v618_v54 = vadd.f32 %v617_v50, %v2519_v36  ;;  %v778_v50 = vld [vmem:[%s2845_s7] sm:$0xf] }
  0xe7   : > { %v548_v55 = vpop.f32.mrf.mxu0  ;;  %v621_v56 = vpop.f32.mrf.mxu1 }
  0xe8   : > { %v2092_v57 = vpack.c.bf16 %v545_v53, %v543_v51  ;;  %v2093_v58 = vpack.c.bf16 %v618_v54, %v616_v52  ;;  %v549_v61 = vadd.f32 %v548_v55, %v2507_v33  ;;  %v622_v62 = vadd.f32 %v621_v56, %v2511_v34 }
  0xe9   : > { %v550_v59 = vpop.f32.mrf.mxu0  ;;  %v623_v60 = vpop.f32.mrf.mxu1 }
  0xea   : > { %748 = vst [vmem:[#allocation2 + $0x10] sm:$0xff] %v2092_v57  ;;  %749 = vst [vmem:[#allocation2 + $0x18] sm:$0xff] %v2093_v58  ;;  %v551_v63 = vadd.f32 %v550_v59, %v2515_v35  ;;  %v624_v0 = vadd.f32 %v623_v60, %v2519_v36  ;;  %v2554_v57 = vrot.slane %v778_v50, %v413_v28 }
  0xeb   : > { %v552_v1 = vpop.f32.mrf.mxu0  ;;  %v625_v2 = vpop.f32.mrf.mxu1  ;;  %v2558_v58 = vrot.slane %v778_v50, %v421_v29  ;;  %v2562_v59 = vrot.slane %v778_v50, %v417_v30  ;;  %v2566_v60 = vrot.slane %v778_v50, %v425_v31 }
  0xec   : > { %v2094_v3 = vpack.c.bf16 %v551_v63, %v549_v61  ;;  %v2095_v4 = vpack.c.bf16 %v624_v0, %v622_v62  ;;  %v553_v7 = vadd.f32 %v552_v1, %v2507_v33  ;;  %v626_v8 = vadd.f32 %v625_v2, %v2511_v34 }
  0xed   : > { %v554_v5 = vpop.f32.mrf.mxu0  ;;  %v627_v6 = vpop.f32.mrf.mxu1 }
  0xee   : > { %750 = vst [vmem:[#allocation2 + $0x20] sm:$0xff] %v2094_v3  ;;  %751 = vst [vmem:[#allocation2 + $0x28] sm:$0xff] %v2095_v4  ;;  %v555_v9 = vadd.f32 %v554_v5, %v2515_v35  ;;  %v628_v10 = vadd.f32 %v627_v6, %v2519_v36 }
  0xef   : > { %v558_v11 = vpop.f32.mrf.mxu0  ;;  %v631_v12 = vpop.f32.mrf.mxu1 }
  0xf0   : > { %v2096_v13 = vpack.c.bf16 %v555_v9, %v553_v7  ;;  %v2097_v14 = vpack.c.bf16 %v628_v10, %v626_v8  ;;  %v559_v17 = vadd.f32 %v558_v11, %v2507_v33  ;;  %v632_v18 = vadd.f32 %v631_v12, %v2511_v34 }
  0xf1   : > { %v560_v15 = vpop.f32.mrf.mxu0  ;;  %v633_v16 = vpop.f32.mrf.mxu1 }
  0xf2   : > { %752 = vst [vmem:[#allocation2 + $0x30] sm:$0xff] %v2096_v13  ;;  %753 = vst [vmem:[#allocation2 + $0x38] sm:$0xff] %v2097_v14  ;;  %v561_v19 = vadd.f32 %v560_v15, %v2515_v35  ;;  %v634_v20 = vadd.f32 %v633_v16, %v2519_v36 }
  0xf3   : > { %v562_v21 = vpop.f32.mrf.mxu0  ;;  %v635_v22 = vpop.f32.mrf.mxu1 }
  0xf4   : > { %v2098_v23 = vpack.c.bf16 %v561_v19, %v559_v17  ;;  %v2099_v24 = vpack.c.bf16 %v634_v20, %v632_v18  ;;  %v563_v32 = vadd.f32 %v562_v21, %v2507_v33  ;;  %v636_v37 = vadd.f32 %v635_v22, %v2511_v34 }
  0xf5   : > { %v564_v25 = vpop.f32.mrf.mxu0  ;;  %v637_v26 = vpop.f32.mrf.mxu1 }
  0xf6   : > { %754 = vst [vmem:[#allocation2 + $0x40] sm:$0xff] %v2098_v23  ;;  %755 = vst [vmem:[#allocation2 + $0x48] sm:$0xff] %v2099_v24  ;;  %v565_v38 = vadd.f32 %v564_v25, %v2515_v35  ;;  %v638_v39 = vadd.f32 %v637_v26, %v2519_v36 }
  0xf7   : > { %v568_v40 = vpop.f32.mrf.mxu0  ;;  %v641_v41 = vpop.f32.mrf.mxu1 }
  0xf8   : > { %v2100_v42 = vpack.c.bf16 %v565_v38, %v563_v32  ;;  %v2101_v43 = vpack.c.bf16 %v638_v39, %v636_v37  ;;  %v569_v46 = vadd.f32 %v568_v40, %v2507_v33  ;;  %v642_v47 = vadd.f32 %v641_v41, %v2511_v34 }
  0xf9   : > { %v570_v44 = vpop.f32.mrf.mxu0  ;;  %v643_v45 = vpop.f32.mrf.mxu1 }
  0xfa   : > { %756 = vst [vmem:[#allocation2 + $0x50] sm:$0xff] %v2100_v42  ;;  %757 = vst [vmem:[#allocation2 + $0x58] sm:$0xff] %v2101_v43  ;;  %v571_v48 = vadd.f32 %v570_v44, %v2515_v35  ;;  %v644_v49 = vadd.f32 %v643_v45, %v2519_v36 }
  0xfb   : > { %v572_v51 = vpop.f32.mrf.mxu0  ;;  %v645_v52 = vpop.f32.mrf.mxu1 }
  0xfc   : > { %v2102_v53 = vpack.c.bf16 %v571_v48, %v569_v46  ;;  %v2103_v54 = vpack.c.bf16 %v644_v49, %v642_v47  ;;  %v573_v61 = vadd.f32 %v572_v51, %v2507_v33  ;;  %v646_v62 = vadd.f32 %v645_v52, %v2511_v34 }
  0xfd   : > { %v574_v55 = vpop.f32.mrf.mxu0  ;;  %v647_v56 = vpop.f32.mrf.mxu1 }
  0xfe   : > { %758 = vst [vmem:[#allocation2 + $0x60] sm:$0xff] %v2102_v53  ;;  %759 = vst [vmem:[#allocation2 + $0x68] sm:$0xff] %v2103_v54  ;;  %v575_v28 = vadd.f32 %v574_v55, %v2515_v35  ;;  %v648_v63 = vadd.f32 %v647_v56, %v2519_v36 }
  0xff   : > { %v906_v29 = vpop.f32.mrf.mxu0  ;;  %v979_v0 = vpop.f32.mrf.mxu1 }
 0x100   : > { %v2104_v1 = vpack.c.bf16 %v575_v28, %v573_v61  ;;  %v2105_v2 = vpack.c.bf16 %v648_v63, %v646_v62  ;;  %v907_v27 = vadd.f32 %v906_v29, %v2554_v57  ;;  %v980_v31 = vadd.f32 %v979_v0, %v2558_v58 }
 0x101   : > { %v908_v30 = vpop.f32.mrf.mxu0  ;;  %v981_v3 = vpop.f32.mrf.mxu1 }
 0x102   : > { %760 = vst [vmem:[#allocation2 + $0x70] sm:$0xff] %v2104_v1  ;;  %761 = vst [vmem:[#allocation2 + $0x78] sm:$0xff] %v2105_v2  ;;  %v909_v33 = vadd.f32 %v908_v30, %v2562_v59  ;;  %v982_v34 = vadd.f32 %v981_v3, %v2566_v60 }
 0x103   : > { %v910_v4 = vpop.f32.mrf.mxu0  ;;  %v983_v35 = vpop.f32.mrf.mxu1 }
 0x104   : > { %v2106_v5 = vpack.c.bf16 %v909_v33, %v907_v27  ;;  %v2107_v36 = vpack.c.bf16 %v982_v34, %v980_v31  ;;  %v911_v8 = vadd.f32 %v910_v4, %v2554_v57  ;;  %v984_v9 = vadd.f32 %v983_v35, %v2558_v58 }
 0x105   : > { %v912_v6 = vpop.f32.mrf.mxu0  ;;  %v985_v7 = vpop.f32.mrf.mxu1 }
 0x106   : > { %1114 = vst [vmem:[#allocation3] sm:$0xff] %v2106_v5  ;;  %1115 = vst [vmem:[#allocation3 + $0x8] sm:$0xff] %v2107_v36  ;;  %v913_v10 = vadd.f32 %v912_v6, %v2562_v59  ;;  %v986_v11 = vadd.f32 %v985_v7, %v2566_v60 }
 0x107   : > { %v916_v12 = vpop.f32.mrf.mxu0  ;;  %v989_v13 = vpop.f32.mrf.mxu1 }
 0x108   : > { %v2108_v14 = vpack.c.bf16 %v913_v10, %v911_v8  ;;  %v2109_v15 = vpack.c.bf16 %v986_v11, %v984_v9  ;;  %v917_v18 = vadd.f32 %v916_v12, %v2554_v57  ;;  %v990_v19 = vadd.f32 %v989_v13, %v2558_v58 }
 0x109   : > { %v918_v16 = vpop.f32.mrf.mxu0  ;;  %v991_v17 = vpop.f32.mrf.mxu1 }
 0x10a   : > { %1116 = vst [vmem:[#allocation3 + $0x10] sm:$0xff] %v2108_v14  ;;  %1117 = vst [vmem:[#allocation3 + $0x18] sm:$0xff] %v2109_v15  ;;  %v919_v20 = vadd.f32 %v918_v16, %v2562_v59  ;;  %v992_v21 = vadd.f32 %v991_v17, %v2566_v60 }
 0x10b   : > { %v920_v22 = vpop.f32.mrf.mxu0  ;;  %v993_v23 = vpop.f32.mrf.mxu1 }
 0x10c   : > { %v2110_v24 = vpack.c.bf16 %v919_v20, %v917_v18  ;;  %v2111_v25 = vpack.c.bf16 %v992_v21, %v990_v19  ;;  %v921_v37 = vadd.f32 %v920_v22, %v2554_v57  ;;  %v994_v38 = vadd.f32 %v993_v23, %v2558_v58 }
 0x10d   : > { %v922_v26 = vpop.f32.mrf.mxu0  ;;  %v995_v32 = vpop.f32.mrf.mxu1 }
 0x10e   : > { %1118 = vst [vmem:[#allocation3 + $0x20] sm:$0xff] %v2110_v24  ;;  %1119 = vst [vmem:[#allocation3 + $0x28] sm:$0xff] %v2111_v25  ;;  %v923_v39 = vadd.f32 %v922_v26, %v2562_v59  ;;  %v996_v40 = vadd.f32 %v995_v32, %v2566_v60 }
 0x10f   : > { %v926_v41 = vpop.f32.mrf.mxu0  ;;  %v999_v42 = vpop.f32.mrf.mxu1 }
 0x110   : > { %v2112_v43 = vpack.c.bf16 %v923_v39, %v921_v37  ;;  %v2113_v44 = vpack.c.bf16 %v996_v40, %v994_v38  ;;  %v927_v47 = vadd.f32 %v926_v41, %v2554_v57  ;;  %v1000_v48 = vadd.f32 %v999_v42, %v2558_v58 }
 0x111   : > { %v928_v45 = vpop.f32.mrf.mxu0  ;;  %v1001_v46 = vpop.f32.mrf.mxu1 }
 0x112   : > { %1120 = vst [vmem:[#allocation3 + $0x30] sm:$0xff] %v2112_v43  ;;  %1121 = vst [vmem:[#allocation3 + $0x38] sm:$0xff] %v2113_v44  ;;  %v929_v49 = vadd.f32 %v928_v45, %v2562_v59  ;;  %v1002_v50 = vadd.f32 %v1001_v46, %v2566_v60 }
 0x113   : > { %v930_v51 = vpop.f32.mrf.mxu0  ;;  %v1003_v52 = vpop.f32.mrf.mxu1 }
 0x114   : > { %v2114_v53 = vpack.c.bf16 %v929_v49, %v927_v47  ;;  %v2115_v54 = vpack.c.bf16 %v1002_v50, %v1000_v48  ;;  %v931_v61 = vadd.f32 %v930_v51, %v2554_v57  ;;  %v1004_v62 = vadd.f32 %v1003_v52, %v2558_v58 }
 0x115   : > { %v932_v55 = vpop.f32.mrf.mxu0  ;;  %v1005_v56 = vpop.f32.mrf.mxu1 }
 0x116   : > { %1122 = vst [vmem:[#allocation3 + $0x40] sm:$0xff] %v2114_v53  ;;  %1123 = vst [vmem:[#allocation3 + $0x48] sm:$0xff] %v2115_v54  ;;  %v933_v28 = vadd.f32 %v932_v55, %v2562_v59  ;;  %v1006_v63 = vadd.f32 %v1005_v56, %v2566_v60 }
 0x117   : > { %v936_v29 = vpop.f32.mrf.mxu0  ;;  %v1009_v0 = vpop.f32.mrf.mxu1 }
 0x118   : > { %v2116_v1 = vpack.c.bf16 %v933_v28, %v931_v61  ;;  %v2117_v2 = vpack.c.bf16 %v1006_v63, %v1004_v62  ;;  %v937_v27 = vadd.f32 %v936_v29, %v2554_v57  ;;  %v1010_v31 = vadd.f32 %v1009_v0, %v2558_v58 }
 0x119   : > { %v938_v30 = vpop.f32.mrf.mxu0  ;;  %v1011_v3 = vpop.f32.mrf.mxu1 }
 0x11a   : > { %1124 = vst [vmem:[#allocation3 + $0x50] sm:$0xff] %v2116_v1  ;;  %1125 = vst [vmem:[#allocation3 + $0x58] sm:$0xff] %v2117_v2  ;;  %v939_v33 = vadd.f32 %v938_v30, %v2562_v59  ;;  %v1012_v34 = vadd.f32 %v1011_v3, %v2566_v60 }
 0x11b   : > { %v940_v4 = vpop.f32.mrf.mxu0  ;;  %v1013_v35 = vpop.f32.mrf.mxu1 }
 0x11c   : > { %v2118_v5 = vpack.c.bf16 %v939_v33, %v937_v27  ;;  %v2119_v36 = vpack.c.bf16 %v1012_v34, %v1010_v31  ;;  %v941_v8 = vadd.f32 %v940_v4, %v2554_v57  ;;  %v1014_v9 = vadd.f32 %v1013_v35, %v2558_v58 }
 0x11d   : > { %v942_v6 = vpop.f32.mrf.mxu0  ;;  %v1015_v7 = vpop.f32.mrf.mxu1 }
 0x11e   : > { %1126 = vst [vmem:[#allocation3 + $0x60] sm:$0xff] %v2118_v5  ;;  %1127 = vst [vmem:[#allocation3 + $0x68] sm:$0xff] %v2119_v36  ;;  %v943_v10 = vadd.f32 %v942_v6, %v2562_v59  ;;  %v1016_v11 = vadd.f32 %v1015_v7, %v2566_v60 }
 0x120   : > { %v2120_v12 = vpack.c.bf16 %v943_v10, %v941_v8  ;;  %v2121_v13 = vpack.c.bf16 %v1016_v11, %v1014_v9 }
 0x122   : > { %1128 = vst [vmem:[#allocation3 + $0x70] sm:$0xff] %v2120_v12  ;;  %1129 = vst [vmem:[#allocation3 + $0x78] sm:$0xff] %v2121_v13 }
 0x123 LB: >> { %v2175_v57 = vld [vmem:[%s2840_s2 + $0xe4] ss:$16 sps:$4 sm:$0xff]   ;;  %v2177_v58 = vld [vmem:[%s2840_s2 + $0xe0] ss:$16 sps:$4 sm:$0xff]   ;;  %v2321_v59 = vmov 0   ;;  %s2010_s14 = sshll.u32 %s2317_s18, 3  ;;  %s1766_s17 = sadd.s32 %s2317_s18, %s2380_s11  ;;  %s2317_s18 = sphi %s2604_s18, %s1138_s18  }
 0x124   : >> { %1382 = vmatprep.mubr.bf16.mxu0 %v2321_v59  ;;  %1423 = vmatprep.mubr.bf16.mxu1 %v2321_v59  ;;  %v2178_v60 = vld [vmem:[%s2840_s2 + $0xc4] ss:$16 sps:$4 sm:$0xff]   ;;  %v2180_v14 = vld [vmem:[%s2840_s2 + $0xc0] ss:$16 sps:$4 sm:$0xff]   ;;  %v2186_v16 = vld [vmem:[%s2840_s2 + $0xec] ss:$16 sps:$4 sm:$0xff]  }
 0x125   : >> { %1350 = vmatprep.subr.bf16.mxu0 %v2175_v57  ;;  %v2181_v15 = vld [vmem:[%s2840_s2 + $0xa4] ss:$16 sps:$4 sm:$0xff]   ;;  %v2189_v17 = vld [vmem:[%s2840_s2 + $0xe8] ss:$16 sps:$4 sm:$0xff]   ;;  %v2183_v18 = vld [vmem:[%s2840_s2 + $0xa0] ss:$16 sps:$4 sm:$0xff]   ;;  %1391 = vmatprep.subr.bf16.mxu1 %v2186_v16 }
 0x126   : >> { %1351 = vmatpush1.bf16.msra.mxu0 %v2177_v58  ;;  %v2184_v19 = vld [vmem:[%s2840_s2 + $0x84] ss:$16 sps:$4 sm:$0xff]   ;;  %1392 = vmatpush1.bf16.msra.mxu1 %v2189_v17  ;;  %v2192_v20 = vld [vmem:[%s2840_s2 + $0xcc] ss:$16 sps:$4 sm:$0xff]   ;;  %v2195_v21 = vld [vmem:[%s2840_s2 + $0xc8] ss:$16 sps:$4 sm:$0xff]  }
 0x127   : >> { %1352 = vmatprep.subr.bf16.mxu0 %v2178_v60  ;;  %1393 = vmatprep.subr.bf16.mxu1 %v2192_v20  ;;  %v2188_v22 = vld [vmem:[%s2840_s2 + $0x80] ss:$16 sps:$4 sm:$0xff]   ;;  %v2190_v23 = vld [vmem:[%s2840_s2 + $0x64] ss:$16 sps:$4 sm:$0xff]   ;;  %v2198_v24 = vld [vmem:[%s2840_s2 + $0xac] ss:$16 sps:$4 sm:$0xff]  }
 0x128   : >> { %v2201_v25 = vld [vmem:[%s2840_s2 + $0xa8] ss:$16 sps:$4 sm:$0xff]   ;;  %v2204_v26 = vld [vmem:[%s2840_s2 + $0x8c] ss:$16 sps:$4 sm:$0xff]   ;;  %v2194_v32 = vld [vmem:[%s2840_s2 + $0x60] ss:$16 sps:$4 sm:$0xff]  }
 0x129   : >> { %v2196_v37 = vld [vmem:[%s2840_s2 + $0x44] ss:$16 sps:$4 sm:$0xff]   ;;  %v2207_v38 = vld [vmem:[%s2840_s2 + $0x88] ss:$16 sps:$4 sm:$0xff]   ;;  %v2210_v39 = vld [vmem:[%s2840_s2 + $0x6c] ss:$16 sps:$4 sm:$0xff]  }
 0x12a   : >> { %1353 = vmatpush1.bf16.msra.mxu0 %v2180_v14  ;;  %1394 = vmatpush1.bf16.msra.mxu1 %v2195_v21  ;;  %v2200_v40 = vld [vmem:[%s2840_s2 + $0x40] ss:$16 sps:$4 sm:$0xff]   ;;  %v2202_v41 = vld [vmem:[%s2840_s2 + $0x24] ss:$16 sps:$4 sm:$0xff]   ;;  %v2213_v42 = vld [vmem:[%s2840_s2 + $0x68] ss:$16 sps:$4 sm:$0xff]  }
 0x12b   : >> { %1354 = vmatprep.subr.bf16.mxu0 %v2181_v15  ;;  %1395 = vmatprep.subr.bf16.mxu1 %v2198_v24  ;;  %v2214_v43 = vld [vmem:[%s2840_s2 + $0x4c] ss:$16 sps:$4 sm:$0xff]   ;;  %v2206_v44 = vld [vmem:[%s2840_s2 + $0x20] ss:$16 sps:$4 sm:$0xff]   ;;  %v2208_v45 = vld [vmem:[%s2840_s2 + $0x4] ss:$16 sps:$4 sm:$0xff]  }
 0x12c   : >> { %v2219_v46 = vld [vmem:[%s2840_s2 + $0x48] ss:$16 sps:$4 sm:$0xff]   ;;  %v2220_v47 = vld [vmem:[%s2840_s2 + $0x2c] ss:$16 sps:$4 sm:$0xff]   ;;  %v2212_v48 = vld [vmem:[%s2840_s2] ss:$16 sps:$4 sm:$0xff]  }
 0x12d   : >> { %v2698_v49 = vld [vmem:[#allocation4] sm:$0xff]  ;;  %v2225_v51 = vld [vmem:[%s2840_s2 + $0x28] ss:$16 sps:$4 sm:$0xff]   ;;  %v2226_v52 = vld [vmem:[%s2840_s2 + $0xc] ss:$16 sps:$4 sm:$0xff]   ;;  %s1179_s15 = sshra.s32 %s2010_s14, 3 }
 0x12e   : >> { %1355 = vmatpush1.bf16.msra.mxu0 %v2183_v18  ;;  %1396 = vmatpush1.bf16.msra.mxu1 %v2201_v25  ;;  %v2218_v50 = vld [vmem:[%s2844_s6 + $0xe4] ss:$16 sps:$4 sm:$0xff]   ;;  %v1146_v53 = vpack.c.bf16 %v2698_v49, %v2698_v49  ;;  %v2216_v54 = vld [vmem:[%s2844_s6 + $0xe0] ss:$16 sps:$4 sm:$0xff]   ;;  %v2231_v56 = vld [vmem:[%s2840_s2 + $0x8] ss:$16 sps:$4 sm:$0xff]  }
 0x12f   : >> { %1356 = vmatprep.subr.bf16.mxu0 %v2184_v19  ;;  %1397 = vmatprep.subr.bf16.mxu1 %v2204_v26  ;;  %v2224_v55 = vld [vmem:[%s2844_s6 + $0xc4] ss:$16 sps:$4 sm:$0xff]   ;;  %v2237_v61 = vld [vmem:[%s2844_s6 + $0xec] ss:$16 sps:$4 sm:$0xff]   ;;  %v2222_v62 = vld [vmem:[%s2844_s6 + $0xc0] ss:$16 sps:$4 sm:$0xff]  }
 0x130   : >> { %v2230_v28 = vld [vmem:[%s2844_s6 + $0xa4] ss:$16 sps:$4 sm:$0xff]   ;;  %v2235_v63 = vld [vmem:[%s2844_s6 + $0xe8] ss:$16 sps:$4 sm:$0xff]   ;;  %v2243_v29 = vld [vmem:[%s2844_s6 + $0xcc] ss:$16 sps:$4 sm:$0xff]  }
 0x131   : >> { %v2228_v0 = vld [vmem:[%s2844_s6 + $0xa0] ss:$16 sps:$4 sm:$0xff]   ;;  %v2234_v1 = vld [vmem:[%s2844_s6 + $0x84] ss:$16 sps:$4 sm:$0xff]   ;;  %v2241_v2 = vld [vmem:[%s2844_s6 + $0xc8] ss:$16 sps:$4 sm:$0xff]  }
 0x132   : >> { %1357 = vmatpush1.bf16.msra.mxu0 %v2188_v22  ;;  %1398 = vmatpush1.bf16.msra.mxu1 %v2207_v38  ;;  %v2249_v30 = vld [vmem:[%s2844_s6 + $0xac] ss:$16 sps:$4 sm:$0xff]   ;;  %v2232_v3 = vld [vmem:[%s2844_s6 + $0x80] ss:$16 sps:$4 sm:$0xff]   ;;  %v2240_v27 = vld [vmem:[%s2844_s6 + $0x64] ss:$16 sps:$4 sm:$0xff]  }
 0x133   : >> { %1358 = vmatprep.subr.bf16.mxu0 %v2190_v23  ;;  %1399 = vmatprep.subr.bf16.mxu1 %v2210_v39  ;;  %v2247_v31 = vld [vmem:[%s2844_s6 + $0xa8] ss:$16 sps:$4 sm:$0xff]   ;;  %v2255_v33 = vld [vmem:[%s2844_s6 + $0x8c] ss:$16 sps:$4 sm:$0xff]   ;;  %v2238_v34 = vld [vmem:[%s2844_s6 + $0x60] ss:$16 sps:$4 sm:$0xff]  }
 0x134   : >> { %v2246_v4 = vld [vmem:[%s2844_s6 + $0x44] ss:$16 sps:$4 sm:$0xff]   ;;  %v2253_v35 = vld [vmem:[%s2844_s6 + $0x88] ss:$16 sps:$4 sm:$0xff]   ;;  %v2261_v5 = vld [vmem:[%s2844_s6 + $0x6c] ss:$16 sps:$4 sm:$0xff]  }
 0x135   : >> { %v2244_v36 = vld [vmem:[%s2844_s6 + $0x40] ss:$16 sps:$4 sm:$0xff]   ;;  %v2252_v6 = vld [vmem:[%s2844_s6 + $0x24] ss:$16 sps:$4 sm:$0xff]   ;;  %v2259_v7 = vld [vmem:[%s2844_s6 + $0x68] ss:$16 sps:$4 sm:$0xff]  }
 0x136   : >> { %1359 = vmatpush1.bf16.msra.mxu0 %v2194_v32  ;;  %1400 = vmatpush1.bf16.msra.mxu1 %v2213_v42  ;;  %v2264_v8 = vld [vmem:[%s2844_s6 + $0x4c] ss:$16 sps:$4 sm:$0xff]   ;;  %v2250_v9 = vld [vmem:[%s2844_s6 + $0x20] ss:$16 sps:$4 sm:$0xff]   ;;  %v2258_v10 = vld [vmem:[%s2844_s6 + $0x4] ss:$16 sps:$4 sm:$0xff]  }
 0x137   : >> { %1360 = vmatprep.subr.bf16.mxu0 %v2196_v37  ;;  %1401 = vmatprep.subr.bf16.mxu1 %v2214_v43  ;;  %v2262_v11 = vld [vmem:[%s2844_s6 + $0x48] ss:$16 sps:$4 sm:$0xff]   ;;  %v2267_v12 = vld [vmem:[%s2844_s6 + $0x2c] ss:$16 sps:$4 sm:$0xff]   ;;  %v2256_v13 = vld [vmem:[%s2844_s6] ss:$16 sps:$4 sm:$0xff]  }
 0x138   : >> { %v2800_v57 = vld [vmem:[#allocation6] sm:$0xff]  ;;  %v2265_v58 = vld [vmem:[%s2844_s6 + $0x28] ss:$16 sps:$4 sm:$0xff]   ;;  %s2122_s16 = sshll.u32 %s1179_s15, 4  ;;  %s2815_s10 = ssub.s32 7, %s2317_s18 }
 0x139   : >> { %v1432_v60 = vpack.c.bf16 %v2800_v57, %v2800_v57  ;;  %v2268_v14 = vld [vmem:[%s2844_s6 + $0x8] ss:$16 sps:$4 sm:$0xff]   ;;  %s1183_s19 = scalar_lea.vmem [#allocation2], %s2122_s16  ;;  %s2011_s23 = sshll.u32 %s2815_s10, 3 }
 0x13a   : >> { %1361 = vmatpush1.bf16.msra.mxu0 %v2200_v40  ;;  %1402 = vmatpush1.bf16.msra.mxu1 %v2219_v46  ;;  %v1184_v15 = vld [vmem:[%s1183_s19] sm:$0xff]  ;;  %v1185_v23 = vld [vmem:[%s1183_s19 + $0x8] sm:$0xff]  ;;  %s1465_s20 = sshra.s32 %s2011_s23, 3  ;;  %p1767_p6 = scmp.lt.s32.totalorder %s1766_s17, 10 }
 0x13b   : >> { %1362 = vmatprep.subr.bf16.mxu0 %v2202_v41  ;;  %1403 = vmatprep.subr.bf16.mxu1 %v2220_v47  ;;  %v1186_v16 = vunpack.c.l.bf16 %v1184_v15  ;;  %v1187_v17 = vunpack.c.h.bf16 %v1184_v15  ;;  %v1189_v37 = vunpack.c.h.bf16 %v1185_v23  ;;  %v1188_v41 = vunpack.c.l.bf16 %v1185_v23  ;;  %s2123_s21 = sshll.u32 %s1465_s20, 4  ;;  %s1770_s28 = sadd.s32 %s2383_s13, %s2815_s10 }
 0x13c   : >> { %s1768_s22 = scalar_select %p1767_p6, 1, 0 }
 0x13d   : >> { %s1469_s24 = scalar_lea.vmem [#allocation3], %s2123_s21  ;;  %p1771_p7 = scmp.lt.s32.totalorder %s1770_s28, 10 }
 0x13e   : >> { %1363 = vmatpush1.bf16.msra.mxu0 %v2206_v44  ;;  %1404 = vmatpush1.bf16.msra.mxu1 %v2225_v51  ;;  %s2820_s25 = scvt.s32.f32 %s1768_s22  ;;  %s2086_s14 = sshll.u32 %s2317_s18, 2 }
 0x13f   : >> { %1364 = vmatprep.subr.bf16.mxu0 %v2208_v45  ;;  %1405 = vmatprep.subr.bf16.mxu1 %v2226_v52  ;;  %s1772_s12 = scalar_select %p1771_p7, 1, 0 }
 0x140   : >> { %s1776_s27 = ssub.f32 1.0, %s2820_s25  ;;  %s1798_s15 = scalar_lea.vmem %s2401_s26, %s2086_s14 }
 0x141   : >> { %s1773_s16 = scvt.s32.f32 %s1772_s12  ;;  %s2087_s23 = sshll.u32 %s2815_s10, 2 }
 0x142   : >> { %1365 = vmatpush1.bf16.msra.mxu0 %v2212_v48  ;;  %1406 = vmatpush1.bf16.msra.mxu1 %v2231_v56  ;;  %s1802_s17 = scalar_lea.vmem %s2406_s29, %s2087_s23  ;;  %s1138_s18 = sadd.s32 1, %s2317_s18  }
 0x143   : >> { %1636 = vmatprep.subr.bf16.mxu0 %v2218_v50  ;;  %1677 = vmatprep.subr.bf16.mxu1 %v2237_v61  ;;  %v1470_v50 = vld [vmem:[%s1469_s24] sm:$0xff]  ;;  %s1785_s19 = ssub.f32 1.0, %s1773_s16  ;;  %p1135_p8 = scmp.ge.s32.totalorder %s1138_s18, 8  }
 0x144   : >> { %v1472_v51 = vunpack.c.l.bf16 %v1470_v50 }
 0x145   : >> { %1383 = vmatmul.mubr.bf16.vlgmr.msra.gmra.mxu0 %v1146_v53  ;;  %1424 = vmatmul.mubr.bf16.vlgmr.msra.gmra.mxu1 %v1146_v53  ;;  %v1473_v53 = vunpack.c.h.bf16 %v1470_v50 }
 0x146   : >> { %1637 = vmatpush1.bf16.msra.mxu0 %v2216_v54  ;;  %1668 = vmatprep.mubr.bf16.mxu0 %v2321_v59 }
 0x147   : >> { %1638 = vmatprep.subr.bf16.mxu0 %v2224_v55  ;;  %1678 = vmatpush1.bf16.msra.mxu1 %v2235_v63 }
 0x148   : >> { %1679 = vmatprep.subr.bf16.mxu1 %v2243_v29  ;;  %1709 = vmatprep.mubr.bf16.mxu1 %v2321_v59  ;;  %v2270_v59 = vld [vmem:[%s2844_s6 + $0xc] ss:$16 sps:$4 sm:$0xff]  }
 0x14a   : >> { %1639 = vmatpush1.bf16.msra.mxu0 %v2222_v62  ;;  %v1143_v62 = vld [vmem:[#allocation5] sm:$0xff] }
 0x14b   : >> { %1640 = vmatprep.subr.bf16.mxu0 %v2230_v28  ;;  %1680 = vmatpush1.bf16.msra.mxu1 %v2241_v2 }
 0x14c   : >> { %1681 = vmatprep.subr.bf16.mxu1 %v2249_v30  ;;  %v1777_v30 = vstv %s1776_s27 }
 0x14e   : >> { %1641 = vmatpush1.bf16.msra.mxu0 %v2228_v0 }
 0x14f   : >> { %1642 = vmatprep.subr.bf16.mxu0 %v2234_v1  ;;  %1682 = vmatpush1.bf16.msra.mxu1 %v2247_v31 }
 0x150   : >> { %1683 = vmatprep.subr.bf16.mxu1 %v2255_v33  ;;  %v1471_v33 = vld [vmem:[%s1469_s24 + $0x8] sm:$0xff] }
 0x152   : >> { %1643 = vmatpush1.bf16.msra.mxu0 %v2232_v3 }
 0x153   : >> { %1644 = vmatprep.subr.bf16.mxu0 %v2240_v27  ;;  %1684 = vmatpush1.bf16.msra.mxu1 %v2253_v35 }
 0x154   : >> { %1685 = vmatprep.subr.bf16.mxu1 %v2261_v5  ;;  %v1781_v5 = vmul.f32 %v1777_v30, %v1143_v62 }
 0x156   : >> { %1645 = vmatpush1.bf16.msra.mxu0 %v2238_v34 }
 0x157   : >> { %1646 = vmatprep.subr.bf16.mxu0 %v2246_v4  ;;  %1686 = vmatpush1.bf16.msra.mxu1 %v2259_v7  ;;  %v1774_v4 = vstv %s2820_s25  ;;  %v1475_v7 = vunpack.c.h.bf16 %v1471_v33 }
 0x158   : >> { %1687 = vmatprep.subr.bf16.mxu1 %v2264_v8 }
 0x15a   : >> { %1647 = vmatpush1.bf16.msra.mxu0 %v2244_v36 }
 0x15b   : >> { %1648 = vmatprep.subr.bf16.mxu0 %v2252_v6  ;;  %1688 = vmatpush1.bf16.msra.mxu1 %v2262_v11  ;;  %v1474_v11 = vunpack.c.l.bf16 %v1471_v33 }
 0x15c   : >> { %1689 = vmatprep.subr.bf16.mxu1 %v2267_v12 }
 0x15e   : >> { %1649 = vmatpush1.bf16.msra.mxu0 %v2250_v9 }
 0x15f   : >> { %1650 = vmatprep.subr.bf16.mxu0 %v2258_v10  ;;  %1690 = vmatpush1.bf16.msra.mxu1 %v2265_v58 }
 0x160   : >> { %1691 = vmatprep.subr.bf16.mxu1 %v2270_v59 }
 0x162   : >> { %1651 = vmatpush1.bf16.msra.mxu0 %v2256_v13 }
 0x163   : >> { %1692 = vmatpush1.bf16.msra.mxu1 %v2268_v14 }
 0x165   : >> { %1669 = vmatmul.mubr.bf16.vlgmr.msra.gmra.mxu0 %v1432_v60 }
 0x166   : >> { %1710 = vmatmul.mubr.bf16.vlgmr.msra.gmra.mxu1 %v1432_v60 }
 0x205   : >> { %v1384_v18 = vpop.f32.mrf.mxu0  ;;  %v1425_v26 = vpop.f32.mrf.mxu1 }
 0x206   : >> { %v1385_v19 = vadd.f32 %v1384_v18, %v1186_v16  ;;  %v1426_v44 = vadd.f32 %v1425_v26, %v1188_v41  ;;  %v1783_v41 = vstv %s1773_s16 }
 0x207   : >> { %v1386_v20 = vpop.f32.mrf.mxu0  ;;  %v1427_v38 = vpop.f32.mrf.mxu1 }
 0x208   : >> { %v2080_v21 = vmul.f32 -1.442695, %v1385_v19  ;;  %v1387_v22 = vadd.f32 %v1386_v20, %v1187_v17  ;;  %v1428_v40 = vadd.f32 %v1427_v38, %v1189_v37  ;;  %v1778_v19 = vmul.f32 %v1777_v30, %v2698_v49 }
 0x209   : >> { %v1388_v24 = vpop.f32.mrf.mxu0  ;;  %v1429_v39 = vpop.f32.mrf.mxu1  ;;  %v1786_v38 = vstv %s1785_s19 }
 0x20a   : >> { %2271 = vpow2.f32 %v2080_v21  ;;  %v2081_v25 = vmul.f32 -1.442695, %v1387_v22  ;;  %v2082_v43 = vmul.f32 -1.442695, %v1428_v40 }
 0x20b   : >> { %v1389_v32 = vpop.f32.mrf.mxu0  ;;  %v1430_v42 = vpop.f32.mrf.mxu1 }
 0x20c   : >> { %2273 = vpow2.f32 %v2081_v25  ;;  %v1145_v32 = vld [vmem:[#allocation7] sm:$0xff] }
 0x20d   : >> { %2275 = vpow2.f32 %v2082_v43  ;;  %v1790_v42 = vmul.f32 %v1786_v38, %v1145_v32 }
 0x20e   : >> { %2277 = vtanh.f32 %v1426_v44 }
 0x217   : >> { %v2272_v45 = vpop.eup %2271 }
 0x218   : >> { %v1721_v46 = vadd.f32 1.0, %v2272_v45 }
 0x219   : >> { %v2274_v47 = vpop.eup %2273 }
 0x21a   : >> { %2279 = vrcp.f32 %v1721_v46  ;;  %v1727_v48 = vadd.f32 1.0, %v2274_v47  ;;  %v2276_v52 = vpop.eup %2275 }
 0x21b   : >> { %v2278_v54 = vpop.eup %2277  ;;  %v1734_v28 = vadd.f32 1.0, %v2276_v52 }
 0x21c   : >> { %2281 = vrcp.f32 %v1727_v48  ;;  %v1787_v48 = vmul.f32 %v1786_v38, %v2800_v57 }
 0x225   : >> { %v1670_v55 = vpop.f32.mrf.mxu0 }
 0x226   : >> { %v1671_v56 = vadd.f32 %v1670_v55, %v1472_v51  ;;  %v1711_v34 = vpop.f32.mrf.mxu1 }
 0x227   : >> { %v2280_v61 = vpop.eup %2279  ;;  %v1672_v63 = vpop.f32.mrf.mxu0  ;;  %v1712_v58 = vadd.f32 %v1711_v34, %v1474_v11 }
 0x228   : >> { %v1738_v29 = vmul.f32 %v2280_v61, %v2278_v54  ;;  %v2083_v0 = vmul.f32 -1.442695, %v1671_v56  ;;  %v1673_v1 = vadd.f32 %v1672_v63, %v1473_v53  ;;  %v1713_v6 = vpop.f32.mrf.mxu1 }
 0x229   : >> { %v2282_v2 = vpop.eup %2281  ;;  %v1674_v3 = vpop.f32.mrf.mxu0  ;;  %v1714_v13 = vadd.f32 %v1713_v6, %v1475_v7 }
 0x22a   : >> { %v1737_v27 = vmul.f32 %v2282_v2, %v1143_v62  ;;  %2283 = vpow2.f32 %v2083_v0  ;;  %v2084_v31 = vmul.f32 -1.442695, %v1673_v1  ;;  %v1715_v9 = vpop.f32.mrf.mxu1 }
 0x22b   : >> { %2285 = vrcp.f32 %v1734_v28  ;;  %v1675_v35 = vpop.f32.mrf.mxu0  ;;  %v2085_v59 = vmul.f32 -1.442695, %v1714_v13 }
 0x22c   : >> { %v1739_v36 = vadd.f32 %v1738_v29, %v1737_v27  ;;  %2287 = vpow2.f32 %v2084_v31  ;;  %v1716_v12 = vpop.f32.mrf.mxu1 }
 0x22e   : >> { %2289 = vtanh.f32 %v1739_v36  ;;  %v1780_v8 = vmul.f32 %v1774_v4, %v1739_v36 }
 0x22f   : >> { %2291 = vtanh.f32 %v1712_v58 }
 0x230   : >> { %v1782_v10 = vadd.f32 %v1781_v5, %v1780_v8  ;;  %2293 = vpow2.f32 %v2085_v59 }
 0x232   : >> { %1793 = vst [vmem:[#allocation5] sm:$0xff] %v1782_v10 }
 0x237   : >> { %v2284_v60 = vpop.eup %2283 }
 0x238   : >> { %v2286_v14 = vpop.eup %2285  ;;  %v1745_v15 = vadd.f32 1.0, %v2284_v60 }
 0x239   : >> { %v2288_v16 = vpop.eup %2287 }
 0x23a   : >> { %2295 = vrcp.f32 %v1745_v15  ;;  %v1751_v17 = vadd.f32 1.0, %v2288_v16 }
 0x23b   : >> { %v2290_v18 = vpop.eup %2289 }
 0x23c   : >> { %v1741_v20 = vmul.f32 %v2290_v18, %v2286_v14  ;;  %2297 = vrcp.f32 %v1751_v17  ;;  %v2292_v24 = vpop.eup %2291 }
 0x23d   : >> { %v2294_v25 = vpop.eup %2293 }
 0x23e   : >> { %v1775_v21 = vmul.f32 %v1774_v4, %v1741_v20  ;;  %v1758_v49 = vadd.f32 1.0, %v2294_v25 }
 0x240   : >> { %v1779_v22 = vadd.f32 %v1778_v19, %v1775_v21  ;;  %2299 = vrcp.f32 %v1758_v49 }
 0x242   : >> { %1792 = vst [vmem:[#allocation4] sm:$0xff] %v1779_v22  ;;  %v1796_v23 = vpack.c.bf16 %v1779_v22, %v1779_v22 }
 0x244   : >> { %1799 = vst [vmem:[%s1798_s15] sm:$0xf] %v1796_v23 }
 0x247   : >> { %v2296_v26 = vpop.eup %2295 }
 0x248   : >> { %v1762_v40 = vmul.f32 %v2296_v26, %v2292_v24 }
 0x249   : >> { %v2298_v37 = vpop.eup %2297 }
 0x24a   : >> { %v1761_v39 = vmul.f32 %v2298_v37, %v1145_v32 }
 0x24c   : >> { %v1763_v43 = vadd.f32 %v1762_v40, %v1761_v39 }
 0x24d   : >> { %v2300_v46 = vpop.eup %2299 }
 0x24e   : >> { %2301 = vtanh.f32 %v1763_v43  ;;  %v1789_v44 = vmul.f32 %v1783_v41, %v1763_v43 }
 0x250   : >> { %v1791_v45 = vadd.f32 %v1790_v42, %v1789_v44 }
 0x252   : >> { %1795 = vst [vmem:[#allocation7] sm:$0xff] %v1791_v45 }
 0x25b   : >> { %v2302_v47 = vpop.eup %2301 }
 0x25c   : >> { %v1765_v50 = vmul.f32 %v2302_v47, %v2300_v46 }
 0x25e   : >> { %v1784_v51 = vmul.f32 %v1783_v41, %v1765_v50 }
 0x260   : >> { %v1788_v52 = vadd.f32 %v1787_v48, %v1784_v51  ;;  %1137 = sbr.rel (!%p1135_p8) target bundleno = 291 (0x123), region = 112 }
 0x262   : >> { %1794 = vst [vmem:[#allocation6] sm:$0xff] %v1788_v52  ;;  %v1800_v53 = vpack.c.bf16 %v1788_v52, %v1788_v52 }
 0x264   : >> { %1803 = vst [vmem:[%s1802_s17] sm:$0xf] %v1800_v53 }
 0x265 PF: > { %s20_s30 = sadd.s32 1, %s2313_s30  }
 0x266   : > { %p17_p9 = scmp.ge.s32.totalorder %s20_s30, 4  }
 0x268   :  { %19 = sbr.rel (!%p17_p9) target bundleno = 1 (0x1), region = 123 }

// kernel: vanilla_seqlabel_forward.11
= control target key start
LH: loop header
LB: loop body
LE: loop exit
PB: predicated region body
PF: predicated region fallthrough
CT: control target
= control target key end

     0   :  { %s870_s3 = inlined_call_operand.vmem [shape: bf16[128,128], index: 3, kind: input, shape index: {}]   ;;  %s871_s2 = inlined_call_operand.vmem [shape: bf16[128,128], index: 2, kind: input, shape index: {}]   ;;  %s872_s1 = inlined_call_operand.vmem [shape: bf16[128,128], index: 1, kind: input, shape index: {}]   ;;  %s873_s0 = inlined_call_operand.vmem [shape: bf16[128,128], index: 0, kind: input, shape index: {}]   ;;  %s874_s4 = inlined_call_operand.vmem [shape: f32[1,128], index: 4, kind: input, shape index: {}]   ;;  %s875_s5 = inlined_call_operand.vmem [shape: f32[128,128], index: 5, kind: output, shape index: {}]  }
   0x1   :  { %v643_v0 = vld [vmem:[%s870_s3 + $0x38] sm:$0xff]   ;;  %v645_v2 = vld [vmem:[%s870_s3 + $0x30] sm:$0xff]   ;;  %v647_v4 = vld [vmem:[%s870_s3 + $0x28] sm:$0xff]  }
   0x2   :  { %v644_v1 = vld [vmem:[%s871_s2 + $0x38] sm:$0xff]   ;;  %579 = vmatprep.subr.bf16.mxu0 %v643_v0  ;;  %v646_v3 = vld [vmem:[%s871_s2 + $0x30] sm:$0xff]   ;;  %v648_v5 = vld [vmem:[%s871_s2 + $0x28] sm:$0xff]  }
   0x3   :  { %611 = vmatprep.subr.bf16.mxu1 %v644_v1  ;;  %580 = vmatpush3.bf16.msra.mxu0 %v643_v0  ;;  %v649_v6 = vld [vmem:[%s870_s3 + $0x20] sm:$0xff]   ;;  %v651_v8 = vld [vmem:[%s870_s3 + $0x18] sm:$0xff]   ;;  %v653_v10 = vld [vmem:[%s870_s3 + $0x10] sm:$0xff]  }
   0x4   :  { %612 = vmatpush3.bf16.msra.mxu1 %v644_v1  ;;  %581 = vmatprep.subr.bf16.mxu0 %v645_v2  ;;  %v650_v7 = vld [vmem:[%s871_s2 + $0x20] sm:$0xff]   ;;  %v652_v9 = vld [vmem:[%s871_s2 + $0x18] sm:$0xff]   ;;  %v654_v11 = vld [vmem:[%s871_s2 + $0x10] sm:$0xff]  }
   0x5   :  { %613 = vmatprep.subr.bf16.mxu1 %v646_v3  ;;  %v659_v12 = vld [vmem:[%s872_s1] sm:$0xff]   ;;  %v655_v14 = vld [vmem:[%s870_s3 + $0x8] sm:$0xff]   ;;  %v663_v20 = vld [vmem:[%s872_s1 + $0x10] sm:$0xff]  }
   0x6   :  { %v660_v13 = vld [vmem:[%s873_s0] sm:$0xff]   ;;  %595 = vmatprep.mubr.bf16.mxu0 %v659_v12  ;;  %v656_v15 = vld [vmem:[%s871_s2 + $0x8] sm:$0xff]   ;;  %v664_v21 = vld [vmem:[%s873_s0 + $0x10] sm:$0xff]  }
   0x7   :  { %582 = vmatpush3.bf16.msra.mxu0 %v645_v2  ;;  %627 = vmatprep.mubr.bf16.mxu1 %v660_v13  ;;  %v657_v16 = vld [vmem:[%s870_s3] sm:$0xff]   ;;  %v661_v18 = vld [vmem:[%s872_s1 + $0x8] sm:$0xff]   ;;  %v665_v22 = vld [vmem:[%s872_s1 + $0x18] sm:$0xff]  }
   0x8   :  { %614 = vmatpush3.bf16.msra.mxu1 %v646_v3  ;;  %583 = vmatprep.subr.bf16.mxu0 %v647_v4  ;;  %v658_v17 = vld [vmem:[%s871_s2] sm:$0xff]   ;;  %v662_v19 = vld [vmem:[%s873_s0 + $0x8] sm:$0xff]   ;;  %v666_v23 = vld [vmem:[%s873_s0 + $0x18] sm:$0xff]  }
   0x9   :  { %615 = vmatprep.subr.bf16.mxu1 %v648_v5  ;;  %v667_v24 = vld [vmem:[%s872_s1 + $0x20] sm:$0xff]   ;;  %v669_v26 = vld [vmem:[%s872_s1 + $0x28] sm:$0xff]   ;;  %v671_v28 = vld [vmem:[%s872_s1 + $0x30] sm:$0xff]  }
   0xa   :  { %v668_v25 = vld [vmem:[%s873_s0 + $0x20] sm:$0xff]   ;;  %v670_v27 = vld [vmem:[%s873_s0 + $0x28] sm:$0xff]   ;;  %v672_v29 = vld [vmem:[%s873_s0 + $0x30] sm:$0xff]  }
   0xb   :  { %584 = vmatpush3.bf16.msra.mxu0 %v647_v4  ;;  %v673_v30 = vld [vmem:[%s872_s1 + $0x38] sm:$0xff]   ;;  %v804_v34 = vld [vmem:[%s874_s4] ss:$0 sm:$0xff] }
   0xc   :  { %616 = vmatpush3.bf16.msra.mxu1 %v648_v5  ;;  %585 = vmatprep.subr.bf16.mxu0 %v649_v6  ;;  %v674_v31 = vld [vmem:[%s873_s0 + $0x38] sm:$0xff]  }
   0xd   :  { %617 = vmatprep.subr.bf16.mxu1 %v650_v7 }
   0xf   :  { %586 = vmatpush3.bf16.msra.mxu0 %v649_v6 }
  0x10   :  { %618 = vmatpush3.bf16.msra.mxu1 %v650_v7  ;;  %587 = vmatprep.subr.bf16.mxu0 %v651_v8 }
  0x11   :  { %619 = vmatprep.subr.bf16.mxu1 %v652_v9 }
  0x13   :  { %588 = vmatpush3.bf16.msra.mxu0 %v651_v8 }
  0x14   :  { %620 = vmatpush3.bf16.msra.mxu1 %v652_v9  ;;  %589 = vmatprep.subr.bf16.mxu0 %v653_v10 }
  0x15   :  { %621 = vmatprep.subr.bf16.mxu1 %v654_v11 }
  0x17   :  { %590 = vmatpush3.bf16.msra.mxu0 %v653_v10 }
  0x18   :  { %622 = vmatpush3.bf16.msra.mxu1 %v654_v11  ;;  %591 = vmatprep.subr.bf16.mxu0 %v655_v14 }
  0x19   :  { %623 = vmatprep.subr.bf16.mxu1 %v656_v15 }
  0x1b   :  { %592 = vmatpush3.bf16.msra.mxu0 %v655_v14 }
  0x1c   :  { %624 = vmatpush3.bf16.msra.mxu1 %v656_v15  ;;  %593 = vmatprep.subr.bf16.mxu0 %v657_v16 }
  0x1d   :  { %625 = vmatprep.subr.bf16.mxu1 %v658_v17 }
  0x1f   :  { %594 = vmatpush3.bf16.msra.mxu0 %v657_v16 }
  0x20   :  { %626 = vmatpush3.bf16.msra.mxu1 %v658_v17 }
  0x22   :  { %596 = vmatmul.mubr.bf16.vlgmr.msra.gmra.mxu0 %v661_v18 }
  0x23   :  { %628 = vmatmul.mubr.bf16.vlgmr.msra.gmra.mxu1 %v662_v19  ;;  %599 = vmatprep.mubr.bf16.mxu0 %v663_v20 }
  0x24   :  { %631 = vmatprep.mubr.bf16.mxu1 %v664_v21 }
  0x2a   :  { %600 = vmatmul.mubr.bf16.gmra.mxu0 %v665_v22 }
  0x2b   :  { %632 = vmatmul.mubr.bf16.gmra.mxu1 %v666_v23  ;;  %603 = vmatprep.mubr.bf16.mxu0 %v667_v24 }
  0x2c   :  { %635 = vmatprep.mubr.bf16.mxu1 %v668_v25 }
  0x32   :  { %604 = vmatmul.mubr.bf16.gmra.mxu0 %v669_v26 }
  0x33   :  { %636 = vmatmul.mubr.bf16.gmra.mxu1 %v670_v27  ;;  %607 = vmatprep.mubr.bf16.mxu0 %v671_v28 }
  0x34   :  { %639 = vmatprep.mubr.bf16.mxu1 %v672_v29 }
  0x3a   :  { %608 = vmatmul.mubr.bf16.gmra.mxu0 %v673_v30 }
  0x3b   :  { %640 = vmatmul.mubr.bf16.gmra.mxu1 %v674_v31 }
  0xe2   :  { %v597_v32 = vpop.f32.mrf.mxu0 }
  0xe3   :  { %v629_v33 = vpop.f32.mrf.mxu1 }
  0xe4   :  { %v417_v35 = vadd.f32 %v629_v33, %v597_v32  ;;  %v215_v36 = vpop.f32.mrf.mxu0 }
  0xe5   :  { %v408_v37 = vpop.f32.mrf.mxu1 }
  0xe6   :  { %v480_v38 = vadd.f32 %v804_v34, %v417_v35  ;;  %v409_v39 = vadd.f32 %v408_v37, %v215_v36  ;;  %v598_v40 = vpop.f32.mrf.mxu0 }
  0xe7   :  { %v630_v41 = vpop.f32.mrf.mxu1 }
  0xe8   :  { %496 = vst [vmem:[%s875_s5 + $0x10] sm:$0xff] %v480_v38  ;;  %v478_v42 = vadd.f32 %v804_v34, %v409_v39  ;;  %v420_v43 = vadd.f32 %v630_v41, %v598_v40  ;;  %v218_v44 = vpop.f32.mrf.mxu0 }
  0xe9   :  { %v411_v45 = vpop.f32.mrf.mxu1 }
  0xea   :  { %494 = vst [vmem:[%s875_s5] sm:$0xff] %v478_v42  ;;  %v481_v46 = vadd.f32 %v804_v34, %v420_v43  ;;  %v412_v47 = vadd.f32 %v411_v45, %v218_v44  ;;  %v601_v48 = vpop.f32.mrf.mxu0 }
  0xeb   :  { %v633_v49 = vpop.f32.mrf.mxu1 }
  0xec   :  { %497 = vst [vmem:[%s875_s5 + $0x18] sm:$0xff] %v481_v46  ;;  %v479_v50 = vadd.f32 %v804_v34, %v412_v47  ;;  %v433_v51 = vadd.f32 %v633_v49, %v601_v48  ;;  %v231_v52 = vpop.f32.mrf.mxu0 }
  0xed   :  { %v424_v53 = vpop.f32.mrf.mxu1 }
  0xee   :  { %495 = vst [vmem:[%s875_s5 + $0x8] sm:$0xff] %v479_v50  ;;  %v484_v54 = vadd.f32 %v804_v34, %v433_v51  ;;  %v425_v55 = vadd.f32 %v424_v53, %v231_v52  ;;  %v602_v56 = vpop.f32.mrf.mxu0 }
  0xef   :  { %v634_v57 = vpop.f32.mrf.mxu1 }
  0xf0   :  { %500 = vst [vmem:[%s875_s5 + $0x30] sm:$0xff] %v484_v54  ;;  %v482_v58 = vadd.f32 %v804_v34, %v425_v55  ;;  %v436_v59 = vadd.f32 %v634_v57, %v602_v56  ;;  %v234_v60 = vpop.f32.mrf.mxu0 }
  0xf1   :  { %v427_v61 = vpop.f32.mrf.mxu1 }
  0xf2   :  { %498 = vst [vmem:[%s875_s5 + $0x20] sm:$0xff] %v482_v58  ;;  %v485_v62 = vadd.f32 %v804_v34, %v436_v59  ;;  %v428_v63 = vadd.f32 %v427_v61, %v234_v60  ;;  %v605_v0 = vpop.f32.mrf.mxu0 }
  0xf3   :  { %v637_v1 = vpop.f32.mrf.mxu1 }
  0xf4   :  { %501 = vst [vmem:[%s875_s5 + $0x38] sm:$0xff] %v485_v62  ;;  %v483_v2 = vadd.f32 %v804_v34, %v428_v63  ;;  %v449_v3 = vadd.f32 %v637_v1, %v605_v0  ;;  %v247_v4 = vpop.f32.mrf.mxu0 }
  0xf5   :  { %v440_v5 = vpop.f32.mrf.mxu1 }
  0xf6   :  { %499 = vst [vmem:[%s875_s5 + $0x28] sm:$0xff] %v483_v2  ;;  %v488_v6 = vadd.f32 %v804_v34, %v449_v3  ;;  %v441_v7 = vadd.f32 %v440_v5, %v247_v4  ;;  %v606_v8 = vpop.f32.mrf.mxu0 }
  0xf7   :  { %v638_v9 = vpop.f32.mrf.mxu1 }
  0xf8   :  { %504 = vst [vmem:[%s875_s5 + $0x50] sm:$0xff] %v488_v6  ;;  %v486_v10 = vadd.f32 %v804_v34, %v441_v7  ;;  %v452_v11 = vadd.f32 %v638_v9, %v606_v8  ;;  %v250_v12 = vpop.f32.mrf.mxu0 }
  0xf9   :  { %v443_v13 = vpop.f32.mrf.mxu1 }
  0xfa   :  { %502 = vst [vmem:[%s875_s5 + $0x40] sm:$0xff] %v486_v10  ;;  %v489_v14 = vadd.f32 %v804_v34, %v452_v11  ;;  %v444_v15 = vadd.f32 %v443_v13, %v250_v12  ;;  %v609_v16 = vpop.f32.mrf.mxu0 }
  0xfb   :  { %v641_v17 = vpop.f32.mrf.mxu1 }
  0xfc   :  { %505 = vst [vmem:[%s875_s5 + $0x58] sm:$0xff] %v489_v14  ;;  %v487_v18 = vadd.f32 %v804_v34, %v444_v15  ;;  %v465_v19 = vadd.f32 %v641_v17, %v609_v16  ;;  %v263_v20 = vpop.f32.mrf.mxu0 }
  0xfd   :  { %v456_v21 = vpop.f32.mrf.mxu1 }
  0xfe   :  { %503 = vst [vmem:[%s875_s5 + $0x48] sm:$0xff] %v487_v18  ;;  %v492_v22 = vadd.f32 %v804_v34, %v465_v19  ;;  %v457_v23 = vadd.f32 %v456_v21, %v263_v20  ;;  %v610_v24 = vpop.f32.mrf.mxu0 }
  0xff   :  { %v642_v25 = vpop.f32.mrf.mxu1 }
 0x100   :  { %508 = vst [vmem:[%s875_s5 + $0x70] sm:$0xff] %v492_v22  ;;  %v490_v26 = vadd.f32 %v804_v34, %v457_v23  ;;  %v468_v27 = vadd.f32 %v642_v25, %v610_v24  ;;  %v266_v28 = vpop.f32.mrf.mxu0 }
 0x101   :  { %v459_v29 = vpop.f32.mrf.mxu1 }
 0x102   :  { %506 = vst [vmem:[%s875_s5 + $0x60] sm:$0xff] %v490_v26  ;;  %v493_v30 = vadd.f32 %v804_v34, %v468_v27  ;;  %v460_v31 = vadd.f32 %v459_v29, %v266_v28 }
 0x104   :  { %509 = vst [vmem:[%s875_s5 + $0x78] sm:$0xff] %v493_v30  ;;  %v491_v32 = vadd.f32 %v804_v34, %v460_v31 }
 0x106   :  { %507 = vst [vmem:[%s875_s5 + $0x68] sm:$0xff] %v491_v32 }

// kernel: vanilla_seqlabel_forward.10
= control target key start
LH: loop header
LB: loop body
LE: loop exit
PB: predicated region body
PF: predicated region fallthrough
CT: control target
= control target key end

     0   :  { %s3355_s30 = smov 0   ;;  %s4133_s0 = inlined_call_operand.vmem [shape: bf16[128,256], index: 0, kind: input, shape index: {}, may-alias: {0,4}]   ;;  %s4134_s1 = inlined_call_operand.vmem [shape: bf16[256,512], index: 1, kind: input, shape index: {}]   ;;  %s4135_s2 = inlined_call_operand.vmem [shape: bf16[128,512], index: 2, kind: input, shape index: {}]   ;;  %s4136_s3 = inlined_call_operand.vmem [shape: f32[1,512], index: 3, kind: input, shape index: {}]   ;;  %s4137_s4 = inlined_call_operand.vmem [shape: bf16[128,256], index: 4, kind: input, shape index: {}, may-alias: {0,4}]   ;;  %s4138_s5 = inlined_call_operand.vmem [shape: bf16[256,512], index: 5, kind: input, shape index: {}]   ;;  %s4139_s6 = inlined_call_operand.vmem [shape: bf16[128,512], index: 6, kind: input, shape index: {}]   ;;  %s4140_s7 = inlined_call_operand.vmem [shape: f32[1,512], index: 7, kind: input, shape index: {}]   ;;  %s4141_s8 = inlined_call_operand.vmem [shape: bf16[16,8,128], index: 8, kind: output, shape index: {0}]   ;;  %s4142_s9 = inlined_call_operand.vmem [shape: bf16[16,8,128], index: 9, kind: output, shape index: {1}]  }
   0x1 LB: > { %s2615_s10 = sadd.s32 4294967295, %s3297_s30   ;;  %p2619_p0 = scmp.ge.s32.totalorder %s3297_s30, 1  ;;  %s3297_s30 = sphi %s3355_s30, %s20_s30  }
   0x2   : > { %p310_p1 = scmp.lt.s32.totalorder %s3297_s30, 3 }
   0x4   : > { %p311_p2 = pnand %p2619_p0, %p310_p1 }
   0x5   : > { %s3363_s11 = sshll.u32 (!%p311_p2), %s2615_s10, 3  ;;  %s367_s12 = ssub.s32 (!%p311_p2), 1, %s2615_s10 }
   0x6   : > { %314 = sbr.rel (%p311_p2) target bundleno = 703 (0x2bf), region = 52  ;;  %p361_p3 = scmp.lt.s32.totalorder (!%p311_p2), %s3363_s11, 15 }
   0x7   : > { %s3366_s13 = sshll.u32 (!%p311_p2), %s367_s12, 3  ;;  %p2630_p5 = scmp.ne.s32.totalorder (!%p311_p2), %s2615_s10, 0 }
   0x8   : > { %p369_p4 = scmp.lt.s32.totalorder (!%p311_p2), %s3366_s13, 15 }
   0xb   : > { %s362_s14 = scalar_select %p361_p3, %s3363_s11, 15 }
   0xc   : > { %s370_s15 = scalar_select %p369_p4, %s3366_s13, 15 }
   0xd   : > { %s2889_s16 = sshll.u32 %s362_s14, 3  ;;  %s2627_s17 = sshll.u32 %s362_s14, 2 }
   0xe   : > { %s3374_s20 = scalar_lea.vmem %s4133_s0, %s2889_s16  ;;  %s2890_s21 = sshll.u32 %s370_s15, 3 }
   0xf   : > { %s3379_s24 = scalar_lea.vmem %s4137_s4, %s2890_s21  ;;  %s3384_s27 = scalar_lea.vmem %s4141_s8, %s2627_s17 }
  0x10   : > { %s2629_s28 = sshll.u32 %s370_s15, 2  ;;  %394 = sbr.rel (%p2630_p5) target bundleno = 24 (0x18), region = 56 }
  0x11   : > { %s3389_s14 = scalar_lea.vmem %s4142_s9, %s2629_s28 }
  0x15   : > { %v3303_v0 = vmov 0.0  }
  0x16   : > { %395 = vst [vmem:[#allocation4] sm:$0xff] %v3303_v0  ;;  %396 = vst [vmem:[#allocation5] sm:$0xff] %v3303_v0 }
  0x17   : > { %397 = vst [vmem:[#allocation6] sm:$0xff] %v3303_v0  ;;  %398 = vst [vmem:[#allocation7] sm:$0xff] %v3303_v0 }
  0x18 PF: > { %v2943_v1 = vld [vmem:[%s4134_s1 + $0xe4] ss:$16 sps:$4 sm:$0xff]   ;;  %v2945_v2 = vld [vmem:[%s4134_s1 + $0xec] ss:$16 sps:$4 sm:$0xff]   ;;  %v2947_v3 = vld [vmem:[%s4134_s1 + $0xe0] ss:$16 sps:$4 sm:$0xff]  }
  0x19   : > { %853 = vmatprep.subr.bf16.mxu0 %v2943_v1  ;;  %v2948_v4 = vld [vmem:[%s4134_s1 + $0xe8] ss:$16 sps:$4 sm:$0xff]   ;;  %926 = vmatprep.subr.bf16.mxu1 %v2945_v2  ;;  %v2949_v5 = vld [vmem:[%s4134_s1 + $0xc4] ss:$16 sps:$4 sm:$0xff]   ;;  %v2951_v6 = vld [vmem:[%s4134_s1 + $0xcc] ss:$16 sps:$4 sm:$0xff]  }
  0x1a   : > { %854 = vmatpush1.bf16.msra.mxu0 %v2947_v3  ;;  %927 = vmatpush1.bf16.msra.mxu1 %v2948_v4  ;;  %v2953_v7 = vld [vmem:[%s4134_s1 + $0xc0] ss:$16 sps:$4 sm:$0xff]   ;;  %v2954_v8 = vld [vmem:[%s4134_s1 + $0xc8] ss:$16 sps:$4 sm:$0xff]   ;;  %v2955_v9 = vld [vmem:[%s4134_s1 + $0xa4] ss:$16 sps:$4 sm:$0xff]  }
  0x1b   : > { %855 = vmatprep.subr.bf16.mxu0 %v2949_v5  ;;  %928 = vmatprep.subr.bf16.mxu1 %v2951_v6  ;;  %v2957_v10 = vld [vmem:[%s4134_s1 + $0xac] ss:$16 sps:$4 sm:$0xff]   ;;  %v2959_v11 = vld [vmem:[%s4134_s1 + $0xa0] ss:$16 sps:$4 sm:$0xff]   ;;  %v2960_v12 = vld [vmem:[%s4134_s1 + $0xa8] ss:$16 sps:$4 sm:$0xff]  }
  0x1c   : > { %v2961_v13 = vld [vmem:[%s4134_s1 + $0x84] ss:$16 sps:$4 sm:$0xff]   ;;  %v2963_v14 = vld [vmem:[%s4134_s1 + $0x8c] ss:$16 sps:$4 sm:$0xff]   ;;  %v2965_v15 = vld [vmem:[%s4134_s1 + $0x80] ss:$16 sps:$4 sm:$0xff]  }
  0x1d   : > { %v2966_v16 = vld [vmem:[%s4134_s1 + $0x88] ss:$16 sps:$4 sm:$0xff]   ;;  %v2967_v17 = vld [vmem:[%s4134_s1 + $0x64] ss:$16 sps:$4 sm:$0xff]   ;;  %v2969_v18 = vld [vmem:[%s4134_s1 + $0x6c] ss:$16 sps:$4 sm:$0xff]  }
  0x1e   : > { %856 = vmatpush1.bf16.msra.mxu0 %v2953_v7  ;;  %929 = vmatpush1.bf16.msra.mxu1 %v2954_v8  ;;  %v2971_v19 = vld [vmem:[%s4134_s1 + $0x60] ss:$16 sps:$4 sm:$0xff]   ;;  %v2972_v20 = vld [vmem:[%s4134_s1 + $0x68] ss:$16 sps:$4 sm:$0xff]   ;;  %v2973_v21 = vld [vmem:[%s4134_s1 + $0x44] ss:$16 sps:$4 sm:$0xff]  }
  0x1f   : > { %857 = vmatprep.subr.bf16.mxu0 %v2955_v9  ;;  %930 = vmatprep.subr.bf16.mxu1 %v2957_v10  ;;  %v2975_v22 = vld [vmem:[%s4134_s1 + $0x4c] ss:$16 sps:$4 sm:$0xff]   ;;  %v2977_v23 = vld [vmem:[%s4134_s1 + $0x40] ss:$16 sps:$4 sm:$0xff]   ;;  %v2978_v24 = vld [vmem:[%s4134_s1 + $0x48] ss:$16 sps:$4 sm:$0xff]  }
  0x20   : > { %v2979_v25 = vld [vmem:[%s4134_s1 + $0x24] ss:$16 sps:$4 sm:$0xff]   ;;  %v2981_v26 = vld [vmem:[%s4134_s1 + $0x2c] ss:$16 sps:$4 sm:$0xff]   ;;  %v2983_v27 = vld [vmem:[%s4134_s1 + $0x20] ss:$16 sps:$4 sm:$0xff]  }
  0x21   : > { %v2984_v28 = vld [vmem:[%s4134_s1 + $0x28] ss:$16 sps:$4 sm:$0xff]   ;;  %v2985_v29 = vld [vmem:[%s4134_s1 + $0x4] ss:$16 sps:$4 sm:$0xff]   ;;  %v2987_v30 = vld [vmem:[%s4134_s1 + $0xc] ss:$16 sps:$4 sm:$0xff]  }
  0x22   : > { %858 = vmatpush1.bf16.msra.mxu0 %v2959_v11  ;;  %931 = vmatpush1.bf16.msra.mxu1 %v2960_v12  ;;  %v2989_v31 = vld [vmem:[%s4134_s1] ss:$16 sps:$4 sm:$0xff]   ;;  %v2990_v32 = vld [vmem:[%s4134_s1 + $0x8] ss:$16 sps:$4 sm:$0xff]   ;;  %v2991_v33 = vld [vmem:[%s4134_s1 + $0x1e4] ss:$16 sps:$4 sm:$0xff]  }
  0x23   : > { %859 = vmatprep.subr.bf16.mxu0 %v2961_v13  ;;  %932 = vmatprep.subr.bf16.mxu1 %v2963_v14  ;;  %v2993_v34 = vld [vmem:[%s4134_s1 + $0x1ec] ss:$16 sps:$4 sm:$0xff]   ;;  %v2995_v35 = vld [vmem:[%s4134_s1 + $0x1e0] ss:$16 sps:$4 sm:$0xff]   ;;  %v2996_v36 = vld [vmem:[%s4134_s1 + $0x1e8] ss:$16 sps:$4 sm:$0xff]  }
  0x24   : > { %v2997_v37 = vld [vmem:[%s4134_s1 + $0x1c4] ss:$16 sps:$4 sm:$0xff]   ;;  %v2999_v38 = vld [vmem:[%s4134_s1 + $0x1cc] ss:$16 sps:$4 sm:$0xff]   ;;  %v3001_v39 = vld [vmem:[%s4134_s1 + $0x1c0] ss:$16 sps:$4 sm:$0xff]  }
  0x25   : > { %v3002_v40 = vld [vmem:[%s4134_s1 + $0x1c8] ss:$16 sps:$4 sm:$0xff]   ;;  %v3003_v41 = vld [vmem:[%s4134_s1 + $0x1a4] ss:$16 sps:$4 sm:$0xff]   ;;  %v3005_v42 = vld [vmem:[%s4134_s1 + $0x1ac] ss:$16 sps:$4 sm:$0xff]  }
  0x26   : > { %860 = vmatpush1.bf16.msra.mxu0 %v2965_v15  ;;  %933 = vmatpush1.bf16.msra.mxu1 %v2966_v16  ;;  %v3007_v43 = vld [vmem:[%s4134_s1 + $0x1a0] ss:$16 sps:$4 sm:$0xff]   ;;  %v3008_v44 = vld [vmem:[%s4134_s1 + $0x1a8] ss:$16 sps:$4 sm:$0xff]   ;;  %v3009_v45 = vld [vmem:[%s4134_s1 + $0x184] ss:$16 sps:$4 sm:$0xff]  }
  0x27   : > { %861 = vmatprep.subr.bf16.mxu0 %v2967_v17  ;;  %934 = vmatprep.subr.bf16.mxu1 %v2969_v18  ;;  %v3011_v46 = vld [vmem:[%s4134_s1 + $0x18c] ss:$16 sps:$4 sm:$0xff]   ;;  %v3013_v47 = vld [vmem:[%s4134_s1 + $0x180] ss:$16 sps:$4 sm:$0xff]   ;;  %v3014_v48 = vld [vmem:[%s4134_s1 + $0x188] ss:$16 sps:$4 sm:$0xff]  }
  0x28   : > { %v3041_v49 = vld [vmem:[%s3374_s20 + $0x4] ss:$8 sps:$4 sm:$0xff]   ;;  %v3019_v52 = vld [vmem:[%s4134_s1 + $0x160] ss:$16 sps:$4 sm:$0xff]   ;;  %v3020_v53 = vld [vmem:[%s4134_s1 + $0x168] ss:$16 sps:$4 sm:$0xff]  }
  0x29   : > { %v3015_v50 = vld [vmem:[%s4134_s1 + $0x164] ss:$16 sps:$4 sm:$0xff]   ;;  %v3017_v51 = vld [vmem:[%s4134_s1 + $0x16c] ss:$16 sps:$4 sm:$0xff]   ;;  %885 = vmatprep.mubr.bf16.mxu0 %v3041_v49  ;;  %958 = vmatprep.mubr.bf16.mxu1 %v3041_v49  ;;  %v3025_v56 = vld [vmem:[%s4134_s1 + $0x140] ss:$16 sps:$4 sm:$0xff]  }
  0x2a   : > { %862 = vmatpush1.bf16.msra.mxu0 %v2971_v19  ;;  %935 = vmatpush1.bf16.msra.mxu1 %v2972_v20  ;;  %v3021_v54 = vld [vmem:[%s4134_s1 + $0x144] ss:$16 sps:$4 sm:$0xff]   ;;  %v3023_v55 = vld [vmem:[%s4134_s1 + $0x14c] ss:$16 sps:$4 sm:$0xff]   ;;  %v3026_v57 = vld [vmem:[%s4134_s1 + $0x148] ss:$16 sps:$4 sm:$0xff]  }
  0x2b   : > { %863 = vmatprep.subr.bf16.mxu0 %v2973_v21  ;;  %936 = vmatprep.subr.bf16.mxu1 %v2975_v22  ;;  %v3027_v58 = vld [vmem:[%s4134_s1 + $0x124] ss:$16 sps:$4 sm:$0xff]   ;;  %v3029_v59 = vld [vmem:[%s4134_s1 + $0x12c] ss:$16 sps:$4 sm:$0xff]   ;;  %v3031_v60 = vld [vmem:[%s4134_s1 + $0x120] ss:$16 sps:$4 sm:$0xff]  }
  0x2c   : > { %v3032_v61 = vld [vmem:[%s4134_s1 + $0x128] ss:$16 sps:$4 sm:$0xff]   ;;  %v3033_v62 = vld [vmem:[%s4134_s1 + $0x104] ss:$16 sps:$4 sm:$0xff]   ;;  %v3035_v63 = vld [vmem:[%s4134_s1 + $0x10c] ss:$16 sps:$4 sm:$0xff]  }
  0x2d   : > { %v3037_v0 = vld [vmem:[%s4134_s1 + $0x100] ss:$16 sps:$4 sm:$0xff]   ;;  %v3038_v1 = vld [vmem:[%s4134_s1 + $0x108] ss:$16 sps:$4 sm:$0xff]   ;;  %v3044_v2 = vld [vmem:[%s4138_s5 + $0xe4] ss:$16 sps:$4 sm:$0xff]  }
  0x2e   : > { %864 = vmatpush1.bf16.msra.mxu0 %v2977_v23  ;;  %937 = vmatpush1.bf16.msra.mxu1 %v2978_v24  ;;  %v3047_v3 = vld [vmem:[%s4138_s5 + $0xec] ss:$16 sps:$4 sm:$0xff]   ;;  %v3039_v4 = vld [vmem:[%s3374_s20] ss:$8 sps:$4 sm:$0xff]   ;;  %v3050_v7 = vld [vmem:[%s4138_s5 + $0xc4] ss:$16 sps:$4 sm:$0xff]  }
  0x2f   : > { %865 = vmatprep.subr.bf16.mxu0 %v2979_v25  ;;  %938 = vmatprep.subr.bf16.mxu1 %v2981_v26  ;;  %v3042_v5 = vld [vmem:[%s4138_s5 + $0xe0] ss:$16 sps:$4 sm:$0xff]   ;;  %v3045_v6 = vld [vmem:[%s4138_s5 + $0xe8] ss:$16 sps:$4 sm:$0xff]   ;;  %v3053_v8 = vld [vmem:[%s4138_s5 + $0xcc] ss:$16 sps:$4 sm:$0xff]  }
  0x30   : > { %v3048_v9 = vld [vmem:[%s4138_s5 + $0xc0] ss:$16 sps:$4 sm:$0xff]   ;;  %v3051_v10 = vld [vmem:[%s4138_s5 + $0xc8] ss:$16 sps:$4 sm:$0xff]   ;;  %v3056_v11 = vld [vmem:[%s4138_s5 + $0xa4] ss:$16 sps:$4 sm:$0xff]  }
  0x31   : > { %v3096_v12 = vld [vmem:[%s3374_s20 + $0x14] ss:$8 sps:$4 sm:$0xff]   ;;  %v3054_v14 = vld [vmem:[%s4138_s5 + $0xa0] ss:$16 sps:$4 sm:$0xff]   ;;  %v3057_v15 = vld [vmem:[%s4138_s5 + $0xa8] ss:$16 sps:$4 sm:$0xff]  }
  0x32   : > { %866 = vmatpush1.bf16.msra.mxu0 %v2983_v27  ;;  %939 = vmatpush1.bf16.msra.mxu1 %v2984_v28  ;;  %v3059_v13 = vld [vmem:[%s4138_s5 + $0xac] ss:$16 sps:$4 sm:$0xff]   ;;  %v3098_v16 = vld [vmem:[%s3374_s20 + $0x10] ss:$8 sps:$4 sm:$0xff]   ;;  %v3062_v17 = vld [vmem:[%s4138_s5 + $0x84] ss:$16 sps:$4 sm:$0xff]  }
  0x33   : > { %867 = vmatprep.subr.bf16.mxu0 %v2985_v29  ;;  %940 = vmatprep.subr.bf16.mxu1 %v2987_v30  ;;  %v3065_v18 = vld [vmem:[%s4138_s5 + $0x8c] ss:$16 sps:$4 sm:$0xff]   ;;  %v3060_v19 = vld [vmem:[%s4138_s5 + $0x80] ss:$16 sps:$4 sm:$0xff]   ;;  %v3063_v20 = vld [vmem:[%s4138_s5 + $0x88] ss:$16 sps:$4 sm:$0xff]  }
  0x34   : > { %v3111_v21 = vld [vmem:[%s3374_s20 + $0x24] ss:$8 sps:$4 sm:$0xff]   ;;  %v3066_v24 = vld [vmem:[%s4138_s5 + $0x60] ss:$16 sps:$4 sm:$0xff]   ;;  %v3069_v25 = vld [vmem:[%s4138_s5 + $0x68] ss:$16 sps:$4 sm:$0xff]  }
  0x35   : > { %v3068_v22 = vld [vmem:[%s4138_s5 + $0x64] ss:$16 sps:$4 sm:$0xff]   ;;  %v3071_v23 = vld [vmem:[%s4138_s5 + $0x6c] ss:$16 sps:$4 sm:$0xff]   ;;  %v3113_v26 = vld [vmem:[%s3374_s20 + $0x20] ss:$8 sps:$4 sm:$0xff]  }
  0x36   : > { %868 = vmatpush1.bf16.msra.mxu0 %v2989_v31  ;;  %941 = vmatpush1.bf16.msra.mxu1 %v2990_v32  ;;  %v3074_v27 = vld [vmem:[%s4138_s5 + $0x44] ss:$16 sps:$4 sm:$0xff]   ;;  %v3077_v28 = vld [vmem:[%s4138_s5 + $0x4c] ss:$16 sps:$4 sm:$0xff]   ;;  %v3072_v30 = vld [vmem:[%s4138_s5 + $0x40] ss:$16 sps:$4 sm:$0xff]  }
  0x37   : > { %869 = vmatprep.subr.bf16.mxu0 %v2991_v33  ;;  %942 = vmatprep.subr.bf16.mxu1 %v2993_v34  ;;  %v3126_v29 = vld [vmem:[%s3374_s20 + $0x34] ss:$8 sps:$4 sm:$0xff]   ;;  %v3075_v31 = vld [vmem:[%s4138_s5 + $0x48] ss:$16 sps:$4 sm:$0xff]   ;;  %v3078_v34 = vld [vmem:[%s4138_s5 + $0x20] ss:$16 sps:$4 sm:$0xff]  }
  0x38   : > { %v3080_v32 = vld [vmem:[%s4138_s5 + $0x24] ss:$16 sps:$4 sm:$0xff]   ;;  %v3083_v33 = vld [vmem:[%s4138_s5 + $0x2c] ss:$16 sps:$4 sm:$0xff]   ;;  %v3102_v49 = vld [vmem:[%s4138_s5 + $0x1c8] ss:$16 sps:$4 sm:$0xff]  }
  0x39   : > { %s3899_s17 = smov 0  }
  0x3a   : > { %870 = vmatpush2.bf16.msra.mxu0 %v2995_v35  ;;  %943 = vmatpush2.bf16.msra.mxu1 %v2996_v36  ;;  %v3081_v35 = vld [vmem:[%s4138_s5 + $0x28] ss:$16 sps:$4 sm:$0xff]  }
  0x3b   : > { %871 = vmatprep.subr.bf16.mxu0 %v2997_v37  ;;  %944 = vmatprep.subr.bf16.mxu1 %v2999_v38  ;;  %v3128_v36 = vld [vmem:[%s3374_s20 + $0x30] ss:$8 sps:$4 sm:$0xff]   ;;  %v3086_v37 = vld [vmem:[%s4138_s5 + $0x4] ss:$16 sps:$4 sm:$0xff]   ;;  %v3089_v38 = vld [vmem:[%s4138_s5 + $0xc] ss:$16 sps:$4 sm:$0xff]  }
  0x3e   : > { %872 = vmatpush2.bf16.msra.mxu0 %v3001_v39  ;;  %945 = vmatpush2.bf16.msra.mxu1 %v3002_v40  ;;  %v3084_v39 = vld [vmem:[%s4138_s5] ss:$16 sps:$4 sm:$0xff]   ;;  %v3087_v40 = vld [vmem:[%s4138_s5 + $0x8] ss:$16 sps:$4 sm:$0xff]  }
  0x3f   : > { %873 = vmatprep.subr.bf16.mxu0 %v3003_v41  ;;  %946 = vmatprep.subr.bf16.mxu1 %v3005_v42  ;;  %v3149_v41 = vld [vmem:[%s3379_s24 + $0x4] ss:$8 sps:$4 sm:$0xff]  }
  0x40   : > { %v3092_v42 = vld [vmem:[%s4138_s5 + $0x1e4] ss:$16 sps:$4 sm:$0xff]  }
  0x42   : > { %874 = vmatpush2.bf16.msra.mxu0 %v3007_v43  ;;  %947 = vmatpush2.bf16.msra.mxu1 %v3008_v44  ;;  %v3095_v43 = vld [vmem:[%s4138_s5 + $0x1ec] ss:$16 sps:$4 sm:$0xff]   ;;  %v3090_v44 = vld [vmem:[%s4138_s5 + $0x1e0] ss:$16 sps:$4 sm:$0xff]  }
  0x43   : > { %875 = vmatprep.subr.bf16.mxu0 %v3009_v45  ;;  %948 = vmatprep.subr.bf16.mxu1 %v3011_v46  ;;  %v3093_v45 = vld [vmem:[%s4138_s5 + $0x1e8] ss:$16 sps:$4 sm:$0xff]   ;;  %v3101_v46 = vld [vmem:[%s4138_s5 + $0x1c4] ss:$16 sps:$4 sm:$0xff]  }
  0x46   : > { %876 = vmatpush2.bf16.msra.mxu0 %v3013_v47  ;;  %949 = vmatpush2.bf16.msra.mxu1 %v3014_v48  ;;  %v3104_v47 = vld [vmem:[%s4138_s5 + $0x1cc] ss:$16 sps:$4 sm:$0xff]   ;;  %v3099_v48 = vld [vmem:[%s4138_s5 + $0x1c0] ss:$16 sps:$4 sm:$0xff]  }
  0x47   : > { %877 = vmatprep.subr.bf16.mxu0 %v3015_v50  ;;  %950 = vmatprep.subr.bf16.mxu1 %v3017_v51  ;;  %v3107_v50 = vld [vmem:[%s4138_s5 + $0x1a4] ss:$16 sps:$4 sm:$0xff]   ;;  %v3110_v51 = vld [vmem:[%s4138_s5 + $0x1ac] ss:$16 sps:$4 sm:$0xff]  }
  0x4a   : > { %878 = vmatpush2.bf16.msra.mxu0 %v3019_v52  ;;  %951 = vmatpush2.bf16.msra.mxu1 %v3020_v53  ;;  %v3105_v52 = vld [vmem:[%s4138_s5 + $0x1a0] ss:$16 sps:$4 sm:$0xff]   ;;  %v3108_v53 = vld [vmem:[%s4138_s5 + $0x1a8] ss:$16 sps:$4 sm:$0xff]  }
  0x4b   : > { %879 = vmatprep.subr.bf16.mxu0 %v3021_v54  ;;  %952 = vmatprep.subr.bf16.mxu1 %v3023_v55  ;;  %v3116_v54 = vld [vmem:[%s4138_s5 + $0x184] ss:$16 sps:$4 sm:$0xff]   ;;  %v3119_v55 = vld [vmem:[%s4138_s5 + $0x18c] ss:$16 sps:$4 sm:$0xff]  }
  0x4e   : > { %880 = vmatpush2.bf16.msra.mxu0 %v3025_v56  ;;  %953 = vmatpush2.bf16.msra.mxu1 %v3026_v57  ;;  %v3114_v56 = vld [vmem:[%s4138_s5 + $0x180] ss:$16 sps:$4 sm:$0xff]   ;;  %v3117_v57 = vld [vmem:[%s4138_s5 + $0x188] ss:$16 sps:$4 sm:$0xff]  }
  0x4f   : > { %881 = vmatprep.subr.bf16.mxu0 %v3027_v58  ;;  %954 = vmatprep.subr.bf16.mxu1 %v3029_v59  ;;  %v3122_v58 = vld [vmem:[%s4138_s5 + $0x164] ss:$16 sps:$4 sm:$0xff]   ;;  %v3125_v59 = vld [vmem:[%s4138_s5 + $0x16c] ss:$16 sps:$4 sm:$0xff]  }
  0x52   : > { %882 = vmatpush2.bf16.msra.mxu0 %v3031_v60  ;;  %955 = vmatpush2.bf16.msra.mxu1 %v3032_v61  ;;  %v3120_v60 = vld [vmem:[%s4138_s5 + $0x160] ss:$16 sps:$4 sm:$0xff]   ;;  %v3123_v61 = vld [vmem:[%s4138_s5 + $0x168] ss:$16 sps:$4 sm:$0xff]  }
  0x53   : > { %883 = vmatprep.subr.bf16.mxu0 %v3033_v62  ;;  %956 = vmatprep.subr.bf16.mxu1 %v3035_v63  ;;  %v3131_v62 = vld [vmem:[%s4138_s5 + $0x144] ss:$16 sps:$4 sm:$0xff]   ;;  %v3134_v63 = vld [vmem:[%s4138_s5 + $0x14c] ss:$16 sps:$4 sm:$0xff]  }
  0x56   : > { %884 = vmatpush2.bf16.msra.mxu0 %v3037_v0  ;;  %957 = vmatpush2.bf16.msra.mxu1 %v3038_v1  ;;  %v3129_v0 = vld [vmem:[%s4138_s5 + $0x140] ss:$16 sps:$4 sm:$0xff]   ;;  %v3132_v1 = vld [vmem:[%s4138_s5 + $0x148] ss:$16 sps:$4 sm:$0xff]  }
  0x57   : > { %1565 = vmatprep.subr.bf16.mxu0 %v3044_v2  ;;  %1638 = vmatprep.subr.bf16.mxu1 %v3047_v3  ;;  %v3137_v2 = vld [vmem:[%s4138_s5 + $0x124] ss:$16 sps:$4 sm:$0xff]   ;;  %v3140_v3 = vld [vmem:[%s4138_s5 + $0x12c] ss:$16 sps:$4 sm:$0xff]  }
  0x59   : > { %886 = vmatmul.mubr.bf16.vlgmr.msra.gmra.mxu0 %v3039_v4  ;;  %959 = vmatmul.mubr.bf16.vlgmr.msra.gmra.mxu1 %v3039_v4  ;;  %v3135_v4 = vld [vmem:[%s4138_s5 + $0x120] ss:$16 sps:$4 sm:$0xff]  }
  0x5a   : > { %1566 = vmatpush1.bf16.msra.mxu0 %v3042_v5  ;;  %1639 = vmatpush1.bf16.msra.mxu1 %v3045_v6  ;;  %v3138_v5 = vld [vmem:[%s4138_s5 + $0x128] ss:$16 sps:$4 sm:$0xff]   ;;  %v3143_v6 = vld [vmem:[%s4138_s5 + $0x104] ss:$16 sps:$4 sm:$0xff]  }
  0x5b   : > { %1567 = vmatprep.subr.bf16.mxu0 %v3050_v7  ;;  %1640 = vmatprep.subr.bf16.mxu1 %v3053_v8  ;;  %v3146_v7 = vld [vmem:[%s4138_s5 + $0x10c] ss:$16 sps:$4 sm:$0xff]   ;;  %v3141_v8 = vld [vmem:[%s4138_s5 + $0x100] ss:$16 sps:$4 sm:$0xff]  }
  0x5c   : > { %895 = vmatprep.mubr.bf16.mxu0 %v3096_v12  ;;  %968 = vmatprep.mubr.bf16.mxu1 %v3096_v12  ;;  %v3152_v12 = vld [vmem:[%s3379_s24 + $0x10] ss:$8 sps:$4 sm:$0xff]  }
  0x5e   : > { %1568 = vmatpush1.bf16.msra.mxu0 %v3048_v9  ;;  %1641 = vmatpush1.bf16.msra.mxu1 %v3051_v10  ;;  %v3144_v9 = vld [vmem:[%s4138_s5 + $0x108] ss:$16 sps:$4 sm:$0xff]  }
  0x5f   : > { %1569 = vmatprep.subr.bf16.mxu0 %v3056_v11  ;;  %1642 = vmatprep.subr.bf16.mxu1 %v3059_v13  ;;  %v3147_v10 = vld [vmem:[%s3379_s24] ss:$8 sps:$4 sm:$0xff]   ;;  %v3150_v11 = vld [vmem:[%s3379_s24 + $0x14] ss:$8 sps:$4 sm:$0xff]   ;;  %v3153_v13 = vld [vmem:[%s3379_s24 + $0x24] ss:$8 sps:$4 sm:$0xff]  }
  0x61   : > { %896 = vmatmul.mubr.bf16.gmra.mxu0 %v3098_v16  ;;  %969 = vmatmul.mubr.bf16.gmra.mxu1 %v3098_v16  ;;  %v3158_v16 = vld [vmem:[%s3379_s24 + $0x30] ss:$8 sps:$4 sm:$0xff]  }
  0x62   : > { %1570 = vmatpush1.bf16.msra.mxu0 %v3054_v14  ;;  %1643 = vmatpush1.bf16.msra.mxu1 %v3057_v15  ;;  %v3155_v14 = vld [vmem:[%s3379_s24 + $0x20] ss:$8 sps:$4 sm:$0xff]   ;;  %v3156_v15 = vld [vmem:[%s3379_s24 + $0x34] ss:$8 sps:$4 sm:$0xff]  }
  0x63   : > { %1571 = vmatprep.subr.bf16.mxu0 %v3062_v17  ;;  %1644 = vmatprep.subr.bf16.mxu1 %v3065_v18  ;;  %v473_v17 = vlaneseq }
  0x64   : > { %905 = vmatprep.mubr.bf16.mxu0 %v3111_v21  ;;  %978 = vmatprep.mubr.bf16.mxu1 %v3111_v21  ;;  %v471_v21 = vld [vmem:[%s4136_s3] sm:$0xf] }
  0x65   : > { %v3791_v18 = vshrl.u32 %v473_v17, 7 }
  0x66   : > { %1572 = vmatpush1.bf16.msra.mxu0 %v3060_v19  ;;  %1645 = vmatpush1.bf16.msra.mxu1 %v3063_v20 }
  0x67   : > { %1573 = vmatprep.subr.bf16.mxu0 %v3068_v22  ;;  %1646 = vmatprep.subr.bf16.mxu1 %v3071_v23  ;;  %v475_v19 = vsub.s32 0, %v3791_v18  ;;  %v483_v20 = vsub.s32 2, %v3791_v18  ;;  %v479_v22 = vsub.s32 1, %v3791_v18  ;;  %v487_v23 = vsub.s32 3, %v3791_v18 }
  0x69   : > { %906 = vmatmul.mubr.bf16.gmra.mxu0 %v3113_v26  ;;  %979 = vmatmul.mubr.bf16.gmra.mxu1 %v3113_v26  ;;  %v3810_v26 = vrot.slane %v471_v21, %v479_v22 }
  0x6a   : > { %1574 = vmatpush1.bf16.msra.mxu0 %v3066_v24  ;;  %1647 = vmatpush1.bf16.msra.mxu1 %v3069_v25  ;;  %v3802_v24 = vrot.slane %v471_v21, %v475_v19  ;;  %v3806_v25 = vrot.slane %v471_v21, %v483_v20 }
  0x6b   : > { %1575 = vmatprep.subr.bf16.mxu0 %v3074_v27  ;;  %1648 = vmatprep.subr.bf16.mxu1 %v3077_v28  ;;  %v3814_v27 = vrot.slane %v471_v21, %v487_v23 }
  0x6c   : > { %915 = vmatprep.mubr.bf16.mxu0 %v3126_v29  ;;  %988 = vmatprep.mubr.bf16.mxu1 %v3126_v29 }
  0x6e   : > { %1576 = vmatpush1.bf16.msra.mxu0 %v3072_v30  ;;  %1649 = vmatpush1.bf16.msra.mxu1 %v3075_v31 }
  0x6f   : > { %1577 = vmatprep.subr.bf16.mxu0 %v3080_v32  ;;  %1650 = vmatprep.subr.bf16.mxu1 %v3083_v33 }
  0x71   : > { %916 = vmatmul.mubr.bf16.gmra.mxu0 %v3128_v36  ;;  %989 = vmatmul.mubr.bf16.gmra.mxu1 %v3128_v36 }
  0x72   : > { %1578 = vmatpush1.bf16.msra.mxu0 %v3078_v34  ;;  %1651 = vmatpush1.bf16.msra.mxu1 %v3081_v35 }
  0x73   : > { %1579 = vmatprep.subr.bf16.mxu0 %v3086_v37  ;;  %1652 = vmatprep.subr.bf16.mxu1 %v3089_v38 }
  0x74   : > { %1597 = vmatprep.mubr.bf16.mxu0 %v3149_v41  ;;  %1670 = vmatprep.mubr.bf16.mxu1 %v3149_v41 }
  0x76   : > { %1580 = vmatpush1.bf16.msra.mxu0 %v3084_v39  ;;  %1653 = vmatpush1.bf16.msra.mxu1 %v3087_v40 }
  0x77   : > { %1581 = vmatprep.subr.bf16.mxu0 %v3092_v42  ;;  %1654 = vmatprep.subr.bf16.mxu1 %v3095_v43 }
  0x7a   : > { %1582 = vmatpush2.bf16.msra.mxu0 %v3090_v44  ;;  %1655 = vmatpush2.bf16.msra.mxu1 %v3093_v45 }
  0x7b   : > { %1583 = vmatprep.subr.bf16.mxu0 %v3101_v46  ;;  %1656 = vmatprep.subr.bf16.mxu1 %v3104_v47 }
  0x7e   : > { %1584 = vmatpush2.bf16.msra.mxu0 %v3099_v48  ;;  %1657 = vmatpush2.bf16.msra.mxu1 %v3102_v49 }
  0x7f   : > { %1585 = vmatprep.subr.bf16.mxu0 %v3107_v50  ;;  %1658 = vmatprep.subr.bf16.mxu1 %v3110_v51 }
  0x82   : > { %1586 = vmatpush2.bf16.msra.mxu0 %v3105_v52  ;;  %1659 = vmatpush2.bf16.msra.mxu1 %v3108_v53 }
  0x83   : > { %1587 = vmatprep.subr.bf16.mxu0 %v3116_v54  ;;  %1660 = vmatprep.subr.bf16.mxu1 %v3119_v55 }
  0x86   : > { %1588 = vmatpush2.bf16.msra.mxu0 %v3114_v56  ;;  %1661 = vmatpush2.bf16.msra.mxu1 %v3117_v57 }
  0x87   : > { %1589 = vmatprep.subr.bf16.mxu0 %v3122_v58  ;;  %1662 = vmatprep.subr.bf16.mxu1 %v3125_v59 }
  0x8a   : > { %1590 = vmatpush2.bf16.msra.mxu0 %v3120_v60  ;;  %1663 = vmatpush2.bf16.msra.mxu1 %v3123_v61 }
  0x8b   : > { %1591 = vmatprep.subr.bf16.mxu0 %v3131_v62  ;;  %1664 = vmatprep.subr.bf16.mxu1 %v3134_v63 }
  0x8e   : > { %1592 = vmatpush2.bf16.msra.mxu0 %v3129_v0  ;;  %1665 = vmatpush2.bf16.msra.mxu1 %v3132_v1 }
  0x8f   : > { %1593 = vmatprep.subr.bf16.mxu0 %v3137_v2  ;;  %1666 = vmatprep.subr.bf16.mxu1 %v3140_v3 }
  0x92   : > { %1594 = vmatpush2.bf16.msra.mxu0 %v3135_v4  ;;  %1667 = vmatpush2.bf16.msra.mxu1 %v3138_v5 }
  0x93   : > { %1595 = vmatprep.subr.bf16.mxu0 %v3143_v6  ;;  %1668 = vmatprep.subr.bf16.mxu1 %v3146_v7 }
  0x96   : > { %1596 = vmatpush2.bf16.msra.mxu0 %v3141_v8  ;;  %1669 = vmatpush2.bf16.msra.mxu1 %v3144_v9 }
  0x99   : > { %1598 = vmatmul.mubr.bf16.vlgmr.msra.gmra.mxu0 %v3147_v10  ;;  %1671 = vmatmul.mubr.bf16.vlgmr.msra.gmra.mxu1 %v3147_v10 }
  0x9a   : > { %1607 = vmatprep.mubr.bf16.mxu0 %v3150_v11  ;;  %1680 = vmatprep.mubr.bf16.mxu1 %v3150_v11 }
  0xa1   : > { %1608 = vmatmul.mubr.bf16.gmra.mxu0 %v3152_v12  ;;  %1681 = vmatmul.mubr.bf16.gmra.mxu1 %v3152_v12 }
  0xa2   : > { %1617 = vmatprep.mubr.bf16.mxu0 %v3153_v13  ;;  %1690 = vmatprep.mubr.bf16.mxu1 %v3153_v13 }
  0xa9   : > { %1618 = vmatmul.mubr.bf16.gmra.mxu0 %v3155_v14  ;;  %1691 = vmatmul.mubr.bf16.gmra.mxu1 %v3155_v14 }
  0xaa   : > { %1627 = vmatprep.mubr.bf16.mxu0 %v3156_v15  ;;  %1700 = vmatprep.mubr.bf16.mxu1 %v3156_v15 }
  0xb1   : > { %1628 = vmatmul.mubr.bf16.gmra.mxu0 %v3158_v16  ;;  %1701 = vmatmul.mubr.bf16.gmra.mxu1 %v3158_v16 }
 0x119   : > { %v887_v28 = vpop.f32.mrf.mxu0  ;;  %v960_v29 = vpop.f32.mrf.mxu1 }
 0x11a   : > { %v888_v30 = vadd.f32 %v887_v28, %v3802_v24  ;;  %v961_v31 = vadd.f32 %v960_v29, %v3806_v25 }
 0x11b   : > { %v889_v32 = vpop.f32.mrf.mxu0  ;;  %v962_v33 = vpop.f32.mrf.mxu1 }
 0x11c   : > { %v890_v34 = vadd.f32 %v889_v32, %v3810_v26  ;;  %v963_v35 = vadd.f32 %v962_v33, %v3814_v27 }
 0x11d   : > { %v891_v36 = vpop.f32.mrf.mxu0  ;;  %v964_v37 = vpop.f32.mrf.mxu1 }
 0x11e   : > { %v2891_v38 = vpack.c.bf16 %v890_v34, %v888_v30  ;;  %v2892_v39 = vpack.c.bf16 %v963_v35, %v961_v31  ;;  %v892_v42 = vadd.f32 %v891_v36, %v3802_v24  ;;  %v965_v43 = vadd.f32 %v964_v37, %v3806_v25 }
 0x11f   : > { %v893_v40 = vpop.f32.mrf.mxu0  ;;  %v966_v41 = vpop.f32.mrf.mxu1 }
 0x120   : > { %1095 = vst [vmem:[#allocation2] sm:$0xff] %v2891_v38  ;;  %1096 = vst [vmem:[#allocation2 + $0x8] sm:$0xff] %v2892_v39  ;;  %v894_v44 = vadd.f32 %v893_v40, %v3810_v26  ;;  %v967_v45 = vadd.f32 %v966_v41, %v3814_v27 }
 0x121   : > { %v897_v46 = vpop.f32.mrf.mxu0  ;;  %v970_v47 = vpop.f32.mrf.mxu1 }
 0x122   : > { %v2893_v48 = vpack.c.bf16 %v894_v44, %v892_v42  ;;  %v2894_v49 = vpack.c.bf16 %v967_v45, %v965_v43  ;;  %v898_v50 = vadd.f32 %v897_v46, %v3802_v24  ;;  %v971_v51 = vadd.f32 %v970_v47, %v3806_v25 }
 0x123   : > { %v899_v52 = vpop.f32.mrf.mxu0  ;;  %v972_v53 = vpop.f32.mrf.mxu1 }
 0x124   : > { %1097 = vst [vmem:[#allocation2 + $0x10] sm:$0xff] %v2893_v48  ;;  %1098 = vst [vmem:[#allocation2 + $0x18] sm:$0xff] %v2894_v49  ;;  %v900_v54 = vadd.f32 %v899_v52, %v3810_v26  ;;  %v973_v55 = vadd.f32 %v972_v53, %v3814_v27  ;;  %v1183_v53 = vld [vmem:[%s4140_s7] sm:$0xf] }
 0x125   : > { %v901_v56 = vpop.f32.mrf.mxu0  ;;  %v974_v57 = vpop.f32.mrf.mxu1 }
 0x126   : > { %v2895_v58 = vpack.c.bf16 %v900_v54, %v898_v50  ;;  %v2896_v59 = vpack.c.bf16 %v973_v55, %v971_v51  ;;  %v902_v60 = vadd.f32 %v901_v56, %v3802_v24  ;;  %v975_v61 = vadd.f32 %v974_v57, %v3806_v25 }
 0x127   : > { %v903_v62 = vpop.f32.mrf.mxu0  ;;  %v976_v63 = vpop.f32.mrf.mxu1 }
 0x128   : > { %1099 = vst [vmem:[#allocation2 + $0x20] sm:$0xff] %v2895_v58  ;;  %1100 = vst [vmem:[#allocation2 + $0x28] sm:$0xff] %v2896_v59  ;;  %v904_v0 = vadd.f32 %v903_v62, %v3810_v26  ;;  %v977_v1 = vadd.f32 %v976_v63, %v3814_v27 }
 0x129   : > { %v907_v2 = vpop.f32.mrf.mxu0  ;;  %v980_v3 = vpop.f32.mrf.mxu1 }
 0x12a   : > { %v2897_v4 = vpack.c.bf16 %v904_v0, %v902_v60  ;;  %v2898_v5 = vpack.c.bf16 %v977_v1, %v975_v61  ;;  %v908_v6 = vadd.f32 %v907_v2, %v3802_v24  ;;  %v981_v7 = vadd.f32 %v980_v3, %v3806_v25 }
 0x12b   : > { %v909_v8 = vpop.f32.mrf.mxu0  ;;  %v982_v9 = vpop.f32.mrf.mxu1 }
 0x12c   : > { %1101 = vst [vmem:[#allocation2 + $0x30] sm:$0xff] %v2897_v4  ;;  %1102 = vst [vmem:[#allocation2 + $0x38] sm:$0xff] %v2898_v5  ;;  %v910_v10 = vadd.f32 %v909_v8, %v3810_v26  ;;  %v983_v11 = vadd.f32 %v982_v9, %v3814_v27 }
 0x12d   : > { %v911_v12 = vpop.f32.mrf.mxu0  ;;  %v984_v13 = vpop.f32.mrf.mxu1 }
 0x12e   : > { %v2899_v14 = vpack.c.bf16 %v910_v10, %v908_v6  ;;  %v2900_v15 = vpack.c.bf16 %v983_v11, %v981_v7  ;;  %v912_v16 = vadd.f32 %v911_v12, %v3802_v24  ;;  %v985_v17 = vadd.f32 %v984_v13, %v3806_v25 }
 0x12f   : > { %v913_v21 = vpop.f32.mrf.mxu0  ;;  %v986_v28 = vpop.f32.mrf.mxu1 }
 0x130   : > { %1103 = vst [vmem:[#allocation2 + $0x40] sm:$0xff] %v2899_v14  ;;  %1104 = vst [vmem:[#allocation2 + $0x48] sm:$0xff] %v2900_v15  ;;  %v914_v29 = vadd.f32 %v913_v21, %v3810_v26  ;;  %v987_v30 = vadd.f32 %v986_v28, %v3814_v27 }
 0x131   : > { %v917_v31 = vpop.f32.mrf.mxu0  ;;  %v990_v32 = vpop.f32.mrf.mxu1 }
 0x132   : > { %v2901_v33 = vpack.c.bf16 %v914_v29, %v912_v16  ;;  %v2902_v34 = vpack.c.bf16 %v987_v30, %v985_v17  ;;  %v918_v35 = vadd.f32 %v917_v31, %v3802_v24  ;;  %v991_v36 = vadd.f32 %v990_v32, %v3806_v25 }
 0x133   : > { %v919_v37 = vpop.f32.mrf.mxu0  ;;  %v992_v38 = vpop.f32.mrf.mxu1 }
 0x134   : > { %1105 = vst [vmem:[#allocation2 + $0x50] sm:$0xff] %v2901_v33  ;;  %1106 = vst [vmem:[#allocation2 + $0x58] sm:$0xff] %v2902_v34  ;;  %v920_v39 = vadd.f32 %v919_v37, %v3810_v26  ;;  %v993_v40 = vadd.f32 %v992_v38, %v3814_v27 }
 0x135   : > { %v921_v41 = vpop.f32.mrf.mxu0  ;;  %v994_v42 = vpop.f32.mrf.mxu1 }
 0x136   : > { %v2903_v43 = vpack.c.bf16 %v920_v39, %v918_v35  ;;  %v2904_v44 = vpack.c.bf16 %v993_v40, %v991_v36  ;;  %v922_v45 = vadd.f32 %v921_v41, %v3802_v24  ;;  %v995_v46 = vadd.f32 %v994_v42, %v3806_v25 }
 0x137   : > { %v923_v47 = vpop.f32.mrf.mxu0  ;;  %v996_v48 = vpop.f32.mrf.mxu1  ;;  %v3853_v24 = vrot.slane %v1183_v53, %v475_v19  ;;  %v3857_v25 = vrot.slane %v1183_v53, %v483_v20 }
 0x138   : > { %1107 = vst [vmem:[#allocation2 + $0x60] sm:$0xff] %v2903_v43  ;;  %1108 = vst [vmem:[#allocation2 + $0x68] sm:$0xff] %v2904_v44  ;;  %v924_v49 = vadd.f32 %v923_v47, %v3810_v26  ;;  %v997_v50 = vadd.f32 %v996_v48, %v3814_v27  ;;  %v3861_v26 = vrot.slane %v1183_v53, %v479_v22 }
 0x139   : > { %v3865_v27 = vrot.slane %v1183_v53, %v487_v23 }
 0x13a   : > { %v2905_v51 = vpack.c.bf16 %v924_v49, %v922_v45  ;;  %v2906_v52 = vpack.c.bf16 %v997_v50, %v995_v46 }
 0x13c   : > { %1109 = vst [vmem:[#allocation2 + $0x70] sm:$0xff] %v2905_v51  ;;  %1110 = vst [vmem:[#allocation2 + $0x78] sm:$0xff] %v2906_v52 }
 0x159   : > { %v1599_v54 = vpop.f32.mrf.mxu0  ;;  %v1672_v55 = vpop.f32.mrf.mxu1 }
 0x15a   : > { %v1600_v58 = vadd.f32 %v1599_v54, %v3853_v24  ;;  %v1673_v19 = vadd.f32 %v1672_v55, %v3857_v25 }
 0x15b   : > { %v1601_v56 = vpop.f32.mrf.mxu0  ;;  %v1674_v57 = vpop.f32.mrf.mxu1 }
 0x15c   : > { %v1602_v59 = vadd.f32 %v1601_v56, %v3861_v26  ;;  %v1675_v20 = vadd.f32 %v1674_v57, %v3865_v27 }
 0x15d   : > { %v1603_v60 = vpop.f32.mrf.mxu0  ;;  %v1676_v61 = vpop.f32.mrf.mxu1 }
 0x15e   : > { %v2907_v22 = vpack.c.bf16 %v1602_v59, %v1600_v58  ;;  %v2908_v62 = vpack.c.bf16 %v1675_v20, %v1673_v19  ;;  %v1604_v23 = vadd.f32 %v1603_v60, %v3853_v24  ;;  %v1677_v0 = vadd.f32 %v1676_v61, %v3857_v25 }
 0x15f   : > { %v1605_v63 = vpop.f32.mrf.mxu0  ;;  %v1678_v18 = vpop.f32.mrf.mxu1 }
 0x160   : > { %1807 = vst [vmem:[#allocation3] sm:$0xff] %v2907_v22  ;;  %1808 = vst [vmem:[#allocation3 + $0x8] sm:$0xff] %v2908_v62  ;;  %v1606_v1 = vadd.f32 %v1605_v63, %v3861_v26  ;;  %v1679_v2 = vadd.f32 %v1678_v18, %v3865_v27 }
 0x161   : > { %v1609_v3 = vpop.f32.mrf.mxu0  ;;  %v1682_v4 = vpop.f32.mrf.mxu1 }
 0x162   : > { %v2909_v5 = vpack.c.bf16 %v1606_v1, %v1604_v23  ;;  %v2910_v6 = vpack.c.bf16 %v1679_v2, %v1677_v0  ;;  %v1610_v9 = vadd.f32 %v1609_v3, %v3853_v24  ;;  %v1683_v10 = vadd.f32 %v1682_v4, %v3857_v25 }
 0x163   : > { %v1611_v7 = vpop.f32.mrf.mxu0  ;;  %v1684_v8 = vpop.f32.mrf.mxu1 }
 0x164   : > { %1809 = vst [vmem:[#allocation3 + $0x10] sm:$0xff] %v2909_v5  ;;  %1810 = vst [vmem:[#allocation3 + $0x18] sm:$0xff] %v2910_v6  ;;  %v1612_v11 = vadd.f32 %v1611_v7, %v3861_v26  ;;  %v1685_v12 = vadd.f32 %v1684_v8, %v3865_v27 }
 0x165   : > { %v1613_v13 = vpop.f32.mrf.mxu0  ;;  %v1686_v14 = vpop.f32.mrf.mxu1 }
 0x166   : > { %v2911_v15 = vpack.c.bf16 %v1612_v11, %v1610_v9  ;;  %v2912_v16 = vpack.c.bf16 %v1685_v12, %v1683_v10  ;;  %v1614_v28 = vadd.f32 %v1613_v13, %v3853_v24  ;;  %v1687_v29 = vadd.f32 %v1686_v14, %v3857_v25 }
 0x167   : > { %v1615_v17 = vpop.f32.mrf.mxu0  ;;  %v1688_v21 = vpop.f32.mrf.mxu1 }
 0x168   : > { %1811 = vst [vmem:[#allocation3 + $0x20] sm:$0xff] %v2911_v15  ;;  %1812 = vst [vmem:[#allocation3 + $0x28] sm:$0xff] %v2912_v16  ;;  %v1616_v30 = vadd.f32 %v1615_v17, %v3861_v26  ;;  %v1689_v31 = vadd.f32 %v1688_v21, %v3865_v27 }
 0x169   : > { %v1619_v32 = vpop.f32.mrf.mxu0  ;;  %v1692_v33 = vpop.f32.mrf.mxu1 }
 0x16a   : > { %v2913_v34 = vpack.c.bf16 %v1616_v30, %v1614_v28  ;;  %v2914_v35 = vpack.c.bf16 %v1689_v31, %v1687_v29  ;;  %v1620_v38 = vadd.f32 %v1619_v32, %v3853_v24  ;;  %v1693_v39 = vadd.f32 %v1692_v33, %v3857_v25 }
 0x16b   : > { %v1621_v36 = vpop.f32.mrf.mxu0  ;;  %v1694_v37 = vpop.f32.mrf.mxu1 }
 0x16c   : > { %1813 = vst [vmem:[#allocation3 + $0x30] sm:$0xff] %v2913_v34  ;;  %1814 = vst [vmem:[#allocation3 + $0x38] sm:$0xff] %v2914_v35  ;;  %v1622_v40 = vadd.f32 %v1621_v36, %v3861_v26  ;;  %v1695_v41 = vadd.f32 %v1694_v37, %v3865_v27 }
 0x16d   : > { %v1623_v42 = vpop.f32.mrf.mxu0  ;;  %v1696_v43 = vpop.f32.mrf.mxu1 }
 0x16e   : > { %v2915_v44 = vpack.c.bf16 %v1622_v40, %v1620_v38  ;;  %v2916_v45 = vpack.c.bf16 %v1695_v41, %v1693_v39  ;;  %v1624_v48 = vadd.f32 %v1623_v42, %v3853_v24  ;;  %v1697_v49 = vadd.f32 %v1696_v43, %v3857_v25 }
 0x16f   : > { %v1625_v46 = vpop.f32.mrf.mxu0  ;;  %v1698_v47 = vpop.f32.mrf.mxu1 }
 0x170   : > { %1815 = vst [vmem:[#allocation3 + $0x40] sm:$0xff] %v2915_v44  ;;  %1816 = vst [vmem:[#allocation3 + $0x48] sm:$0xff] %v2916_v45  ;;  %v1626_v50 = vadd.f32 %v1625_v46, %v3861_v26  ;;  %v1699_v51 = vadd.f32 %v1698_v47, %v3865_v27 }
 0x171   : > { %v1629_v52 = vpop.f32.mrf.mxu0  ;;  %v1702_v53 = vpop.f32.mrf.mxu1 }
 0x172   : > { %v2917_v54 = vpack.c.bf16 %v1626_v50, %v1624_v48  ;;  %v2918_v55 = vpack.c.bf16 %v1699_v51, %v1697_v49  ;;  %v1630_v58 = vadd.f32 %v1629_v52, %v3853_v24  ;;  %v1703_v19 = vadd.f32 %v1702_v53, %v3857_v25 }
 0x173   : > { %v1631_v56 = vpop.f32.mrf.mxu0  ;;  %v1704_v57 = vpop.f32.mrf.mxu1 }
 0x174   : > { %1817 = vst [vmem:[#allocation3 + $0x50] sm:$0xff] %v2917_v54  ;;  %1818 = vst [vmem:[#allocation3 + $0x58] sm:$0xff] %v2918_v55  ;;  %v1632_v59 = vadd.f32 %v1631_v56, %v3861_v26  ;;  %v1705_v20 = vadd.f32 %v1704_v57, %v3865_v27 }
 0x175   : > { %v1633_v60 = vpop.f32.mrf.mxu0  ;;  %v1706_v61 = vpop.f32.mrf.mxu1 }
 0x176   : > { %v2919_v22 = vpack.c.bf16 %v1632_v59, %v1630_v58  ;;  %v2920_v62 = vpack.c.bf16 %v1705_v20, %v1703_v19  ;;  %v1634_v23 = vadd.f32 %v1633_v60, %v3853_v24  ;;  %v1707_v0 = vadd.f32 %v1706_v61, %v3857_v25 }
 0x177   : > { %v1635_v63 = vpop.f32.mrf.mxu0  ;;  %v1708_v18 = vpop.f32.mrf.mxu1 }
 0x178   : > { %1819 = vst [vmem:[#allocation3 + $0x60] sm:$0xff] %v2919_v22  ;;  %1820 = vst [vmem:[#allocation3 + $0x68] sm:$0xff] %v2920_v62  ;;  %v1636_v1 = vadd.f32 %v1635_v63, %v3861_v26  ;;  %v1709_v2 = vadd.f32 %v1708_v18, %v3865_v27 }
 0x17a   : > { %v2921_v3 = vpack.c.bf16 %v1636_v1, %v1634_v23  ;;  %v2922_v4 = vpack.c.bf16 %v1709_v2, %v1707_v0 }
 0x17c   : > { %1821 = vst [vmem:[#allocation3 + $0x70] sm:$0xff] %v2921_v3  ;;  %1822 = vst [vmem:[#allocation3 + $0x78] sm:$0xff] %v2922_v4 }
 0x17d LB: >> { %v3159_v24 = vld [vmem:[%s4135_s2 + $0xe4] ss:$16 sps:$4 sm:$0xff]   ;;  %v3161_v25 = vld [vmem:[%s4135_s2 + $0xe0] ss:$16 sps:$4 sm:$0xff]   ;;  %v3304_v26 = vmov 0   ;;  %s2809_s26 = sshll.u32 %s3301_s17, 3  ;;  %s2459_s18 = sadd.s32 %s3301_s17, %s3363_s11  ;;  %s3301_s17 = sphi %s3899_s17, %s1831_s17  }
 0x17e   : >> { %2075 = vmatprep.mubr.bf16.mxu0 %v3304_v26  ;;  %2116 = vmatprep.mubr.bf16.mxu1 %v3304_v26  ;;  %v3162_v27 = vld [vmem:[%s4135_s2 + $0xc4] ss:$16 sps:$4 sm:$0xff]   ;;  %v3164_v5 = vld [vmem:[%s4135_s2 + $0xc0] ss:$16 sps:$4 sm:$0xff]   ;;  %v3170_v7 = vld [vmem:[%s4135_s2 + $0xec] ss:$16 sps:$4 sm:$0xff]  }
 0x17f   : >> { %2043 = vmatprep.subr.bf16.mxu0 %v3159_v24  ;;  %v3165_v6 = vld [vmem:[%s4135_s2 + $0xa4] ss:$16 sps:$4 sm:$0xff]   ;;  %v3173_v8 = vld [vmem:[%s4135_s2 + $0xe8] ss:$16 sps:$4 sm:$0xff]   ;;  %v3167_v9 = vld [vmem:[%s4135_s2 + $0xa0] ss:$16 sps:$4 sm:$0xff]   ;;  %2084 = vmatprep.subr.bf16.mxu1 %v3170_v7 }
 0x180   : >> { %2044 = vmatpush1.bf16.msra.mxu0 %v3161_v25  ;;  %v3168_v10 = vld [vmem:[%s4135_s2 + $0x84] ss:$16 sps:$4 sm:$0xff]   ;;  %2085 = vmatpush1.bf16.msra.mxu1 %v3173_v8  ;;  %v3176_v11 = vld [vmem:[%s4135_s2 + $0xcc] ss:$16 sps:$4 sm:$0xff]   ;;  %v3179_v12 = vld [vmem:[%s4135_s2 + $0xc8] ss:$16 sps:$4 sm:$0xff]  }
 0x181   : >> { %2045 = vmatprep.subr.bf16.mxu0 %v3162_v27  ;;  %2086 = vmatprep.subr.bf16.mxu1 %v3176_v11  ;;  %v3172_v13 = vld [vmem:[%s4135_s2 + $0x80] ss:$16 sps:$4 sm:$0xff]   ;;  %v3174_v14 = vld [vmem:[%s4135_s2 + $0x64] ss:$16 sps:$4 sm:$0xff]   ;;  %v3182_v15 = vld [vmem:[%s4135_s2 + $0xac] ss:$16 sps:$4 sm:$0xff]  }
 0x182   : >> { %v3185_v16 = vld [vmem:[%s4135_s2 + $0xa8] ss:$16 sps:$4 sm:$0xff]   ;;  %v3188_v17 = vld [vmem:[%s4135_s2 + $0x8c] ss:$16 sps:$4 sm:$0xff]   ;;  %v3178_v21 = vld [vmem:[%s4135_s2 + $0x60] ss:$16 sps:$4 sm:$0xff]  }
 0x183   : >> { %v3180_v28 = vld [vmem:[%s4135_s2 + $0x44] ss:$16 sps:$4 sm:$0xff]   ;;  %v3191_v29 = vld [vmem:[%s4135_s2 + $0x88] ss:$16 sps:$4 sm:$0xff]   ;;  %v3194_v30 = vld [vmem:[%s4135_s2 + $0x6c] ss:$16 sps:$4 sm:$0xff]  }
 0x184   : >> { %2046 = vmatpush1.bf16.msra.mxu0 %v3164_v5  ;;  %2087 = vmatpush1.bf16.msra.mxu1 %v3179_v12  ;;  %v3184_v31 = vld [vmem:[%s4135_s2 + $0x40] ss:$16 sps:$4 sm:$0xff]   ;;  %v3186_v32 = vld [vmem:[%s4135_s2 + $0x24] ss:$16 sps:$4 sm:$0xff]   ;;  %v3197_v33 = vld [vmem:[%s4135_s2 + $0x68] ss:$16 sps:$4 sm:$0xff]  }
 0x185   : >> { %2047 = vmatprep.subr.bf16.mxu0 %v3165_v6  ;;  %2088 = vmatprep.subr.bf16.mxu1 %v3182_v15  ;;  %v3198_v34 = vld [vmem:[%s4135_s2 + $0x4c] ss:$16 sps:$4 sm:$0xff]   ;;  %v3190_v35 = vld [vmem:[%s4135_s2 + $0x20] ss:$16 sps:$4 sm:$0xff]   ;;  %v3192_v36 = vld [vmem:[%s4135_s2 + $0x4] ss:$16 sps:$4 sm:$0xff]  }
 0x186   : >> { %v3203_v37 = vld [vmem:[%s4135_s2 + $0x48] ss:$16 sps:$4 sm:$0xff]   ;;  %v3204_v38 = vld [vmem:[%s4135_s2 + $0x2c] ss:$16 sps:$4 sm:$0xff]   ;;  %v3196_v39 = vld [vmem:[%s4135_s2] ss:$16 sps:$4 sm:$0xff]  }
 0x187   : >> { %v3993_v40 = vld [vmem:[#allocation4] sm:$0xff]  ;;  %v3209_v42 = vld [vmem:[%s4135_s2 + $0x28] ss:$16 sps:$4 sm:$0xff]   ;;  %v3210_v43 = vld [vmem:[%s4135_s2 + $0xc] ss:$16 sps:$4 sm:$0xff]   ;;  %s1872_s28 = sshra.s32 %s2809_s26, 3 }
 0x188   : >> { %2048 = vmatpush1.bf16.msra.mxu0 %v3167_v9  ;;  %2089 = vmatpush1.bf16.msra.mxu1 %v3185_v16  ;;  %v3202_v41 = vld [vmem:[%s4139_s6 + $0xe4] ss:$16 sps:$4 sm:$0xff]   ;;  %v1839_v44 = vpack.c.bf16 %v3993_v40, %v3993_v40  ;;  %v3200_v45 = vld [vmem:[%s4139_s6 + $0xe0] ss:$16 sps:$4 sm:$0xff]   ;;  %v3215_v47 = vld [vmem:[%s4135_s2 + $0x8] ss:$16 sps:$4 sm:$0xff]  }
 0x189   : >> { %2049 = vmatprep.subr.bf16.mxu0 %v3168_v10  ;;  %2090 = vmatprep.subr.bf16.mxu1 %v3188_v17  ;;  %v3208_v46 = vld [vmem:[%s4139_s6 + $0xc4] ss:$16 sps:$4 sm:$0xff]   ;;  %v3221_v48 = vld [vmem:[%s4139_s6 + $0xec] ss:$16 sps:$4 sm:$0xff]   ;;  %v3206_v49 = vld [vmem:[%s4139_s6 + $0xc0] ss:$16 sps:$4 sm:$0xff]  }
 0x18a   : >> { %v3214_v50 = vld [vmem:[%s4139_s6 + $0xa4] ss:$16 sps:$4 sm:$0xff]   ;;  %v3219_v51 = vld [vmem:[%s4139_s6 + $0xe8] ss:$16 sps:$4 sm:$0xff]   ;;  %v3227_v52 = vld [vmem:[%s4139_s6 + $0xcc] ss:$16 sps:$4 sm:$0xff]  }
 0x18b   : >> { %v3212_v53 = vld [vmem:[%s4139_s6 + $0xa0] ss:$16 sps:$4 sm:$0xff]   ;;  %v3218_v54 = vld [vmem:[%s4139_s6 + $0x84] ss:$16 sps:$4 sm:$0xff]   ;;  %v3225_v55 = vld [vmem:[%s4139_s6 + $0xc8] ss:$16 sps:$4 sm:$0xff]  }
 0x18c   : >> { %2050 = vmatpush1.bf16.msra.mxu0 %v3172_v13  ;;  %2091 = vmatpush1.bf16.msra.mxu1 %v3191_v29  ;;  %v3233_v56 = vld [vmem:[%s4139_s6 + $0xac] ss:$16 sps:$4 sm:$0xff]   ;;  %v3216_v57 = vld [vmem:[%s4139_s6 + $0x80] ss:$16 sps:$4 sm:$0xff]   ;;  %v3224_v58 = vld [vmem:[%s4139_s6 + $0x64] ss:$16 sps:$4 sm:$0xff]  }
 0x18d   : >> { %2051 = vmatprep.subr.bf16.mxu0 %v3174_v14  ;;  %2092 = vmatprep.subr.bf16.mxu1 %v3194_v30  ;;  %v3231_v19 = vld [vmem:[%s4139_s6 + $0xa8] ss:$16 sps:$4 sm:$0xff]   ;;  %v3239_v59 = vld [vmem:[%s4139_s6 + $0x8c] ss:$16 sps:$4 sm:$0xff]   ;;  %v3222_v20 = vld [vmem:[%s4139_s6 + $0x60] ss:$16 sps:$4 sm:$0xff]  }
 0x18e   : >> { %v3230_v60 = vld [vmem:[%s4139_s6 + $0x44] ss:$16 sps:$4 sm:$0xff]   ;;  %v3237_v61 = vld [vmem:[%s4139_s6 + $0x88] ss:$16 sps:$4 sm:$0xff]   ;;  %v3245_v22 = vld [vmem:[%s4139_s6 + $0x6c] ss:$16 sps:$4 sm:$0xff]  }
 0x18f   : >> { %v3228_v62 = vld [vmem:[%s4139_s6 + $0x40] ss:$16 sps:$4 sm:$0xff]   ;;  %v3236_v63 = vld [vmem:[%s4139_s6 + $0x24] ss:$16 sps:$4 sm:$0xff]   ;;  %v3243_v18 = vld [vmem:[%s4139_s6 + $0x68] ss:$16 sps:$4 sm:$0xff]  }
 0x190   : >> { %2052 = vmatpush1.bf16.msra.mxu0 %v3178_v21  ;;  %2093 = vmatpush1.bf16.msra.mxu1 %v3197_v33  ;;  %v3248_v23 = vld [vmem:[%s4139_s6 + $0x4c] ss:$16 sps:$4 sm:$0xff]   ;;  %v3234_v0 = vld [vmem:[%s4139_s6 + $0x20] ss:$16 sps:$4 sm:$0xff]   ;;  %v3242_v1 = vld [vmem:[%s4139_s6 + $0x4] ss:$16 sps:$4 sm:$0xff]  }
 0x191   : >> { %2053 = vmatprep.subr.bf16.mxu0 %v3180_v28  ;;  %2094 = vmatprep.subr.bf16.mxu1 %v3198_v34  ;;  %v3246_v2 = vld [vmem:[%s4139_s6 + $0x48] ss:$16 sps:$4 sm:$0xff]   ;;  %v3251_v3 = vld [vmem:[%s4139_s6 + $0x2c] ss:$16 sps:$4 sm:$0xff]   ;;  %v3240_v4 = vld [vmem:[%s4139_s6] ss:$16 sps:$4 sm:$0xff]  }
 0x192   : >> { %v4095_v24 = vld [vmem:[#allocation6] sm:$0xff]  ;;  %v3249_v25 = vld [vmem:[%s4139_s6 + $0x28] ss:$16 sps:$4 sm:$0xff]   ;;  %s2923_s29 = sshll.u32 %s1872_s28, 4  ;;  %s4110_s16 = ssub.s32 7, %s3301_s17 }
 0x193   : >> { %v2125_v27 = vpack.c.bf16 %v4095_v24, %v4095_v24  ;;  %v3252_v5 = vld [vmem:[%s4139_s6 + $0x8] ss:$16 sps:$4 sm:$0xff]   ;;  %s1876_s12 = scalar_lea.vmem [#allocation2], %s2923_s29  ;;  %s2810_s24 = sshll.u32 %s4110_s16, 3 }
 0x194   : >> { %2054 = vmatpush1.bf16.msra.mxu0 %v3184_v31  ;;  %2095 = vmatpush1.bf16.msra.mxu1 %v3203_v37  ;;  %v1877_v6 = vld [vmem:[%s1876_s12] sm:$0xff]  ;;  %v1878_v14 = vld [vmem:[%s1876_s12 + $0x8] sm:$0xff]  ;;  %s2158_s19 = sshra.s32 %s2810_s24, 3  ;;  %p2460_p6 = scmp.lt.s32.totalorder %s2459_s18, 10 }
 0x195   : >> { %2055 = vmatprep.subr.bf16.mxu0 %v3186_v32  ;;  %2096 = vmatprep.subr.bf16.mxu1 %v3204_v38  ;;  %v1879_v7 = vunpack.c.l.bf16 %v1877_v6  ;;  %v1880_v8 = vunpack.c.h.bf16 %v1877_v6  ;;  %v1882_v28 = vunpack.c.h.bf16 %v1878_v14  ;;  %v1881_v32 = vunpack.c.l.bf16 %v1878_v14  ;;  %s2924_s15 = sshll.u32 %s2158_s19, 4  ;;  %s2463_s25 = sadd.s32 %s3366_s13, %s4110_s16 }
 0x196   : >> { %s2461_s21 = scalar_select %p2460_p6, 1, 0 }
 0x197   : >> { %s2162_s10 = scalar_lea.vmem [#allocation3], %s2924_s15  ;;  %p2464_p7 = scmp.lt.s32.totalorder %s2463_s25, 10 }
 0x198   : >> { %2056 = vmatpush1.bf16.msra.mxu0 %v3190_v35  ;;  %2097 = vmatpush1.bf16.msra.mxu1 %v3209_v42  ;;  %s4115_s22 = scvt.s32.f32 %s2461_s21  ;;  %s2885_s26 = sshll.u32 %s3301_s17, 2 }
 0x199   : >> { %2057 = vmatprep.subr.bf16.mxu0 %v3192_v36  ;;  %2098 = vmatprep.subr.bf16.mxu1 %v3210_v43  ;;  %s2465_s20 = scalar_select %p2464_p7, 1, 0 }
 0x19a   : >> { %s2469_s23 = ssub.f32 1.0, %s4115_s22  ;;  %s2491_s28 = scalar_lea.vmem %s3384_s27, %s2885_s26 }
 0x19b   : >> { %s2466_s29 = scvt.s32.f32 %s2465_s20  ;;  %s2886_s24 = sshll.u32 %s4110_s16, 2 }
 0x19c   : >> { %2058 = vmatpush1.bf16.msra.mxu0 %v3196_v39  ;;  %2099 = vmatpush1.bf16.msra.mxu1 %v3215_v47  ;;  %s2495_s18 = scalar_lea.vmem %s3389_s14, %s2886_s24  ;;  %s1831_s17 = sadd.s32 1, %s3301_s17  }
 0x19d   : >> { %2329 = vmatprep.subr.bf16.mxu0 %v3202_v41  ;;  %2370 = vmatprep.subr.bf16.mxu1 %v3221_v48  ;;  %v2163_v41 = vld [vmem:[%s2162_s10] sm:$0xff]  ;;  %s2478_s12 = ssub.f32 1.0, %s2466_s29  ;;  %p1828_p8 = scmp.ge.s32.totalorder %s1831_s17, 8  }
 0x19e   : >> { %v2165_v42 = vunpack.c.l.bf16 %v2163_v41 }
 0x19f   : >> { %2076 = vmatmul.mubr.bf16.vlgmr.msra.gmra.mxu0 %v1839_v44  ;;  %2117 = vmatmul.mubr.bf16.vlgmr.msra.gmra.mxu1 %v1839_v44  ;;  %v2166_v44 = vunpack.c.h.bf16 %v2163_v41 }
 0x1a0   : >> { %2330 = vmatpush1.bf16.msra.mxu0 %v3200_v45  ;;  %2361 = vmatprep.mubr.bf16.mxu0 %v3304_v26 }
 0x1a1   : >> { %2331 = vmatprep.subr.bf16.mxu0 %v3208_v46  ;;  %2371 = vmatpush1.bf16.msra.mxu1 %v3219_v51 }
 0x1a2   : >> { %2372 = vmatprep.subr.bf16.mxu1 %v3227_v52  ;;  %2402 = vmatprep.mubr.bf16.mxu1 %v3304_v26  ;;  %v3254_v26 = vld [vmem:[%s4139_s6 + $0xc] ss:$16 sps:$4 sm:$0xff]  }
 0x1a4   : >> { %2332 = vmatpush1.bf16.msra.mxu0 %v3206_v49  ;;  %v1836_v49 = vld [vmem:[#allocation5] sm:$0xff] }
 0x1a5   : >> { %2333 = vmatprep.subr.bf16.mxu0 %v3214_v50  ;;  %2373 = vmatpush1.bf16.msra.mxu1 %v3225_v55 }
 0x1a6   : >> { %2374 = vmatprep.subr.bf16.mxu1 %v3233_v56  ;;  %v2470_v56 = vstv %s2469_s23 }
 0x1a8   : >> { %2334 = vmatpush1.bf16.msra.mxu0 %v3212_v53 }
 0x1a9   : >> { %2335 = vmatprep.subr.bf16.mxu0 %v3218_v54  ;;  %2375 = vmatpush1.bf16.msra.mxu1 %v3231_v19 }
 0x1aa   : >> { %2376 = vmatprep.subr.bf16.mxu1 %v3239_v59  ;;  %v2164_v59 = vld [vmem:[%s2162_s10 + $0x8] sm:$0xff] }
 0x1ac   : >> { %2336 = vmatpush1.bf16.msra.mxu0 %v3216_v57 }
 0x1ad   : >> { %2337 = vmatprep.subr.bf16.mxu0 %v3224_v58  ;;  %2377 = vmatpush1.bf16.msra.mxu1 %v3237_v61 }
 0x1ae   : >> { %2378 = vmatprep.subr.bf16.mxu1 %v3245_v22  ;;  %v2474_v22 = vmul.f32 %v2470_v56, %v1836_v49 }
 0x1b0   : >> { %2338 = vmatpush1.bf16.msra.mxu0 %v3222_v20 }
 0x1b1   : >> { %2339 = vmatprep.subr.bf16.mxu0 %v3230_v60  ;;  %2379 = vmatpush1.bf16.msra.mxu1 %v3243_v18  ;;  %v2467_v60 = vstv %s4115_s22  ;;  %v2168_v18 = vunpack.c.h.bf16 %v2164_v59 }
 0x1b2   : >> { %2380 = vmatprep.subr.bf16.mxu1 %v3248_v23 }
 0x1b4   : >> { %2340 = vmatpush1.bf16.msra.mxu0 %v3228_v62 }
 0x1b5   : >> { %2341 = vmatprep.subr.bf16.mxu0 %v3236_v63  ;;  %2381 = vmatpush1.bf16.msra.mxu1 %v3246_v2  ;;  %v2167_v2 = vunpack.c.l.bf16 %v2164_v59 }
 0x1b6   : >> { %2382 = vmatprep.subr.bf16.mxu1 %v3251_v3 }
 0x1b8   : >> { %2342 = vmatpush1.bf16.msra.mxu0 %v3234_v0 }
 0x1b9   : >> { %2343 = vmatprep.subr.bf16.mxu0 %v3242_v1  ;;  %2383 = vmatpush1.bf16.msra.mxu1 %v3249_v25 }
 0x1ba   : >> { %2384 = vmatprep.subr.bf16.mxu1 %v3254_v26 }
 0x1bc   : >> { %2344 = vmatpush1.bf16.msra.mxu0 %v3240_v4 }
 0x1bd   : >> { %2385 = vmatpush1.bf16.msra.mxu1 %v3252_v5 }
 0x1bf   : >> { %2362 = vmatmul.mubr.bf16.vlgmr.msra.gmra.mxu0 %v2125_v27 }
 0x1c0   : >> { %2403 = vmatmul.mubr.bf16.vlgmr.msra.gmra.mxu1 %v2125_v27 }
 0x25f   : >> { %v2077_v9 = vpop.f32.mrf.mxu0  ;;  %v2118_v17 = vpop.f32.mrf.mxu1 }
 0x260   : >> { %v2078_v10 = vadd.f32 %v2077_v9, %v1879_v7  ;;  %v2119_v35 = vadd.f32 %v2118_v17, %v1881_v32  ;;  %v2476_v32 = vstv %s2466_s29 }
 0x261   : >> { %v2079_v11 = vpop.f32.mrf.mxu0  ;;  %v2120_v29 = vpop.f32.mrf.mxu1 }
 0x262   : >> { %v2879_v12 = vmul.f32 -1.442695, %v2078_v10  ;;  %v2080_v13 = vadd.f32 %v2079_v11, %v1880_v8  ;;  %v2121_v31 = vadd.f32 %v2120_v29, %v1882_v28  ;;  %v2471_v10 = vmul.f32 %v2470_v56, %v3993_v40 }
 0x263   : >> { %v2081_v15 = vpop.f32.mrf.mxu0  ;;  %v2122_v30 = vpop.f32.mrf.mxu1  ;;  %v2479_v29 = vstv %s2478_s12 }
 0x264   : >> { %3255 = vpow2.f32 %v2879_v12  ;;  %v2880_v16 = vmul.f32 -1.442695, %v2080_v13  ;;  %v2881_v34 = vmul.f32 -1.442695, %v2121_v31 }
 0x265   : >> { %v2082_v21 = vpop.f32.mrf.mxu0  ;;  %v2123_v33 = vpop.f32.mrf.mxu1 }
 0x266   : >> { %3257 = vpow2.f32 %v2880_v16  ;;  %v1838_v21 = vld [vmem:[#allocation7] sm:$0xff] }
 0x267   : >> { %3259 = vpow2.f32 %v2881_v34  ;;  %v2483_v33 = vmul.f32 %v2479_v29, %v1838_v21 }
 0x268   : >> { %3261 = vtanh.f32 %v2119_v35 }
 0x271   : >> { %v3256_v36 = vpop.eup %3255 }
 0x272   : >> { %v2414_v37 = vadd.f32 1.0, %v3256_v36 }
 0x273   : >> { %v3258_v38 = vpop.eup %3257 }
 0x274   : >> { %3263 = vrcp.f32 %v2414_v37  ;;  %v2420_v39 = vadd.f32 1.0, %v3258_v38  ;;  %v3260_v43 = vpop.eup %3259 }
 0x275   : >> { %v3262_v45 = vpop.eup %3261  ;;  %v2427_v50 = vadd.f32 1.0, %v3260_v43 }
 0x276   : >> { %3265 = vrcp.f32 %v2420_v39  ;;  %v2480_v39 = vmul.f32 %v2479_v29, %v4095_v24 }
 0x27f   : >> { %v2363_v46 = vpop.f32.mrf.mxu0 }
 0x280   : >> { %v2364_v47 = vadd.f32 %v2363_v46, %v2165_v42  ;;  %v2404_v20 = vpop.f32.mrf.mxu1 }
 0x281   : >> { %v3264_v48 = vpop.eup %3263  ;;  %v2365_v51 = vpop.f32.mrf.mxu0  ;;  %v2405_v25 = vadd.f32 %v2404_v20, %v2167_v2 }
 0x282   : >> { %v2431_v52 = vmul.f32 %v3264_v48, %v3262_v45  ;;  %v2882_v53 = vmul.f32 -1.442695, %v2364_v47  ;;  %v2366_v54 = vadd.f32 %v2365_v51, %v2166_v44  ;;  %v2406_v63 = vpop.f32.mrf.mxu1 }
 0x283   : >> { %v3266_v55 = vpop.eup %3265  ;;  %v2367_v57 = vpop.f32.mrf.mxu0  ;;  %v2407_v4 = vadd.f32 %v2406_v63, %v2168_v18 }
 0x284   : >> { %v2430_v58 = vmul.f32 %v3266_v55, %v1836_v49  ;;  %3267 = vpow2.f32 %v2882_v53  ;;  %v2883_v19 = vmul.f32 -1.442695, %v2366_v54  ;;  %v2408_v0 = vpop.f32.mrf.mxu1 }
 0x285   : >> { %3269 = vrcp.f32 %v2427_v50  ;;  %v2368_v61 = vpop.f32.mrf.mxu0  ;;  %v2884_v26 = vmul.f32 -1.442695, %v2407_v4 }
 0x286   : >> { %v2432_v62 = vadd.f32 %v2431_v52, %v2430_v58  ;;  %3271 = vpow2.f32 %v2883_v19  ;;  %v2409_v3 = vpop.f32.mrf.mxu1 }
 0x288   : >> { %3273 = vtanh.f32 %v2432_v62  ;;  %v2473_v23 = vmul.f32 %v2467_v60, %v2432_v62 }
 0x289   : >> { %3275 = vtanh.f32 %v2405_v25 }
 0x28a   : >> { %v2475_v1 = vadd.f32 %v2474_v22, %v2473_v23  ;;  %3277 = vpow2.f32 %v2884_v26 }
 0x28c   : >> { %2486 = vst [vmem:[#allocation5] sm:$0xff] %v2475_v1 }
 0x291   : >> { %v3268_v27 = vpop.eup %3267 }
 0x292   : >> { %v3270_v5 = vpop.eup %3269  ;;  %v2438_v6 = vadd.f32 1.0, %v3268_v27 }
 0x293   : >> { %v3272_v7 = vpop.eup %3271 }
 0x294   : >> { %3279 = vrcp.f32 %v2438_v6  ;;  %v2444_v8 = vadd.f32 1.0, %v3272_v7 }
 0x295   : >> { %v3274_v9 = vpop.eup %3273 }
 0x296   : >> { %v2434_v11 = vmul.f32 %v3274_v9, %v3270_v5  ;;  %3281 = vrcp.f32 %v2444_v8  ;;  %v3276_v15 = vpop.eup %3275 }
 0x297   : >> { %v3278_v16 = vpop.eup %3277 }
 0x298   : >> { %v2468_v12 = vmul.f32 %v2467_v60, %v2434_v11  ;;  %v2451_v40 = vadd.f32 1.0, %v3278_v16 }
 0x29a   : >> { %v2472_v13 = vadd.f32 %v2471_v10, %v2468_v12  ;;  %3283 = vrcp.f32 %v2451_v40 }
 0x29c   : >> { %2485 = vst [vmem:[#allocation4] sm:$0xff] %v2472_v13  ;;  %v2489_v14 = vpack.c.bf16 %v2472_v13, %v2472_v13 }
 0x29e   : >> { %2492 = vst [vmem:[%s2491_s28] sm:$0xf] %v2489_v14 }
 0x2a1   : >> { %v3280_v17 = vpop.eup %3279 }
 0x2a2   : >> { %v2455_v31 = vmul.f32 %v3280_v17, %v3276_v15 }
 0x2a3   : >> { %v3282_v28 = vpop.eup %3281 }
 0x2a4   : >> { %v2454_v30 = vmul.f32 %v3282_v28, %v1838_v21 }
 0x2a6   : >> { %v2456_v34 = vadd.f32 %v2455_v31, %v2454_v30 }
 0x2a7   : >> { %v3284_v37 = vpop.eup %3283 }
 0x2a8   : >> { %3285 = vtanh.f32 %v2456_v34  ;;  %v2482_v35 = vmul.f32 %v2476_v32, %v2456_v34 }
 0x2aa   : >> { %v2484_v36 = vadd.f32 %v2483_v33, %v2482_v35 }
 0x2ac   : >> { %2488 = vst [vmem:[#allocation7] sm:$0xff] %v2484_v36 }
 0x2b5   : >> { %v3286_v38 = vpop.eup %3285 }
 0x2b6   : >> { %v2458_v41 = vmul.f32 %v3286_v38, %v3284_v37 }
 0x2b8   : >> { %v2477_v42 = vmul.f32 %v2476_v32, %v2458_v41 }
 0x2ba   : >> { %v2481_v43 = vadd.f32 %v2480_v39, %v2477_v42  ;;  %1830 = sbr.rel (!%p1828_p8) target bundleno = 381 (0x17d), region = 112 }
 0x2bc   : >> { %2487 = vst [vmem:[#allocation6] sm:$0xff] %v2481_v43  ;;  %v2493_v44 = vpack.c.bf16 %v2481_v43, %v2481_v43 }
 0x2be   : >> { %2496 = vst [vmem:[%s2495_s18] sm:$0xf] %v2493_v44 }
 0x2bf PF: > { %s20_s30 = sadd.s32 1, %s3297_s30  }
 0x2c0   : > { %p17_p9 = scmp.ge.s32.totalorder %s20_s30, 4  }
 0x2c2   :  { %19 = sbr.rel (!%p17_p9) target bundleno = 1 (0x1), region = 123 }

</bundles_post_ra>
